<compile_context>
chip_gen: v7x
topology: tpu7x:2x2x1
jax: 0.10.0
libtpu: 0.0.40
codegen_flags: <defaults>
</compile_context>

<pallas_src>
import jax
import jax.numpy as jnp
from jax.experimental import pallas as pl
from jax.experimental.pallas import tpu as pltpu

ACT_DTYPE = jnp.bfloat16
_VMEM_LIMIT = 32 * 1024 * 1024


# ----------------------------- Pallas kernels -----------------------------

def conv_stats_kernel(x_ref, w_ref, y_ref, s_ref, q_ref):
    """Conv (as KH row-shifted matmuls) + per-tile BN partial statistics.

    x_ref: (B_t, Hp, Wp*Cin)      bf16 padded input rows for B_t images
    w_ref: (KH, Wp*Cin, W*Cout)   bf16 width-Toeplitz conv weight (resident)
    y_ref: (B_t, H, W*Cout)       bf16 pre-BN conv output (lane-dense, 448 lanes)
    s_ref: (8, W*Cout)            f32 partial sum over (B_t, H)   (rows identical)
    q_ref: (8, W*Cout)            f32 partial sum of squares      (rows identical)
    """
    bt, H, WC = y_ref.shape
    KH = w_ref.shape[0]
    s_acc = jnp.zeros((8, WC), jnp.float32)
    q_acc = jnp.zeros((8, WC), jnp.float32)
    for b in range(bt):                       # static, fully unrolled
        acc = jnp.zeros((H, WC), jnp.float32)
        for kh in range(KH):                  # 5 shifted-row matmuls
            acc = acc + jnp.dot(x_ref[b, kh:kh + H, :], w_ref[kh],
                                preferred_element_type=jnp.float32)
        y_ref[b] = acc.astype(y_ref.dtype)
        s_acc = s_acc + jnp.sum(acc, axis=0, keepdims=True)
        q_acc = q_acc + jnp.sum(acc * acc, axis=0, keepdims=True)
    s_ref[...] = s_acc
    q_ref[...] = q_acc


def bn_relu_pool_kernel(y_ref, scale_ref, shift_ref, o_ref):
    """Fused BatchNorm(apply) + ReLU + MaxPool2d(2).

    y_ref:     (B_t, H, W*C) bf16, lanes ordered [even w | odd w] x C
    scale_ref: (1, W*C) f32 per-lane BN scale  (gamma * rsqrt(var + eps))
    shift_ref: (1, W*C) f32 per-lane BN shift  (beta - mean * scale)
    o_ref:     (B_t, H//2, (W//2)*C) bf16 pooled output, lanes (w_out, c)
    """
    n_out_rows = o_ref.shape[1]
    half = o_ref.shape[2]
    scale = scale_ref[...]
    shift = shift_ref[...]
    for ho in range(n_out_rows):              # static, small (<= 14)
        r0 = y_ref[:, 2 * ho, :].astype(jnp.float32)
        r1 = y_ref[:, 2 * ho + 1, :].astype(jnp.float32)
        z0 = jnp.maximum(r0 * scale + shift, 0.0)          # BN + ReLU
        z1 = jnp.maximum(r1 * scale + shift, 0.0)
        m = jnp.maximum(z0, z1)                             # pool over H
        pooled = jnp.maximum(m[:, :half], m[:, half:])      # pool over W
        o_ref[:, ho, :] = pooled.astype(o_ref.dtype)


def linear_kernel(x_ref, w_ref, b_ref, o_ref):
    """o = x @ w + b (MXU matmul, f32 accumulation)."""
    o_ref[...] = (jnp.dot(x_ref[...], w_ref[...],
                          preferred_element_type=jnp.float32) + b_ref[...])


# ------------------------------- wrappers ----------------------------------

def _compiler_params():
    return pltpu.CompilerParams(dimension_semantics=("parallel",),
                                vmem_limit_bytes=_VMEM_LIMIT)


def _batch_tile(n, target=8):
    """Largest divisor of n that is <= target (images per grid step)."""
    for d in range(min(n, target), 0, -1):
        if n % d == 0:
            return d
    return 1


def _fc_row_tile(n, target=1024):
    if n <= target:
        return n
    for d in range(target, 7, -1):
        if n % d == 0 and d % 8 == 0:
            return d
    return n


def conv2d_stats(x_pad, toe_w, b_t):
    """Run pass 1 of a conv layer, tiled over the batch."""
    n, hp, k = x_pad.shape
    kh, _, wc = toe_w.shape
    h = hp - (kh - 1)
    t = n // b_t
    return pl.pallas_call(
        conv_stats_kernel,
        grid=(t,),
        in_specs=[
            pl.BlockSpec((b_t, hp, k), lambda i: (i, 0, 0)),
            pl.BlockSpec((kh, k, wc), lambda i: (0, 0, 0)),
        ],
        out_specs=[
            pl.BlockSpec((b_t, h, wc), lambda i: (i, 0, 0)),
            pl.BlockSpec((None, 8, wc), lambda i: (i, 0, 0)),
            pl.BlockSpec((None, 8, wc), lambda i: (i, 0, 0)),
        ],
        out_shape=[
            jax.ShapeDtypeStruct((n, h, wc), ACT_DTYPE),
            jax.ShapeDtypeStruct((t, 8, wc), jnp.float32),
            jax.ShapeDtypeStruct((t, 8, wc), jnp.float32),
        ],
        compiler_params=_compiler_params(),
    )(x_pad, toe_w)


def bn_relu_pool(y, scale_l, shift_l, b_t):
    """Run pass 2 of a conv layer (BN apply + ReLU + 2x2 max-pool)."""
    n, h, wc = y.shape
    ho, half = h // 2, wc // 2
    t = n // b_t
    return pl.pallas_call(
        bn_relu_pool_kernel,
        grid=(t,),
        in_specs=[
            pl.BlockSpec((b_t, h, wc), lambda i: (i, 0, 0)),
            pl.BlockSpec((1, wc), lambda i: (0, 0)),
            pl.BlockSpec((1, wc), lambda i: (0, 0)),
        ],
        out_specs=pl.BlockSpec((b_t, ho, half), lambda i: (i, 0, 0)),
        out_shape=jax.ShapeDtypeStruct((n, ho, half), ACT_DTYPE),
        compiler_params=_compiler_params(),
    )(y, scale_l, shift_l)


def linear_pl(x, w, b, tn):
    n, f = x.shape
    o = w.shape[1]
    t = n // tn
    return pl.pallas_call(
        linear_kernel,
        grid=(t,),
        in_specs=[
            pl.BlockSpec((tn, f), lambda i: (i, 0)),
            pl.BlockSpec((f, o), lambda i: (0, 0)),
            pl.BlockSpec((1, o), lambda i: (0, 0)),
        ],
        out_specs=pl.BlockSpec((tn, o), lambda i: (i, 0)),
        out_shape=jax.ShapeDtypeStruct((n, o), jnp.float32),
        compiler_params=_compiler_params(),
    )(x, w, b)


# ------------------------------- glue (JAX) ---------------------------------

def _even_odd_perm(w):
    return list(range(0, w, 2)) + list(range(1, w, 2))


def _toeplitz_weight(w_oihw, w_out, pad, w_perm):
    """torch (Cout,Cin,KH,KW) conv weight -> (KH, Wp*Cin, W*Cout) Toeplitz form.

    Output columns are ordered (perm(w)-major, Cout-minor) so the max-pool's
    W reduction becomes a max of two contiguous lane halves.
    """
    cout, cin, kh, kw = w_oihw.shape
    wp = w_out + 2 * pad
    wk = jnp.transpose(w_oihw, (2, 3, 1, 0))                 # (KH, KW, Cin, Cout)
    wj = jnp.asarray(w_perm, jnp.int32)                      # (W,)
    kw_idx = jnp.arange(wp, dtype=jnp.int32)[:, None] - wj[None, :]   # (Wp, W)
    valid = (kw_idx >= 0) & (kw_idx < kw)
    kw_c = jnp.clip(kw_idx, 0, kw - 1)
    g = wk[:, kw_c, :, :]                                    # (KH, Wp, W, Cin, Cout)
    g = jnp.where(valid[None, :, :, None, None], g, 0.0)
    g = jnp.transpose(g, (0, 1, 3, 2, 4))                    # (KH, Wp, Cin, W, Cout)
    return g.reshape(kh, wp * cin, w_out * cout)


def _fc_weight_nhwc(fc_w, h, w, c):
    """torch (10, C*H*W) fc weight -> (H*W*C, 10), folding the NCHW flatten."""
    o = fc_w.shape[0]
    wm = fc_w.reshape(o, c, h, w)
    wm = jnp.transpose(wm, (2, 3, 1, 0))                     # (H, W, C, O)
    return wm.reshape(h * w * c, o)


def _finalize_bn(s_all, q_all, count, w, c, gamma, beta, eps=1e-5):
    """Per-channel batch stats -> per-lane (w,c) scale/shift, (1, W*C) f32."""
    s = s_all[:, 0, :].sum(axis=0)                           # (W*C,)
    q = q_all[:, 0, :].sum(axis=0)
    s_c = s.reshape(w, c).sum(axis=0)                        # (C,)
    q_c = q.reshape(w, c).sum(axis=0)
    mean = s_c / count
    var = jnp.maximum(q_c / count - mean * mean, 0.0)        # biased var (PyTorch)
    scale = gamma * jax.lax.rsqrt(var + eps)
    shift = beta - mean * scale
    scale_l = jnp.tile(scale, w).reshape(1, w * c)
    shift_l = jnp.tile(shift, w).reshape(1, w * c)
    return scale_l, shift_l


def init_params(key):
    k1, k2, k3, k4, k5, k6 = jax.random.split(key, 6)
    return {
        # Conv2d(1, 16, kernel_size=5, padding=2)
        "w1": jax.random.normal(k1, (16, 1, 5, 5), jnp.float32) * 0.1,
        "b1": jax.random.normal(k2, (16,), jnp.float32) * 0.1,   # cancelled by BN
        "gamma1": jnp.ones((16,), jnp.float32),
        "beta1": jnp.zeros((16,), jnp.float32),
        # Conv2d(16, 32, kernel_size=5, padding=2)
        "w2": jax.random.normal(k3, (32, 16, 5, 5), jnp.float32) * 0.05,
        "b2": jax.random.normal(k4, (32,), jnp.float32) * 0.1,   # cancelled by BN
        "gamma2": jnp.ones((32,), jnp.float32),
        "beta2": jnp.zeros((32,), jnp.float32),
        # Linear(7*7*32, 10)
        "fc_w": jax.random.normal(k5, (10, 7 * 7 * 32), jnp.float32) * 0.02,
        "fc_b": jax.random.normal(k6, (10,), jnp.float32) * 0.02,
    }


def cnn_forward(x_nchw, p):
    n = x_nchw.shape[0]
    h1 = w1 = 28
    c1 = 16
    h2 = w2 = 14
    c2 = 32
    pad = 2
    bt = _batch_tile(n, 8)

    # ----- layer1: Conv(1->16,5,pad2) + BN + ReLU + MaxPool(2) -----
    x = jnp.transpose(x_nchw, (0, 2, 3, 1))                       # (N,28,28,1)
    xp = jnp.pad(x, ((0, 0), (pad, pad), (pad, pad), (0, 0)))
    xp = xp.reshape(n, h1 + 2 * pad, (w1 + 2 * pad) * 1).astype(ACT_DTYPE)
    tw1 = _toeplitz_weight(p["w1"], w1, pad, _even_odd_perm(w1)).astype(ACT_DTYPE)
    y1, s1, q1 = conv2d_stats(xp, tw1, bt)                        # (N,28,448) bf16
    sc1, sh1 = _finalize_bn(s1, q1, float(n * h1 * w1), w1, c1,
                            p["gamma1"], p["beta1"])
    a1 = bn_relu_pool(y1, sc1, sh1, bt)                           # (N,14,14*16)

    # ----- layer2: Conv(16->32,5,pad2) + BN + ReLU + MaxPool(2) -----
    x2 = a1.reshape(n, h2, w2, c1)
    x2p = jnp.pad(x2, ((0, 0), (pad, pad), (pad, pad), (0, 0)))
    x2p = x2p.reshape(n, h2 + 2 * pad, (w2 + 2 * pad) * c1)       # (N,18,288) bf16
    tw2 = _toeplitz_weight(p["w2"], w2, pad, _even_odd_perm(w2)).astype(ACT_DTYPE)
    y2, s2, q2 = conv2d_stats(x2p, tw2, bt)                       # (N,14,448) bf16
    sc2, sh2 = _finalize_bn(s2, q2, float(n * h2 * w2), w2, c2,
                            p["gamma2"], p["beta2"])
    a2 = bn_relu_pool(y2, sc2, sh2, bt)                           # (N,7,7*32)

    # ----- fc: flatten is NHWC; NCHW permutation folded into the weight -----
    flat = a2.reshape(n, 7 * 7 * c2)
    fc_w = _fc_weight_nhwc(p["fc_w"], 7, 7, c2).astype(ACT_DTYPE)
    fc_b = p["fc_b"].reshape(1, -1).astype(jnp.float32)
    return linear_pl(flat, fc_w, fc_b, _fc_row_tile(n))           # (N,10) f32


if __name__ == "__main__":
    key = jax.random.PRNGKey(0)
    kx, kp = jax.random.split(key)
    # MNIST-like input: batch=2, 1 channel, 28x28 (fc layer requires 28x28).
    x = jax.random.normal(kx, (2, 1, 28, 28), jnp.float32)
    params = init_params(kp)

    fwd = jax.jit(cnn_forward)
    out = fwd(x, params)
    out = jax.block_until_ready(out)
    assert out.shape == (2, 10), out.shape
    assert bool(jnp.all(jnp.isfinite(out))), "non-finite output"
    print("KERNEL_OK")
</pallas_src>

<mosaic_0001>
module attributes {stable_mosaic.version = 11 : i64} {
  func.func @conv_stats_kernel(%arg0: i32, %arg1: memref<2x32x32xbf16, #tpu.memory_space<vmem>>, %arg2: memref<5x32x448xbf16, #tpu.memory_space<vmem>>, %arg3: memref<2x28x448xbf16, #tpu.memory_space<vmem>>, %arg4: memref<1x8x448xf32, #tpu.memory_space<vmem>>, %arg5: memref<1x8x448xf32, #tpu.memory_space<vmem>>) attributes {dimension_semantics = [#tpu.dimension_semantics<parallel>], iteration_bounds = array<i64: 1>, scalar_prefetch = 0 : i64, scratch_operands = 0 : i64, tpu.core_type = #tpu.core_type<tc>, window_params = [{transform_indices = @transform_0, window_bounds = array<i64: 2, 32, 32>}, {pipeline_mode = #tpu.pipeline_mode<synchronous>, transform_indices = @transform_1, window_bounds = array<i64: 5, 32, 448>}, {transform_indices = @transform_2, window_bounds = array<i64: 2, 28, 448>}, {transform_indices = @transform_3, window_bounds = array<i64: 1, 8, 448>}, {transform_indices = @transform_4, window_bounds = array<i64: 1, 8, 448>}]} {
    %cst = arith.constant 0.000000e+00 : f32
    %0 = vector.broadcast %cst : f32 to vector<8x448xf32>
    %cst_0 = arith.constant 0.000000e+00 : f32
    %1 = vector.broadcast %cst_0 : f32 to vector<8x448xf32>
    %cst_1 = arith.constant 0.000000e+00 : f32
    %2 = vector.broadcast %cst_1 : f32 to vector<28x448xf32>
    %c0 = arith.constant 0 : index
    %c0_2 = arith.constant 0 : index
    %c0_3 = arith.constant 0 : index
    %3 = vector.load %arg1[%c0, %c0_2, %c0_3] : memref<2x32x32xbf16, #tpu.memory_space<vmem>>, vector<1x28x32xbf16>
    %4 = vector.shape_cast %3 : vector<1x28x32xbf16> to vector<28x32xbf16>
    %c0_4 = arith.constant 0 : index
    %c0_5 = arith.constant 0 : index
    %c0_6 = arith.constant 0 : index
    %5 = vector.load %arg2[%c0_4, %c0_5, %c0_6] : memref<5x32x448xbf16, #tpu.memory_space<vmem>>, vector<1x32x448xbf16>
    %6 = vector.shape_cast %5 : vector<1x32x448xbf16> to vector<32x448xbf16>
    %cst_7 = arith.constant dense<0.000000e+00> : vector<28x448xf32>
    %7 = tpu.matmul %4, %6, %cst_7 {dimension_numbers = #tpu.dot_dimension_numbers<[1], [0], [0], [1], [0, 0, 1, 1], [], []>} : vector<28x32xbf16>, vector<32x448xbf16>, vector<28x448xf32> -> vector<28x448xf32>
    %8 = arith.addf %2, %7 : vector<28x448xf32>
    %c0_8 = arith.constant 0 : index
    %c1 = arith.constant 1 : index
    %c0_9 = arith.constant 0 : index
    %9 = vector.load %arg1[%c0_8, %c1, %c0_9] : memref<2x32x32xbf16, #tpu.memory_space<vmem>>, vector<1x28x32xbf16>
    %10 = vector.shape_cast %9 : vector<1x28x32xbf16> to vector<28x32xbf16>
    %c1_10 = arith.constant 1 : index
    %c0_11 = arith.constant 0 : index
    %c0_12 = arith.constant 0 : index
    %11 = vector.load %arg2[%c1_10, %c0_11, %c0_12] : memref<5x32x448xbf16, #tpu.memory_space<vmem>>, vector<1x32x448xbf16>
    %12 = vector.shape_cast %11 : vector<1x32x448xbf16> to vector<32x448xbf16>
    %cst_13 = arith.constant dense<0.000000e+00> : vector<28x448xf32>
    %13 = tpu.matmul %10, %12, %cst_13 {dimension_numbers = #tpu.dot_dimension_numbers<[1], [0], [0], [1], [0, 0, 1, 1], [], []>} : vector<28x32xbf16>, vector<32x448xbf16>, vector<28x448xf32> -> vector<28x448xf32>
    %14 = arith.addf %8, %13 : vector<28x448xf32>
    %c0_14 = arith.constant 0 : index
    %c2 = arith.constant 2 : index
    %c0_15 = arith.constant 0 : index
    %15 = vector.load %arg1[%c0_14, %c2, %c0_15] : memref<2x32x32xbf16, #tpu.memory_space<vmem>>, vector<1x28x32xbf16>
    %16 = vector.shape_cast %15 : vector<1x28x32xbf16> to vector<28x32xbf16>
    %c2_16 = arith.constant 2 : index
    %c0_17 = arith.constant 0 : index
    %c0_18 = arith.constant 0 : index
    %17 = vector.load %arg2[%c2_16, %c0_17, %c0_18] : memref<5x32x448xbf16, #tpu.memory_space<vmem>>, vector<1x32x448xbf16>
    %18 = vector.shape_cast %17 : vector<1x32x448xbf16> to vector<32x448xbf16>
    %cst_19 = arith.constant dense<0.000000e+00> : vector<28x448xf32>
    %19 = tpu.matmul %16, %18, %cst_19 {dimension_numbers = #tpu.dot_dimension_numbers<[1], [0], [0], [1], [0, 0, 1, 1], [], []>} : vector<28x32xbf16>, vector<32x448xbf16>, vector<28x448xf32> -> vector<28x448xf32>
    %20 = arith.addf %14, %19 : vector<28x448xf32>
    %c0_20 = arith.constant 0 : index
    %c3 = arith.constant 3 : index
    %c0_21 = arith.constant 0 : index
    %21 = vector.load %arg1[%c0_20, %c3, %c0_21] : memref<2x32x32xbf16, #tpu.memory_space<vmem>>, vector<1x28x32xbf16>
    %22 = vector.shape_cast %21 : vector<1x28x32xbf16> to vector<28x32xbf16>
    %c3_22 = arith.constant 3 : index
    %c0_23 = arith.constant 0 : index
    %c0_24 = arith.constant 0 : index
    %23 = vector.load %arg2[%c3_22, %c0_23, %c0_24] : memref<5x32x448xbf16, #tpu.memory_space<vmem>>, vector<1x32x448xbf16>
    %24 = vector.shape_cast %23 : vector<1x32x448xbf16> to vector<32x448xbf16>
    %cst_25 = arith.constant dense<0.000000e+00> : vector<28x448xf32>
    %25 = tpu.matmul %22, %24, %cst_25 {dimension_numbers = #tpu.dot_dimension_numbers<[1], [0], [0], [1], [0, 0, 1, 1], [], []>} : vector<28x32xbf16>, vector<32x448xbf16>, vector<28x448xf32> -> vector<28x448xf32>
    %26 = arith.addf %20, %25 : vector<28x448xf32>
    %c0_26 = arith.constant 0 : index
    %c4 = arith.constant 4 : index
    %c0_27 = arith.constant 0 : index
    %27 = vector.load %arg1[%c0_26, %c4, %c0_27] : memref<2x32x32xbf16, #tpu.memory_space<vmem>>, vector<1x28x32xbf16>
    %28 = vector.shape_cast %27 : vector<1x28x32xbf16> to vector<28x32xbf16>
    %c4_28 = arith.constant 4 : index
    %c0_29 = arith.constant 0 : index
    %c0_30 = arith.constant 0 : index
    %29 = vector.load %arg2[%c4_28, %c0_29, %c0_30] : memref<5x32x448xbf16, #tpu.memory_space<vmem>>, vector<1x32x448xbf16>
    %30 = vector.shape_cast %29 : vector<1x32x448xbf16> to vector<32x448xbf16>
    %cst_31 = arith.constant dense<0.000000e+00> : vector<28x448xf32>
    %31 = tpu.matmul %28, %30, %cst_31 {dimension_numbers = #tpu.dot_dimension_numbers<[1], [0], [0], [1], [0, 0, 1, 1], [], []>} : vector<28x32xbf16>, vector<32x448xbf16>, vector<28x448xf32> -> vector<28x448xf32>
    %32 = arith.addf %26, %31 : vector<28x448xf32>
    %33 = arith.truncf %32 : vector<28x448xf32> to vector<28x448xbf16>
    %c0_32 = arith.constant 0 : index
    %c0_33 = arith.constant 0 : index
    %c0_34 = arith.constant 0 : index
    %34 = vector.load %arg3[%c0_32, %c0_33, %c0_34] : memref<2x28x448xbf16, #tpu.memory_space<vmem>>, vector<1x28x448xbf16>
    %35 = vector.shape_cast %34 : vector<1x28x448xbf16> to vector<28x448xbf16>
    %36 = vector.shape_cast %33 : vector<28x448xbf16> to vector<1x28x448xbf16>
    tpu.vector_store %arg3[%c0_32, %c0_33, %c0_34], %36 {strides = array<i32>} : memref<2x28x448xbf16, #tpu.memory_space<vmem>>, vector<1x28x448xbf16>,
    %cst_35 = arith.constant dense<0.000000e+00> : vector<448xf32>
    %37 = vector.multi_reduction <add>, %32, %cst_35 [0] : vector<28x448xf32> to vector<448xf32>
    %38 = vector.shape_cast %37 : vector<448xf32> to vector<1x448xf32>
    %39 = vector.broadcast %38 : vector<1x448xf32> to vector<8x448xf32>
    %40 = arith.addf %0, %39 : vector<8x448xf32>
    %41 = arith.mulf %32, %32 : vector<28x448xf32>
    %cst_36 = arith.constant dense<0.000000e+00> : vector<448xf32>
    %42 = vector.multi_reduction <add>, %41, %cst_36 [0] : vector<28x448xf32> to vector<448xf32>
    %43 = vector.shape_cast %42 : vector<448xf32> to vector<1x448xf32>
    %44 = vector.broadcast %43 : vector<1x448xf32> to vector<8x448xf32>
    %45 = arith.addf %1, %44 : vector<8x448xf32>
    %cst_37 = arith.constant 0.000000e+00 : f32
    %46 = vector.broadcast %cst_37 : f32 to vector<28x448xf32>
    %c1_38 = arith.constant 1 : index
    %c0_39 = arith.constant 0 : index
    %c0_40 = arith.constant 0 : index
    %47 = vector.load %arg1[%c1_38, %c0_39, %c0_40] : memref<2x32x32xbf16, #tpu.memory_space<vmem>>, vector<1x28x32xbf16>
    %48 = vector.shape_cast %47 : vector<1x28x32xbf16> to vector<28x32xbf16>
    %c0_41 = arith.constant 0 : index
    %c0_42 = arith.constant 0 : index
    %c0_43 = arith.constant 0 : index
    %49 = vector.load %arg2[%c0_41, %c0_42, %c0_43] : memref<5x32x448xbf16, #tpu.memory_space<vmem>>, vector<1x32x448xbf16>
    %50 = vector.shape_cast %49 : vector<1x32x448xbf16> to vector<32x448xbf16>
    %cst_44 = arith.constant dense<0.000000e+00> : vector<28x448xf32>
    %51 = tpu.matmul %48, %50, %cst_44 {dimension_numbers = #tpu.dot_dimension_numbers<[1], [0], [0], [1], [0, 0, 1, 1], [], []>} : vector<28x32xbf16>, vector<32x448xbf16>, vector<28x448xf32> -> vector<28x448xf32>
    %52 = arith.addf %46, %51 : vector<28x448xf32>
    %c1_45 = arith.constant 1 : index
    %c1_46 = arith.constant 1 : index
    %c0_47 = arith.constant 0 : index
    %53 = vector.load %arg1[%c1_45, %c1_46, %c0_47] : memref<2x32x32xbf16, #tpu.memory_space<vmem>>, vector<1x28x32xbf16>
    %54 = vector.shape_cast %53 : vector<1x28x32xbf16> to vector<28x32xbf16>
    %c1_48 = arith.constant 1 : index
    %c0_49 = arith.constant 0 : index
    %c0_50 = arith.constant 0 : index
    %55 = vector.load %arg2[%c1_48, %c0_49, %c0_50] : memref<5x32x448xbf16, #tpu.memory_space<vmem>>, vector<1x32x448xbf16>
    %56 = vector.shape_cast %55 : vector<1x32x448xbf16> to vector<32x448xbf16>
    %cst_51 = arith.constant dense<0.000000e+00> : vector<28x448xf32>
    %57 = tpu.matmul %54, %56, %cst_51 {dimension_numbers = #tpu.dot_dimension_numbers<[1], [0], [0], [1], [0, 0, 1, 1], [], []>} : vector<28x32xbf16>, vector<32x448xbf16>, vector<28x448xf32> -> vector<28x448xf32>
    %58 = arith.addf %52, %57 : vector<28x448xf32>
    %c1_52 = arith.constant 1 : index
    %c2_53 = arith.constant 2 : index
    %c0_54 = arith.constant 0 : index
    %59 = vector.load %arg1[%c1_52, %c2_53, %c0_54] : memref<2x32x32xbf16, #tpu.memory_space<vmem>>, vector<1x28x32xbf16>
    %60 = vector.shape_cast %59 : vector<1x28x32xbf16> to vector<28x32xbf16>
    %c2_55 = arith.constant 2 : index
    %c0_56 = arith.constant 0 : index
    %c0_57 = arith.constant 0 : index
    %61 = vector.load %arg2[%c2_55, %c0_56, %c0_57] : memref<5x32x448xbf16, #tpu.memory_space<vmem>>, vector<1x32x448xbf16>
    %62 = vector.shape_cast %61 : vector<1x32x448xbf16> to vector<32x448xbf16>
    %cst_58 = arith.constant dense<0.000000e+00> : vector<28x448xf32>
    %63 = tpu.matmul %60, %62, %cst_58 {dimension_numbers = #tpu.dot_dimension_numbers<[1], [0], [0], [1], [0, 0, 1, 1], [], []>} : vector<28x32xbf16>, vector<32x448xbf16>, vector<28x448xf32> -> vector<28x448xf32>
    %64 = arith.addf %58, %63 : vector<28x448xf32>
    %c1_59 = arith.constant 1 : index
    %c3_60 = arith.constant 3 : index
    %c0_61 = arith.constant 0 : index
    %65 = vector.load %arg1[%c1_59, %c3_60, %c0_61] : memref<2x32x32xbf16, #tpu.memory_space<vmem>>, vector<1x28x32xbf16>
    %66 = vector.shape_cast %65 : vector<1x28x32xbf16> to vector<28x32xbf16>
    %c3_62 = arith.constant 3 : index
    %c0_63 = arith.constant 0 : index
    %c0_64 = arith.constant 0 : index
    %67 = vector.load %arg2[%c3_62, %c0_63, %c0_64] : memref<5x32x448xbf16, #tpu.memory_space<vmem>>, vector<1x32x448xbf16>
    %68 = vector.shape_cast %67 : vector<1x32x448xbf16> to vector<32x448xbf16>
    %cst_65 = arith.constant dense<0.000000e+00> : vector<28x448xf32>
    %69 = tpu.matmul %66, %68, %cst_65 {dimension_numbers = #tpu.dot_dimension_numbers<[1], [0], [0], [1], [0, 0, 1, 1], [], []>} : vector<28x32xbf16>, vector<32x448xbf16>, vector<28x448xf32> -> vector<28x448xf32>
    %70 = arith.addf %64, %69 : vector<28x448xf32>
    %c1_66 = arith.constant 1 : index
    %c4_67 = arith.constant 4 : index
    %c0_68 = arith.constant 0 : index
    %71 = vector.load %arg1[%c1_66, %c4_67, %c0_68] : memref<2x32x32xbf16, #tpu.memory_space<vmem>>, vector<1x28x32xbf16>
    %72 = vector.shape_cast %71 : vector<1x28x32xbf16> to vector<28x32xbf16>
    %c4_69 = arith.constant 4 : index
    %c0_70 = arith.constant 0 : index
    %c0_71 = arith.constant 0 : index
    %73 = vector.load %arg2[%c4_69, %c0_70, %c0_71] : memref<5x32x448xbf16, #tpu.memory_space<vmem>>, vector<1x32x448xbf16>
    %74 = vector.shape_cast %73 : vector<1x32x448xbf16> to vector<32x448xbf16>
    %cst_72 = arith.constant dense<0.000000e+00> : vector<28x448xf32>
    %75 = tpu.matmul %72, %74, %cst_72 {dimension_numbers = #tpu.dot_dimension_numbers<[1], [0], [0], [1], [0, 0, 1, 1], [], []>} : vector<28x32xbf16>, vector<32x448xbf16>, vector<28x448xf32> -> vector<28x448xf32>
    %76 = arith.addf %70, %75 : vector<28x448xf32>
    %77 = arith.truncf %76 : vector<28x448xf32> to vector<28x448xbf16>
    %c1_73 = arith.constant 1 : index
    %c0_74 = arith.constant 0 : index
    %c0_75 = arith.constant 0 : index
    %78 = vector.load %arg3[%c1_73, %c0_74, %c0_75] : memref<2x28x448xbf16, #tpu.memory_space<vmem>>, vector<1x28x448xbf16>
    %79 = vector.shape_cast %78 : vector<1x28x448xbf16> to vector<28x448xbf16>
    %80 = vector.shape_cast %77 : vector<28x448xbf16> to vector<1x28x448xbf16>
    tpu.vector_store %arg3[%c1_73, %c0_74, %c0_75], %80 {strides = array<i32>} : memref<2x28x448xbf16, #tpu.memory_space<vmem>>, vector<1x28x448xbf16>,
    %cst_76 = arith.constant dense<0.000000e+00> : vector<448xf32>
    %81 = vector.multi_reduction <add>, %76, %cst_76 [0] : vector<28x448xf32> to vector<448xf32>
    %82 = vector.shape_cast %81 : vector<448xf32> to vector<1x448xf32>
    %83 = vector.broadcast %82 : vector<1x448xf32> to vector<8x448xf32>
    %84 = arith.addf %40, %83 : vector<8x448xf32>
    %85 = arith.mulf %76, %76 : vector<28x448xf32>
    %cst_77 = arith.constant dense<0.000000e+00> : vector<448xf32>
    %86 = vector.multi_reduction <add>, %85, %cst_77 [0] : vector<28x448xf32> to vector<448xf32>
    %87 = vector.shape_cast %86 : vector<448xf32> to vector<1x448xf32>
    %88 = vector.broadcast %87 : vector<1x448xf32> to vector<8x448xf32>
    %89 = arith.addf %45, %88 : vector<8x448xf32>
    %c0_78 = arith.constant 0 : index
    %c0_79 = arith.constant 0 : index
    %c0_80 = arith.constant 0 : index
    %90 = vector.load %arg4[%c0_78, %c0_79, %c0_80] : memref<1x8x448xf32, #tpu.memory_space<vmem>>, vector<1x8x448xf32>
    %91 = vector.shape_cast %90 : vector<1x8x448xf32> to vector<8x448xf32>
    %92 = vector.shape_cast %84 : vector<8x448xf32> to vector<1x8x448xf32>
    tpu.vector_store %arg4[%c0_78, %c0_79, %c0_80], %92 {strides = array<i32>} : memref<1x8x448xf32, #tpu.memory_space<vmem>>, vector<1x8x448xf32>,
    %c0_81 = arith.constant 0 : index
    %c0_82 = arith.constant 0 : index
    %c0_83 = arith.constant 0 : index
    %93 = vector.load %arg5[%c0_81, %c0_82, %c0_83] : memref<1x8x448xf32, #tpu.memory_space<vmem>>, vector<1x8x448xf32>
    %94 = vector.shape_cast %93 : vector<1x8x448xf32> to vector<8x448xf32>
    %95 = vector.shape_cast %89 : vector<8x448xf32> to vector<1x8x448xf32>
    tpu.vector_store %arg5[%c0_81, %c0_82, %c0_83], %95 {strides = array<i32>} : memref<1x8x448xf32, #tpu.memory_space<vmem>>, vector<1x8x448xf32>,
    return
  }
  func.func @transform_0(%arg0: i32) -> (i32, i32, i32) {
    %c0_i32 = arith.constant 0 : i32
    %c0_i32_0 = arith.constant 0 : i32
    %c0_i32_1 = arith.constant 0 : i32
    return %arg0, %c0_i32, %c0_i32_0 : i32, i32, i32
  }
  func.func @transform_1(%arg0: i32) -> (i32, i32, i32) {
    %c0_i32 = arith.constant 0 : i32
    %c0_i32_0 = arith.constant 0 : i32
    %c0_i32_1 = arith.constant 0 : i32
    %c0_i32_2 = arith.constant 0 : i32
    return %c0_i32, %c0_i32_0, %c0_i32_1 : i32, i32, i32
  }
  func.func @transform_2(%arg0: i32) -> (i32, i32, i32) {
    %c0_i32 = arith.constant 0 : i32
    %c0_i32_0 = arith.constant 0 : i32
    %c0_i32_1 = arith.constant 0 : i32
    return %arg0, %c0_i32, %c0_i32_0 : i32, i32, i32
  }
  func.func @transform_3(%arg0: i32) -> (i32, i32, i32) {
    %c0_i32 = arith.constant 0 : i32
    %c0_i32_0 = arith.constant 0 : i32
    %c0_i32_1 = arith.constant 0 : i32
    return %arg0, %c0_i32, %c0_i32_0 : i32, i32, i32
  }
  func.func @transform_4(%arg0: i32) -> (i32, i32, i32) {
    %c0_i32 = arith.constant 0 : i32
    %c0_i32_0 = arith.constant 0 : i32
    %c0_i32_1 = arith.constant 0 : i32
    return %arg0, %c0_i32, %c0_i32_0 : i32, i32, i32
  }
}

module attributes {stable_mosaic.version = 11 : i64} {
  func.func @bn_relu_pool_kernel(%arg0: i32, %arg1: memref<2x28x448xbf16, #tpu.memory_space<vmem>>, %arg2: memref<1x448xf32, #tpu.memory_space<vmem>>, %arg3: memref<1x448xf32, #tpu.memory_space<vmem>>, %arg4: memref<2x14x224xbf16, #tpu.memory_space<vmem>>) attributes {dimension_semantics = [#tpu.dimension_semantics<parallel>], iteration_bounds = array<i64: 1>, scalar_prefetch = 0 : i64, scratch_operands = 0 : i64, tpu.core_type = #tpu.core_type<tc>, window_params = [{transform_indices = @transform_0, window_bounds = array<i64: 2, 28, 448>}, {pipeline_mode = #tpu.pipeline_mode<synchronous>, transform_indices = @transform_1, window_bounds = array<i64: 1, 448>}, {pipeline_mode = #tpu.pipeline_mode<synchronous>, transform_indices = @transform_2, window_bounds = array<i64: 1, 448>}, {transform_indices = @transform_3, window_bounds = array<i64: 2, 14, 224>}]} {
    %c0 = arith.constant 0 : index
    %c0_0 = arith.constant 0 : index
    %0 = vector.load %arg2[%c0, %c0_0] : memref<1x448xf32, #tpu.memory_space<vmem>>, vector<1x448xf32>
    %c0_1 = arith.constant 0 : index
    %c0_2 = arith.constant 0 : index
    %1 = vector.load %arg3[%c0_1, %c0_2] : memref<1x448xf32, #tpu.memory_space<vmem>>, vector<1x448xf32>
    %c0_3 = arith.constant 0 : index
    %c0_4 = arith.constant 0 : index
    %c0_5 = arith.constant 0 : index
    %2 = vector.load %arg1[%c0_3, %c0_4, %c0_5] : memref<2x28x448xbf16, #tpu.memory_space<vmem>>, vector<2x1x448xbf16>
    %3 = vector.shape_cast %2 : vector<2x1x448xbf16> to vector<2x448xbf16>
    %4 = arith.extf %3 : vector<2x448xbf16> to vector<2x448xf32>
    %c0_6 = arith.constant 0 : index
    %c1 = arith.constant 1 : index
    %c0_7 = arith.constant 0 : index
    %5 = vector.load %arg1[%c0_6, %c1, %c0_7] : memref<2x28x448xbf16, #tpu.memory_space<vmem>>, vector<2x1x448xbf16>
    %6 = vector.shape_cast %5 : vector<2x1x448xbf16> to vector<2x448xbf16>
    %7 = arith.extf %6 : vector<2x448xbf16> to vector<2x448xf32>
    %8 = vector.broadcast %0 : vector<1x448xf32> to vector<2x448xf32>
    %9 = arith.mulf %4, %8 : vector<2x448xf32>
    %10 = vector.broadcast %1 : vector<1x448xf32> to vector<2x448xf32>
    %11 = arith.addf %9, %10 : vector<2x448xf32>
    %cst = arith.constant 0.000000e+00 : f32
    %12 = vector.broadcast %cst : f32 to vector<2x448xf32>
    %13 = arith.maximumf %11, %12 : vector<2x448xf32>
    %14 = vector.broadcast %0 : vector<1x448xf32> to vector<2x448xf32>
    %15 = arith.mulf %7, %14 : vector<2x448xf32>
    %16 = vector.broadcast %1 : vector<1x448xf32> to vector<2x448xf32>
    %17 = arith.addf %15, %16 : vector<2x448xf32>
    %cst_8 = arith.constant 0.000000e+00 : f32
    %18 = vector.broadcast %cst_8 : f32 to vector<2x448xf32>
    %19 = arith.maximumf %17, %18 : vector<2x448xf32>
    %20 = arith.maximumf %13, %19 : vector<2x448xf32>
    %21 = vector.extract_strided_slice %20 {offsets = [0, 0], sizes = [2, 224], strides = [1, 1]} : vector<2x448xf32> to vector<2x224xf32>
    %22 = vector.extract_strided_slice %20 {offsets = [0, 224], sizes = [2, 224], strides = [1, 1]} : vector<2x448xf32> to vector<2x224xf32>
    %23 = arith.maximumf %21, %22 : vector<2x224xf32>
    %24 = arith.truncf %23 : vector<2x224xf32> to vector<2x224xbf16>
    %c0_9 = arith.constant 0 : index
    %c0_10 = arith.constant 0 : index
    %c0_11 = arith.constant 0 : index
    %25 = vector.load %arg4[%c0_9, %c0_10, %c0_11] : memref<2x14x224xbf16, #tpu.memory_space<vmem>>, vector<2x1x224xbf16>
    %26 = vector.shape_cast %25 : vector<2x1x224xbf16> to vector<2x224xbf16>
    %27 = vector.shape_cast %24 : vector<2x224xbf16> to vector<2x1x224xbf16>
    tpu.vector_store %arg4[%c0_9, %c0_10, %c0_11], %27 {strides = array<i32>} : memref<2x14x224xbf16, #tpu.memory_space<vmem>>, vector<2x1x224xbf16>,
    %c0_12 = arith.constant 0 : index
    %c2 = arith.constant 2 : index
    %c0_13 = arith.constant 0 : index
    %28 = vector.load %arg1[%c0_12, %c2, %c0_13] : memref<2x28x448xbf16, #tpu.memory_space<vmem>>, vector<2x1x448xbf16>
    %29 = vector.shape_cast %28 : vector<2x1x448xbf16> to vector<2x448xbf16>
    %30 = arith.extf %29 : vector<2x448xbf16> to vector<2x448xf32>
    %c0_14 = arith.constant 0 : index
    %c3 = arith.constant 3 : index
    %c0_15 = arith.constant 0 : index
    %31 = vector.load %arg1[%c0_14, %c3, %c0_15] : memref<2x28x448xbf16, #tpu.memory_space<vmem>>, vector<2x1x448xbf16>
    %32 = vector.shape_cast %31 : vector<2x1x448xbf16> to vector<2x448xbf16>
    %33 = arith.extf %32 : vector<2x448xbf16> to vector<2x448xf32>
    %34 = vector.broadcast %0 : vector<1x448xf32> to vector<2x448xf32>
    %35 = arith.mulf %30, %34 : vector<2x448xf32>
    %36 = vector.broadcast %1 : vector<1x448xf32> to vector<2x448xf32>
    %37 = arith.addf %35, %36 : vector<2x448xf32>
    %cst_16 = arith.constant 0.000000e+00 : f32
    %38 = vector.broadcast %cst_16 : f32 to vector<2x448xf32>
    %39 = arith.maximumf %37, %38 : vector<2x448xf32>
    %40 = vector.broadcast %0 : vector<1x448xf32> to vector<2x448xf32>
    %41 = arith.mulf %33, %40 : vector<2x448xf32>
    %42 = vector.broadcast %1 : vector<1x448xf32> to vector<2x448xf32>
    %43 = arith.addf %41, %42 : vector<2x448xf32>
    %cst_17 = arith.constant 0.000000e+00 : f32
    %44 = vector.broadcast %cst_17 : f32 to vector<2x448xf32>
    %45 = arith.maximumf %43, %44 : vector<2x448xf32>
    %46 = arith.maximumf %39, %45 : vector<2x448xf32>
    %47 = vector.extract_strided_slice %46 {offsets = [0, 0], sizes = [2, 224], strides = [1, 1]} : vector<2x448xf32> to vector<2x224xf32>
    %48 = vector.extract_strided_slice %46 {offsets = [0, 224], sizes = [2, 224], strides = [1, 1]} : vector<2x448xf32> to vector<2x224xf32>
    %49 = arith.maximumf %47, %48 : vector<2x224xf32>
    %50 = arith.truncf %49 : vector<2x224xf32> to vector<2x224xbf16>
    %c0_18 = arith.constant 0 : index
    %c1_19 = arith.constant 1 : index
    %c0_20 = arith.constant 0 : index
    %51 = vector.load %arg4[%c0_18, %c1_19, %c0_20] : memref<2x14x224xbf16, #tpu.memory_space<vmem>>, vector<2x1x224xbf16>
    %52 = vector.shape_cast %51 : vector<2x1x224xbf16> to vector<2x224xbf16>
    %53 = vector.shape_cast %50 : vector<2x224xbf16> to vector<2x1x224xbf16>
    tpu.vector_store %arg4[%c0_18, %c1_19, %c0_20], %53 {strides = array<i32>} : memref<2x14x224xbf16, #tpu.memory_space<vmem>>, vector<2x1x224xbf16>,
    %c0_21 = arith.constant 0 : index
    %c4 = arith.constant 4 : index
    %c0_22 = arith.constant 0 : index
    %54 = vector.load %arg1[%c0_21, %c4, %c0_22] : memref<2x28x448xbf16, #tpu.memory_space<vmem>>, vector<2x1x448xbf16>
    %55 = vector.shape_cast %54 : vector<2x1x448xbf16> to vector<2x448xbf16>
    %56 = arith.extf %55 : vector<2x448xbf16> to vector<2x448xf32>
    %c0_23 = arith.constant 0 : index
    %c5 = arith.constant 5 : index
    %c0_24 = arith.constant 0 : index
    %57 = vector.load %arg1[%c0_23, %c5, %c0_24] : memref<2x28x448xbf16, #tpu.memory_space<vmem>>, vector<2x1x448xbf16>
    %58 = vector.shape_cast %57 : vector<2x1x448xbf16> to vector<2x448xbf16>
    %59 = arith.extf %58 : vector<2x448xbf16> to vector<2x448xf32>
    %60 = vector.broadcast %0 : vector<1x448xf32> to vector<2x448xf32>
    %61 = arith.mulf %56, %60 : vector<2x448xf32>
    %62 = vector.broadcast %1 : vector<1x448xf32> to vector<2x448xf32>
    %63 = arith.addf %61, %62 : vector<2x448xf32>
    %cst_25 = arith.constant 0.000000e+00 : f32
    %64 = vector.broadcast %cst_25 : f32 to vector<2x448xf32>
    %65 = arith.maximumf %63, %64 : vector<2x448xf32>
    %66 = vector.broadcast %0 : vector<1x448xf32> to vector<2x448xf32>
    %67 = arith.mulf %59, %66 : vector<2x448xf32>
    %68 = vector.broadcast %1 : vector<1x448xf32> to vector<2x448xf32>
    %69 = arith.addf %67, %68 : vector<2x448xf32>
    %cst_26 = arith.constant 0.000000e+00 : f32
    %70 = vector.broadcast %cst_26 : f32 to vector<2x448xf32>
    %71 = arith.maximumf %69, %70 : vector<2x448xf32>
    %72 = arith.maximumf %65, %71 : vector<2x448xf32>
    %73 = vector.extract_strided_slice %72 {offsets = [0, 0], sizes = [2, 224], strides = [1, 1]} : vector<2x448xf32> to vector<2x224xf32>
    %74 = vector.extract_strided_slice %72 {offsets = [0, 224], sizes = [2, 224], strides = [1, 1]} : vector<2x448xf32> to vector<2x224xf32>
    %75 = arith.maximumf %73, %74 : vector<2x224xf32>
    %76 = arith.truncf %75 : vector<2x224xf32> to vector<2x224xbf16>
    %c0_27 = arith.constant 0 : index
    %c2_28 = arith.constant 2 : index
    %c0_29 = arith.constant 0 : index
    %77 = vector.load %arg4[%c0_27, %c2_28, %c0_29] : memref<2x14x224xbf16, #tpu.memory_space<vmem>>, vector<2x1x224xbf16>
    %78 = vector.shape_cast %77 : vector<2x1x224xbf16> to vector<2x224xbf16>
    %79 = vector.shape_cast %76 : vector<2x224xbf16> to vector<2x1x224xbf16>
    tpu.vector_store %arg4[%c0_27, %c2_28, %c0_29], %79 {strides = array<i32>} : memref<2x14x224xbf16, #tpu.memory_space<vmem>>, vector<2x1x224xbf16>,
    %c0_30 = arith.constant 0 : index
    %c6 = arith.constant 6 : index
    %c0_31 = arith.constant 0 : index
    %80 = vector.load %arg1[%c0_30, %c6, %c0_31] : memref<2x28x448xbf16, #tpu.memory_space<vmem>>, vector<2x1x448xbf16>
    %81 = vector.shape_cast %80 : vector<2x1x448xbf16> to vector<2x448xbf16>
    %82 = arith.extf %81 : vector<2x448xbf16> to vector<2x448xf32>
    %c0_32 = arith.constant 0 : index
    %c7 = arith.constant 7 : index
    %c0_33 = arith.constant 0 : index
    %83 = vector.load %arg1[%c0_32, %c7, %c0_33] : memref<2x28x448xbf16, #tpu.memory_space<vmem>>, vector<2x1x448xbf16>
    %84 = vector.shape_cast %83 : vector<2x1x448xbf16> to vector<2x448xbf16>
    %85 = arith.extf %84 : vector<2x448xbf16> to vector<2x448xf32>
    %86 = vector.broadcast %0 : vector<1x448xf32> to vector<2x448xf32>
    %87 = arith.mulf %82, %86 : vector<2x448xf32>
    %88 = vector.broadcast %1 : vector<1x448xf32> to vector<2x448xf32>
    %89 = arith.addf %87, %88 : vector<2x448xf32>
    %cst_34 = arith.constant 0.000000e+00 : f32
    %90 = vector.broadcast %cst_34 : f32 to vector<2x448xf32>
    %91 = arith.maximumf %89, %90 : vector<2x448xf32>
    %92 = vector.broadcast %0 : vector<1x448xf32> to vector<2x448xf32>
    %93 = arith.mulf %85, %92 : vector<2x448xf32>
    %94 = vector.broadcast %1 : vector<1x448xf32> to vector<2x448xf32>
    %95 = arith.addf %93, %94 : vector<2x448xf32>
    %cst_35 = arith.constant 0.000000e+00 : f32
    %96 = vector.broadcast %cst_35 : f32 to vector<2x448xf32>
    %97 = arith.maximumf %95, %96 : vector<2x448xf32>
    %98 = arith.maximumf %91, %97 : vector<2x448xf32>
    %99 = vector.extract_strided_slice %98 {offsets = [0, 0], sizes = [2, 224], strides = [1, 1]} : vector<2x448xf32> to vector<2x224xf32>
    %100 = vector.extract_strided_slice %98 {offsets = [0, 224], sizes = [2, 224], strides = [1, 1]} : vector<2x448xf32> to vector<2x224xf32>
    %101 = arith.maximumf %99, %100 : vector<2x224xf32>
    %102 = arith.truncf %101 : vector<2x224xf32> to vector<2x224xbf16>
    %c0_36 = arith.constant 0 : index
    %c3_37 = arith.constant 3 : index
    %c0_38 = arith.constant 0 : index
    %103 = vector.load %arg4[%c0_36, %c3_37, %c0_38] : memref<2x14x224xbf16, #tpu.memory_space<vmem>>, vector<2x1x224xbf16>
    %104 = vector.shape_cast %103 : vector<2x1x224xbf16> to vector<2x224xbf16>
    %105 = vector.shape_cast %102 : vector<2x224xbf16> to vector<2x1x224xbf16>
    tpu.vector_store %arg4[%c0_36, %c3_37, %c0_38], %105 {strides = array<i32>} : memref<2x14x224xbf16, #tpu.memory_space<vmem>>, vector<2x1x224xbf16>,
    %c0_39 = arith.constant 0 : index
    %c8 = arith.constant 8 : index
    %c0_40 = arith.constant 0 : index
    %106 = vector.load %arg1[%c0_39, %c8, %c0_40] : memref<2x28x448xbf16, #tpu.memory_space<vmem>>, vector<2x1x448xbf16>
    %107 = vector.shape_cast %106 : vector<2x1x448xbf16> to vector<2x448xbf16>
    %108 = arith.extf %107 : vector<2x448xbf16> to vector<2x448xf32>
    %c0_41 = arith.constant 0 : index
    %c9 = arith.constant 9 : index
    %c0_42 = arith.constant 0 : index
    %109 = vector.load %arg1[%c0_41, %c9, %c0_42] : memref<2x28x448xbf16, #tpu.memory_space<vmem>>, vector<2x1x448xbf16>
    %110 = vector.shape_cast %109 : vector<2x1x448xbf16> to vector<2x448xbf16>
    %111 = arith.extf %110 : vector<2x448xbf16> to vector<2x448xf32>
    %112 = vector.broadcast %0 : vector<1x448xf32> to vector<2x448xf32>
    %113 = arith.mulf %108, %112 : vector<2x448xf32>
    %114 = vector.broadcast %1 : vector<1x448xf32> to vector<2x448xf32>
    %115 = arith.addf %113, %114 : vector<2x448xf32>
    %cst_43 = arith.constant 0.000000e+00 : f32
    %116 = vector.broadcast %cst_43 : f32 to vector<2x448xf32>
    %117 = arith.maximumf %115, %116 : vector<2x448xf32>
    %118 = vector.broadcast %0 : vector<1x448xf32> to vector<2x448xf32>
    %119 = arith.mulf %111, %118 : vector<2x448xf32>
    %120 = vector.broadcast %1 : vector<1x448xf32> to vector<2x448xf32>
    %121 = arith.addf %119, %120 : vector<2x448xf32>
    %cst_44 = arith.constant 0.000000e+00 : f32
    %122 = vector.broadcast %cst_44 : f32 to vector<2x448xf32>
    %123 = arith.maximumf %121, %122 : vector<2x448xf32>
    %124 = arith.maximumf %117, %123 : vector<2x448xf32>
    %125 = vector.extract_strided_slice %124 {offsets = [0, 0], sizes = [2, 224], strides = [1, 1]} : vector<2x448xf32> to vector<2x224xf32>
    %126 = vector.extract_strided_slice %124 {offsets = [0, 224], sizes = [2, 224], strides = [1, 1]} : vector<2x448xf32> to vector<2x224xf32>
    %127 = arith.maximumf %125, %126 : vector<2x224xf32>
    %128 = arith.truncf %127 : vector<2x224xf32> to vector<2x224xbf16>
    %c0_45 = arith.constant 0 : index
    %c4_46 = arith.constant 4 : index
    %c0_47 = arith.constant 0 : index
    %129 = vector.load %arg4[%c0_45, %c4_46, %c0_47] : memref<2x14x224xbf16, #tpu.memory_space<vmem>>, vector<2x1x224xbf16>
    %130 = vector.shape_cast %129 : vector<2x1x224xbf16> to vector<2x224xbf16>
    %131 = vector.shape_cast %128 : vector<2x224xbf16> to vector<2x1x224xbf16>
    tpu.vector_store %arg4[%c0_45, %c4_46, %c0_47], %131 {strides = array<i32>} : memref<2x14x224xbf16, #tpu.memory_space<vmem>>, vector<2x1x224xbf16>,
    %c0_48 = arith.constant 0 : index
    %c10 = arith.constant 10 : index
    %c0_49 = arith.constant 0 : index
    %132 = vector.load %arg1[%c0_48, %c10, %c0_49] : memref<2x28x448xbf16, #tpu.memory_space<vmem>>, vector<2x1x448xbf16>
    %133 = vector.shape_cast %132 : vector<2x1x448xbf16> to vector<2x448xbf16>
    %134 = arith.extf %133 : vector<2x448xbf16> to vector<2x448xf32>
    %c0_50 = arith.constant 0 : index
    %c11 = arith.constant 11 : index
    %c0_51 = arith.constant 0 : index
    %135 = vector.load %arg1[%c0_50, %c11, %c0_51] : memref<2x28x448xbf16, #tpu.memory_space<vmem>>, vector<2x1x448xbf16>
    %136 = vector.shape_cast %135 : vector<2x1x448xbf16> to vector<2x448xbf16>
    %137 = arith.extf %136 : vector<2x448xbf16> to vector<2x448xf32>
    %138 = vector.broadcast %0 : vector<1x448xf32> to vector<2x448xf32>
    %139 = arith.mulf %134, %138 : vector<2x448xf32>
    %140 = vector.broadcast %1 : vector<1x448xf32> to vector<2x448xf32>
    %141 = arith.addf %139, %140 : vector<2x448xf32>
    %cst_52 = arith.constant 0.000000e+00 : f32
    %142 = vector.broadcast %cst_52 : f32 to vector<2x448xf32>
    %143 = arith.maximumf %141, %142 : vector<2x448xf32>
    %144 = vector.broadcast %0 : vector<1x448xf32> to vector<2x448xf32>
    %145 = arith.mulf %137, %144 : vector<2x448xf32>
    %146 = vector.broadcast %1 : vector<1x448xf32> to vector<2x448xf32>
    %147 = arith.addf %145, %146 : vector<2x448xf32>
    %cst_53 = arith.constant 0.000000e+00 : f32
    %148 = vector.broadcast %cst_53 : f32 to vector<2x448xf32>
    %149 = arith.maximumf %147, %148 : vector<2x448xf32>
    %150 = arith.maximumf %143, %149 : vector<2x448xf32>
    %151 = vector.extract_strided_slice %150 {offsets = [0, 0], sizes = [2, 224], strides = [1, 1]} : vector<2x448xf32> to vector<2x224xf32>
    %152 = vector.extract_strided_slice %150 {offsets = [0, 224], sizes = [2, 224], strides = [1, 1]} : vector<2x448xf32> to vector<2x224xf32>
    %153 = arith.maximumf %151, %152 : vector<2x224xf32>
    %154 = arith.truncf %153 : vector<2x224xf32> to vector<2x224xbf16>
    %c0_54 = arith.constant 0 : index
    %c5_55 = arith.constant 5 : index
    %c0_56 = arith.constant 0 : index
    %155 = vector.load %arg4[%c0_54, %c5_55, %c0_56] : memref<2x14x224xbf16, #tpu.memory_space<vmem>>, vector<2x1x224xbf16>
    %156 = vector.shape_cast %155 : vector<2x1x224xbf16> to vector<2x224xbf16>
    %157 = vector.shape_cast %154 : vector<2x224xbf16> to vector<2x1x224xbf16>
    tpu.vector_store %arg4[%c0_54, %c5_55, %c0_56], %157 {strides = array<i32>} : memref<2x14x224xbf16, #tpu.memory_space<vmem>>, vector<2x1x224xbf16>,
    %c0_57 = arith.constant 0 : index
    %c12 = arith.constant 12 : index
    %c0_58 = arith.constant 0 : index
    %158 = vector.load %arg1[%c0_57, %c12, %c0_58] : memref<2x28x448xbf16, #tpu.memory_space<vmem>>, vector<2x1x448xbf16>
    %159 = vector.shape_cast %158 : vector<2x1x448xbf16> to vector<2x448xbf16>
    %160 = arith.extf %159 : vector<2x448xbf16> to vector<2x448xf32>
    %c0_59 = arith.constant 0 : index
    %c13 = arith.constant 13 : index
    %c0_60 = arith.constant 0 : index
    %161 = vector.load %arg1[%c0_59, %c13, %c0_60] : memref<2x28x448xbf16, #tpu.memory_space<vmem>>, vector<2x1x448xbf16>
    %162 = vector.shape_cast %161 : vector<2x1x448xbf16> to vector<2x448xbf16>
    %163 = arith.extf %162 : vector<2x448xbf16> to vector<2x448xf32>
    %164 = vector.broadcast %0 : vector<1x448xf32> to vector<2x448xf32>
    %165 = arith.mulf %160, %164 : vector<2x448xf32>
    %166 = vector.broadcast %1 : vector<1x448xf32> to vector<2x448xf32>
    %167 = arith.addf %165, %166 : vector<2x448xf32>
    %cst_61 = arith.constant 0.000000e+00 : f32
    %168 = vector.broadcast %cst_61 : f32 to vector<2x448xf32>
    %169 = arith.maximumf %167, %168 : vector<2x448xf32>
    %170 = vector.broadcast %0 : vector<1x448xf32> to vector<2x448xf32>
    %171 = arith.mulf %163, %170 : vector<2x448xf32>
    %172 = vector.broadcast %1 : vector<1x448xf32> to vector<2x448xf32>
    %173 = arith.addf %171, %172 : vector<2x448xf32>
    %cst_62 = arith.constant 0.000000e+00 : f32
    %174 = vector.broadcast %cst_62 : f32 to vector<2x448xf32>
    %175 = arith.maximumf %173, %174 : vector<2x448xf32>
    %176 = arith.maximumf %169, %175 : vector<2x448xf32>
    %177 = vector.extract_strided_slice %176 {offsets = [0, 0], sizes = [2, 224], strides = [1, 1]} : vector<2x448xf32> to vector<2x224xf32>
    %178 = vector.extract_strided_slice %176 {offsets = [0, 224], sizes = [2, 224], strides = [1, 1]} : vector<2x448xf32> to vector<2x224xf32>
    %179 = arith.maximumf %177, %178 : vector<2x224xf32>
    %180 = arith.truncf %179 : vector<2x224xf32> to vector<2x224xbf16>
    %c0_63 = arith.constant 0 : index
    %c6_64 = arith.constant 6 : index
    %c0_65 = arith.constant 0 : index
    %181 = vector.load %arg4[%c0_63, %c6_64, %c0_65] : memref<2x14x224xbf16, #tpu.memory_space<vmem>>, vector<2x1x224xbf16>
    %182 = vector.shape_cast %181 : vector<2x1x224xbf16> to vector<2x224xbf16>
    %183 = vector.shape_cast %180 : vector<2x224xbf16> to vector<2x1x224xbf16>
    tpu.vector_store %arg4[%c0_63, %c6_64, %c0_65], %183 {strides = array<i32>} : memref<2x14x224xbf16, #tpu.memory_space<vmem>>, vector<2x1x224xbf16>,
    %c0_66 = arith.constant 0 : index
    %c14 = arith.constant 14 : index
    %c0_67 = arith.constant 0 : index
    %184 = vector.load %arg1[%c0_66, %c14, %c0_67] : memref<2x28x448xbf16, #tpu.memory_space<vmem>>, vector<2x1x448xbf16>
    %185 = vector.shape_cast %184 : vector<2x1x448xbf16> to vector<2x448xbf16>
    %186 = arith.extf %185 : vector<2x448xbf16> to vector<2x448xf32>
    %c0_68 = arith.constant 0 : index
    %c15 = arith.constant 15 : index
    %c0_69 = arith.constant 0 : index
    %187 = vector.load %arg1[%c0_68, %c15, %c0_69] : memref<2x28x448xbf16, #tpu.memory_space<vmem>>, vector<2x1x448xbf16>
    %188 = vector.shape_cast %187 : vector<2x1x448xbf16> to vector<2x448xbf16>
    %189 = arith.extf %188 : vector<2x448xbf16> to vector<2x448xf32>
    %190 = vector.broadcast %0 : vector<1x448xf32> to vector<2x448xf32>
    %191 = arith.mulf %186, %190 : vector<2x448xf32>
    %192 = vector.broadcast %1 : vector<1x448xf32> to vector<2x448xf32>
    %193 = arith.addf %191, %192 : vector<2x448xf32>
    %cst_70 = arith.constant 0.000000e+00 : f32
    %194 = vector.broadcast %cst_70 : f32 to vector<2x448xf32>
    %195 = arith.maximumf %193, %194 : vector<2x448xf32>
    %196 = vector.broadcast %0 : vector<1x448xf32> to vector<2x448xf32>
    %197 = arith.mulf %189, %196 : vector<2x448xf32>
    %198 = vector.broadcast %1 : vector<1x448xf32> to vector<2x448xf32>
    %199 = arith.addf %197, %198 : vector<2x448xf32>
    %cst_71 = arith.constant 0.000000e+00 : f32
    %200 = vector.broadcast %cst_71 : f32 to vector<2x448xf32>
    %201 = arith.maximumf %199, %200 : vector<2x448xf32>
    %202 = arith.maximumf %195, %201 : vector<2x448xf32>
    %203 = vector.extract_strided_slice %202 {offsets = [0, 0], sizes = [2, 224], strides = [1, 1]} : vector<2x448xf32> to vector<2x224xf32>
    %204 = vector.extract_strided_slice %202 {offsets = [0, 224], sizes = [2, 224], strides = [1, 1]} : vector<2x448xf32> to vector<2x224xf32>
    %205 = arith.maximumf %203, %204 : vector<2x224xf32>
    %206 = arith.truncf %205 : vector<2x224xf32> to vector<2x224xbf16>
    %c0_72 = arith.constant 0 : index
    %c7_73 = arith.constant 7 : index
    %c0_74 = arith.constant 0 : index
    %207 = vector.load %arg4[%c0_72, %c7_73, %c0_74] : memref<2x14x224xbf16, #tpu.memory_space<vmem>>, vector<2x1x224xbf16>
    %208 = vector.shape_cast %207 : vector<2x1x224xbf16> to vector<2x224xbf16>
    %209 = vector.shape_cast %206 : vector<2x224xbf16> to vector<2x1x224xbf16>
    tpu.vector_store %arg4[%c0_72, %c7_73, %c0_74], %209 {strides = array<i32>} : memref<2x14x224xbf16, #tpu.memory_space<vmem>>, vector<2x1x224xbf16>,
    %c0_75 = arith.constant 0 : index
    %c16 = arith.constant 16 : index
    %c0_76 = arith.constant 0 : index
    %210 = vector.load %arg1[%c0_75, %c16, %c0_76] : memref<2x28x448xbf16, #tpu.memory_space<vmem>>, vector<2x1x448xbf16>
    %211 = vector.shape_cast %210 : vector<2x1x448xbf16> to vector<2x448xbf16>
    %212 = arith.extf %211 : vector<2x448xbf16> to vector<2x448xf32>
    %c0_77 = arith.constant 0 : index
    %c17 = arith.constant 17 : index
    %c0_78 = arith.constant 0 : index
    %213 = vector.load %arg1[%c0_77, %c17, %c0_78] : memref<2x28x448xbf16, #tpu.memory_space<vmem>>, vector<2x1x448xbf16>
    %214 = vector.shape_cast %213 : vector<2x1x448xbf16> to vector<2x448xbf16>
    %215 = arith.extf %214 : vector<2x448xbf16> to vector<2x448xf32>
    %216 = vector.broadcast %0 : vector<1x448xf32> to vector<2x448xf32>
    %217 = arith.mulf %212, %216 : vector<2x448xf32>
    %218 = vector.broadcast %1 : vector<1x448xf32> to vector<2x448xf32>
    %219 = arith.addf %217, %218 : vector<2x448xf32>
    %cst_79 = arith.constant 0.000000e+00 : f32
    %220 = vector.broadcast %cst_79 : f32 to vector<2x448xf32>
    %221 = arith.maximumf %219, %220 : vector<2x448xf32>
    %222 = vector.broadcast %0 : vector<1x448xf32> to vector<2x448xf32>
    %223 = arith.mulf %215, %222 : vector<2x448xf32>
    %224 = vector.broadcast %1 : vector<1x448xf32> to vector<2x448xf32>
    %225 = arith.addf %223, %224 : vector<2x448xf32>
    %cst_80 = arith.constant 0.000000e+00 : f32
    %226 = vector.broadcast %cst_80 : f32 to vector<2x448xf32>
    %227 = arith.maximumf %225, %226 : vector<2x448xf32>
    %228 = arith.maximumf %221, %227 : vector<2x448xf32>
    %229 = vector.extract_strided_slice %228 {offsets = [0, 0], sizes = [2, 224], strides = [1, 1]} : vector<2x448xf32> to vector<2x224xf32>
    %230 = vector.extract_strided_slice %228 {offsets = [0, 224], sizes = [2, 224], strides = [1, 1]} : vector<2x448xf32> to vector<2x224xf32>
    %231 = arith.maximumf %229, %230 : vector<2x224xf32>
    %232 = arith.truncf %231 : vector<2x224xf32> to vector<2x224xbf16>
    %c0_81 = arith.constant 0 : index
    %c8_82 = arith.constant 8 : index
    %c0_83 = arith.constant 0 : index
    %233 = vector.load %arg4[%c0_81, %c8_82, %c0_83] : memref<2x14x224xbf16, #tpu.memory_space<vmem>>, vector<2x1x224xbf16>
    %234 = vector.shape_cast %233 : vector<2x1x224xbf16> to vector<2x224xbf16>
    %235 = vector.shape_cast %232 : vector<2x224xbf16> to vector<2x1x224xbf16>
    tpu.vector_store %arg4[%c0_81, %c8_82, %c0_83], %235 {strides = array<i32>} : memref<2x14x224xbf16, #tpu.memory_space<vmem>>, vector<2x1x224xbf16>,
    %c0_84 = arith.constant 0 : index
    %c18 = arith.constant 18 : index
    %c0_85 = arith.constant 0 : index
    %236 = vector.load %arg1[%c0_84, %c18, %c0_85] : memref<2x28x448xbf16, #tpu.memory_space<vmem>>, vector<2x1x448xbf16>
    %237 = vector.shape_cast %236 : vector<2x1x448xbf16> to vector<2x448xbf16>
    %238 = arith.extf %237 : vector<2x448xbf16> to vector<2x448xf32>
    %c0_86 = arith.constant 0 : index
    %c19 = arith.constant 19 : index
    %c0_87 = arith.constant 0 : index
    %239 = vector.load %arg1[%c0_86, %c19, %c0_87] : memref<2x28x448xbf16, #tpu.memory_space<vmem>>, vector<2x1x448xbf16>
    %240 = vector.shape_cast %239 : vector<2x1x448xbf16> to vector<2x448xbf16>
    %241 = arith.extf %240 : vector<2x448xbf16> to vector<2x448xf32>
    %242 = vector.broadcast %0 : vector<1x448xf32> to vector<2x448xf32>
    %243 = arith.mulf %238, %242 : vector<2x448xf32>
    %244 = vector.broadcast %1 : vector<1x448xf32> to vector<2x448xf32>
    %245 = arith.addf %243, %244 : vector<2x448xf32>
    %cst_88 = arith.constant 0.000000e+00 : f32
    %246 = vector.broadcast %cst_88 : f32 to vector<2x448xf32>
    %247 = arith.maximumf %245, %246 : vector<2x448xf32>
    %248 = vector.broadcast %0 : vector<1x448xf32> to vector<2x448xf32>
    %249 = arith.mulf %241, %248 : vector<2x448xf32>
    %250 = vector.broadcast %1 : vector<1x448xf32> to vector<2x448xf32>
    %251 = arith.addf %249, %250 : vector<2x448xf32>
    %cst_89 = arith.constant 0.000000e+00 : f32
    %252 = vector.broadcast %cst_89 : f32 to vector<2x448xf32>
    %253 = arith.maximumf %251, %252 : vector<2x448xf32>
    %254 = arith.maximumf %247, %253 : vector<2x448xf32>
    %255 = vector.extract_strided_slice %254 {offsets = [0, 0], sizes = [2, 224], strides = [1, 1]} : vector<2x448xf32> to vector<2x224xf32>
    %256 = vector.extract_strided_slice %254 {offsets = [0, 224], sizes = [2, 224], strides = [1, 1]} : vector<2x448xf32> to vector<2x224xf32>
    %257 = arith.maximumf %255, %256 : vector<2x224xf32>
    %258 = arith.truncf %257 : vector<2x224xf32> to vector<2x224xbf16>
    %c0_90 = arith.constant 0 : index
    %c9_91 = arith.constant 9 : index
    %c0_92 = arith.constant 0 : index
    %259 = vector.load %arg4[%c0_90, %c9_91, %c0_92] : memref<2x14x224xbf16, #tpu.memory_space<vmem>>, vector<2x1x224xbf16>
    %260 = vector.shape_cast %259 : vector<2x1x224xbf16> to vector<2x224xbf16>
    %261 = vector.shape_cast %258 : vector<2x224xbf16> to vector<2x1x224xbf16>
    tpu.vector_store %arg4[%c0_90, %c9_91, %c0_92], %261 {strides = array<i32>} : memref<2x14x224xbf16, #tpu.memory_space<vmem>>, vector<2x1x224xbf16>,
    %c0_93 = arith.constant 0 : index
    %c20 = arith.constant 20 : index
    %c0_94 = arith.constant 0 : index
    %262 = vector.load %arg1[%c0_93, %c20, %c0_94] : memref<2x28x448xbf16, #tpu.memory_space<vmem>>, vector<2x1x448xbf16>
    %263 = vector.shape_cast %262 : vector<2x1x448xbf16> to vector<2x448xbf16>
    %264 = arith.extf %263 : vector<2x448xbf16> to vector<2x448xf32>
    %c0_95 = arith.constant 0 : index
    %c21 = arith.constant 21 : index
    %c0_96 = arith.constant 0 : index
    %265 = vector.load %arg1[%c0_95, %c21, %c0_96] : memref<2x28x448xbf16, #tpu.memory_space<vmem>>, vector<2x1x448xbf16>
    %266 = vector.shape_cast %265 : vector<2x1x448xbf16> to vector<2x448xbf16>
    %267 = arith.extf %266 : vector<2x448xbf16> to vector<2x448xf32>
    %268 = vector.broadcast %0 : vector<1x448xf32> to vector<2x448xf32>
    %269 = arith.mulf %264, %268 : vector<2x448xf32>
    %270 = vector.broadcast %1 : vector<1x448xf32> to vector<2x448xf32>
    %271 = arith.addf %269, %270 : vector<2x448xf32>
    %cst_97 = arith.constant 0.000000e+00 : f32
    %272 = vector.broadcast %cst_97 : f32 to vector<2x448xf32>
    %273 = arith.maximumf %271, %272 : vector<2x448xf32>
    %274 = vector.broadcast %0 : vector<1x448xf32> to vector<2x448xf32>
    %275 = arith.mulf %267, %274 : vector<2x448xf32>
    %276 = vector.broadcast %1 : vector<1x448xf32> to vector<2x448xf32>
    %277 = arith.addf %275, %276 : vector<2x448xf32>
    %cst_98 = arith.constant 0.000000e+00 : f32
    %278 = vector.broadcast %cst_98 : f32 to vector<2x448xf32>
    %279 = arith.maximumf %277, %278 : vector<2x448xf32>
    %280 = arith.maximumf %273, %279 : vector<2x448xf32>
    %281 = vector.extract_strided_slice %280 {offsets = [0, 0], sizes = [2, 224], strides = [1, 1]} : vector<2x448xf32> to vector<2x224xf32>
    %282 = vector.extract_strided_slice %280 {offsets = [0, 224], sizes = [2, 224], strides = [1, 1]} : vector<2x448xf32> to vector<2x224xf32>
    %283 = arith.maximumf %281, %282 : vector<2x224xf32>
    %284 = arith.truncf %283 : vector<2x224xf32> to vector<2x224xbf16>
    %c0_99 = arith.constant 0 : index
    %c10_100 = arith.constant 10 : index
    %c0_101 = arith.constant 0 : index
    %285 = vector.load %arg4[%c0_99, %c10_100, %c0_101] : memref<2x14x224xbf16, #tpu.memory_space<vmem>>, vector<2x1x224xbf16>
    %286 = vector.shape_cast %285 : vector<2x1x224xbf16> to vector<2x224xbf16>
    %287 = vector.shape_cast %284 : vector<2x224xbf16> to vector<2x1x224xbf16>
    tpu.vector_store %arg4[%c0_99, %c10_100, %c0_101], %287 {strides = array<i32>} : memref<2x14x224xbf16, #tpu.memory_space<vmem>>, vector<2x1x224xbf16>,
    %c0_102 = arith.constant 0 : index
    %c22 = arith.constant 22 : index
    %c0_103 = arith.constant 0 : index
    %288 = vector.load %arg1[%c0_102, %c22, %c0_103] : memref<2x28x448xbf16, #tpu.memory_space<vmem>>, vector<2x1x448xbf16>
    %289 = vector.shape_cast %288 : vector<2x1x448xbf16> to vector<2x448xbf16>
    %290 = arith.extf %289 : vector<2x448xbf16> to vector<2x448xf32>
    %c0_104 = arith.constant 0 : index
    %c23 = arith.constant 23 : index
    %c0_105 = arith.constant 0 : index
    %291 = vector.load %arg1[%c0_104, %c23, %c0_105] : memref<2x28x448xbf16, #tpu.memory_space<vmem>>, vector<2x1x448xbf16>
    %292 = vector.shape_cast %291 : vector<2x1x448xbf16> to vector<2x448xbf16>
    %293 = arith.extf %292 : vector<2x448xbf16> to vector<2x448xf32>
    %294 = vector.broadcast %0 : vector<1x448xf32> to vector<2x448xf32>
    %295 = arith.mulf %290, %294 : vector<2x448xf32>
    %296 = vector.broadcast %1 : vector<1x448xf32> to vector<2x448xf32>
    %297 = arith.addf %295, %296 : vector<2x448xf32>
    %cst_106 = arith.constant 0.000000e+00 : f32
    %298 = vector.broadcast %cst_106 : f32 to vector<2x448xf32>
    %299 = arith.maximumf %297, %298 : vector<2x448xf32>
    %300 = vector.broadcast %0 : vector<1x448xf32> to vector<2x448xf32>
    %301 = arith.mulf %293, %300 : vector<2x448xf32>
    %302 = vector.broadcast %1 : vector<1x448xf32> to vector<2x448xf32>
    %303 = arith.addf %301, %302 : vector<2x448xf32>
    %cst_107 = arith.constant 0.000000e+00 : f32
    %304 = vector.broadcast %cst_107 : f32 to vector<2x448xf32>
    %305 = arith.maximumf %303, %304 : vector<2x448xf32>
    %306 = arith.maximumf %299, %305 : vector<2x448xf32>
    %307 = vector.extract_strided_slice %306 {offsets = [0, 0], sizes = [2, 224], strides = [1, 1]} : vector<2x448xf32> to vector<2x224xf32>
    %308 = vector.extract_strided_slice %306 {offsets = [0, 224], sizes = [2, 224], strides = [1, 1]} : vector<2x448xf32> to vector<2x224xf32>
    %309 = arith.maximumf %307, %308 : vector<2x224xf32>
    %310 = arith.truncf %309 : vector<2x224xf32> to vector<2x224xbf16>
    %c0_108 = arith.constant 0 : index
    %c11_109 = arith.constant 11 : index
    %c0_110 = arith.constant 0 : index
    %311 = vector.load %arg4[%c0_108, %c11_109, %c0_110] : memref<2x14x224xbf16, #tpu.memory_space<vmem>>, vector<2x1x224xbf16>
    %312 = vector.shape_cast %311 : vector<2x1x224xbf16> to vector<2x224xbf16>
    %313 = vector.shape_cast %310 : vector<2x224xbf16> to vector<2x1x224xbf16>
    tpu.vector_store %arg4[%c0_108, %c11_109, %c0_110], %313 {strides = array<i32>} : memref<2x14x224xbf16, #tpu.memory_space<vmem>>, vector<2x1x224xbf16>,
    %c0_111 = arith.constant 0 : index
    %c24 = arith.constant 24 : index
    %c0_112 = arith.constant 0 : index
    %314 = vector.load %arg1[%c0_111, %c24, %c0_112] : memref<2x28x448xbf16, #tpu.memory_space<vmem>>, vector<2x1x448xbf16>
    %315 = vector.shape_cast %314 : vector<2x1x448xbf16> to vector<2x448xbf16>
    %316 = arith.extf %315 : vector<2x448xbf16> to vector<2x448xf32>
    %c0_113 = arith.constant 0 : index
    %c25 = arith.constant 25 : index
    %c0_114 = arith.constant 0 : index
    %317 = vector.load %arg1[%c0_113, %c25, %c0_114] : memref<2x28x448xbf16, #tpu.memory_space<vmem>>, vector<2x1x448xbf16>
    %318 = vector.shape_cast %317 : vector<2x1x448xbf16> to vector<2x448xbf16>
    %319 = arith.extf %318 : vector<2x448xbf16> to vector<2x448xf32>
    %320 = vector.broadcast %0 : vector<1x448xf32> to vector<2x448xf32>
    %321 = arith.mulf %316, %320 : vector<2x448xf32>
    %322 = vector.broadcast %1 : vector<1x448xf32> to vector<2x448xf32>
    %323 = arith.addf %321, %322 : vector<2x448xf32>
    %cst_115 = arith.constant 0.000000e+00 : f32
    %324 = vector.broadcast %cst_115 : f32 to vector<2x448xf32>
    %325 = arith.maximumf %323, %324 : vector<2x448xf32>
    %326 = vector.broadcast %0 : vector<1x448xf32> to vector<2x448xf32>
    %327 = arith.mulf %319, %326 : vector<2x448xf32>
    %328 = vector.broadcast %1 : vector<1x448xf32> to vector<2x448xf32>
    %329 = arith.addf %327, %328 : vector<2x448xf32>
    %cst_116 = arith.constant 0.000000e+00 : f32
    %330 = vector.broadcast %cst_116 : f32 to vector<2x448xf32>
    %331 = arith.maximumf %329, %330 : vector<2x448xf32>
    %332 = arith.maximumf %325, %331 : vector<2x448xf32>
    %333 = vector.extract_strided_slice %332 {offsets = [0, 0], sizes = [2, 224], strides = [1, 1]} : vector<2x448xf32> to vector<2x224xf32>
    %334 = vector.extract_strided_slice %332 {offsets = [0, 224], sizes = [2, 224], strides = [1, 1]} : vector<2x448xf32> to vector<2x224xf32>
    %335 = arith.maximumf %333, %334 : vector<2x224xf32>
    %336 = arith.truncf %335 : vector<2x224xf32> to vector<2x224xbf16>
    %c0_117 = arith.constant 0 : index
    %c12_118 = arith.constant 12 : index
    %c0_119 = arith.constant 0 : index
    %337 = vector.load %arg4[%c0_117, %c12_118, %c0_119] : memref<2x14x224xbf16, #tpu.memory_space<vmem>>, vector<2x1x224xbf16>
    %338 = vector.shape_cast %337 : vector<2x1x224xbf16> to vector<2x224xbf16>
    %339 = vector.shape_cast %336 : vector<2x224xbf16> to vector<2x1x224xbf16>
    tpu.vector_store %arg4[%c0_117, %c12_118, %c0_119], %339 {strides = array<i32>} : memref<2x14x224xbf16, #tpu.memory_space<vmem>>, vector<2x1x224xbf16>,
    %c0_120 = arith.constant 0 : index
    %c26 = arith.constant 26 : index
    %c0_121 = arith.constant 0 : index
    %340 = vector.load %arg1[%c0_120, %c26, %c0_121] : memref<2x28x448xbf16, #tpu.memory_space<vmem>>, vector<2x1x448xbf16>
    %341 = vector.shape_cast %340 : vector<2x1x448xbf16> to vector<2x448xbf16>
    %342 = arith.extf %341 : vector<2x448xbf16> to vector<2x448xf32>
    %c0_122 = arith.constant 0 : index
    %c27 = arith.constant 27 : index
    %c0_123 = arith.constant 0 : index
    %343 = vector.load %arg1[%c0_122, %c27, %c0_123] : memref<2x28x448xbf16, #tpu.memory_space<vmem>>, vector<2x1x448xbf16>
    %344 = vector.shape_cast %343 : vector<2x1x448xbf16> to vector<2x448xbf16>
    %345 = arith.extf %344 : vector<2x448xbf16> to vector<2x448xf32>
    %346 = vector.broadcast %0 : vector<1x448xf32> to vector<2x448xf32>
    %347 = arith.mulf %342, %346 : vector<2x448xf32>
    %348 = vector.broadcast %1 : vector<1x448xf32> to vector<2x448xf32>
    %349 = arith.addf %347, %348 : vector<2x448xf32>
    %cst_124 = arith.constant 0.000000e+00 : f32
    %350 = vector.broadcast %cst_124 : f32 to vector<2x448xf32>
    %351 = arith.maximumf %349, %350 : vector<2x448xf32>
    %352 = vector.broadcast %0 : vector<1x448xf32> to vector<2x448xf32>
    %353 = arith.mulf %345, %352 : vector<2x448xf32>
    %354 = vector.broadcast %1 : vector<1x448xf32> to vector<2x448xf32>
    %355 = arith.addf %353, %354 : vector<2x448xf32>
    %cst_125 = arith.constant 0.000000e+00 : f32
    %356 = vector.broadcast %cst_125 : f32 to vector<2x448xf32>
    %357 = arith.maximumf %355, %356 : vector<2x448xf32>
    %358 = arith.maximumf %351, %357 : vector<2x448xf32>
    %359 = vector.extract_strided_slice %358 {offsets = [0, 0], sizes = [2, 224], strides = [1, 1]} : vector<2x448xf32> to vector<2x224xf32>
    %360 = vector.extract_strided_slice %358 {offsets = [0, 224], sizes = [2, 224], strides = [1, 1]} : vector<2x448xf32> to vector<2x224xf32>
    %361 = arith.maximumf %359, %360 : vector<2x224xf32>
    %362 = arith.truncf %361 : vector<2x224xf32> to vector<2x224xbf16>
    %c0_126 = arith.constant 0 : index
    %c13_127 = arith.constant 13 : index
    %c0_128 = arith.constant 0 : index
    %363 = vector.load %arg4[%c0_126, %c13_127, %c0_128] : memref<2x14x224xbf16, #tpu.memory_space<vmem>>, vector<2x1x224xbf16>
    %364 = vector.shape_cast %363 : vector<2x1x224xbf16> to vector<2x224xbf16>
    %365 = vector.shape_cast %362 : vector<2x224xbf16> to vector<2x1x224xbf16>
    tpu.vector_store %arg4[%c0_126, %c13_127, %c0_128], %365 {strides = array<i32>} : memref<2x14x224xbf16, #tpu.memory_space<vmem>>, vector<2x1x224xbf16>,
    return
  }
  func.func @transform_0(%arg0: i32) -> (i32, i32, i32) {
    %c0_i32 = arith.constant 0 : i32
    %c0_i32_0 = arith.constant 0 : i32
    %c0_i32_1 = arith.constant 0 : i32
    return %arg0, %c0_i32, %c0_i32_0 : i32, i32, i32
  }
  func.func @transform_1(%arg0: i32) -> (i32, i32) {
    %c0_i32 = arith.constant 0 : i32
    %c0_i32_0 = arith.constant 0 : i32
    %c0_i32_1 = arith.constant 0 : i32
    return %c0_i32, %c0_i32_0 : i32, i32
  }
  func.func @transform_2(%arg0: i32) -> (i32, i32) {
    %c0_i32 = arith.constant 0 : i32
    %c0_i32_0 = arith.constant 0 : i32
    %c0_i32_1 = arith.constant 0 : i32
    return %c0_i32, %c0_i32_0 : i32, i32
  }
  func.func @transform_3(%arg0: i32) -> (i32, i32, i32) {
    %c0_i32 = arith.constant 0 : i32
    %c0_i32_0 = arith.constant 0 : i32
    %c0_i32_1 = arith.constant 0 : i32
    return %arg0, %c0_i32, %c0_i32_0 : i32, i32, i32
  }
}

module attributes {stable_mosaic.version = 11 : i64} {
  func.func @conv_stats_kernel(%arg0: i32, %arg1: memref<2x18x288xbf16, #tpu.memory_space<vmem>>, %arg2: memref<5x288x448xbf16, #tpu.memory_space<vmem>>, %arg3: memref<2x14x448xbf16, #tpu.memory_space<vmem>>, %arg4: memref<1x8x448xf32, #tpu.memory_space<vmem>>, %arg5: memref<1x8x448xf32, #tpu.memory_space<vmem>>) attributes {dimension_semantics = [#tpu.dimension_semantics<parallel>], iteration_bounds = array<i64: 1>, scalar_prefetch = 0 : i64, scratch_operands = 0 : i64, tpu.core_type = #tpu.core_type<tc>, window_params = [{transform_indices = @transform_0, window_bounds = array<i64: 2, 18, 288>}, {pipeline_mode = #tpu.pipeline_mode<synchronous>, transform_indices = @transform_1, window_bounds = array<i64: 5, 288, 448>}, {transform_indices = @transform_2, window_bounds = array<i64: 2, 14, 448>}, {transform_indices = @transform_3, window_bounds = array<i64: 1, 8, 448>}, {transform_indices = @transform_4, window_bounds = array<i64: 1, 8, 448>}]} {
    %cst = arith.constant 0.000000e+00 : f32
    %0 = vector.broadcast %cst : f32 to vector<8x448xf32>
    %cst_0 = arith.constant 0.000000e+00 : f32
    %1 = vector.broadcast %cst_0 : f32 to vector<8x448xf32>
    %cst_1 = arith.constant 0.000000e+00 : f32
    %2 = vector.broadcast %cst_1 : f32 to vector<14x448xf32>
    %c0 = arith.constant 0 : index
    %c0_2 = arith.constant 0 : index
    %c0_3 = arith.constant 0 : index
    %3 = vector.load %arg1[%c0, %c0_2, %c0_3] : memref<2x18x288xbf16, #tpu.memory_space<vmem>>, vector<1x14x288xbf16>
    %4 = vector.shape_cast %3 : vector<1x14x288xbf16> to vector<14x288xbf16>
    %c0_4 = arith.constant 0 : index
    %c0_5 = arith.constant 0 : index
    %c0_6 = arith.constant 0 : index
    %5 = vector.load %arg2[%c0_4, %c0_5, %c0_6] : memref<5x288x448xbf16, #tpu.memory_space<vmem>>, vector<1x288x448xbf16>
    %6 = vector.shape_cast %5 : vector<1x288x448xbf16> to vector<288x448xbf16>
    %cst_7 = arith.constant dense<0.000000e+00> : vector<14x448xf32>
    %7 = tpu.matmul %4, %6, %cst_7 {dimension_numbers = #tpu.dot_dimension_numbers<[1], [0], [0], [1], [0, 0, 1, 1], [], []>} : vector<14x288xbf16>, vector<288x448xbf16>, vector<14x448xf32> -> vector<14x448xf32>
    %8 = arith.addf %2, %7 : vector<14x448xf32>
    %c0_8 = arith.constant 0 : index
    %c1 = arith.constant 1 : index
    %c0_9 = arith.constant 0 : index
    %9 = vector.load %arg1[%c0_8, %c1, %c0_9] : memref<2x18x288xbf16, #tpu.memory_space<vmem>>, vector<1x14x288xbf16>
    %10 = vector.shape_cast %9 : vector<1x14x288xbf16> to vector<14x288xbf16>
    %c1_10 = arith.constant 1 : index
    %c0_11 = arith.constant 0 : index
    %c0_12 = arith.constant 0 : index
    %11 = vector.load %arg2[%c1_10, %c0_11, %c0_12] : memref<5x288x448xbf16, #tpu.memory_space<vmem>>, vector<1x288x448xbf16>
    %12 = vector.shape_cast %11 : vector<1x288x448xbf16> to vector<288x448xbf16>
    %cst_13 = arith.constant dense<0.000000e+00> : vector<14x448xf32>
    %13 = tpu.matmul %10, %12, %cst_13 {dimension_numbers = #tpu.dot_dimension_numbers<[1], [0], [0], [1], [0, 0, 1, 1], [], []>} : vector<14x288xbf16>, vector<288x448xbf16>, vector<14x448xf32> -> vector<14x448xf32>
    %14 = arith.addf %8, %13 : vector<14x448xf32>
    %c0_14 = arith.constant 0 : index
    %c2 = arith.constant 2 : index
    %c0_15 = arith.constant 0 : index
    %15 = vector.load %arg1[%c0_14, %c2, %c0_15] : memref<2x18x288xbf16, #tpu.memory_space<vmem>>, vector<1x14x288xbf16>
    %16 = vector.shape_cast %15 : vector<1x14x288xbf16> to vector<14x288xbf16>
    %c2_16 = arith.constant 2 : index
    %c0_17 = arith.constant 0 : index
    %c0_18 = arith.constant 0 : index
    %17 = vector.load %arg2[%c2_16, %c0_17, %c0_18] : memref<5x288x448xbf16, #tpu.memory_space<vmem>>, vector<1x288x448xbf16>
    %18 = vector.shape_cast %17 : vector<1x288x448xbf16> to vector<288x448xbf16>
    %cst_19 = arith.constant dense<0.000000e+00> : vector<14x448xf32>
    %19 = tpu.matmul %16, %18, %cst_19 {dimension_numbers = #tpu.dot_dimension_numbers<[1], [0], [0], [1], [0, 0, 1, 1], [], []>} : vector<14x288xbf16>, vector<288x448xbf16>, vector<14x448xf32> -> vector<14x448xf32>
    %20 = arith.addf %14, %19 : vector<14x448xf32>
    %c0_20 = arith.constant 0 : index
    %c3 = arith.constant 3 : index
    %c0_21 = arith.constant 0 : index
    %21 = vector.load %arg1[%c0_20, %c3, %c0_21] : memref<2x18x288xbf16, #tpu.memory_space<vmem>>, vector<1x14x288xbf16>
    %22 = vector.shape_cast %21 : vector<1x14x288xbf16> to vector<14x288xbf16>
    %c3_22 = arith.constant 3 : index
    %c0_23 = arith.constant 0 : index
    %c0_24 = arith.constant 0 : index
    %23 = vector.load %arg2[%c3_22, %c0_23, %c0_24] : memref<5x288x448xbf16, #tpu.memory_space<vmem>>, vector<1x288x448xbf16>
    %24 = vector.shape_cast %23 : vector<1x288x448xbf16> to vector<288x448xbf16>
    %cst_25 = arith.constant dense<0.000000e+00> : vector<14x448xf32>
    %25 = tpu.matmul %22, %24, %cst_25 {dimension_numbers = #tpu.dot_dimension_numbers<[1], [0], [0], [1], [0, 0, 1, 1], [], []>} : vector<14x288xbf16>, vector<288x448xbf16>, vector<14x448xf32> -> vector<14x448xf32>
    %26 = arith.addf %20, %25 : vector<14x448xf32>
    %c0_26 = arith.constant 0 : index
    %c4 = arith.constant 4 : index
    %c0_27 = arith.constant 0 : index
    %27 = vector.load %arg1[%c0_26, %c4, %c0_27] : memref<2x18x288xbf16, #tpu.memory_space<vmem>>, vector<1x14x288xbf16>
    %28 = vector.shape_cast %27 : vector<1x14x288xbf16> to vector<14x288xbf16>
    %c4_28 = arith.constant 4 : index
    %c0_29 = arith.constant 0 : index
    %c0_30 = arith.constant 0 : index
    %29 = vector.load %arg2[%c4_28, %c0_29, %c0_30] : memref<5x288x448xbf16, #tpu.memory_space<vmem>>, vector<1x288x448xbf16>
    %30 = vector.shape_cast %29 : vector<1x288x448xbf16> to vector<288x448xbf16>
    %cst_31 = arith.constant dense<0.000000e+00> : vector<14x448xf32>
    %31 = tpu.matmul %28, %30, %cst_31 {dimension_numbers = #tpu.dot_dimension_numbers<[1], [0], [0], [1], [0, 0, 1, 1], [], []>} : vector<14x288xbf16>, vector<288x448xbf16>, vector<14x448xf32> -> vector<14x448xf32>
    %32 = arith.addf %26, %31 : vector<14x448xf32>
    %33 = arith.truncf %32 : vector<14x448xf32> to vector<14x448xbf16>
    %c0_32 = arith.constant 0 : index
    %c0_33 = arith.constant 0 : index
    %c0_34 = arith.constant 0 : index
    %34 = vector.load %arg3[%c0_32, %c0_33, %c0_34] : memref<2x14x448xbf16, #tpu.memory_space<vmem>>, vector<1x14x448xbf16>
    %35 = vector.shape_cast %34 : vector<1x14x448xbf16> to vector<14x448xbf16>
    %36 = vector.shape_cast %33 : vector<14x448xbf16> to vector<1x14x448xbf16>
    tpu.vector_store %arg3[%c0_32, %c0_33, %c0_34], %36 {strides = array<i32>} : memref<2x14x448xbf16, #tpu.memory_space<vmem>>, vector<1x14x448xbf16>,
    %cst_35 = arith.constant dense<0.000000e+00> : vector<448xf32>
    %37 = vector.multi_reduction <add>, %32, %cst_35 [0] : vector<14x448xf32> to vector<448xf32>
    %38 = vector.shape_cast %37 : vector<448xf32> to vector<1x448xf32>
    %39 = vector.broadcast %38 : vector<1x448xf32> to vector<8x448xf32>
    %40 = arith.addf %0, %39 : vector<8x448xf32>
    %41 = arith.mulf %32, %32 : vector<14x448xf32>
    %cst_36 = arith.constant dense<0.000000e+00> : vector<448xf32>
    %42 = vector.multi_reduction <add>, %41, %cst_36 [0] : vector<14x448xf32> to vector<448xf32>
    %43 = vector.shape_cast %42 : vector<448xf32> to vector<1x448xf32>
    %44 = vector.broadcast %43 : vector<1x448xf32> to vector<8x448xf32>
    %45 = arith.addf %1, %44 : vector<8x448xf32>
    %cst_37 = arith.constant 0.000000e+00 : f32
    %46 = vector.broadcast %cst_37 : f32 to vector<14x448xf32>
    %c1_38 = arith.constant 1 : index
    %c0_39 = arith.constant 0 : index
    %c0_40 = arith.constant 0 : index
    %47 = vector.load %arg1[%c1_38, %c0_39, %c0_40] : memref<2x18x288xbf16, #tpu.memory_space<vmem>>, vector<1x14x288xbf16>
    %48 = vector.shape_cast %47 : vector<1x14x288xbf16> to vector<14x288xbf16>
    %c0_41 = arith.constant 0 : index
    %c0_42 = arith.constant 0 : index
    %c0_43 = arith.constant 0 : index
    %49 = vector.load %arg2[%c0_41, %c0_42, %c0_43] : memref<5x288x448xbf16, #tpu.memory_space<vmem>>, vector<1x288x448xbf16>
    %50 = vector.shape_cast %49 : vector<1x288x448xbf16> to vector<288x448xbf16>
    %cst_44 = arith.constant dense<0.000000e+00> : vector<14x448xf32>
    %51 = tpu.matmul %48, %50, %cst_44 {dimension_numbers = #tpu.dot_dimension_numbers<[1], [0], [0], [1], [0, 0, 1, 1], [], []>} : vector<14x288xbf16>, vector<288x448xbf16>, vector<14x448xf32> -> vector<14x448xf32>
    %52 = arith.addf %46, %51 : vector<14x448xf32>
    %c1_45 = arith.constant 1 : index
    %c1_46 = arith.constant 1 : index
    %c0_47 = arith.constant 0 : index
    %53 = vector.load %arg1[%c1_45, %c1_46, %c0_47] : memref<2x18x288xbf16, #tpu.memory_space<vmem>>, vector<1x14x288xbf16>
    %54 = vector.shape_cast %53 : vector<1x14x288xbf16> to vector<14x288xbf16>
    %c1_48 = arith.constant 1 : index
    %c0_49 = arith.constant 0 : index
    %c0_50 = arith.constant 0 : index
    %55 = vector.load %arg2[%c1_48, %c0_49, %c0_50] : memref<5x288x448xbf16, #tpu.memory_space<vmem>>, vector<1x288x448xbf16>
    %56 = vector.shape_cast %55 : vector<1x288x448xbf16> to vector<288x448xbf16>
    %cst_51 = arith.constant dense<0.000000e+00> : vector<14x448xf32>
    %57 = tpu.matmul %54, %56, %cst_51 {dimension_numbers = #tpu.dot_dimension_numbers<[1], [0], [0], [1], [0, 0, 1, 1], [], []>} : vector<14x288xbf16>, vector<288x448xbf16>, vector<14x448xf32> -> vector<14x448xf32>
    %58 = arith.addf %52, %57 : vector<14x448xf32>
    %c1_52 = arith.constant 1 : index
    %c2_53 = arith.constant 2 : index
    %c0_54 = arith.constant 0 : index
    %59 = vector.load %arg1[%c1_52, %c2_53, %c0_54] : memref<2x18x288xbf16, #tpu.memory_space<vmem>>, vector<1x14x288xbf16>
    %60 = vector.shape_cast %59 : vector<1x14x288xbf16> to vector<14x288xbf16>
    %c2_55 = arith.constant 2 : index
    %c0_56 = arith.constant 0 : index
    %c0_57 = arith.constant 0 : index
    %61 = vector.load %arg2[%c2_55, %c0_56, %c0_57] : memref<5x288x448xbf16, #tpu.memory_space<vmem>>, vector<1x288x448xbf16>
    %62 = vector.shape_cast %61 : vector<1x288x448xbf16> to vector<288x448xbf16>
    %cst_58 = arith.constant dense<0.000000e+00> : vector<14x448xf32>
    %63 = tpu.matmul %60, %62, %cst_58 {dimension_numbers = #tpu.dot_dimension_numbers<[1], [0], [0], [1], [0, 0, 1, 1], [], []>} : vector<14x288xbf16>, vector<288x448xbf16>, vector<14x448xf32> -> vector<14x448xf32>
    %64 = arith.addf %58, %63 : vector<14x448xf32>
    %c1_59 = arith.constant 1 : index
    %c3_60 = arith.constant 3 : index
    %c0_61 = arith.constant 0 : index
    %65 = vector.load %arg1[%c1_59, %c3_60, %c0_61] : memref<2x18x288xbf16, #tpu.memory_space<vmem>>, vector<1x14x288xbf16>
    %66 = vector.shape_cast %65 : vector<1x14x288xbf16> to vector<14x288xbf16>
    %c3_62 = arith.constant 3 : index
    %c0_63 = arith.constant 0 : index
    %c0_64 = arith.constant 0 : index
    %67 = vector.load %arg2[%c3_62, %c0_63, %c0_64] : memref<5x288x448xbf16, #tpu.memory_space<vmem>>, vector<1x288x448xbf16>
    %68 = vector.shape_cast %67 : vector<1x288x448xbf16> to vector<288x448xbf16>
    %cst_65 = arith.constant dense<0.000000e+00> : vector<14x448xf32>
    %69 = tpu.matmul %66, %68, %cst_65 {dimension_numbers = #tpu.dot_dimension_numbers<[1], [0], [0], [1], [0, 0, 1, 1], [], []>} : vector<14x288xbf16>, vector<288x448xbf16>, vector<14x448xf32> -> vector<14x448xf32>
    %70 = arith.addf %64, %69 : vector<14x448xf32>
    %c1_66 = arith.constant 1 : index
    %c4_67 = arith.constant 4 : index
    %c0_68 = arith.constant 0 : index
    %71 = vector.load %arg1[%c1_66, %c4_67, %c0_68] : memref<2x18x288xbf16, #tpu.memory_space<vmem>>, vector<1x14x288xbf16>
    %72 = vector.shape_cast %71 : vector<1x14x288xbf16> to vector<14x288xbf16>
    %c4_69 = arith.constant 4 : index
    %c0_70 = arith.constant 0 : index
    %c0_71 = arith.constant 0 : index
    %73 = vector.load %arg2[%c4_69, %c0_70, %c0_71] : memref<5x288x448xbf16, #tpu.memory_space<vmem>>, vector<1x288x448xbf16>
    %74 = vector.shape_cast %73 : vector<1x288x448xbf16> to vector<288x448xbf16>
    %cst_72 = arith.constant dense<0.000000e+00> : vector<14x448xf32>
    %75 = tpu.matmul %72, %74, %cst_72 {dimension_numbers = #tpu.dot_dimension_numbers<[1], [0], [0], [1], [0, 0, 1, 1], [], []>} : vector<14x288xbf16>, vector<288x448xbf16>, vector<14x448xf32> -> vector<14x448xf32>
    %76 = arith.addf %70, %75 : vector<14x448xf32>
    %77 = arith.truncf %76 : vector<14x448xf32> to vector<14x448xbf16>
    %c1_73 = arith.constant 1 : index
    %c0_74 = arith.constant 0 : index
    %c0_75 = arith.constant 0 : index
    %78 = vector.load %arg3[%c1_73, %c0_74, %c0_75] : memref<2x14x448xbf16, #tpu.memory_space<vmem>>, vector<1x14x448xbf16>
    %79 = vector.shape_cast %78 : vector<1x14x448xbf16> to vector<14x448xbf16>
    %80 = vector.shape_cast %77 : vector<14x448xbf16> to vector<1x14x448xbf16>
    tpu.vector_store %arg3[%c1_73, %c0_74, %c0_75], %80 {strides = array<i32>} : memref<2x14x448xbf16, #tpu.memory_space<vmem>>, vector<1x14x448xbf16>,
    %cst_76 = arith.constant dense<0.000000e+00> : vector<448xf32>
    %81 = vector.multi_reduction <add>, %76, %cst_76 [0] : vector<14x448xf32> to vector<448xf32>
    %82 = vector.shape_cast %81 : vector<448xf32> to vector<1x448xf32>
    %83 = vector.broadcast %82 : vector<1x448xf32> to vector<8x448xf32>
    %84 = arith.addf %40, %83 : vector<8x448xf32>
    %85 = arith.mulf %76, %76 : vector<14x448xf32>
    %cst_77 = arith.constant dense<0.000000e+00> : vector<448xf32>
    %86 = vector.multi_reduction <add>, %85, %cst_77 [0] : vector<14x448xf32> to vector<448xf32>
    %87 = vector.shape_cast %86 : vector<448xf32> to vector<1x448xf32>
    %88 = vector.broadcast %87 : vector<1x448xf32> to vector<8x448xf32>
    %89 = arith.addf %45, %88 : vector<8x448xf32>
    %c0_78 = arith.constant 0 : index
    %c0_79 = arith.constant 0 : index
    %c0_80 = arith.constant 0 : index
    %90 = vector.load %arg4[%c0_78, %c0_79, %c0_80] : memref<1x8x448xf32, #tpu.memory_space<vmem>>, vector<1x8x448xf32>
    %91 = vector.shape_cast %90 : vector<1x8x448xf32> to vector<8x448xf32>
    %92 = vector.shape_cast %84 : vector<8x448xf32> to vector<1x8x448xf32>
    tpu.vector_store %arg4[%c0_78, %c0_79, %c0_80], %92 {strides = array<i32>} : memref<1x8x448xf32, #tpu.memory_space<vmem>>, vector<1x8x448xf32>,
    %c0_81 = arith.constant 0 : index
    %c0_82 = arith.constant 0 : index
    %c0_83 = arith.constant 0 : index
    %93 = vector.load %arg5[%c0_81, %c0_82, %c0_83] : memref<1x8x448xf32, #tpu.memory_space<vmem>>, vector<1x8x448xf32>
    %94 = vector.shape_cast %93 : vector<1x8x448xf32> to vector<8x448xf32>
    %95 = vector.shape_cast %89 : vector<8x448xf32> to vector<1x8x448xf32>
    tpu.vector_store %arg5[%c0_81, %c0_82, %c0_83], %95 {strides = array<i32>} : memref<1x8x448xf32, #tpu.memory_space<vmem>>, vector<1x8x448xf32>,
    return
  }
  func.func @transform_0(%arg0: i32) -> (i32, i32, i32) {
    %c0_i32 = arith.constant 0 : i32
    %c0_i32_0 = arith.constant 0 : i32
    %c0_i32_1 = arith.constant 0 : i32
    return %arg0, %c0_i32, %c0_i32_0 : i32, i32, i32
  }
  func.func @transform_1(%arg0: i32) -> (i32, i32, i32) {
    %c0_i32 = arith.constant 0 : i32
    %c0_i32_0 = arith.constant 0 : i32
    %c0_i32_1 = arith.constant 0 : i32
    %c0_i32_2 = arith.constant 0 : i32
    return %c0_i32, %c0_i32_0, %c0_i32_1 : i32, i32, i32
  }
  func.func @transform_2(%arg0: i32) -> (i32, i32, i32) {
    %c0_i32 = arith.constant 0 : i32
    %c0_i32_0 = arith.constant 0 : i32
    %c0_i32_1 = arith.constant 0 : i32
    return %arg0, %c0_i32, %c0_i32_0 : i32, i32, i32
  }
  func.func @transform_3(%arg0: i32) -> (i32, i32, i32) {
    %c0_i32 = arith.constant 0 : i32
    %c0_i32_0 = arith.constant 0 : i32
    %c0_i32_1 = arith.constant 0 : i32
    return %arg0, %c0_i32, %c0_i32_0 : i32, i32, i32
  }
  func.func @transform_4(%arg0: i32) -> (i32, i32, i32) {
    %c0_i32 = arith.constant 0 : i32
    %c0_i32_0 = arith.constant 0 : i32
    %c0_i32_1 = arith.constant 0 : i32
    return %arg0, %c0_i32, %c0_i32_0 : i32, i32, i32
  }
}

module attributes {stable_mosaic.version = 11 : i64} {
  func.func @bn_relu_pool_kernel(%arg0: i32, %arg1: memref<2x14x448xbf16, #tpu.memory_space<vmem>>, %arg2: memref<1x448xf32, #tpu.memory_space<vmem>>, %arg3: memref<1x448xf32, #tpu.memory_space<vmem>>, %arg4: memref<2x7x224xbf16, #tpu.memory_space<vmem>>) attributes {dimension_semantics = [#tpu.dimension_semantics<parallel>], iteration_bounds = array<i64: 1>, scalar_prefetch = 0 : i64, scratch_operands = 0 : i64, tpu.core_type = #tpu.core_type<tc>, window_params = [{transform_indices = @transform_0, window_bounds = array<i64: 2, 14, 448>}, {pipeline_mode = #tpu.pipeline_mode<synchronous>, transform_indices = @transform_1, window_bounds = array<i64: 1, 448>}, {pipeline_mode = #tpu.pipeline_mode<synchronous>, transform_indices = @transform_2, window_bounds = array<i64: 1, 448>}, {transform_indices = @transform_3, window_bounds = array<i64: 2, 7, 224>}]} {
    %c0 = arith.constant 0 : index
    %c0_0 = arith.constant 0 : index
    %0 = vector.load %arg2[%c0, %c0_0] : memref<1x448xf32, #tpu.memory_space<vmem>>, vector<1x448xf32>
    %c0_1 = arith.constant 0 : index
    %c0_2 = arith.constant 0 : index
    %1 = vector.load %arg3[%c0_1, %c0_2] : memref<1x448xf32, #tpu.memory_space<vmem>>, vector<1x448xf32>
    %c0_3 = arith.constant 0 : index
    %c0_4 = arith.constant 0 : index
    %c0_5 = arith.constant 0 : index
    %2 = vector.load %arg1[%c0_3, %c0_4, %c0_5] : memref<2x14x448xbf16, #tpu.memory_space<vmem>>, vector<2x1x448xbf16>
    %3 = vector.shape_cast %2 : vector<2x1x448xbf16> to vector<2x448xbf16>
    %4 = arith.extf %3 : vector<2x448xbf16> to vector<2x448xf32>
    %c0_6 = arith.constant 0 : index
    %c1 = arith.constant 1 : index
    %c0_7 = arith.constant 0 : index
    %5 = vector.load %arg1[%c0_6, %c1, %c0_7] : memref<2x14x448xbf16, #tpu.memory_space<vmem>>, vector<2x1x448xbf16>
    %6 = vector.shape_cast %5 : vector<2x1x448xbf16> to vector<2x448xbf16>
    %7 = arith.extf %6 : vector<2x448xbf16> to vector<2x448xf32>
    %8 = vector.broadcast %0 : vector<1x448xf32> to vector<2x448xf32>
    %9 = arith.mulf %4, %8 : vector<2x448xf32>
    %10 = vector.broadcast %1 : vector<1x448xf32> to vector<2x448xf32>
    %11 = arith.addf %9, %10 : vector<2x448xf32>
    %cst = arith.constant 0.000000e+00 : f32
    %12 = vector.broadcast %cst : f32 to vector<2x448xf32>
    %13 = arith.maximumf %11, %12 : vector<2x448xf32>
    %14 = vector.broadcast %0 : vector<1x448xf32> to vector<2x448xf32>
    %15 = arith.mulf %7, %14 : vector<2x448xf32>
    %16 = vector.broadcast %1 : vector<1x448xf32> to vector<2x448xf32>
    %17 = arith.addf %15, %16 : vector<2x448xf32>
    %cst_8 = arith.constant 0.000000e+00 : f32
    %18 = vector.broadcast %cst_8 : f32 to vector<2x448xf32>
    %19 = arith.maximumf %17, %18 : vector<2x448xf32>
    %20 = arith.maximumf %13, %19 : vector<2x448xf32>
    %21 = vector.extract_strided_slice %20 {offsets = [0, 0], sizes = [2, 224], strides = [1, 1]} : vector<2x448xf32> to vector<2x224xf32>
    %22 = vector.extract_strided_slice %20 {offsets = [0, 224], sizes = [2, 224], strides = [1, 1]} : vector<2x448xf32> to vector<2x224xf32>
    %23 = arith.maximumf %21, %22 : vector<2x224xf32>
    %24 = arith.truncf %23 : vector<2x224xf32> to vector<2x224xbf16>
    %c0_9 = arith.constant 0 : index
    %c0_10 = arith.constant 0 : index
    %c0_11 = arith.constant 0 : index
    %25 = vector.load %arg4[%c0_9, %c0_10, %c0_11] : memref<2x7x224xbf16, #tpu.memory_space<vmem>>, vector<2x1x224xbf16>
    %26 = vector.shape_cast %25 : vector<2x1x224xbf16> to vector<2x224xbf16>
    %27 = vector.shape_cast %24 : vector<2x224xbf16> to vector<2x1x224xbf16>
    tpu.vector_store %arg4[%c0_9, %c0_10, %c0_11], %27 {strides = array<i32>} : memref<2x7x224xbf16, #tpu.memory_space<vmem>>, vector<2x1x224xbf16>,
    %c0_12 = arith.constant 0 : index
    %c2 = arith.constant 2 : index
    %c0_13 = arith.constant 0 : index
    %28 = vector.load %arg1[%c0_12, %c2, %c0_13] : memref<2x14x448xbf16, #tpu.memory_space<vmem>>, vector<2x1x448xbf16>
    %29 = vector.shape_cast %28 : vector<2x1x448xbf16> to vector<2x448xbf16>
    %30 = arith.extf %29 : vector<2x448xbf16> to vector<2x448xf32>
    %c0_14 = arith.constant 0 : index
    %c3 = arith.constant 3 : index
    %c0_15 = arith.constant 0 : index
    %31 = vector.load %arg1[%c0_14, %c3, %c0_15] : memref<2x14x448xbf16, #tpu.memory_space<vmem>>, vector<2x1x448xbf16>
    %32 = vector.shape_cast %31 : vector<2x1x448xbf16> to vector<2x448xbf16>
    %33 = arith.extf %32 : vector<2x448xbf16> to vector<2x448xf32>
    %34 = vector.broadcast %0 : vector<1x448xf32> to vector<2x448xf32>
    %35 = arith.mulf %30, %34 : vector<2x448xf32>
    %36 = vector.broadcast %1 : vector<1x448xf32> to vector<2x448xf32>
    %37 = arith.addf %35, %36 : vector<2x448xf32>
    %cst_16 = arith.constant 0.000000e+00 : f32
    %38 = vector.broadcast %cst_16 : f32 to vector<2x448xf32>
    %39 = arith.maximumf %37, %38 : vector<2x448xf32>
    %40 = vector.broadcast %0 : vector<1x448xf32> to vector<2x448xf32>
    %41 = arith.mulf %33, %40 : vector<2x448xf32>
    %42 = vector.broadcast %1 : vector<1x448xf32> to vector<2x448xf32>
    %43 = arith.addf %41, %42 : vector<2x448xf32>
    %cst_17 = arith.constant 0.000000e+00 : f32
    %44 = vector.broadcast %cst_17 : f32 to vector<2x448xf32>
    %45 = arith.maximumf %43, %44 : vector<2x448xf32>
    %46 = arith.maximumf %39, %45 : vector<2x448xf32>
    %47 = vector.extract_strided_slice %46 {offsets = [0, 0], sizes = [2, 224], strides = [1, 1]} : vector<2x448xf32> to vector<2x224xf32>
    %48 = vector.extract_strided_slice %46 {offsets = [0, 224], sizes = [2, 224], strides = [1, 1]} : vector<2x448xf32> to vector<2x224xf32>
    %49 = arith.maximumf %47, %48 : vector<2x224xf32>
    %50 = arith.truncf %49 : vector<2x224xf32> to vector<2x224xbf16>
    %c0_18 = arith.constant 0 : index
    %c1_19 = arith.constant 1 : index
    %c0_20 = arith.constant 0 : index
    %51 = vector.load %arg4[%c0_18, %c1_19, %c0_20] : memref<2x7x224xbf16, #tpu.memory_space<vmem>>, vector<2x1x224xbf16>
    %52 = vector.shape_cast %51 : vector<2x1x224xbf16> to vector<2x224xbf16>
    %53 = vector.shape_cast %50 : vector<2x224xbf16> to vector<2x1x224xbf16>
    tpu.vector_store %arg4[%c0_18, %c1_19, %c0_20], %53 {strides = array<i32>} : memref<2x7x224xbf16, #tpu.memory_space<vmem>>, vector<2x1x224xbf16>,
    %c0_21 = arith.constant 0 : index
    %c4 = arith.constant 4 : index
    %c0_22 = arith.constant 0 : index
    %54 = vector.load %arg1[%c0_21, %c4, %c0_22] : memref<2x14x448xbf16, #tpu.memory_space<vmem>>, vector<2x1x448xbf16>
    %55 = vector.shape_cast %54 : vector<2x1x448xbf16> to vector<2x448xbf16>
    %56 = arith.extf %55 : vector<2x448xbf16> to vector<2x448xf32>
    %c0_23 = arith.constant 0 : index
    %c5 = arith.constant 5 : index
    %c0_24 = arith.constant 0 : index
    %57 = vector.load %arg1[%c0_23, %c5, %c0_24] : memref<2x14x448xbf16, #tpu.memory_space<vmem>>, vector<2x1x448xbf16>
    %58 = vector.shape_cast %57 : vector<2x1x448xbf16> to vector<2x448xbf16>
    %59 = arith.extf %58 : vector<2x448xbf16> to vector<2x448xf32>
    %60 = vector.broadcast %0 : vector<1x448xf32> to vector<2x448xf32>
    %61 = arith.mulf %56, %60 : vector<2x448xf32>
    %62 = vector.broadcast %1 : vector<1x448xf32> to vector<2x448xf32>
    %63 = arith.addf %61, %62 : vector<2x448xf32>
    %cst_25 = arith.constant 0.000000e+00 : f32
    %64 = vector.broadcast %cst_25 : f32 to vector<2x448xf32>
    %65 = arith.maximumf %63, %64 : vector<2x448xf32>
    %66 = vector.broadcast %0 : vector<1x448xf32> to vector<2x448xf32>
    %67 = arith.mulf %59, %66 : vector<2x448xf32>
    %68 = vector.broadcast %1 : vector<1x448xf32> to vector<2x448xf32>
    %69 = arith.addf %67, %68 : vector<2x448xf32>
    %cst_26 = arith.constant 0.000000e+00 : f32
    %70 = vector.broadcast %cst_26 : f32 to vector<2x448xf32>
    %71 = arith.maximumf %69, %70 : vector<2x448xf32>
    %72 = arith.maximumf %65, %71 : vector<2x448xf32>
    %73 = vector.extract_strided_slice %72 {offsets = [0, 0], sizes = [2, 224], strides = [1, 1]} : vector<2x448xf32> to vector<2x224xf32>
    %74 = vector.extract_strided_slice %72 {offsets = [0, 224], sizes = [2, 224], strides = [1, 1]} : vector<2x448xf32> to vector<2x224xf32>
    %75 = arith.maximumf %73, %74 : vector<2x224xf32>
    %76 = arith.truncf %75 : vector<2x224xf32> to vector<2x224xbf16>
    %c0_27 = arith.constant 0 : index
    %c2_28 = arith.constant 2 : index
    %c0_29 = arith.constant 0 : index
    %77 = vector.load %arg4[%c0_27, %c2_28, %c0_29] : memref<2x7x224xbf16, #tpu.memory_space<vmem>>, vector<2x1x224xbf16>
    %78 = vector.shape_cast %77 : vector<2x1x224xbf16> to vector<2x224xbf16>
    %79 = vector.shape_cast %76 : vector<2x224xbf16> to vector<2x1x224xbf16>
    tpu.vector_store %arg4[%c0_27, %c2_28, %c0_29], %79 {strides = array<i32>} : memref<2x7x224xbf16, #tpu.memory_space<vmem>>, vector<2x1x224xbf16>,
    %c0_30 = arith.constant 0 : index
    %c6 = arith.constant 6 : index
    %c0_31 = arith.constant 0 : index
    %80 = vector.load %arg1[%c0_30, %c6, %c0_31] : memref<2x14x448xbf16, #tpu.memory_space<vmem>>, vector<2x1x448xbf16>
    %81 = vector.shape_cast %80 : vector<2x1x448xbf16> to vector<2x448xbf16>
    %82 = arith.extf %81 : vector<2x448xbf16> to vector<2x448xf32>
    %c0_32 = arith.constant 0 : index
    %c7 = arith.constant 7 : index
    %c0_33 = arith.constant 0 : index
    %83 = vector.load %arg1[%c0_32, %c7, %c0_33] : memref<2x14x448xbf16, #tpu.memory_space<vmem>>, vector<2x1x448xbf16>
    %84 = vector.shape_cast %83 : vector<2x1x448xbf16> to vector<2x448xbf16>
    %85 = arith.extf %84 : vector<2x448xbf16> to vector<2x448xf32>
    %86 = vector.broadcast %0 : vector<1x448xf32> to vector<2x448xf32>
    %87 = arith.mulf %82, %86 : vector<2x448xf32>
    %88 = vector.broadcast %1 : vector<1x448xf32> to vector<2x448xf32>
    %89 = arith.addf %87, %88 : vector<2x448xf32>
    %cst_34 = arith.constant 0.000000e+00 : f32
    %90 = vector.broadcast %cst_34 : f32 to vector<2x448xf32>
    %91 = arith.maximumf %89, %90 : vector<2x448xf32>
    %92 = vector.broadcast %0 : vector<1x448xf32> to vector<2x448xf32>
    %93 = arith.mulf %85, %92 : vector<2x448xf32>
    %94 = vector.broadcast %1 : vector<1x448xf32> to vector<2x448xf32>
    %95 = arith.addf %93, %94 : vector<2x448xf32>
    %cst_35 = arith.constant 0.000000e+00 : f32
    %96 = vector.broadcast %cst_35 : f32 to vector<2x448xf32>
    %97 = arith.maximumf %95, %96 : vector<2x448xf32>
    %98 = arith.maximumf %91, %97 : vector<2x448xf32>
    %99 = vector.extract_strided_slice %98 {offsets = [0, 0], sizes = [2, 224], strides = [1, 1]} : vector<2x448xf32> to vector<2x224xf32>
    %100 = vector.extract_strided_slice %98 {offsets = [0, 224], sizes = [2, 224], strides = [1, 1]} : vector<2x448xf32> to vector<2x224xf32>
    %101 = arith.maximumf %99, %100 : vector<2x224xf32>
    %102 = arith.truncf %101 : vector<2x224xf32> to vector<2x224xbf16>
    %c0_36 = arith.constant 0 : index
    %c3_37 = arith.constant 3 : index
    %c0_38 = arith.constant 0 : index
    %103 = vector.load %arg4[%c0_36, %c3_37, %c0_38] : memref<2x7x224xbf16, #tpu.memory_space<vmem>>, vector<2x1x224xbf16>
    %104 = vector.shape_cast %103 : vector<2x1x224xbf16> to vector<2x224xbf16>
    %105 = vector.shape_cast %102 : vector<2x224xbf16> to vector<2x1x224xbf16>
    tpu.vector_store %arg4[%c0_36, %c3_37, %c0_38], %105 {strides = array<i32>} : memref<2x7x224xbf16, #tpu.memory_space<vmem>>, vector<2x1x224xbf16>,
    %c0_39 = arith.constant 0 : index
    %c8 = arith.constant 8 : index
    %c0_40 = arith.constant 0 : index
    %106 = vector.load %arg1[%c0_39, %c8, %c0_40] : memref<2x14x448xbf16, #tpu.memory_space<vmem>>, vector<2x1x448xbf16>
    %107 = vector.shape_cast %106 : vector<2x1x448xbf16> to vector<2x448xbf16>
    %108 = arith.extf %107 : vector<2x448xbf16> to vector<2x448xf32>
    %c0_41 = arith.constant 0 : index
    %c9 = arith.constant 9 : index
    %c0_42 = arith.constant 0 : index
    %109 = vector.load %arg1[%c0_41, %c9, %c0_42] : memref<2x14x448xbf16, #tpu.memory_space<vmem>>, vector<2x1x448xbf16>
    %110 = vector.shape_cast %109 : vector<2x1x448xbf16> to vector<2x448xbf16>
    %111 = arith.extf %110 : vector<2x448xbf16> to vector<2x448xf32>
    %112 = vector.broadcast %0 : vector<1x448xf32> to vector<2x448xf32>
    %113 = arith.mulf %108, %112 : vector<2x448xf32>
    %114 = vector.broadcast %1 : vector<1x448xf32> to vector<2x448xf32>
    %115 = arith.addf %113, %114 : vector<2x448xf32>
    %cst_43 = arith.constant 0.000000e+00 : f32
    %116 = vector.broadcast %cst_43 : f32 to vector<2x448xf32>
    %117 = arith.maximumf %115, %116 : vector<2x448xf32>
    %118 = vector.broadcast %0 : vector<1x448xf32> to vector<2x448xf32>
    %119 = arith.mulf %111, %118 : vector<2x448xf32>
    %120 = vector.broadcast %1 : vector<1x448xf32> to vector<2x448xf32>
    %121 = arith.addf %119, %120 : vector<2x448xf32>
    %cst_44 = arith.constant 0.000000e+00 : f32
    %122 = vector.broadcast %cst_44 : f32 to vector<2x448xf32>
    %123 = arith.maximumf %121, %122 : vector<2x448xf32>
    %124 = arith.maximumf %117, %123 : vector<2x448xf32>
    %125 = vector.extract_strided_slice %124 {offsets = [0, 0], sizes = [2, 224], strides = [1, 1]} : vector<2x448xf32> to vector<2x224xf32>
    %126 = vector.extract_strided_slice %124 {offsets = [0, 224], sizes = [2, 224], strides = [1, 1]} : vector<2x448xf32> to vector<2x224xf32>
    %127 = arith.maximumf %125, %126 : vector<2x224xf32>
    %128 = arith.truncf %127 : vector<2x224xf32> to vector<2x224xbf16>
    %c0_45 = arith.constant 0 : index
    %c4_46 = arith.constant 4 : index
    %c0_47 = arith.constant 0 : index
    %129 = vector.load %arg4[%c0_45, %c4_46, %c0_47] : memref<2x7x224xbf16, #tpu.memory_space<vmem>>, vector<2x1x224xbf16>
    %130 = vector.shape_cast %129 : vector<2x1x224xbf16> to vector<2x224xbf16>
    %131 = vector.shape_cast %128 : vector<2x224xbf16> to vector<2x1x224xbf16>
    tpu.vector_store %arg4[%c0_45, %c4_46, %c0_47], %131 {strides = array<i32>} : memref<2x7x224xbf16, #tpu.memory_space<vmem>>, vector<2x1x224xbf16>,
    %c0_48 = arith.constant 0 : index
    %c10 = arith.constant 10 : index
    %c0_49 = arith.constant 0 : index
    %132 = vector.load %arg1[%c0_48, %c10, %c0_49] : memref<2x14x448xbf16, #tpu.memory_space<vmem>>, vector<2x1x448xbf16>
    %133 = vector.shape_cast %132 : vector<2x1x448xbf16> to vector<2x448xbf16>
    %134 = arith.extf %133 : vector<2x448xbf16> to vector<2x448xf32>
    %c0_50 = arith.constant 0 : index
    %c11 = arith.constant 11 : index
    %c0_51 = arith.constant 0 : index
    %135 = vector.load %arg1[%c0_50, %c11, %c0_51] : memref<2x14x448xbf16, #tpu.memory_space<vmem>>, vector<2x1x448xbf16>
    %136 = vector.shape_cast %135 : vector<2x1x448xbf16> to vector<2x448xbf16>
    %137 = arith.extf %136 : vector<2x448xbf16> to vector<2x448xf32>
    %138 = vector.broadcast %0 : vector<1x448xf32> to vector<2x448xf32>
    %139 = arith.mulf %134, %138 : vector<2x448xf32>
    %140 = vector.broadcast %1 : vector<1x448xf32> to vector<2x448xf32>
    %141 = arith.addf %139, %140 : vector<2x448xf32>
    %cst_52 = arith.constant 0.000000e+00 : f32
    %142 = vector.broadcast %cst_52 : f32 to vector<2x448xf32>
    %143 = arith.maximumf %141, %142 : vector<2x448xf32>
    %144 = vector.broadcast %0 : vector<1x448xf32> to vector<2x448xf32>
    %145 = arith.mulf %137, %144 : vector<2x448xf32>
    %146 = vector.broadcast %1 : vector<1x448xf32> to vector<2x448xf32>
    %147 = arith.addf %145, %146 : vector<2x448xf32>
    %cst_53 = arith.constant 0.000000e+00 : f32
    %148 = vector.broadcast %cst_53 : f32 to vector<2x448xf32>
    %149 = arith.maximumf %147, %148 : vector<2x448xf32>
    %150 = arith.maximumf %143, %149 : vector<2x448xf32>
    %151 = vector.extract_strided_slice %150 {offsets = [0, 0], sizes = [2, 224], strides = [1, 1]} : vector<2x448xf32> to vector<2x224xf32>
    %152 = vector.extract_strided_slice %150 {offsets = [0, 224], sizes = [2, 224], strides = [1, 1]} : vector<2x448xf32> to vector<2x224xf32>
    %153 = arith.maximumf %151, %152 : vector<2x224xf32>
    %154 = arith.truncf %153 : vector<2x224xf32> to vector<2x224xbf16>
    %c0_54 = arith.constant 0 : index
    %c5_55 = arith.constant 5 : index
    %c0_56 = arith.constant 0 : index
    %155 = vector.load %arg4[%c0_54, %c5_55, %c0_56] : memref<2x7x224xbf16, #tpu.memory_space<vmem>>, vector<2x1x224xbf16>
    %156 = vector.shape_cast %155 : vector<2x1x224xbf16> to vector<2x224xbf16>
    %157 = vector.shape_cast %154 : vector<2x224xbf16> to vector<2x1x224xbf16>
    tpu.vector_store %arg4[%c0_54, %c5_55, %c0_56], %157 {strides = array<i32>} : memref<2x7x224xbf16, #tpu.memory_space<vmem>>, vector<2x1x224xbf16>,
    %c0_57 = arith.constant 0 : index
    %c12 = arith.constant 12 : index
    %c0_58 = arith.constant 0 : index
    %158 = vector.load %arg1[%c0_57, %c12, %c0_58] : memref<2x14x448xbf16, #tpu.memory_space<vmem>>, vector<2x1x448xbf16>
    %159 = vector.shape_cast %158 : vector<2x1x448xbf16> to vector<2x448xbf16>
    %160 = arith.extf %159 : vector<2x448xbf16> to vector<2x448xf32>
    %c0_59 = arith.constant 0 : index
    %c13 = arith.constant 13 : index
    %c0_60 = arith.constant 0 : index
    %161 = vector.load %arg1[%c0_59, %c13, %c0_60] : memref<2x14x448xbf16, #tpu.memory_space<vmem>>, vector<2x1x448xbf16>
    %162 = vector.shape_cast %161 : vector<2x1x448xbf16> to vector<2x448xbf16>
    %163 = arith.extf %162 : vector<2x448xbf16> to vector<2x448xf32>
    %164 = vector.broadcast %0 : vector<1x448xf32> to vector<2x448xf32>
    %165 = arith.mulf %160, %164 : vector<2x448xf32>
    %166 = vector.broadcast %1 : vector<1x448xf32> to vector<2x448xf32>
    %167 = arith.addf %165, %166 : vector<2x448xf32>
    %cst_61 = arith.constant 0.000000e+00 : f32
    %168 = vector.broadcast %cst_61 : f32 to vector<2x448xf32>
    %169 = arith.maximumf %167, %168 : vector<2x448xf32>
    %170 = vector.broadcast %0 : vector<1x448xf32> to vector<2x448xf32>
    %171 = arith.mulf %163, %170 : vector<2x448xf32>
    %172 = vector.broadcast %1 : vector<1x448xf32> to vector<2x448xf32>
    %173 = arith.addf %171, %172 : vector<2x448xf32>
    %cst_62 = arith.constant 0.000000e+00 : f32
    %174 = vector.broadcast %cst_62 : f32 to vector<2x448xf32>
    %175 = arith.maximumf %173, %174 : vector<2x448xf32>
    %176 = arith.maximumf %169, %175 : vector<2x448xf32>
    %177 = vector.extract_strided_slice %176 {offsets = [0, 0], sizes = [2, 224], strides = [1, 1]} : vector<2x448xf32> to vector<2x224xf32>
    %178 = vector.extract_strided_slice %176 {offsets = [0, 224], sizes = [2, 224], strides = [1, 1]} : vector<2x448xf32> to vector<2x224xf32>
    %179 = arith.maximumf %177, %178 : vector<2x224xf32>
    %180 = arith.truncf %179 : vector<2x224xf32> to vector<2x224xbf16>
    %c0_63 = arith.constant 0 : index
    %c6_64 = arith.constant 6 : index
    %c0_65 = arith.constant 0 : index
    %181 = vector.load %arg4[%c0_63, %c6_64, %c0_65] : memref<2x7x224xbf16, #tpu.memory_space<vmem>>, vector<2x1x224xbf16>
    %182 = vector.shape_cast %181 : vector<2x1x224xbf16> to vector<2x224xbf16>
    %183 = vector.shape_cast %180 : vector<2x224xbf16> to vector<2x1x224xbf16>
    tpu.vector_store %arg4[%c0_63, %c6_64, %c0_65], %183 {strides = array<i32>} : memref<2x7x224xbf16, #tpu.memory_space<vmem>>, vector<2x1x224xbf16>,
    return
  }
  func.func @transform_0(%arg0: i32) -> (i32, i32, i32) {
    %c0_i32 = arith.constant 0 : i32
    %c0_i32_0 = arith.constant 0 : i32
    %c0_i32_1 = arith.constant 0 : i32
    return %arg0, %c0_i32, %c0_i32_0 : i32, i32, i32
  }
  func.func @transform_1(%arg0: i32) -> (i32, i32) {
    %c0_i32 = arith.constant 0 : i32
    %c0_i32_0 = arith.constant 0 : i32
    %c0_i32_1 = arith.constant 0 : i32
    return %c0_i32, %c0_i32_0 : i32, i32
  }
  func.func @transform_2(%arg0: i32) -> (i32, i32) {
    %c0_i32 = arith.constant 0 : i32
    %c0_i32_0 = arith.constant 0 : i32
    %c0_i32_1 = arith.constant 0 : i32
    return %c0_i32, %c0_i32_0 : i32, i32
  }
  func.func @transform_3(%arg0: i32) -> (i32, i32, i32) {
    %c0_i32 = arith.constant 0 : i32
    %c0_i32_0 = arith.constant 0 : i32
    %c0_i32_1 = arith.constant 0 : i32
    return %arg0, %c0_i32, %c0_i32_0 : i32, i32, i32
  }
}

module attributes {stable_mosaic.version = 11 : i64} {
  func.func @linear_kernel(%arg0: i32, %arg1: memref<2x1568xbf16, #tpu.memory_space<vmem>>, %arg2: memref<1568x10xbf16, #tpu.memory_space<vmem>>, %arg3: memref<1x10xf32, #tpu.memory_space<vmem>>, %arg4: memref<2x10xf32, #tpu.memory_space<vmem>>) attributes {dimension_semantics = [#tpu.dimension_semantics<parallel>], iteration_bounds = array<i64: 1>, scalar_prefetch = 0 : i64, scratch_operands = 0 : i64, tpu.core_type = #tpu.core_type<tc>, window_params = [{transform_indices = @transform_0, window_bounds = array<i64: 2, 1568>}, {pipeline_mode = #tpu.pipeline_mode<synchronous>, transform_indices = @transform_1, window_bounds = array<i64: 1568, 10>}, {pipeline_mode = #tpu.pipeline_mode<synchronous>, transform_indices = @transform_2, window_bounds = array<i64: 1, 10>}, {transform_indices = @transform_3, window_bounds = array<i64: 2, 10>}]} {
    %c0 = arith.constant 0 : index
    %c0_0 = arith.constant 0 : index
    %0 = vector.load %arg1[%c0, %c0_0] : memref<2x1568xbf16, #tpu.memory_space<vmem>>, vector<2x1568xbf16>
    %c0_1 = arith.constant 0 : index
    %c0_2 = arith.constant 0 : index
    %1 = vector.load %arg2[%c0_1, %c0_2] : memref<1568x10xbf16, #tpu.memory_space<vmem>>, vector<1568x10xbf16>
    %cst = arith.constant dense<0.000000e+00> : vector<2x10xf32>
    %2 = tpu.matmul %0, %1, %cst {dimension_numbers = #tpu.dot_dimension_numbers<[1], [0], [0], [1], [0, 0, 1, 1], [], []>} : vector<2x1568xbf16>, vector<1568x10xbf16>, vector<2x10xf32> -> vector<2x10xf32>
    %c0_3 = arith.constant 0 : index
    %c0_4 = arith.constant 0 : index
    %3 = vector.load %arg3[%c0_3, %c0_4] : memref<1x10xf32, #tpu.memory_space<vmem>>, vector<1x10xf32>
    %4 = vector.broadcast %3 : vector<1x10xf32> to vector<2x10xf32>
    %5 = arith.addf %2, %4 : vector<2x10xf32>
    %c0_5 = arith.constant 0 : index
    %c0_6 = arith.constant 0 : index
    %6 = vector.load %arg4[%c0_5, %c0_6] : memref<2x10xf32, #tpu.memory_space<vmem>>, vector<2x10xf32>
    tpu.vector_store %arg4[%c0_5, %c0_6], %5 {strides = array<i32>} : memref<2x10xf32, #tpu.memory_space<vmem>>, vector<2x10xf32>,
    return
  }
  func.func @transform_0(%arg0: i32) -> (i32, i32) {
    %c0_i32 = arith.constant 0 : i32
    %c0_i32_0 = arith.constant 0 : i32
    return %arg0, %c0_i32 : i32, i32
  }
  func.func @transform_1(%arg0: i32) -> (i32, i32) {
    %c0_i32 = arith.constant 0 : i32
    %c0_i32_0 = arith.constant 0 : i32
    %c0_i32_1 = arith.constant 0 : i32
    return %c0_i32, %c0_i32_0 : i32, i32
  }
  func.func @transform_2(%arg0: i32) -> (i32, i32) {
    %c0_i32 = arith.constant 0 : i32
    %c0_i32_0 = arith.constant 0 : i32
    %c0_i32_1 = arith.constant 0 : i32
    return %c0_i32, %c0_i32_0 : i32, i32
  }
  func.func @transform_3(%arg0: i32) -> (i32, i32) {
    %c0_i32 = arith.constant 0 : i32
    %c0_i32_0 = arith.constant 0 : i32
    return %arg0, %c0_i32 : i32, i32
  }
}

</mosaic_0001>

<bundles_post_ra>
// kernel: tile.23
= control target key start
LH: loop header
LB: loop body
LE: loop exit
PB: predicated region body
PF: predicated region fallthrough
CT: control target
= control target key end

     0   :  { %s40_s0 = inlined_call_operand.vmem [shape: f32[16], index: 0, kind: input, shape index: {}]   ;;  %s41_s1 = inlined_call_operand.vmem [shape: f32[28,16], index: 1, kind: output, shape index: {}]  }
   0x1   :  { %v4_v0 = vld [vmem:[%s40_s0] ss:$0 sm:$0xff] }
   0x2   :  { %5 = vst [vmem:[%s41_s1] sm:$0xff] %v4_v0  ;;  %12 = vst [vmem:[%s41_s1 + $0x8] sm:$0xff] %v4_v0 }
   0x3   :  { %13 = vst [vmem:[%s41_s1 + $0x10] sm:$0xff] %v4_v0  ;;  %14 = vst [vmem:[%s41_s1 + $0x18] sm:$0xff] %v4_v0 }

// kernel: tile.24
= control target key start
LH: loop header
LB: loop body
LE: loop exit
PB: predicated region body
PF: predicated region fallthrough
CT: control target
= control target key end

     0   :  { %s89_s8 = smov 112   ;;  %s90_s11 = smov 80   ;;  %vm3_vm0 = vcmask 130048   ;;  %vm9_vm1 = vcmask 1048448   ;;  %vm15_vm2 = vcmask 917248   ;;  %vm21_vm3 = vcmask 786048   ;;  %s142_s0 = inlined_call_operand.vmem [shape: f32[28,16], index: 0, kind: input, shape index: {}]   ;;  %s143_s1 = inlined_call_operand.vmem [shape: f32[1,448], index: 1, kind: output, shape index: {}]  }
   0x1   :  { %v72_v0 = vld [vmem:[%s142_s0 + $0x7] ss:$8 sm:$0x7]   ;;  %v74_v1 = vld [vmem:[%s142_s0 + $0x5] ss:$8 sm:$0x7]  }
   0x2   :  { %7 = vrot.lane.b32.xlu0 %v72_v0, %s89_s8  ;;  %19 = vrot.lane.b32.xlu1 %v74_v1, %s90_s11  ;;  %v73_v2 = vld [vmem:[%s142_s0 + $0x6] ss:$8 sm:$0x7]   ;;  %v75_v3 = vld [vmem:[%s142_s0 + $0x4] ss:$8 sm:$0x7]  }
   0x3   :  { %s91_s16 = smov 96   ;;  %v2_v4 = vld [vmem:[%s142_s0] ss:$8 sm:$0xf]   ;;  %s92_s19 = smov 64   ;;  %vm27_vm4 = vcmask 654848  }
   0x4   :  { %v76_v5 = vld [vmem:[%s142_s0 + $0x3] ss:$8 sm:$0xf]   ;;  %4 = vst.msk [vmem:[#allocation0] ss:$8 sm:$0xf] %vm3_vm0, %v2_v4  }
   0x5   :  { %v77_v6 = vld [vmem:[%s142_s0 + $0x2] ss:$8 sm:$0xf]   ;;  %s93_s24 = smov 48   ;;  %s94_s25 = smov 32   ;;  %vm33_vm5 = vcmask 523648  }
   0x6   :  { %13 = vrot.lane.b32.xlu0 %v73_v2, %s91_s16  ;;  %25 = vrot.lane.b32.xlu1 %v75_v3, %s92_s19  ;;  %v78_v7 = vld [vmem:[%s142_s0 + $0x1] ss:$8 sm:$0xf]   ;;  %s95_s0 = smov 16   ;;  %vm39_vm6 = vcmask 392448   ;;  %vm45_vm7 = vcmask 261248  }
   0xa   :  { %31 = vrot.lane.b32.xlu0 %v76_v5, %s93_s24  ;;  %37 = vrot.lane.b32.xlu1 %v77_v6, %s94_s25 }
   0xe   :  { %43 = vrot.lane.b32.xlu0 %v78_v7, %s95_s0 }
  0x74   :  { %v8_v8 = vpop.permute.xlu0 %7   ;;  %v20_v9 = vpop.permute.xlu1 %19  }
  0x75   :  { %10 = vst.msk [vmem:[#allocation0] ss:$8 sm:$0x7] %vm9_vm1, %v8_v8  }
  0x78   :  { %v14_v10 = vpop.permute.xlu0 %13   ;;  %v26_v11 = vpop.permute.xlu1 %25  }
  0x79   :  { %16 = vst.msk [vmem:[#allocation0] ss:$8 sm:$0x7] %vm15_vm2, %v14_v10  }
  0x7a   :  { %22 = vst.msk [vmem:[#allocation0] ss:$8 sm:$0x7] %vm21_vm3, %v20_v9  }
  0x7b   :  { %28 = vst.msk [vmem:[#allocation0] ss:$8 sm:$0x7] %vm27_vm4, %v26_v11  }
  0x7c   :  { %v32_v12 = vpop.permute.xlu0 %31   ;;  %v38_v13 = vpop.permute.xlu1 %37  }
  0x7d   :  { %34 = vst.msk [vmem:[#allocation0] ss:$8 sm:$0xf] %vm33_vm5, %v32_v12  }
  0x7e   :  { %40 = vst.msk [vmem:[#allocation0] ss:$8 sm:$0xf] %vm39_vm6, %v38_v13  }
  0x80   :  { %v44_v14 = vpop.permute.xlu0 %43  }
  0x81   :  { %46 = vst.msk [vmem:[#allocation0] ss:$8 sm:$0xf] %vm45_vm7, %v44_v14  }
  0x88   :  { %v50_v15 = vld [vmem:[#allocation0] sm:$0x1]  ;;  %v54_v16 = vld [vmem:[#allocation0 + $0x8] sm:$0x1]  ;;  %v59_v17 = vld [vmem:[#allocation0 + $0x10] sm:$0x1] }
  0x89   :  { %52 = vst [vmem:[%s143_s1] sm:$0x1] %v50_v15  ;;  %79 = vst [vmem:[%s143_s1 + $0x1] sm:$0x1] %v54_v16  ;;  %v65_v18 = vld [vmem:[#allocation0 + $0x18] sm:$0x1] }
  0x8a   :  { %80 = vst [vmem:[%s143_s1 + $0x2] sm:$0x1] %v59_v17  ;;  %81 = vst [vmem:[%s143_s1 + $0x3] sm:$0x1] %v65_v18 }

// kernel: cnn_forward.6
= control target key start
LH: loop header
LB: loop body
LE: loop exit
PB: predicated region body
PF: predicated region fallthrough
CT: control target
= control target key end

     0   :  { %v29_v0 = vlaneseq  ;;  %s2160_s11 = smov 32   ;;  %vm144_vm0 = vcmask 261120   ;;  %vm173_vm1 = vcmask 1040384   ;;  %vm174_vm2 = vsmask.f32 256  ;;  %s3445_s0 = inlined_call_operand.vmem [shape: bf16[2,28,448], index: 0, kind: input, shape index: {}]   ;;  %s3446_s1 = inlined_call_operand.vmem [shape: f32[1,448], index: 1, kind: input, shape index: {}]   ;;  %s3447_s2 = inlined_call_operand.vmem [shape: f32[1,448], index: 2, kind: input, shape index: {}]   ;;  %s3448_s3 = inlined_call_operand.vmem [shape: bf16[2,14,224], index: 3, kind: output, shape index: {}]  }
   0x1   :  { %v14_v1 = vld [vmem:[%s3446_s1] sm:$0xf]  ;;  %v19_v3 = vld [vmem:[%s3445_s0 + $0x48] sm:$0x11]  ;;  %v2209_v11 = vld [vmem:[%s3445_s0 + $0x8] sm:$0x22] }
   0x2   :  { %v15_v2 = vld [vmem:[%s3447_s2] sm:$0xf]  ;;  %v2190_v4 = vshrl.u32 %v29_v0, 7  ;;  %v17_v6 = vld [vmem:[%s3445_s0 + $0x8] sm:$0x11]  ;;  %v26_v7 = vunpack.c.l.bf16 %v19_v3  ;;  %v27_v8 = vunpack.c.h.bf16 %v19_v3  ;;  %v192_v20 = vunpack.c.l.bf16 %v2209_v11  ;;  %vm2799_vm5 = vmand %vm173_vm1, %vm174_vm2 }
   0x3   :  { %v2195_v5 = vld [vmem:[%s3445_s0] sm:$0x11]  ;;  %v2204_v10 = vld [vmem:[%s3445_s0] sm:$0x22]  ;;  %v22_v15 = vunpack.c.l.bf16 %v17_v6  ;;  %v189_v17 = vld [vmem:[%s3445_s0 + $0x48] sm:$0x22]  ;;  %v23_v18 = vunpack.c.h.bf16 %v17_v6 }
   0x4   :  { %v21_v9 = vunpack.c.h.bf16 %v2195_v5  ;;  %v18_v12 = vld [vmem:[%s3445_s0 + $0x40] sm:$0x11]  ;;  %v39_v13 = vsub.s32 2, %v2190_v4  ;;  %v43_v14 = vsub.s32 3, %v2190_v4  ;;  %v35_v16 = vsub.s32 1, %v2190_v4 }
   0x5   :  { %v191_v19 = vunpack.c.h.bf16 %v2204_v10  ;;  %v25_v21 = vunpack.c.h.bf16 %v18_v12  ;;  %v196_v28 = vunpack.c.l.bf16 %v189_v17  ;;  %v197_v29 = vunpack.c.h.bf16 %v189_v17  ;;  %v321_v17 = vld [vmem:[%s3445_s0] sm:$0x44] }
   0x6   :  { %v2222_v22 = vrot.slane %v14_v1, %v39_v13  ;;  %v2224_v23 = vrot.slane %v14_v1, %v43_v14  ;;  %v2226_v24 = vrot.slane %v15_v2, %v39_v13  ;;  %v2228_v25 = vrot.slane %v15_v2, %v43_v14 }
   0x7   :  { %v2230_v26 = vrot.slane %v14_v1, %v35_v16  ;;  %v2232_v27 = vrot.slane %v15_v2, %v35_v16  ;;  %v193_v14 = vunpack.c.h.bf16 %v2209_v11  ;;  %v323_v16 = vld [vmem:[%s3445_s0 + $0x40] sm:$0x44]  ;;  %vm176_vm3 = vcmask 782340  }
   0x8   :  { %v55_v30 = vmul.f32 %v2222_v22, %v26_v7  ;;  %v56_v31 = vmul.f32 %v2224_v23, %v27_v8  ;;  %v51_v32 = vmul.f32 %v2222_v22, %v22_v15  ;;  %v200_v33 = vmul.f32 %v192_v20, %v2222_v22  ;;  %v2259_v8 = vld [vmem:[%s3445_s0 + $0x40] sm:$0x22]  ;;  %v322_v15 = vld [vmem:[%s3445_s0 + $0x8] sm:$0x44] }
   0x9   :  { %v50_v34 = vmul.f32 %v2230_v26, %v21_v9  ;;  %v199_v35 = vmul.f32 %v191_v19, %v2230_v26  ;;  %v52_v36 = vmul.f32 %v2224_v23, %v23_v18  ;;  %v54_v37 = vmul.f32 %v2230_v26, %v25_v21 }
   0xa   :  { %v84_v38 = vadd.f32 %v2226_v24, %v55_v30  ;;  %v85_v39 = vadd.f32 %v2228_v25, %v56_v31  ;;  %v80_v40 = vadd.f32 %v2226_v24, %v51_v32  ;;  %v208_v41 = vadd.f32 %v200_v33, %v2226_v24 }
   0xb   :  { %v79_v42 = vadd.f32 %v2232_v27, %v50_v34  ;;  %v207_v43 = vadd.f32 %v199_v35, %v2232_v27  ;;  %v81_v44 = vadd.f32 %v2228_v25, %v52_v36  ;;  %v83_v45 = vadd.f32 %v2232_v27, %v54_v37 }
   0xc   :  { %v92_v46 = vmax.f32 %v84_v38, 0.0  ;;  %v93_v47 = vmax.f32 %v85_v39, 0.0  ;;  %v88_v48 = vmax.f32 %v80_v40, 0.0  ;;  %v216_v49 = vmax.f32 %v208_v41, 0.0 }
   0xd   :  { %v87_v50 = vmax.f32 %v79_v42, 0.0  ;;  %v215_v51 = vmax.f32 %v207_v43, 0.0  ;;  %v89_v52 = vmax.f32 %v81_v44, 0.0  ;;  %v91_v53 = vmax.f32 %v83_v45, 0.0 }
   0xe   :  { %v108_v54 = vrot.slane %v92_v46, 1  ;;  %v109_v55 = vrot.slane %v93_v47, 1  ;;  %v104_v56 = vrot.slane %v88_v48, 1  ;;  %v232_v57 = vrot.slane %v216_v49, 1 }
   0xf   :  { %v103_v58 = vrot.slane %v87_v50, 1  ;;  %v231_v59 = vrot.slane %v215_v51, 1  ;;  %v105_v60 = vrot.slane %v89_v52, 1  ;;  %v107_v61 = vrot.slane %v91_v53, 1 }
  0x10   :  { %v124_v62 = vmax.f32 %v92_v46, %v108_v54  ;;  %v125_v63 = vmax.f32 %v93_v47, %v109_v55  ;;  %v120_v0 = vmax.f32 %v88_v48, %v104_v56  ;;  %v248_v1 = vmax.f32 %v216_v49, %v232_v57 }
  0x11   :  { %v2250_v2 = vmax.f32 %v87_v50, %v103_v58  ;;  %v2252_v3 = vmax.f32 %v215_v51, %v231_v59  ;;  %v121_v6 = vmax.f32 %v89_v52, %v105_v60  ;;  %v2254_v7 = vmax.f32 %v91_v53, %v107_v61  ;;  %v452_v53 = vld [vmem:[%s3445_s0] sm:$0x88]  ;;  %v453_v58 = vld [vmem:[%s3445_s0 + $0x8] sm:$0x88] }
  0x12   :  { %v1946_v9 = vpack.i.bf16 %v125_v63, %v124_v62  ;;  %v204_v12 = vmul.f32 %v196_v28, %v2222_v22  ;;  %v205_v13 = vmul.f32 %v197_v29, %v2224_v23  ;;  %v195_v21 = vunpack.c.h.bf16 %v2259_v8 }
  0x13   :  { %v1936_v18 = vpack.i.bf16 %v120_v0, %v2250_v2  ;;  %v1951_v19 = vpack.i.bf16 %v248_v1, %v2252_v3  ;;  %v201_v28 = vmul.f32 %v193_v14, %v2224_v23  ;;  %v1941_v29 = vpack.i.bf16 %v2254_v7, %v121_v6  ;;  %v324_v6 = vld [vmem:[%s3445_s0 + $0x48] sm:$0x44]  ;;  %v455_v14 = vld [vmem:[%s3445_s0 + $0x48] sm:$0x88] }
  0x14   :  { %1947 = vrot.lane.b32.xlu1 %v1946_v9, %s2160_s11  ;;  %v212_v11 = vadd.f32 %v204_v12, %v2226_v24  ;;  %v213_v20 = vadd.f32 %v205_v13, %v2228_v25  ;;  %v328_v30 = vunpack.c.h.bf16 %v322_v15  ;;  %v330_v31 = vunpack.c.h.bf16 %v323_v16 }
  0x15   :  { %1937 = vrot.lane.b32.xlu0 %v1936_v18, %s2160_s11  ;;  %v326_v32 = vunpack.c.h.bf16 %v321_v17  ;;  %v203_v35 = vmul.f32 %v195_v21, %v2230_v26  ;;  %v209_v36 = vadd.f32 %v201_v28, %v2228_v25  ;;  %v327_v39 = vunpack.c.l.bf16 %v322_v15 }
  0x16   :  { %v220_v33 = vmax.f32 %v212_v11, 0.0  ;;  %v221_v34 = vmax.f32 %v213_v20, 0.0  ;;  %v336_v37 = vmul.f32 %v328_v30, %v2224_v23  ;;  %v338_v38 = vmul.f32 %v330_v31, %v2230_v26 }
  0x17   :  { %v334_v40 = vmul.f32 %v326_v32, %v2230_v26  ;;  %v211_v43 = vadd.f32 %v203_v35, %v2232_v27  ;;  %v217_v44 = vmax.f32 %v209_v36, 0.0  ;;  %v335_v47 = vmul.f32 %v327_v39, %v2222_v22  ;;  %v2325_v36 = vld [vmem:[%s3445_s0 + $0x40] sm:$0x88] }
  0x18   :  { %1952 = vrot.lane.b32.xlu1 %v1951_v19, %s2160_s11  ;;  %v236_v41 = vrot.slane %v220_v33, 1  ;;  %v237_v42 = vrot.slane %v221_v34, 1  ;;  %v344_v45 = vadd.f32 %v336_v37, %v2228_v25  ;;  %v346_v46 = vadd.f32 %v338_v38, %v2232_v27 }
  0x19   :  { %1942 = vrot.lane.b32.xlu0 %v1941_v29, %s2160_s11  ;;  %v342_v48 = vadd.f32 %v334_v40, %v2232_v27  ;;  %v219_v51 = vmax.f32 %v211_v43, 0.0  ;;  %v233_v52 = vrot.slane %v217_v44, 1  ;;  %v343_v56 = vadd.f32 %v335_v47, %v2226_v24 }
  0x1a   :  { %v252_v49 = vmax.f32 %v220_v33, %v236_v41  ;;  %v253_v50 = vmax.f32 %v221_v34, %v237_v42  ;;  %v352_v54 = vmax.f32 %v344_v45, 0.0  ;;  %v354_v55 = vmax.f32 %v346_v46, 0.0 }
  0x1b   :  { %v350_v57 = vmax.f32 %v342_v48, 0.0  ;;  %v235_v60 = vrot.slane %v219_v51, 1  ;;  %v249_v61 = vmax.f32 %v217_v44, %v233_v52  ;;  %v351_v0 = vmax.f32 %v343_v56, 0.0  ;;  %v588_v56 = vld [vmem:[%s3445_s0 + $0x18] sm:$0x11] }
  0x1c   :  { %v1961_v59 = vpack.i.bf16 %v253_v50, %v252_v49  ;;  %v368_v62 = vrot.slane %v352_v54, 1  ;;  %v370_v63 = vrot.slane %v354_v55, 1  ;;  %v457_v12 = vunpack.c.h.bf16 %v452_v53 }
  0x1d   :  { %v366_v1 = vrot.slane %v350_v57, 1  ;;  %v2305_v9 = vmax.f32 %v219_v51, %v235_v60  ;;  %v458_v13 = vunpack.c.l.bf16 %v453_v58  ;;  %v367_v17 = vrot.slane %v351_v0, 1 }
  0x1e   :  { %1962 = vrot.lane.b32.xlu1 %v1961_v59, %s2160_s11  ;;  %v384_v15 = vmax.f32 %v352_v54, %v368_v62  ;;  %v2310_v16 = vmax.f32 %v354_v55, %v370_v63  ;;  %v465_v11 = vmul.f32 %v457_v12, %v2230_v26  ;;  %v331_v21 = vunpack.c.l.bf16 %v324_v6 }
  0x1f   :  { %v2312_v18 = vmax.f32 %v350_v57, %v366_v1  ;;  %v1956_v19 = vpack.i.bf16 %v2305_v9, %v249_v61  ;;  %v466_v20 = vmul.f32 %v458_v13, %v2222_v22  ;;  %v383_v29 = vmax.f32 %v351_v0, %v367_v17  ;;  %v589_v1 = vld [vmem:[%s3445_s0 + $0x50] sm:$0x11] }
  0x20   :  { %v1971_v28 = vpack.i.bf16 %v2310_v16, %v384_v15  ;;  %v332_v30 = vunpack.c.h.bf16 %v324_v6  ;;  %v462_v31 = vunpack.c.l.bf16 %v455_v14  ;;  %v473_v32 = vadd.f32 %v465_v11, %v2232_v27  ;;  %v587_v15 = vld [vmem:[%s3445_s0 + $0x10] sm:$0x11] }
  0x21   :  { %1957 = vrot.lane.b32.xlu0 %v1956_v19, %s2160_s11  ;;  %v474_v33 = vadd.f32 %v466_v20, %v2226_v24  ;;  %v339_v34 = vmul.f32 %v331_v21, %v2222_v22  ;;  %v463_v35 = vunpack.c.h.bf16 %v455_v14  ;;  %v1966_v37 = vpack.i.bf16 %v383_v29, %v2312_v18 }
  0x22   :  { %1972 = vrot.lane.b32.xlu1 %v1971_v28, %s2160_s11  ;;  %v340_v38 = vmul.f32 %v332_v30, %v2224_v23  ;;  %v470_v39 = vmul.f32 %v462_v31, %v2222_v22  ;;  %v459_v40 = vunpack.c.h.bf16 %v453_v58  ;;  %v481_v41 = vmax.f32 %v473_v32, 0.0 }
  0x23   :  { %v482_v42 = vmax.f32 %v474_v33, 0.0  ;;  %v347_v43 = vadd.f32 %v339_v34, %v2226_v24  ;;  %v471_v44 = vmul.f32 %v463_v35, %v2224_v23  ;;  %v461_v47 = vunpack.c.h.bf16 %v2325_v36  ;;  %v716_v34 = vld [vmem:[%s3445_s0 + $0x10] sm:$0x22] }
  0x24   :  { %v348_v45 = vadd.f32 %v340_v38, %v2228_v25  ;;  %v478_v46 = vadd.f32 %v470_v39, %v2226_v24  ;;  %v497_v48 = vrot.slane %v481_v41, 1  ;;  %v467_v54 = vmul.f32 %v459_v40, %v2224_v23  ;;  %v2364_v40 = vld [vmem:[%s3445_s0 + $0x18] sm:$0x22] }
  0x25   :  { %1967 = vrot.lane.b32.xlu0 %v1966_v37, %s2160_s11  ;;  %v498_v49 = vrot.slane %v482_v42, 1  ;;  %v355_v50 = vmax.f32 %v347_v43, 0.0  ;;  %v479_v51 = vadd.f32 %v471_v44, %v2228_v25  ;;  %v469_v55 = vmul.f32 %v461_v47, %v2230_v26 }
  0x26   :  { %v356_v52 = vmax.f32 %v348_v45, 0.0  ;;  %v486_v53 = vmax.f32 %v478_v46, 0.0  ;;  %v2343_v57 = vmax.f32 %v481_v41, %v497_v48  ;;  %v475_v63 = vadd.f32 %v467_v54, %v2228_v25  ;;  %v590_v48 = vld [vmem:[%s3445_s0 + $0x58] sm:$0x11] }
  0x27   :  { %v514_v58 = vmax.f32 %v482_v42, %v498_v49  ;;  %v371_v59 = vrot.slane %v355_v50, 1  ;;  %v487_v60 = vmax.f32 %v479_v51, 0.0  ;;  %v477_v0 = vadd.f32 %v469_v55, %v2232_v27 }
  0x28   :  { %v372_v61 = vrot.slane %v356_v52, 1  ;;  %v502_v62 = vrot.slane %v486_v53, 1  ;;  %v594_v14 = vunpack.c.h.bf16 %v588_v56  ;;  %v483_v11 = vmax.f32 %v475_v63, 0.0 }
  0x29   :  { %v1981_v6 = vpack.i.bf16 %v514_v58, %v2343_v57  ;;  %v387_v12 = vmax.f32 %v355_v50, %v371_v59  ;;  %v503_v13 = vrot.slane %v487_v60, 1  ;;  %v485_v20 = vmax.f32 %v477_v0, 0.0 }
  0x2a   :  { %v388_v17 = vmax.f32 %v356_v52, %v372_v61  ;;  %v518_v19 = vmax.f32 %v486_v53, %v502_v62  ;;  %v596_v28 = vunpack.c.h.bf16 %v589_v1  ;;  %v602_v29 = vmul.f32 %v594_v14, %v2224_v23  ;;  %v719_v61 = vld [vmem:[%s3445_s0 + $0x58] sm:$0x22] }
  0x2b   :  { %1982 = vrot.lane.b32.xlu1 %v1981_v6, %s2160_s11  ;;  %v519_v21 = vmax.f32 %v487_v60, %v503_v13  ;;  %v499_v31 = vrot.slane %v483_v11, 1  ;;  %v501_v32 = vrot.slane %v485_v20, 1  ;;  %v592_v33 = vunpack.c.h.bf16 %v587_v15 }
  0x2c   :  { %v1976_v30 = vpack.i.bf16 %v388_v17, %v387_v12  ;;  %v604_v37 = vmul.f32 %v596_v28, %v2230_v26  ;;  %v610_v38 = vadd.f32 %v602_v29, %v2228_v25  ;;  %v593_v39 = vunpack.c.l.bf16 %v588_v56 }
  0x2d   :  { %v1991_v35 = vpack.i.bf16 %v519_v21, %v518_v19  ;;  %v515_v41 = vmax.f32 %v483_v11, %v499_v31  ;;  %v2367_v42 = vmax.f32 %v485_v20, %v501_v32  ;;  %v600_v43 = vmul.f32 %v592_v33, %v2230_v26 }
  0x2e   :  { %1977 = vrot.lane.b32.xlu0 %v1976_v30, %s2160_s11  ;;  %v612_v44 = vadd.f32 %v604_v37, %v2232_v27  ;;  %v618_v45 = vmax.f32 %v610_v38, 0.0  ;;  %v601_v46 = vmul.f32 %v593_v39, %v2222_v22  ;;  %v721_v47 = vunpack.c.h.bf16 %v716_v34  ;;  %v718_v39 = vld [vmem:[%s3445_s0 + $0x50] sm:$0x22] }
  0x2f   :  { %1992 = vrot.lane.b32.xlu1 %v1991_v35, %s2160_s11  ;;  %v1986_v49 = vpack.i.bf16 %v2367_v42, %v515_v41  ;;  %v608_v50 = vadd.f32 %v600_v43, %v2232_v27  ;;  %v722_v51 = vunpack.c.l.bf16 %v2364_v40  ;;  %v597_v59 = vunpack.c.l.bf16 %v590_v48 }
  0x30   :  { %v620_v52 = vmax.f32 %v612_v44, 0.0  ;;  %v634_v53 = vrot.slane %v618_v45, 1  ;;  %v609_v54 = vadd.f32 %v601_v46, %v2226_v24  ;;  %v729_v55 = vmul.f32 %v721_v47, %v2230_v26 }
  0x31   :  { %v616_v56 = vmax.f32 %v608_v50, 0.0  ;;  %v730_v58 = vmul.f32 %v722_v51, %v2222_v22  ;;  %v598_v60 = vunpack.c.h.bf16 %v590_v48  ;;  %v605_v13 = vmul.f32 %v597_v59, %v2222_v22  ;;  %v850_v50 = vld [vmem:[%s3445_s0 + $0x18] sm:$0x44] }
  0x32   :  { %1987 = vrot.lane.b32.xlu0 %v1986_v49, %s2160_s11  ;;  %v636_v62 = vrot.slane %v620_v52, 1  ;;  %v650_v63 = vmax.f32 %v618_v45, %v634_v53  ;;  %v617_v0 = vmax.f32 %v609_v54, 0.0  ;;  %v737_v1 = vadd.f32 %v729_v55, %v2232_v27 }
  0x33   :  { %v632_v6 = vrot.slane %v616_v56, 1  ;;  %v738_v12 = vadd.f32 %v730_v58, %v2226_v24  ;;  %v606_v14 = vmul.f32 %v598_v60, %v2224_v23  ;;  %v726_v11 = vunpack.c.l.bf16 %v719_v61 }
  0x34   :  { %v2390_v15 = vmax.f32 %v620_v52, %v636_v62  ;;  %v633_v17 = vrot.slane %v617_v0, 1  ;;  %v745_v19 = vmax.f32 %v737_v1, 0.0  ;;  %v613_v28 = vadd.f32 %v605_v13, %v2226_v24 }
  0x35   :  { %v2392_v20 = vmax.f32 %v616_v56, %v632_v6  ;;  %v746_v21 = vmax.f32 %v738_v12, 0.0  ;;  %v614_v29 = vadd.f32 %v606_v14, %v2228_v25  ;;  %v727_v33 = vunpack.c.h.bf16 %v719_v61 }
  0x36   :  { %v2001_v30 = vpack.i.bf16 %v2390_v15, %v650_v63  ;;  %v649_v31 = vmax.f32 %v617_v0, %v633_v17  ;;  %v761_v32 = vrot.slane %v745_v19, 1  ;;  %v621_v35 = vmax.f32 %v613_v28, 0.0  ;;  %v849_v63 = vld [vmem:[%s3445_s0 + $0x10] sm:$0x44] }
  0x37   :  { %v762_v34 = vrot.slane %v746_v21, 1  ;;  %v622_v37 = vmax.f32 %v614_v29, 0.0  ;;  %v734_v38 = vmul.f32 %v726_v11, %v2222_v22  ;;  %v735_v44 = vmul.f32 %v727_v33, %v2224_v23  ;;  %v978_v33 = vld [vmem:[%s3445_s0 + $0x10] sm:$0x88] }
  0x38   :  { %2002 = vrot.lane.b32.xlu1 %v2001_v30, %s2160_s11  ;;  %v1996_v41 = vpack.i.bf16 %v649_v31, %v2392_v20  ;;  %v2403_v43 = vmax.f32 %v745_v19, %v761_v32  ;;  %v723_v45 = vunpack.c.h.bf16 %v2364_v40  ;;  %v637_v47 = vrot.slane %v621_v35, 1  ;;  %v851_v40 = vld [vmem:[%s3445_s0 + $0x50] sm:$0x44] }
  0x39   :  { %v778_v46 = vmax.f32 %v746_v21, %v762_v34  ;;  %v638_v48 = vrot.slane %v622_v37, 1  ;;  %v742_v49 = vadd.f32 %v734_v38, %v2226_v24  ;;  %v743_v51 = vadd.f32 %v735_v44, %v2228_v25  ;;  %v2438_v38 = vld [vmem:[%s3445_s0 + $0x18] sm:$0x88] }
  0x3a   :  { %1997 = vrot.lane.b32.xlu0 %v1996_v41, %s2160_s11  ;;  %v725_v52 = vunpack.c.h.bf16 %v718_v39  ;;  %v731_v53 = vmul.f32 %v723_v45, %v2224_v23  ;;  %v653_v55 = vmax.f32 %v621_v35, %v637_v47  ;;  %v856_v62 = vunpack.c.h.bf16 %v850_v50 }
  0x3b   :  { %v2011_v54 = vpack.i.bf16 %v778_v46, %v2403_v43  ;;  %v654_v56 = vmax.f32 %v622_v37, %v638_v48  ;;  %v750_v58 = vmax.f32 %v742_v49, 0.0  ;;  %v751_v59 = vmax.f32 %v743_v51, 0.0 }
  0x3c   :  { %v733_v60 = vmul.f32 %v725_v52, %v2230_v26  ;;  %v739_v61 = vadd.f32 %v731_v53, %v2228_v25  ;;  %v858_v6 = vunpack.c.h.bf16 %v851_v40  ;;  %v864_v17 = vmul.f32 %v856_v62, %v2224_v23 }
  0x3d   :  { %2012 = vrot.lane.b32.xlu1 %v2011_v54, %s2160_s11  ;;  %v2006_v0 = vpack.i.bf16 %v654_v56, %v653_v55  ;;  %v766_v1 = vrot.slane %v750_v58, 1  ;;  %v767_v12 = vrot.slane %v751_v59, 1  ;;  %v854_v21 = vunpack.c.h.bf16 %v849_v63 }
  0x3e   :  { %v741_v13 = vadd.f32 %v733_v60, %v2232_v27  ;;  %v747_v14 = vmax.f32 %v739_v61, 0.0  ;;  %v866_v11 = vmul.f32 %v858_v6, %v2230_v26  ;;  %v855_v28 = vunpack.c.l.bf16 %v850_v50  ;;  %v852_v50 = vld [vmem:[%s3445_s0 + $0x58] sm:$0x44] }
  0x3f   :  { %2007 = vrot.lane.b32.xlu0 %v2006_v0, %s2160_s11  ;;  %v782_v19 = vmax.f32 %v750_v58, %v766_v1  ;;  %v783_v29 = vmax.f32 %v751_v59, %v767_v12  ;;  %v872_v32 = vadd.f32 %v864_v17, %v2228_v25  ;;  %v862_v35 = vmul.f32 %v854_v21, %v2230_v26  ;;  %v2453_v58 = vld [vmem:[%s3445_s0 + $0x58] sm:$0x88] }
  0x40   :  { %v749_v30 = vmax.f32 %v741_v13, 0.0  ;;  %v763_v31 = vrot.slane %v747_v14, 1  ;;  %v874_v34 = vadd.f32 %v866_v11, %v2232_v27  ;;  %v863_v37 = vmul.f32 %v855_v28, %v2222_v22 }
  0x41   :  { %v2021_v39 = vpack.i.bf16 %v783_v29, %v782_v19  ;;  %v880_v45 = vmax.f32 %v872_v32, 0.0  ;;  %v870_v47 = vadd.f32 %v862_v35, %v2232_v27  ;;  %v983_v49 = vunpack.c.h.bf16 %v978_v33  ;;  %v1359_v19 = vld [vmem:[%s3445_s0 + $0x20] sm:$0x44] }
  0x42   :  { %v765_v41 = vrot.slane %v749_v30, 1  ;;  %v779_v44 = vmax.f32 %v747_v14, %v763_v31  ;;  %v882_v46 = vmax.f32 %v874_v34, 0.0  ;;  %v871_v48 = vadd.f32 %v863_v37, %v2226_v24 }
  0x43   :  { %2022 = vrot.lane.b32.xlu1 %v2021_v39, %s2160_s11  ;;  %v896_v52 = vrot.slane %v880_v45, 1  ;;  %v984_v53 = vunpack.c.l.bf16 %v2438_v38  ;;  %v878_v54 = vmax.f32 %v870_v47, 0.0  ;;  %v991_v56 = vmul.f32 %v983_v49, %v2230_v26  ;;  %v1361_v47 = vld [vmem:[%s3445_s0 + $0x60] sm:$0x44] }
  0x44   :  { %v2446_v51 = vmax.f32 %v749_v30, %v765_v41  ;;  %v898_v40 = vrot.slane %v882_v46, 1  ;;  %v879_v55 = vmax.f32 %v871_v48, 0.0  ;;  %v859_v62 = vunpack.c.l.bf16 %v852_v50 }
  0x45   :  { %v912_v60 = vmax.f32 %v880_v45, %v896_v52  ;;  %v992_v61 = vmul.f32 %v984_v53, %v2222_v22  ;;  %v894_v0 = vrot.slane %v878_v54, 1  ;;  %v999_v6 = vadd.f32 %v991_v56, %v2232_v27 }
  0x46   :  { %v2016_v59 = vpack.i.bf16 %v2446_v51, %v779_v44  ;;  %v2457_v63 = vmax.f32 %v882_v46, %v898_v40  ;;  %v895_v1 = vrot.slane %v879_v55, 1  ;;  %v860_v13 = vunpack.c.h.bf16 %v852_v50  ;;  %v980_v46 = vld [vmem:[%s3445_s0 + $0x50] sm:$0x88] }
  0x47   :  { %v1000_v12 = vadd.f32 %v992_v61, %v2226_v24  ;;  %v867_v14 = vmul.f32 %v859_v62, %v2222_v22  ;;  %v988_v17 = vunpack.c.l.bf16 %v2453_v58  ;;  %v2468_v21 = vmax.f32 %v878_v54, %v894_v0 }
  0x48   :  { %2017 = vrot.lane.b32.xlu0 %v2016_v59, %s2160_s11  ;;  %v2031_v11 = vpack.i.bf16 %v2457_v63, %v912_v60  ;;  %v911_v28 = vmax.f32 %v879_v55, %v895_v1  ;;  %v1007_v29 = vmax.f32 %v999_v6, 0.0  ;;  %v868_v31 = vmul.f32 %v860_v13, %v2224_v23  ;;  %v1362_v55 = vld [vmem:[%s3445_s0 + $0x68] sm:$0x44] }
  0x49   :  { %v1008_v30 = vmax.f32 %v1000_v12, 0.0  ;;  %v875_v32 = vadd.f32 %v867_v14, %v2226_v24  ;;  %v996_v33 = vmul.f32 %v988_v17, %v2222_v22  ;;  %v1364_v37 = vunpack.c.h.bf16 %v1359_v19  ;;  %v1360_v17 = vld [vmem:[%s3445_s0 + $0x28] sm:$0x44] }
  0x4a   :  { %2032 = vrot.lane.b32.xlu1 %v2031_v11, %s2160_s11  ;;  %v2026_v34 = vpack.i.bf16 %v911_v28, %v2468_v21  ;;  %v1023_v35 = vrot.slane %v1007_v29, 1  ;;  %v876_v41 = vadd.f32 %v868_v31, %v2228_v25  ;;  %v985_v50 = vunpack.c.h.bf16 %v2438_v38 }
  0x4b   :  { %v1024_v39 = vrot.slane %v1008_v30, 1  ;;  %v883_v44 = vmax.f32 %v875_v32, 0.0  ;;  %v1004_v45 = vadd.f32 %v996_v33, %v2226_v24  ;;  %v1372_v49 = vmul.f32 %v1364_v37, %v2230_v26  ;;  %v1614_v33 = vld [vmem:[%s3445_s0 + $0x38] sm:$0x11] }
  0x4c   :  { %2027 = vrot.lane.b32.xlu0 %v2026_v34, %s2160_s11  ;;  %v2484_v48 = vmax.f32 %v1007_v29, %v1023_v35  ;;  %v884_v53 = vmax.f32 %v876_v41, 0.0  ;;  %v987_v59 = vunpack.c.h.bf16 %v980_v46  ;;  %v993_v60 = vmul.f32 %v985_v50, %v2224_v23 }
  0x4d   :  { %v1040_v52 = vmax.f32 %v1008_v30, %v1024_v39  ;;  %v899_v40 = vrot.slane %v883_v44, 1  ;;  %v1012_v54 = vmax.f32 %v1004_v45, 0.0  ;;  %v1380_v56 = vadd.f32 %v1372_v49, %v2232_v27 }
  0x4e   :  { %3457 = vst [vmem:[#allocation2_spill] sm:$0xff] %v2484_v48  ;;  %v1368_v61 = vunpack.c.h.bf16 %v1361_v47  ;;  %v900_v0 = vrot.slane %v884_v53, 1  ;;  %v995_v12 = vmul.f32 %v987_v59, %v2230_v26  ;;  %v1001_v13 = vadd.f32 %v993_v60, %v2228_v25 }
  0x4f   :  { %v2041_v62 = vpack.i.bf16 %v1040_v52, %v2484_v48  ;;  %v915_v1 = vmax.f32 %v883_v44, %v899_v40  ;;  %v1028_v6 = vrot.slane %v1012_v54, 1  ;;  %v1388_v38 = vmax.f32 %v1380_v56, 0.0 }
  0x50   :  { %v1369_v14 = vunpack.c.l.bf16 %v1362_v55  ;;  %v916_v19 = vmax.f32 %v884_v53, %v900_v0  ;;  %v1376_v28 = vmul.f32 %v1368_v61, %v2230_v26  ;;  %v1003_v30 = vadd.f32 %v995_v12, %v2232_v27 }
  0x51   :  { %2042 = vrot.lane.b32.xlu1 %v2041_v62, %s2160_s11  ;;  %v1044_v11 = vmax.f32 %v1012_v54, %v1028_v6  ;;  %v1404_v29 = vrot.slane %v1388_v38, 1  ;;  %v1009_v31 = vmax.f32 %v1001_v13, 0.0  ;;  %v1365_v37 = vunpack.c.l.bf16 %v1360_v17 }
  0x52   :  { %v1377_v32 = vmul.f32 %v1369_v14, %v2222_v22  ;;  %v2036_v34 = vpack.i.bf16 %v916_v19, %v915_v1  ;;  %v1384_v35 = vadd.f32 %v1376_v28, %v2232_v27  ;;  %v1366_v39 = vunpack.c.h.bf16 %v1360_v17  ;;  %v1613_v19 = vld [vmem:[%s3445_s0 + $0x30] sm:$0x11] }
  0x53   :  { %v2507_v41 = vmax.f32 %v1388_v38, %v1404_v29  ;;  %v1011_v44 = vmax.f32 %v1003_v30, 0.0  ;;  %v1025_v45 = vrot.slane %v1009_v31, 1  ;;  %v1373_v49 = vmul.f32 %v1365_v37, %v2222_v22 }
  0x54   :  { %v1385_v46 = vadd.f32 %v1377_v32, %v2226_v24  ;;  %2037 = vrot.lane.b32.xlu0 %v2036_v34, %s2160_s11  ;;  %v1392_v47 = vmax.f32 %v1384_v35, 0.0  ;;  %v1374_v50 = vmul.f32 %v1366_v39, %v2224_v23  ;;  %v1619_v52 = vunpack.c.l.bf16 %v1614_v33  ;;  %v1616_v34 = vld [vmem:[%s3445_s0 + $0x78] sm:$0x11] }
  0x55   :  { %v2051_v53 = vpack.i.bf16 %v2507_v41, %v1044_v11  ;;  %v1027_v40 = vrot.slane %v1011_v44, 1  ;;  %v1041_v54 = vmax.f32 %v1009_v31, %v1025_v45  ;;  %v1381_v60 = vadd.f32 %v1373_v49, %v2226_v24 }
  0x56   :  { %v1393_v56 = vmax.f32 %v1385_v46, 0.0  ;;  %v1408_v59 = vrot.slane %v1392_v47, 1  ;;  %v1382_v61 = vadd.f32 %v1374_v50, %v2228_v25  ;;  %v1620_v62 = vunpack.c.h.bf16 %v1614_v33 }
  0x57   :  { %2052 = vrot.lane.b32.xlu1 %v2051_v53, %s2160_s11  ;;  %v2517_v0 = vmax.f32 %v1011_v44, %v1027_v40  ;;  %v1627_v6 = vmul.f32 %v1619_v52, %v2222_v22  ;;  %v1370_v38 = vunpack.c.h.bf16 %v1362_v55  ;;  %v1389_v13 = vmax.f32 %v1381_v60, 0.0  ;;  %v2532_v55 = vld [vmem:[%s3445_s0 + $0x20] sm:$0x11] }
  0x58   :  { %v1409_v1 = vrot.slane %v1393_v56, 1  ;;  %v2520_v12 = vmax.f32 %v1392_v47, %v1408_v59  ;;  %v1390_v14 = vmax.f32 %v1382_v61, 0.0  ;;  %v1628_v17 = vmul.f32 %v1620_v62, %v2224_v23 }
  0x59   :  { %3458 = vst [vmem:[#allocation3_spill] sm:$0xff] %v2517_v0  ;;  %v2046_v11 = vpack.i.bf16 %v2517_v0, %v1041_v54  ;;  %v1635_v29 = vadd.f32 %v1627_v6, %v2226_v24  ;;  %v1378_v30 = vmul.f32 %v1370_v38, %v2224_v23  ;;  %v1405_v31 = vrot.slane %v1389_v13, 1  ;;  %v2547_v54 = vld [vmem:[%s3445_s0 + $0x70] sm:$0x11] }
  0x5a   :  { %v1425_v28 = vmax.f32 %v1393_v56, %v1409_v1  ;;  %v1406_v32 = vrot.slane %v1390_v14, 1  ;;  %v1636_v33 = vadd.f32 %v1628_v17, %v2228_v25  ;;  %v1618_v44 = vunpack.c.h.bf16 %v1613_v19  ;;  %v2558_v19 = vld [vmem:[%s3445_s0 + $0x60] sm:$0x11] }
  0x5b   :  { %2047 = vrot.lane.b32.xlu0 %v2046_v11, %s2160_s11  ;;  %v1643_v37 = vmax.f32 %v1635_v29, 0.0  ;;  %v1386_v39 = vadd.f32 %v1378_v30, %v2228_v25  ;;  %v1421_v45 = vmax.f32 %v1389_v13, %v1405_v31  ;;  %v1114_v49 = vunpack.c.h.bf16 %v2532_v55  ;;  %v2563_v11 = vld [vmem:[%s3445_s0 + $0x68] sm:$0x11] }
  0x5c   :  { %v2061_v35 = vpack.i.bf16 %v1425_v28, %v2520_v12  ;;  %v1422_v46 = vmax.f32 %v1390_v14, %v1406_v32  ;;  %v1644_v47 = vmax.f32 %v1636_v33, 0.0  ;;  %v1626_v53 = vmul.f32 %v1618_v44, %v2230_v26 }
  0x5d   :  { %v1659_v50 = vrot.slane %v1643_v37, 1  ;;  %v1394_v52 = vmax.f32 %v1386_v39, 0.0  ;;  %v1624_v40 = vunpack.c.h.bf16 %v1616_v34  ;;  %v1122_v60 = vmul.f32 %v1114_v49, %v2230_v26 }
  0x5e   :  { %2062 = vrot.lane.b32.xlu1 %v2061_v35, %s2160_s11  ;;  %v2056_v56 = vpack.i.bf16 %v1422_v46, %v1421_v45  ;;  %v1660_v59 = vrot.slane %v1644_v47, 1  ;;  %v1634_v1 = vadd.f32 %v1626_v53, %v2232_v27  ;;  %v1622_v14 = vunpack.c.h.bf16 %v2547_v54  ;;  %v1110_v45 = vld [vmem:[%s3445_s0 + $0x28] sm:$0x11] }
  0x5f   :  { %v1675_v61 = vmax.f32 %v1643_v37, %v1659_v50  ;;  %v1410_v62 = vrot.slane %v1394_v52, 1  ;;  %v1632_v6 = vmul.f32 %v1624_v40, %v2224_v23  ;;  %v1130_v13 = vadd.f32 %v1122_v60, %v2232_v27 }
  0x60   :  { %2057 = vrot.lane.b32.xlu0 %v2056_v56, %s2160_s11  ;;  %v1676_v38 = vmax.f32 %v1644_v47, %v1660_v59  ;;  %v1623_v17 = vunpack.c.l.bf16 %v1616_v34  ;;  %v1642_v29 = vmax.f32 %v1634_v1, 0.0  ;;  %v1630_v33 = vmul.f32 %v1622_v14, %v2230_v26 }
  0x61   :  { %v1426_v28 = vmax.f32 %v1394_v52, %v1410_v62  ;;  %v1640_v30 = vadd.f32 %v1632_v6, %v2228_v25  ;;  %v1138_v32 = vmax.f32 %v1130_v13, 0.0  ;;  %v1118_v39 = vunpack.c.h.bf16 %v2558_v19  ;;  %v1230_v62 = vld [vmem:[%s3445_s0 + $0x28] sm:$0x22] }
  0x62   :  { %v2071_v31 = vpack.i.bf16 %v1676_v38, %v1675_v61  ;;  %v1631_v34 = vmul.f32 %v1623_v17, %v2222_v22  ;;  %v1658_v35 = vrot.slane %v1642_v29, 1  ;;  %v1119_v44 = vunpack.c.l.bf16 %v2563_v11 }
  0x63   :  { %v1648_v37 = vmax.f32 %v1640_v30, 0.0  ;;  %v1154_v46 = vrot.slane %v1138_v32, 1  ;;  %v1638_v47 = vadd.f32 %v1630_v33, %v2232_v27  ;;  %v1126_v53 = vmul.f32 %v1118_v39, %v2230_v26 }
  0x64   :  { %2072 = vrot.lane.b32.xlu1 %v2071_v31, %s2160_s11  ;;  %v1639_v49 = vadd.f32 %v1631_v34, %v2226_v24  ;;  %v2576_v50 = vmax.f32 %v1642_v29, %v1658_v35  ;;  %v1127_v40 = vmul.f32 %v1119_v44, %v2222_v22  ;;  %v1115_v61 = vunpack.c.l.bf16 %v1110_v45 }
  0x65   :  { %v1664_v52 = vrot.slane %v1648_v37, 1  ;;  %v2580_v56 = vmax.f32 %v1138_v32, %v1154_v46  ;;  %v1646_v59 = vmax.f32 %v1638_v47, 0.0  ;;  %v1134_v38 = vadd.f32 %v1126_v53, %v2232_v27 }
  0x66   :  { %v1647_v60 = vmax.f32 %v1639_v49, 0.0  ;;  %v2066_v1 = vpack.i.bf16 %v2576_v50, %v1426_v28  ;;  %v1135_v13 = vadd.f32 %v1127_v40, %v2226_v24  ;;  %v1116_v29 = vunpack.c.h.bf16 %v1110_v45 }
  0x67   :  { %3459 = vst [vmem:[#allocation4_spill] sm:$0xff] %v2580_v56  ;;  %v1680_v6 = vmax.f32 %v1648_v37, %v1664_v52  ;;  %v1662_v14 = vrot.slane %v1646_v59, 1  ;;  %v1123_v30 = vmul.f32 %v1115_v61, %v2222_v22  ;;  %v1142_v32 = vmax.f32 %v1134_v38, 0.0 }
  0x68   :  { %v1663_v17 = vrot.slane %v1647_v60, 1  ;;  %2067 = vrot.lane.b32.xlu0 %v2066_v1, %s2160_s11  ;;  %v1143_v33 = vmax.f32 %v1135_v13, 0.0  ;;  %v1235_v34 = vunpack.c.l.bf16 %v1230_v62  ;;  %v1124_v37 = vmul.f32 %v1116_v29, %v2224_v23 }
  0x69   :  { %v2081_v31 = vpack.i.bf16 %v2580_v56, %v1680_v6  ;;  %v2591_v35 = vmax.f32 %v1646_v59, %v1662_v14  ;;  %v1131_v39 = vadd.f32 %v1123_v30, %v2226_v24  ;;  %v1158_v44 = vrot.slane %v1142_v32, 1  ;;  %v2603_v59 = vld [vmem:[%s3445_s0 + $0x20] sm:$0x22]  ;;  %v1232_v6 = vld [vmem:[%s3445_s0 + $0x68] sm:$0x22] }
  0x6a   :  { %v1679_v28 = vmax.f32 %v1647_v60, %v1663_v17  ;;  %v1159_v45 = vrot.slane %v1143_v33, 1  ;;  %v1236_v46 = vunpack.c.h.bf16 %v1230_v62  ;;  %v1243_v47 = vmul.f32 %v1235_v34, %v2222_v22 }
  0x6b   :  { %2082 = vrot.lane.b32.xlu1 %v2081_v31, %s2160_s11  ;;  %v1132_v52 = vadd.f32 %v1124_v37, %v2228_v25  ;;  %v1139_v53 = vmax.f32 %v1131_v39, 0.0  ;;  %v1120_v40 = vunpack.c.h.bf16 %v2563_v11  ;;  %v2605_v60 = vmax.f32 %v1142_v32, %v1158_v44  ;;  %v2621_v32 = vld [vmem:[%s3445_s0 + $0x20] sm:$0x88]  ;;  %v2627_v39 = vld [vmem:[%s3445_s0 + $0x60] sm:$0x22] }
  0x6c   :  { %v2076_v49 = vpack.i.bf16 %v1679_v28, %v2591_v35  ;;  %v1175_v61 = vmax.f32 %v1143_v33, %v1159_v45  ;;  %v1244_v1 = vmul.f32 %v1236_v46, %v2224_v23  ;;  %v1251_v62 = vadd.f32 %v1243_v47, %v2226_v24 }
  0x6d   :  { %3460 = vst [vmem:[#allocation5_spill] sm:$0xff] %v2605_v60  ;;  %v1140_v11 = vmax.f32 %v1132_v52, 0.0  ;;  %v1155_v13 = vrot.slane %v1139_v53, 1  ;;  %v1128_v14 = vmul.f32 %v1120_v40, %v2224_v23  ;;  %v1234_v31 = vunpack.c.h.bf16 %v2603_v59 }
  0x6e   :  { %2077 = vrot.lane.b32.xlu0 %v2076_v49, %s2160_s11  ;;  %v2091_v17 = vpack.i.bf16 %v1175_v61, %v2605_v60  ;;  %v1252_v29 = vadd.f32 %v1244_v1, %v2228_v25  ;;  %v1259_v30 = vmax.f32 %v1251_v62, 0.0  ;;  %v1240_v37 = vunpack.c.h.bf16 %v1232_v6 }
  0x6f   :  { %v1156_v33 = vrot.slane %v1140_v11, 1  ;;  %v1171_v34 = vmax.f32 %v1139_v53, %v1155_v13  ;;  %v1136_v28 = vadd.f32 %v1128_v14, %v2228_v25  ;;  %v1242_v47 = vmul.f32 %v1234_v31, %v2230_v26 }
  0x70   :  { %2092 = vrot.lane.b32.xlu1 %v2091_v17, %s2160_s11  ;;  %v1260_v45 = vmax.f32 %v1252_v29, 0.0  ;;  %v1275_v46 = vrot.slane %v1259_v30, 1  ;;  %v1248_v53 = vmul.f32 %v1240_v37, %v2224_v23  ;;  %v1488_v40 = vunpack.c.h.bf16 %v2621_v32  ;;  %v1484_v37 = vld [vmem:[%s3445_s0 + $0x28] sm:$0x88] }
  0x71   :  { %v1172_v49 = vmax.f32 %v1140_v11, %v1156_v33  ;;  %v1144_v52 = vmax.f32 %v1136_v28, 0.0  ;;  %v1250_v62 = vadd.f32 %v1242_v47, %v2232_v27  ;;  %v1238_v13 = vunpack.c.h.bf16 %v2627_v39  ;;  %v2642_v28 = vld [vmem:[%s3445_s0 + $0x60] sm:$0x88] }
  0x72   :  { %v1276_v61 = vrot.slane %v1260_v45, 1  ;;  %v1291_v1 = vmax.f32 %v1259_v30, %v1275_v46  ;;  %v1256_v17 = vadd.f32 %v1248_v53, %v2228_v25  ;;  %v1496_v29 = vmul.f32 %v1488_v40, %v2230_v26  ;;  %v1486_v30 = vld [vmem:[%s3445_s0 + $0x68] sm:$0x88] }
  0x73   :  { %v2086_v14 = vpack.i.bf16 %v1172_v49, %v1171_v34  ;;  %v1160_v44 = vrot.slane %v1144_v52, 1  ;;  %v1258_v31 = vmax.f32 %v1250_v62, 0.0  ;;  %v1239_v11 = vunpack.c.l.bf16 %v1232_v6  ;;  %v2650_v34 = vld [vmem:[%s3445_s0 + $0x40] sm:$0x11] }
  0x74   :  { %v1292_v38 = vmax.f32 %v1260_v45, %v1276_v61  ;;  %v1246_v33 = vmul.f32 %v1238_v13, %v2230_v26  ;;  %v1264_v45 = vmax.f32 %v1256_v17, 0.0  ;;  %v1504_v46 = vadd.f32 %v1496_v29, %v2232_v27 }
  0x75   :  { %2087 = vrot.lane.b32.xlu0 %v2086_v14, %s2160_s11  ;;  %v1176_v6 = vmax.f32 %v1144_v52, %v1160_v44  ;;  %v1274_v49 = vrot.slane %v1258_v31, 1  ;;  %v1247_v53 = vmul.f32 %v1239_v11, %v2222_v22  ;;  %v1492_v13 = vunpack.c.h.bf16 %v2642_v28 }
  0x76   :  { %v2101_v47 = vpack.i.bf16 %v1292_v38, %v1291_v1  ;;  %v1254_v40 = vadd.f32 %v1246_v33, %v2232_v27  ;;  %v1280_v61 = vrot.slane %v1264_v45, 1  ;;  %v1512_v62 = vmax.f32 %v1504_v46, 0.0  ;;  %v1736_v33 = vld [vmem:[%s3445_s0 + $0x38] sm:$0x22] }
  0x77   :  { %v1493_v0 = vunpack.c.l.bf16 %v1486_v30  ;;  %v2663_v52 = vmax.f32 %v1258_v31, %v1274_v49  ;;  %v1255_v38 = vadd.f32 %v1247_v53, %v2226_v24  ;;  %v1500_v29 = vmul.f32 %v1492_v13, %v2230_v26 }
  0x78   :  { %2102 = vrot.lane.b32.xlu1 %v2101_v47, %s2160_s11  ;;  %v1262_v1 = vmax.f32 %v1254_v40, 0.0  ;;  %v1296_v14 = vmax.f32 %v1264_v45, %v1280_v61  ;;  %v1528_v17 = vrot.slane %v1512_v62, 1  ;;  %v1489_v47 = vunpack.c.l.bf16 %v1484_v37 }
  0x79   :  { %3461 = vst [vmem:[#allocation6_spill] sm:$0xff] %v2663_v52  ;;  %v1501_v11 = vmul.f32 %v1493_v0, %v2222_v22  ;;  %v2096_v46 = vpack.i.bf16 %v2663_v52, %v1176_v6  ;;  %v1263_v44 = vmax.f32 %v1255_v38, 0.0  ;;  %v1508_v49 = vadd.f32 %v1500_v29, %v2232_v27 }
  0x7a   :  { %v1278_v60 = vrot.slane %v1262_v1, 1  ;;  %v2672_v31 = vmax.f32 %v1512_v62, %v1528_v17  ;;  %v1490_v53 = vunpack.c.h.bf16 %v1484_v37  ;;  %v1497_v61 = vmul.f32 %v1489_v47, %v2222_v22 }
  0x7b   :  { %v1509_v45 = vadd.f32 %v1501_v11, %v2226_v24  ;;  %2097 = vrot.lane.b32.xlu0 %v2096_v46, %s2160_s11  ;;  %v1279_v40 = vrot.slane %v1263_v44, 1  ;;  %v1741_v13 = vunpack.c.l.bf16 %v1736_v33  ;;  %v1516_v38 = vmax.f32 %v1508_v49, 0.0 }
  0x7c   :  { %3462 = vst [vmem:[#allocation7_spill] sm:$0xff] %v2672_v31  ;;  %v2677_v0 = vmax.f32 %v1262_v1, %v1278_v60  ;;  %v2111_v6 = vpack.i.bf16 %v2672_v31, %v1296_v14  ;;  %v1498_v62 = vmul.f32 %v1490_v53, %v2224_v23  ;;  %v1505_v29 = vadd.f32 %v1497_v61, %v2226_v24 }
  0x7d   :  { %v1517_v52 = vmax.f32 %v1509_v45, 0.0  ;;  %v1295_v17 = vmax.f32 %v1263_v44, %v1279_v40  ;;  %v1742_v56 = vunpack.c.h.bf16 %v1736_v33  ;;  %v1749_v37 = vmul.f32 %v1741_v13, %v2222_v22  ;;  %v1735_v44 = vld [vmem:[%s3445_s0 + $0x30] sm:$0x22] }
  0x7e   :  { %3463 = vst [vmem:[#allocation8_spill] sm:$0xff] %v2677_v0  ;;  %2112 = vrot.lane.b32.xlu1 %v2111_v6, %s2160_s11  ;;  %v1532_v11 = vrot.slane %v1516_v38, 1  ;;  %v1506_v1 = vadd.f32 %v1498_v62, %v2228_v25  ;;  %v1494_v46 = vunpack.c.h.bf16 %v1486_v30  ;;  %v1513_v14 = vmax.f32 %v1505_v29, 0.0  ;;  %v1737_v30 = vld [vmem:[%s3445_s0 + $0x70] sm:$0x22] }
  0x7f   :  { %v1533_v60 = vrot.slane %v1517_v52, 1  ;;  %v2106_v47 = vpack.i.bf16 %v1295_v17, %v2677_v0  ;;  %v1750_v49 = vmul.f32 %v1742_v56, %v2224_v23  ;;  %v1757_v45 = vadd.f32 %v1749_v37, %v2226_v24  ;;  %v2701_v56 = vld [vmem:[%s3445_s0 + $0x40] sm:$0x44]  ;;  %v1738_v62 = vld [vmem:[%s3445_s0 + $0x78] sm:$0x22] }
  0x80   :  { %v2692_v33 = vmax.f32 %v1516_v38, %v1532_v11  ;;  %v1514_v40 = vmax.f32 %v1506_v1, 0.0  ;;  %v1502_v61 = vmul.f32 %v1494_v46, %v2224_v23  ;;  %v1529_v6 = vrot.slane %v1513_v14, 1 }
  0x81   :  { %v1549_v53 = vmax.f32 %v1517_v52, %v1533_v60  ;;  %2107 = vrot.lane.b32.xlu0 %v2106_v47, %s2160_s11  ;;  %v1758_v38 = vadd.f32 %v1750_v49, %v2228_v25  ;;  %v1765_v52 = vmax.f32 %v1757_v45, 0.0  ;;  %v1740_v11 = vunpack.c.h.bf16 %v1735_v44 }
  0x82   :  { %3464 = vst [vmem:[#allocation9_spill] sm:$0xff] %v2692_v33  ;;  %v1530_v29 = vrot.slane %v1514_v40, 1  ;;  %v1510_v37 = vadd.f32 %v1502_v61, %v2228_v25  ;;  %v1545_v60 = vmax.f32 %v1513_v14, %v1529_v6  ;;  %v1744_v13 = vunpack.c.h.bf16 %v1737_v30 }
  0x83   :  { %v2121_v17 = vpack.i.bf16 %v1549_v53, %v2692_v33  ;;  %v1766_v1 = vmax.f32 %v1758_v38, 0.0  ;;  %v1781_v46 = vrot.slane %v1765_v52, 1  ;;  %v1748_v49 = vmul.f32 %v1740_v11, %v2230_v26  ;;  %v2718_v53 = vld [vmem:[%s3445_s0] sm:$0x44] }
  0x84   :  { %v1546_v47 = vmax.f32 %v1514_v40, %v1530_v29  ;;  %v1518_v31 = vmax.f32 %v1510_v37, 0.0  ;;  %v1745_v45 = vunpack.c.l.bf16 %v1738_v62  ;;  %v1752_v30 = vmul.f32 %v1744_v13, %v2230_v26 }
  0x85   :  { %2122 = vrot.lane.b32.xlu1 %v2121_v17, %s2160_s11  ;;  %v1782_v14 = vrot.slane %v1766_v1, 1  ;;  %v1797_v61 = vmax.f32 %v1765_v52, %v1781_v46  ;;  %v1756_v40 = vadd.f32 %v1748_v49, %v2232_v27  ;;  %v1746_v11 = vunpack.c.h.bf16 %v1738_v62 }
  0x86   :  { %v2713_v0 = vpop.permute.xlu1 %1947  ;;  %v2116_v6 = vpack.i.bf16 %v1546_v47, %v1545_v60  ;;  %v1534_v38 = vrot.slane %v1518_v31, 1  ;;  %v1753_v17 = vmul.f32 %v1745_v45, %v2222_v22  ;;  %v1760_v37 = vadd.f32 %v1752_v30, %v2232_v27 }
  0x87   :  { %v1798_v29 = vmax.f32 %v1766_v1, %v1782_v14  ;;  %v989_v33 = vunpack.c.h.bf16 %v2453_v58  ;;  %v1764_v44 = vmax.f32 %v1756_v40, 0.0  ;;  %v2728_v26 = vpop.permute.xlu0 %1937  ;;  %v1754_v46 = vmul.f32 %v1746_v11, %v2224_v23 }
  0x88   :  { %2117 = vrot.lane.b32.xlu0 %v2116_v6, %s2160_s11  ;;  %v1550_v48 = vmax.f32 %v1518_v31, %v1534_v38  ;;  %v1761_v52 = vadd.f32 %v1753_v17, %v2226_v24  ;;  %v1768_v60 = vmax.f32 %v1760_v37, 0.0  ;;  %v1950_v62 = vunpack.i.h.bf16 %v2713_v0  ;;  %v2146_v37 = vld [vmem:[%s3447_s2] sm:$0xf] }
  0x89   :  { %v2131_v13 = vpack.i.bf16 %v1798_v29, %v1797_v61  ;;  %v997_v22 = vmul.f32 %v989_v33, %v2224_v23  ;;  %v1780_v1 = vrot.slane %v1764_v44, 1  ;;  %v1949_v58 = vunpack.i.l.bf16 %v2713_v0  ;;  %v2743_v23 = vld [vmem:[%s3445_s0] sm:$0x88] }
  0x8a   :  { %v1769_v27 = vmax.f32 %v1761_v52, 0.0  ;;  %v2734_v47 = vpop.permute.xlu1 %1952  ;;  %v1784_v24 = vrot.slane %v1768_v60, 1  ;;  %v1762_v31 = vadd.f32 %v1754_v46, %v2228_v25  ;;  %v31_v45 = vsub.s32 0, %v2190_v4 }
  0x8b   :  { %2132 = vrot.lane.b32.xlu1 %v2131_v13, %s2160_s11  ;;  %v1005_v49 = vadd.f32 %v997_v22, %v2228_v25  ;;  %v2746_v14 = vmax.f32 %v1764_v44, %v1780_v1  ;;  %v2751_v30 = vsel %vm144_vm0, %v1949_v58, %v1950_v62  ;;  %v2145_v44 = vld [vmem:[%s3446_s1] sm:$0xf]  ;;  %v1943_v52 = vpop.permute.xlu0 %1942  ;;  %v1939_v1 = vunpack.i.l.bf16 %v2728_v26 }
  0x8c   :  { %v1785_v61 = vrot.slane %v1769_v27, 1  ;;  %v2754_v25 = vmax.f32 %v1768_v60, %v1784_v24  ;;  %v1770_v4 = vmax.f32 %v1762_v31, 0.0  ;;  %v2760_v29 = vrot.slane %v2145_v44, %v31_v45 }
  0x8d   :  { %v1013_v38 = vmax.f32 %v1005_v49, 0.0  ;;  %v2126_v40 = vpack.i.bf16 %v2746_v14, %v1550_v48  ;;  %v2765_v11 = vrot.slane %v2146_v37, %v31_v45  ;;  %v1940_v48 = vunpack.i.h.bf16 %v2728_v26 }
  0x8e   :  { %v1801_v17 = vmax.f32 %v1769_v27, %v1785_v61  ;;  %v1786_v13 = vrot.slane %v1770_v4, 1  ;;  %v3465_v27 = vunpack.c.l.bf16 %v2195_v5  ;;  %v3466_v24 = vunpack.c.l.bf16 %v2204_v10 }
  0x8f   :  { %v1029_v60 = vrot.slane %v1013_v38, 1  ;;  %2127 = vrot.lane.b32.xlu0 %v2126_v40, %s2160_s11  ;;  %v1955_v61 = vunpack.i.h.bf16 %v2734_v47  ;;  %v1954_v44 = vunpack.i.l.bf16 %v2734_v47  ;;  %v3467_v40 = vunpack.c.l.bf16 %v2650_v34 }
  0x90   :  { %v2136_v22 = vpack.i.bf16 %v1801_v17, %v2754_v25  ;;  %v49_v62 = vmul.f32 %v2760_v29, %v3465_v27  ;;  %v198_v31 = vmul.f32 %v3466_v24, %v2760_v29  ;;  %v1963_v49 = vpop.permute.xlu1 %1962  ;;  %v1802_v45 = vmax.f32 %v1770_v4, %v1786_v13 }
  0x91   :  { %v53_v17 = vmul.f32 %v2760_v29, %v3467_v40  ;;  %v1045_v37 = vmax.f32 %v1013_v38, %v1029_v60  ;;  %vm177_vm4 = vsmask.f32 4352  ;;  %v1945_v34 = vunpack.i.h.bf16 %v1943_v52 }
  0x92   :  { %v78_v26 = vadd.f32 %v2765_v11, %v49_v62  ;;  %v206_v5 = vadd.f32 %v198_v31, %v2765_v11  ;;  %1819 = vrot.lane.b32.xlu1 %v1802_v45, %s2160_s11  ;;  %v1944_v13 = vunpack.i.l.bf16 %v1943_v52  ;;  %v1965_v60 = vunpack.i.h.bf16 %v1963_v49  ;;  %vm178_vm6 = vmand %vm176_vm3, %vm177_vm4 }
  0x93   :  { %v82_v10 = vadd.f32 %v2765_v11, %v53_v17  ;;  %2137 = vrot.lane.b32.xlu0 %v2136_v22, %s2160_s11  ;;  %v1958_v27 = vpop.permute.xlu0 %1957  ;;  %v1964_v62 = vunpack.i.l.bf16 %v1963_v49  ;;  %v3468_v24 = vunpack.c.l.bf16 %v2259_v8  ;;  %v145_v40 = vsel %vm144_vm0, %v1939_v1, %v1940_v48  ;;  %vm2815_vm9 = vmor %vm178_vm6, %vm2799_vm5 }
  0x94   :  { %v86_v47 = vmax.f32 %v78_v26, 0.0  ;;  %v214_v4 = vmax.f32 %v206_v5, 0.0  ;;  %v146_v6 = vsel %vm144_vm0, %v1940_v48, %v1944_v13  ;;  %v2794_v33 = vpop.permute.xlu1 %1972  ;;  %v272_v22 = vsel %vm144_vm0, %v1954_v44, %v1955_v61 }
  0x95   :  { %v90_v38 = vmax.f32 %v82_v10, 0.0  ;;  %v202_v31 = vmul.f32 %v3468_v24, %v2760_v29  ;;  %v275_v8 = vsel %vm144_vm0, %v1964_v62, %v1965_v60  ;;  %v147_v48 = vsel %vm144_vm0, %v1945_v34, %v1949_v58 }
  0x96   :  { %v102_v45 = vrot.slane %v86_v47, 1  ;;  %v230_v17 = vrot.slane %v214_v4, 1  ;;  %v154_v44 = vmax.f32 %v2250_v2, %v146_v6  ;;  %v283_v13 = vmax.f32 %v2305_v9, %v275_v8  ;;  %v180_v2 = vld [vmem:[%s3448_s3] sm:$0x11]  ;;  %v183_v6 = vld [vmem:[%s3448_s3 + $0x10] sm:$0x11] }
  0x97   :  { %v106_v26 = vrot.slane %v90_v38, 1  ;;  %v210_v49 = vadd.f32 %v202_v31, %v2765_v11  ;;  %1062 = vrot.lane.b32.xlu0 %v1045_v37, %s2160_s11  ;;  %v1960_v60 = vunpack.i.h.bf16 %v1958_v27  ;;  %vm310_vm7 = vsmask.f32 7938 }
  0x98   :  { %v118_v1 = vmax.f32 %v86_v47, %v102_v45  ;;  %v246_v5 = vmax.f32 %v214_v4, %v230_v17  ;;  %vm312_vm8 = vsmask.f32 7954  ;;  %v1959_v37 = vunpack.i.l.bf16 %v1958_v27  ;;  %v1968_v47 = vpop.permute.xlu0 %1967  ;;  %vm2850_vm13 = vmand %vm173_vm1, %vm310_vm7 }
  0x99   :  { %v122_v10 = vmax.f32 %v90_v38, %v106_v26  ;;  %v218_v24 = vmax.f32 %v210_v49, 0.0  ;;  %v274_v58 = vsel %vm144_vm0, %v1960_v60, %v1964_v62  ;;  %v1974_v38 = vunpack.i.l.bf16 %v2794_v33  ;;  %vm313_vm15 = vmand %vm176_vm3, %vm312_vm8 }
  0x9a   :  { %v153_v46 = vmax.f32 %v118_v1, %v145_v40  ;;  %v280_v4 = vmax.f32 %v246_v5, %v272_v22  ;;  %v273_v27 = vsel %vm144_vm0, %v1955_v61, %v1959_v37  ;;  %v3473_v45 = vunpack.c.l.bf16 %v2718_v53  ;;  %vm2872_vm1 = vmor %vm313_vm15, %vm2850_vm13 }
  0x9b   :  { %v155_v0 = vmax.f32 %v122_v10, %v147_v48  ;;  %v234_v9 = vrot.slane %v218_v24, 1  ;;  %v3474_v22 = vmax.f32 %v2254_v7, %v2751_v30  ;;  %v281_v52 = vmax.f32 %v2252_v3, %v273_v27 }
  0x9c   :  { %v1907_v34 = vpack.c.bf16 %v154_v44, %v153_v46  ;;  %v333_v40 = vmul.f32 %v3473_v45, %v2760_v29  ;;  %vm439_vm10 = vcmask 1041409   ;;  %vm440_vm11 = vsmask.f32 1280 }
  0x9d   :  { %v2831_v17 = vpop.permute.xlu1 %1982  ;;  %v1908_v26 = vpack.c.bf16 %v3474_v22, %v155_v0  ;;  %v250_v62 = vmax.f32 %v218_v24, %v234_v9  ;;  %vm442_vm12 = vcmask 783365   ;;  %v1909_v30 = vpack.c.bf16 %v281_v52, %v280_v4  ;;  %vm2884_vm2 = vmand %vm439_vm10, %vm440_vm11 }
  0x9e   :  { %v181_v46 = vsel %vm2815_vm9, %v1907_v34, %v180_v2  ;;  %v341_v61 = vadd.f32 %v333_v40, %v2765_v11  ;;  %v1970_v8 = vunpack.i.h.bf16 %v1968_v47  ;;  %vm443_vm14 = vsmask.f32 5376 }
  0x9f   :  { %v184_v53 = vsel %vm2815_vm9, %v1908_v26, %v183_v6  ;;  %182 = vst [vmem:[%s3448_s3] sm:$0x11] %v181_v46  ;;  %v282_v7 = vmax.f32 %v250_v62, %v274_v58  ;;  %v1969_v1 = vunpack.i.l.bf16 %v1968_v47  ;;  %v3477_v5 = vunpack.c.l.bf16 %v2743_v23  ;;  %vm2895_vm3 = vmand %vm442_vm12, %vm443_vm14 }
  0xa0   :  { %185 = vst [vmem:[%s3448_s3 + $0x10] sm:$0x11] %v184_v53  ;;  %v349_v49 = vmax.f32 %v341_v61, 0.0  ;;  %v1978_v44 = vpop.permute.xlu0 %1977  ;;  %v299_v24 = vshll.u32 %v1909_v30, 16  ;;  %v408_v60 = vsel %vm144_vm0, %v1970_v8, %v1974_v38  ;;  %v1985_v37 = vunpack.i.h.bf16 %v2831_v17  ;;  %vm2923_vm4 = vmor %vm2895_vm3, %vm2884_vm2 }
  0xa1   :  { %v464_v48 = vmul.f32 %v3477_v5, %v2760_v29  ;;  %v1910_v10 = vpack.c.bf16 %v283_v13, %v282_v7  ;;  %v416_v2 = vmax.f32 %v2312_v18, %v408_v60  ;;  %v1984_v47 = vunpack.i.l.bf16 %v2831_v17  ;;  %v2864_v9 = vpop.permute.xlu1 %1992  ;;  %v2879_v17 = vld [vmem:[%s3445_s0 + $0x50] sm:$0x11] }
  0xa2   :  { %v365_v4 = vrot.slane %v349_v49, 1  ;;  %v1871_v58 = vrot.slane %v299_v24, 9  ;;  %v407_v6 = vsel %vm144_vm0, %v1969_v1, %v1970_v8  ;;  %v3478_v13 = vunpack.c.l.bf16 %v2701_v56 }
  0xa3   :  { %v472_v0 = vadd.f32 %v464_v48, %v2765_v11  ;;  %v304_v23 = vshll.u32 %v1910_v10, 16  ;;  %v1980_v45 = vunpack.i.h.bf16 %v1978_v44  ;;  %v1979_v40 = vunpack.i.l.bf16 %v1978_v44 }
  0xa4   :  { %v337_v34 = vmul.f32 %v3478_v13, %v2760_v29  ;;  %v381_v18 = vmax.f32 %v349_v49, %v365_v4  ;;  %v595_v22 = vunpack.c.l.bf16 %v2879_v17  ;;  %v1995_v52 = vunpack.i.h.bf16 %v2864_v9  ;;  %v1988_v3 = vpop.permute.xlu0 %1987  ;;  %v2148_v49 = vld [vmem:[%s3445_s0 + $0x10] sm:$0x11] }
  0xa5   :  { %v480_v38 = vmax.f32 %v472_v0, 0.0  ;;  %v1872_v26 = vrot.slane %v304_v23, 9  ;;  %v410_v30 = vsel %vm144_vm0, %v1979_v40, %v1980_v45  ;;  %v1994_v8 = vunpack.i.l.bf16 %v2864_v9  ;;  %v446_v9 = vld [vmem:[%s3448_s3] sm:$0x22] }
  0xa6   :  { %v345_v62 = vadd.f32 %v337_v34, %v2765_v11  ;;  %v315_v46 = vld [vmem:[%s3448_s3] sm:$0x11]  ;;  %v415_v53 = vmax.f32 %v381_v18, %v407_v6  ;;  %v591_v1 = vunpack.c.l.bf16 %v2148_v49  ;;  %v1975_v44 = vunpack.i.h.bf16 %v2794_v33 }
  0xa7   :  { %v496_v7 = vrot.slane %v480_v38, 1  ;;  %v316_v5 = vsel %vm2872_vm1, %v1871_v58, %v315_v46  ;;  %v318_v48 = vld [vmem:[%s3448_s3 + $0x10] sm:$0x11]  ;;  %v538_v0 = vsel %vm144_vm0, %v1984_v47, %v1985_v37  ;;  %v418_v47 = vmax.f32 %v2310_v16, %v410_v30  ;;  %v2149_v30 = vld [vmem:[%s3445_s0 + $0x10] sm:$0x22] }
  0xa8   :  { %v353_v10 = vmax.f32 %v345_v62, 0.0  ;;  %317 = vst [vmem:[%s3448_s3] sm:$0x11] %v316_v5  ;;  %v319_v24 = vsel %vm2872_vm1, %v1872_v26, %v318_v48  ;;  %v1911_v60 = vpack.c.bf16 %v416_v2, %v415_v53  ;;  %v409_v23 = vsel %vm144_vm0, %v1975_v44, %v1979_v40 }
  0xa9   :  { %v512_v4 = vmax.f32 %v480_v38, %v496_v7  ;;  %320 = vst [vmem:[%s3448_s3 + $0x10] sm:$0x11] %v319_v24  ;;  %v3487_v58 = vunpack.c.l.bf16 %v2325_v36  ;;  %v541_v34 = vsel %vm144_vm0, %v1994_v8, %v1995_v52  ;;  %v1990_v18 = vunpack.i.h.bf16 %v1988_v3 }
  0xaa   :  { %v369_v2 = vrot.slane %v353_v10, 1  ;;  %v1875_v13 = vrot.slane %v1911_v60, 9  ;;  %v1989_v38 = vunpack.i.l.bf16 %v1988_v3  ;;  %v2936_v45 = vpop.permute.xlu1 %2002  ;;  %vm576_vm5 = vsmask.f32 7942 }
  0xab   :  { %v468_v6 = vmul.f32 %v3487_v58, %v2760_v29  ;;  %vm578_vm6 = vsmask.f32 7958  ;;  %v546_v16 = vmax.f32 %v512_v4, %v538_v0  ;;  %v599_v36 = vmul.f32 %v591_v1, %v2760_v29  ;;  %vm2954_vm7 = vmand %vm439_vm10, %vm576_vm5 }
  0xac   :  { %v385_v26 = vmax.f32 %v353_v10, %v369_v2  ;;  %v447_v40 = vsel %vm2923_vm4, %v1875_v13, %v446_v9  ;;  %v539_v62 = vsel %vm144_vm0, %v1985_v37, %v1989_v38  ;;  %v1998_v46 = vpop.permute.xlu0 %1997  ;;  %v2004_v7 = vunpack.i.l.bf16 %v2936_v45  ;;  %vm579_vm8 = vmand %vm442_vm12, %vm578_vm6 }
  0xad   :  { %v476_v56 = vadd.f32 %v468_v6, %v2765_v11  ;;  %448 = vst [vmem:[%s3448_s3] sm:$0x22] %v447_v40  ;;  %v547_v53 = vmax.f32 %v2343_v57, %v539_v62  ;;  %v720_v3 = vunpack.c.l.bf16 %v2149_v30  ;;  %v549_v37 = vmax.f32 %v2367_v42, %v541_v34  ;;  %v449_v42 = vld [vmem:[%s3448_s3 + $0x10] sm:$0x22]  ;;  %vm2970_vm12 = vmor %vm579_vm8, %vm2954_vm7 }
  0xae   :  { %v417_v52 = vmax.f32 %v385_v26, %v409_v23  ;;  %v540_v1 = vsel %vm144_vm0, %v1990_v18, %v1994_v8  ;;  %v607_v5 = vadd.f32 %v599_v36, %v2765_v11  ;;  %v2000_v10 = vunpack.i.h.bf16 %v1998_v46  ;;  %v2150_v26 = vld [vmem:[%s3445_s0 + $0x50] sm:$0x22] }
  0xaf   :  { %v484_v61 = vmax.f32 %v476_v56, 0.0  ;;  %v1913_v44 = vpack.c.bf16 %v547_v53, %v546_v16  ;;  %vm703_vm10 = vcmask 1042434   ;;  %vm704_vm11 = vsmask.f32 2304  ;;  %v2965_v4 = vpop.permute.xlu1 %2012 }
  0xb0   :  { %v1912_v57 = vpack.c.bf16 %v418_v47, %v417_v52  ;;  %v615_v24 = vmax.f32 %v607_v5, 0.0  ;;  %v1999_v60 = vunpack.i.l.bf16 %v1998_v46  ;;  %v674_v2 = vsel %vm144_vm0, %v2000_v10, %v2004_v7  ;;  %vm2995_vm15 = vmand %vm703_vm10, %vm704_vm11 }
  0xb1   :  { %v500_v48 = vrot.slane %v484_v61, 1  ;;  %v565_v9 = vshll.u32 %v1913_v44, 16  ;;  %vm706_vm13 = vcmask 784390   ;;  %vm707_vm14 = vsmask.f32 6400  ;;  %v2008_v6 = vpop.permute.xlu0 %2007 }
  0xb2   :  { %v1876_v8 = vrot.slane %v1912_v57, 9  ;;  %v631_v47 = vrot.slane %v615_v24, 1  ;;  %v728_v58 = vmul.f32 %v720_v3, %v2760_v29  ;;  %v673_v38 = vsel %vm144_vm0, %v1999_v60, %v2000_v10  ;;  %vm708_vm2 = vmand %vm706_vm13, %vm707_vm14  ;;  %v710_v44 = vld [vmem:[%s3448_s3] sm:$0x44] }
  0xb3   :  { %v516_v0 = vmax.f32 %v484_v61, %v500_v48  ;;  %v1879_v18 = vrot.slane %v565_v9, 10  ;;  %v724_v56 = vunpack.c.l.bf16 %v2150_v26  ;;  %v682_v62 = vmax.f32 %v2392_v20, %v674_v2  ;;  %vm3014_vm3 = vmor %vm708_vm2, %vm2995_vm15  ;;  %v2153_v61 = vld [vmem:[%s3445_s0 + $0x10] sm:$0x88] }
  0xb4   :  { %v450_v13 = vsel %vm2923_vm4, %v1876_v8, %v449_v42  ;;  %v581_v40 = vld [vmem:[%s3448_s3] sm:$0x22]  ;;  %v647_v16 = vmax.f32 %v615_v24, %v631_v47  ;;  %v603_v36 = vmul.f32 %v595_v22, %v2760_v29  ;;  %v2010_v53 = vunpack.i.h.bf16 %v2008_v6  ;;  %v975_v48 = vld [vmem:[%s3448_s3 + $0x10] sm:$0x88] }
  0xb5   :  { %v548_v34 = vmax.f32 %v516_v0, %v540_v1  ;;  %451 = vst [vmem:[%s3448_s3 + $0x10] sm:$0x22] %v450_v13  ;;  %v582_v52 = vsel %vm2970_vm12, %v1879_v18, %v581_v40  ;;  %v2009_v7 = vunpack.i.l.bf16 %v2008_v6  ;;  %v736_v17 = vadd.f32 %v728_v58, %v2765_v11  ;;  %v3006_v30 = vpop.permute.xlu1 %2022  ;;  %v2151_v1 = vld [vmem:[%s3445_s0 + $0x10] sm:$0x44] }
  0xb6   :  { %583 = vst [vmem:[%s3448_s3] sm:$0x22] %v582_v52  ;;  %v681_v20 = vmax.f32 %v647_v16, %v673_v38  ;;  %v611_v22 = vadd.f32 %v603_v36, %v2765_v11  ;;  %v853_v5 = vunpack.c.l.bf16 %v2151_v1  ;;  %v2005_v57 = vunpack.i.h.bf16 %v2936_v45  ;;  %v2152_v36 = vld [vmem:[%s3445_s0 + $0x50] sm:$0x44] }
  0xb7   :  { %v1914_v46 = vpack.c.bf16 %v549_v37, %v548_v34  ;;  %v676_v10 = vsel %vm144_vm0, %v2009_v7, %v2010_v53  ;;  %v732_v42 = vmul.f32 %v724_v56, %v2760_v29  ;;  %v744_v0 = vmax.f32 %v736_v17, 0.0  ;;  %v2155_v17 = vld [vmem:[%s3445_s0 + $0x60] sm:$0x44] }
  0xb8   :  { %v1915_v37 = vpack.c.bf16 %v682_v62, %v681_v20  ;;  %v619_v49 = vmax.f32 %v611_v22, 0.0  ;;  %v675_v2 = vsel %vm144_vm0, %v2005_v57, %v2009_v7  ;;  %v684_v34 = vmax.f32 %v2390_v15, %v676_v10 }
  0xb9   :  { %v570_v3 = vshll.u32 %v1914_v46, 16  ;;  %v740_v47 = vadd.f32 %v732_v42, %v2765_v11  ;;  %v2015_v38 = vunpack.i.h.bf16 %v2965_v4  ;;  %v2014_v26 = vunpack.i.l.bf16 %v2965_v4  ;;  %v2154_v4 = vld [vmem:[%s3445_s0 + $0x20] sm:$0x44] }
  0xba   :  { %v2018_v24 = vpop.permute.xlu0 %2017  ;;  %v699_v8 = vrot.slane %v1915_v37, 6  ;;  %v635_v9 = vrot.slane %v619_v49, 1  ;;  %v760_v40 = vrot.slane %v744_v0, 1  ;;  %v861_v15 = vmul.f32 %v853_v5, %v2760_v29  ;;  %v713_v37 = vld [vmem:[%s3448_s3 + $0x10] sm:$0x44] }
  0xbb   :  { %v1880_v60 = vrot.slane %v570_v3, 10  ;;  %v2019_v56 = vunpack.i.l.bf16 %v2018_v24  ;;  %v748_v62 = vmax.f32 %v740_v47, 0.0  ;;  %v857_v46 = vunpack.c.l.bf16 %v2152_v36 }
  0xbc   :  { %v584_v45 = vld [vmem:[%s3448_s3 + $0x10] sm:$0x22]  ;;  %v711_v6 = vsel %vm3014_vm3, %v699_v8, %v710_v44  ;;  %v651_v13 = vmax.f32 %v619_v49, %v635_v9  ;;  %v3033_v18 = vpop.permute.xlu1 %2032  ;;  %v982_v53 = vunpack.c.l.bf16 %v2153_v61  ;;  %v1363_v20 = vunpack.c.l.bf16 %v2154_v4 }
  0xbd   :  { %v585_v58 = vsel %vm2970_vm12, %v1880_v60, %v584_v45  ;;  %712 = vst [vmem:[%s3448_s3] sm:$0x44] %v711_v6  ;;  %v1367_v22 = vunpack.c.l.bf16 %v2155_v17  ;;  %v802_v3 = vsel %vm144_vm0, %v2014_v26, %v2015_v38  ;;  %v803_v49 = vsel %vm144_vm0, %v2015_v38, %v2019_v56  ;;  %v2156_v45 = vld [vmem:[%s3445_s0 + $0x30] sm:$0x11] }
  0xbe   :  { %586 = vst [vmem:[%s3448_s3 + $0x10] sm:$0x22] %v585_v58  ;;  %v683_v16 = vmax.f32 %v651_v13, %v675_v2  ;;  %v3047_v52 = vpop.permute.xlu0 %2027  ;;  %v776_v1 = vmax.f32 %v744_v0, %v760_v40  ;;  %v764_v57 = vrot.slane %v748_v62, 1  ;;  %v869_v44 = vadd.f32 %v861_v15, %v2765_v11 }
  0xbf   :  { %v2025_v42 = vunpack.i.h.bf16 %v3006_v30  ;;  %v2024_v60 = vunpack.i.l.bf16 %v3006_v30  ;;  %v2020_v8 = vunpack.i.h.bf16 %v2018_v24  ;;  %v865_v9 = vmul.f32 %v857_v46, %v2760_v29 }
  0xc0   :  { %v1916_v7 = vpack.c.bf16 %v684_v34, %v683_v16  ;;  %v1617_v2 = vunpack.c.l.bf16 %v2156_v45  ;;  %v811_v47 = vmax.f32 %v2403_v43, %v803_v49  ;;  %v1113_v58 = vunpack.c.l.bf16 %v2532_v55 }
  0xc1   :  { %v1621_v6 = vunpack.c.l.bf16 %v2547_v54  ;;  %v1117_v13 = vunpack.c.l.bf16 %v2558_v19  ;;  %v990_v30 = vmul.f32 %v982_v53, %v2760_v29  ;;  %v810_v34 = vmax.f32 %v776_v1, %v802_v3 }
  0xc2   :  { %v700_v5 = vrot.slane %v1916_v7, 6  ;;  %v780_v38 = vmax.f32 %v748_v62, %v764_v57  ;;  %v877_v26 = vmax.f32 %v869_v44, 0.0  ;;  %v1371_v56 = vmul.f32 %v1363_v20, %v2760_v29 }
  0xc3   :  { %v3064_v10 = vpop.permute.xlu1 %2042  ;;  %v805_v43 = vsel %vm144_vm0, %v2024_v60, %v2025_v42  ;;  %v804_v40 = vsel %vm144_vm0, %v2020_v8, %v2024_v60  ;;  %v873_v54 = vadd.f32 %v865_v9, %v2765_v11  ;;  %v1375_v16 = vmul.f32 %v1367_v22, %v2760_v29 }
  0xc4   :  { %v714_v0 = vsel %vm3014_vm3, %v700_v5, %v713_v37  ;;  %v1917_v15 = vpack.c.bf16 %v811_v47, %v810_v34  ;;  %v2034_v36 = vunpack.i.l.bf16 %v3033_v18  ;;  %v2030_v46 = vunpack.i.h.bf16 %v3047_v52 }
  0xc5   :  { %715 = vst [vmem:[%s3448_s3 + $0x10] sm:$0x44] %v714_v0  ;;  %v1625_v62 = vmul.f32 %v1617_v2, %v2760_v29  ;;  %v1233_v53 = vunpack.c.l.bf16 %v2603_v59  ;;  %v1487_v7 = vunpack.c.l.bf16 %v2621_v32  ;;  %v1237_v4 = vunpack.c.l.bf16 %v2627_v39 }
  0xc6   :  { %v3082_v24 = vpop.permute.xlu0 %2037  ;;  %v998_v20 = vadd.f32 %v990_v30, %v2765_v11  ;;  %v813_v17 = vmax.f32 %v2446_v51, %v805_v43  ;;  %v812_v22 = vmax.f32 %v780_v38, %v804_v40  ;;  %v893_v3 = vrot.slane %v877_v26, 1 }
  0xc7   :  { %v1379_v37 = vadd.f32 %v1371_v56, %v2765_v11  ;;  %v1491_v49 = vunpack.c.l.bf16 %v2642_v28  ;;  %v2035_v1 = vunpack.i.h.bf16 %v3033_v18  ;;  %v881_v5 = vmax.f32 %v873_v54, 0.0  ;;  %v2159_v28 = vld [vmem:[%s3445_s0 + $0x50] sm:$0x88] }
  0xc8   :  { %v1383_v44 = vadd.f32 %v1375_v16, %v2765_v11  ;;  %v829_v42 = vshll.u32 %v1917_v15, 16  ;;  %v936_v60 = vsel %vm144_vm0, %v2030_v46, %v2034_v36  ;;  %v2029_v8 = vunpack.i.l.bf16 %v3047_v52 }
  0xc9   :  { %v3091_v61 = vpop.permute.xlu1 %2052  ;;  %v1633_v51 = vadd.f32 %v1625_v62, %v2765_v11  ;;  %v1006_v9 = vmax.f32 %v998_v20, 0.0  ;;  %v2045_v45 = vunpack.i.h.bf16 %v3064_v10  ;;  %v2044_v2 = vunpack.i.l.bf16 %v3064_v10 }
  0xca   :  { %v1387_v0 = vmax.f32 %v1379_v37, 0.0  ;;  %v1918_v47 = vpack.c.bf16 %v813_v17, %v812_v22  ;;  %v909_v18 = vmax.f32 %v877_v26, %v893_v3  ;;  %v2040_v30 = vunpack.i.h.bf16 %v3082_v24 }
  0xcb   :  { %v1629_v38 = vmul.f32 %v1621_v6, %v2760_v29  ;;  %v897_v56 = vrot.slane %v881_v5, 1  ;;  %v2039_v43 = vunpack.i.l.bf16 %v3082_v24  ;;  %v1391_v52 = vmax.f32 %v1383_v44, 0.0 }
  0xcc   :  { %v1403_v40 = vrot.slane %v1387_v0, 1  ;;  %v3115_v54 = vrot.slane %v829_v42, 7  ;;  %v944_v16 = vmax.f32 %v2468_v21, %v936_v60  ;;  %v935_v15 = vsel %vm144_vm0, %v2029_v8, %v2030_v46 }
  0xcd   :  { %v3102_v57 = vpop.permute.xlu0 %2047  ;;  %v1641_v62 = vmax.f32 %v1633_v51, 0.0  ;;  %v1022_v26 = vrot.slane %v1006_v9, 1  ;;  %v3122_v20 = vsel %vm144_vm0, %v2044_v2, %v2045_v45  ;;  %v833_v22 = vshll.u32 %v1918_v47, 16 }
  0xce   :  { %v1419_v6 = vmax.f32 %v1387_v0, %v1403_v40  ;;  %v2055_v24 = vunpack.i.h.bf16 %v3091_v61  ;;  %v1637_v37 = vadd.f32 %v1629_v38, %v2765_v11  ;;  %v943_v44 = vmax.f32 %v909_v18, %v935_v15 }
  0xcf   :  { %v913_v21 = vmax.f32 %v881_v5, %v897_v56  ;;  %v938_v46 = vsel %vm144_vm0, %v2039_v43, %v2040_v30  ;;  %v1407_v42 = vrot.slane %v1391_v52, 1  ;;  %v1657_v2 = vrot.slane %v1641_v62, 1 }
  0xd0   :  { %v3111_v34 = vpop.permute.xlu1 %2062  ;;  %v1121_v0 = vmul.f32 %v1113_v58, %v2760_v29  ;;  %v937_v5 = vsel %vm144_vm0, %v2035_v1, %v2039_v43  ;;  %v1645_v56 = vmax.f32 %v1637_v37, 0.0  ;;  %v3136_v15 = vrot.slane %v833_v22, 7  ;;  %v1477_v1 = vld [vmem:[%s3448_s3 + $0x8] sm:$0x22] }
  0xd1   :  { %v2065_v18 = vunpack.i.h.bf16 %v3111_v34  ;;  %v2064_v30 = vunpack.i.l.bf16 %v3111_v34  ;;  %v1125_v55 = vmul.f32 %v1117_v13, %v2760_v29  ;;  %v3143_v58 = vpack.c.bf16 %v944_v16, %v943_v44 }
  0xd2   :  { %v2058_v36 = vpop.permute.xlu0 %2057  ;;  %v3151_v43 = vadd.f32 %v1121_v0, %v2765_v11  ;;  %v1673_v22 = vmax.f32 %v1641_v62, %v1657_v2  ;;  %v1661_v37 = vrot.slane %v1645_v56, 1  ;;  %vm838_vm5 = vsmask.f32 7946 }
  0xd3   :  { %v2060_v17 = vunpack.i.h.bf16 %v2058_v36  ;;  %v2059_v3 = vunpack.i.l.bf16 %v2058_v36  ;;  %v1447_v19 = vsel %vm144_vm0, %v2064_v30, %v2065_v18  ;;  %vm3182_vm6 = vmand %vm703_vm10, %vm838_vm5  ;;  %vm840_vm7 = vsmask.f32 7962 }
  0xd4   :  { %vm841_vm8 = vmand %vm706_vm13, %vm840_vm7  ;;  %vm966_vm11 = vsmask.f32 3328  ;;  %vm968_vm13 = vcmask 785415   ;;  %vm969_vm14 = vsmask.f32 7424 }
  0xd5   :  { %v1445_v60 = vsel %vm144_vm0, %v2055_v24, %v2059_v3  ;;  %v1446_v8 = vsel %vm144_vm0, %v2059_v3, %v2060_v17  ;;  %v3138_v17 = vmax.f32 %v1006_v9, %v1022_v26  ;;  %v945_v9 = vmax.f32 %v913_v21, %v937_v5  ;;  %v1480_v5 = vld [vmem:[%s3448_s3 + $0x18] sm:$0x22]  ;;  %vm3209_vm10 = vmor %vm841_vm8, %vm3182_vm6 }
  0xd6   :  { %v2073_v51 = vpop.permute.xlu1 %2072  ;;  %v1453_v47 = vmax.f32 %v1419_v6, %v1445_v60  ;;  %v1454_v40 = vmax.f32 %v2507_v41, %v1446_v8  ;;  %v946_v41 = vmax.f32 %v2457_v63, %v938_v46  ;;  %v1423_v26 = vmax.f32 %v1391_v52, %v1407_v42  ;;  %vm3264_vm2 = vmand %vm968_vm13, %vm969_vm14 }
  0xd7   :  { %v2075_v36 = vunpack.i.h.bf16 %v2073_v51  ;;  %v2074_v38 = vunpack.i.l.bf16 %v2073_v51  ;;  %v1072_v63 = vmax.f32 %v3138_v17, %v3122_v20  ;;  %v3162_v52 = vadd.f32 %v1125_v55, %v2765_v11 }
  0xd8   :  { %v1927_v24 = vpack.c.bf16 %v1454_v40, %v1453_v47  ;;  %v1137_v42 = vmax.f32 %v3151_v43, 0.0  ;;  %v1241_v8 = vmul.f32 %v1233_v53, %v2760_v29  ;;  %v3175_v47 = vpack.c.bf16 %v946_v41, %v945_v9 }
  0xd9   :  { %v1700_v34 = vsel %vm144_vm0, %v2074_v38, %v2075_v36  ;;  %v2049_v40 = vunpack.i.l.bf16 %v3102_v57  ;;  %v1677_v36 = vmax.f32 %v1645_v56, %v1661_v37  ;;  %v1141_v56 = vmax.f32 %v3162_v52, 0.0 }
  0xda   :  { %v1897_v6 = vrot.slane %v1927_v24, 9  ;;  %v2068_v3 = vpop.permute.xlu0 %2067  ;;  %v1708_v46 = vmax.f32 %v2576_v50, %v1700_v34  ;;  %v1455_v50 = vmax.f32 %v1423_v26, %v1447_v19  ;;  %v1729_v24 = vld [vmem:[%s3448_s3 + $0x8] sm:$0x44]  ;;  %v1153_v55 = vrot.slane %v1137_v42, 1  ;;  %v843_v26 = vld [vmem:[%s3448_s3] sm:$0x44] }
  0xdb   :  { %v2070_v13 = vunpack.i.h.bf16 %v2068_v3  ;;  %v2069_v16 = vunpack.i.l.bf16 %v2068_v3  ;;  %v3191_v41 = vadd.f32 %v1241_v8, %v2765_v11  ;;  %v1065_v3 = vsel %vm144_vm0, %v2045_v45, %v2049_v40 }
  0xdc   :  { %v1478_v44 = vsel %vm2923_vm4, %v1897_v6, %v1477_v1  ;;  %v846_v6 = vld [vmem:[%s3448_s3 + $0x10] sm:$0x44]  ;;  %v962_v37 = vrot.slane %v3175_v47, 7  ;;  %v844_v33 = vsel %vm3209_vm10, %v3115_v54, %v843_v26  ;;  %v1157_v8 = vrot.slane %v1141_v56, 1  ;;  %v2157_v26 = vld [vmem:[%s3445_s0 + $0x30] sm:$0x22] }
  0xdd   :  { %v3159_v60 = vpop.permute.xlu1 %2082  ;;  %1479 = vst [vmem:[%s3448_s3 + $0x8] sm:$0x22] %v1478_v44  ;;  %v1699_v62 = vsel %vm144_vm0, %v2070_v13, %v2074_v38  ;;  %v1448_v21 = vsel %vm144_vm0, %v2065_v18, %v2069_v16  ;;  %v847_v39 = vsel %vm3209_vm10, %v3136_v15, %v846_v6  ;;  %845 = vst [vmem:[%s3448_s3] sm:$0x44] %v844_v33  ;;  %vm1098_vm5 = vsmask.f32 7950 }
  0xde   :  { %v1707_v51 = vmax.f32 %v1673_v22, %v1699_v62  ;;  %v1456_v2 = vmax.f32 %v2520_v12, %v1448_v21  ;;  %v2084_v0 = vunpack.i.l.bf16 %v3159_v60  ;;  %v961_v22 = vrot.slane %v3143_v58, 7  ;;  %v1732_v21 = vld [vmem:[%s3448_s3 + $0x18] sm:$0x44]  ;;  %848 = vst [vmem:[%s3448_s3 + $0x10] sm:$0x44] %v847_v39  ;;  %v3505_v12 = vld [vmem:[#allocation4_spill] sm:$0xff] }
  0xdf   :  { %vm1100_vm6 = vsmask.f32 7966  ;;  %v1739_v6 = vunpack.c.l.bf16 %v2157_v26  ;;  %v1499_v33 = vmul.f32 %v1491_v49, %v2760_v29  ;;  %v986_v49 = vunpack.c.l.bf16 %v2159_v28 }
  0xe0   :  { %v2078_v38 = vpop.permute.xlu0 %2077  ;;  %v1931_v18 = vpack.c.bf16 %v1708_v46, %v1707_v51  ;;  %v1928_v59 = vpack.c.bf16 %v1456_v2, %v1455_v50  ;;  %v1257_v46 = vmax.f32 %v3191_v41, 0.0  ;;  %v1169_v50 = vmax.f32 %v1137_v42, %v1153_v55  ;;  %vm3316_vm8 = vmand %vm968_vm13, %vm1100_vm6 }
  0xe1   :  { %v2080_v53 = vunpack.i.h.bf16 %v2078_v38  ;;  %v2079_v30 = vunpack.i.l.bf16 %v2078_v38  ;;  %v2085_v51 = vunpack.i.h.bf16 %v3159_v60  ;;  %v1495_v60 = vmul.f32 %v1487_v7, %v2760_v29 }
  0xe2   :  { %v1725_v1 = vrot.slane %v1931_v18, 6  ;;  %v1898_v34 = vrot.slane %v1928_v59, 9  ;;  %v3218_v10 = vpop.permute.xlu1 %2092  ;;  %v1273_v38 = vrot.slane %v1257_v46, 1  ;;  %v972_v18 = vld [vmem:[%s3448_s3] sm:$0x88] }
  0xe3   :  { %v1702_v43 = vsel %vm144_vm0, %v2080_v53, %v2084_v0  ;;  %v1701_v9 = vsel %vm144_vm0, %v2079_v30, %v2080_v53  ;;  %v2094_v32 = vunpack.i.l.bf16 %v3218_v10 }
  0xe4   :  { %v1710_v19 = vmax.f32 %v2591_v35, %v1702_v43  ;;  %v1709_v13 = vmax.f32 %v1677_v36, %v1701_v9  ;;  %v1730_v44 = vsel %vm3014_vm3, %v1725_v1, %v1729_v24  ;;  %v1481_v58 = vsel %vm2923_vm4, %v1898_v34, %v1480_v5  ;;  %v1223_v1 = vld [vmem:[%s3448_s3 + $0x8] sm:$0x11] }
  0xe5   :  { %v1245_v35 = vmul.f32 %v1237_v4, %v2760_v29  ;;  %1731 = vst [vmem:[%s3448_s3 + $0x8] sm:$0x44] %v1730_v44  ;;  %1482 = vst [vmem:[%s3448_s3 + $0x18] sm:$0x22] %v1481_v58  ;;  %v3500_v4 = vld [vmem:[#allocation2_spill] sm:$0xff]  ;;  %vm965_vm4 = vcmask 1043459   ;;  %v2095_v36 = vunpack.i.h.bf16 %v3218_v10  ;;  %v1503_v58 = vadd.f32 %v1495_v60, %v2765_v11 }
  0xe6   :  { %v1932_v45 = vpack.c.bf16 %v1710_v19, %v1709_v13  ;;  %v1073_v62 = vmax.f32 %v3500_v4, %v1065_v3  ;;  %vm3253_vm15 = vmand %vm965_vm4, %vm966_vm11 }
  0xe7   :  { %v2088_v15 = vpop.permute.xlu0 %2087  ;;  %v3250_v42 = vadd.f32 %v1245_v35, %v2765_v11  ;;  %vm3307_vm7 = vmand %vm965_vm4, %vm1098_vm5  ;;  %v1197_v17 = vsel %vm144_vm0, %v2094_v32, %v2095_v36 }
  0xe8   :  { %v1726_v54 = vrot.slane %v1932_v45, 6  ;;  %v2090_v2 = vunpack.i.h.bf16 %v2088_v15  ;;  %v2089_v0 = vunpack.i.l.bf16 %v2088_v15  ;;  %v1921_v3 = vpack.c.bf16 %v1073_v62, %v1072_v63  ;;  %vm1102_vm4 = vmor %vm3316_vm8, %vm3307_vm7 }
  0xe9   :  { %v1261_v34 = vmax.f32 %v3250_v42, 0.0  ;;  %v1226_v42 = vld [vmem:[%s3448_s3 + $0x18] sm:$0x11] }
  0xea   :  { %v1733_v40 = vsel %vm3014_vm3, %v1726_v54, %v1732_v21  ;;  %v1195_v7 = vsel %vm144_vm0, %v2085_v51, %v2089_v0  ;;  %v1196_v59 = vsel %vm144_vm0, %v2089_v0, %v2090_v2  ;;  %v2103_v53 = vpop.permute.xlu1 %2102  ;;  %vm971_vm3 = vmor %vm3264_vm2, %vm3253_vm15  ;;  %v1091_v39 = vshll.u32 %v1921_v3, 16  ;;  %v3511_v2 = vld [vmem:[#allocation5_spill] sm:$0xff] }
  0xeb   :  { %1734 = vst [vmem:[%s3448_s3 + $0x18] sm:$0x44] %v1733_v40  ;;  %v1203_v30 = vmax.f32 %v1169_v50, %v1195_v7  ;;  %v1204_v24 = vmax.f32 %v3505_v12, %v1196_v59  ;;  %v2105_v55 = vunpack.i.h.bf16 %v2103_v53  ;;  %v2104_v41 = vunpack.i.l.bf16 %v2103_v53  ;;  %v2158_v50 = vld [vmem:[%s3445_s0 + $0x70] sm:$0x22] }
  0xec   :  { %v973_v43 = vsel %vm971_vm3, %v961_v22, %v972_v18  ;;  %v976_v9 = vsel %vm971_vm3, %v962_v37, %v975_v48  ;;  %v1173_v22 = vmax.f32 %v1141_v56, %v1157_v8  ;;  %v1289_v37 = vmax.f32 %v1257_v46, %v1273_v38  ;;  %v3510_v56 = vld [vmem:[#allocation6_spill] sm:$0xff] }
  0xed   :  { %v1923_v19 = vpack.c.bf16 %v1204_v24, %v1203_v30  ;;  %v1316_v13 = vsel %vm144_vm0, %v2104_v41, %v2105_v55  ;;  %974 = vst [vmem:[%s3448_s3] sm:$0x88] %v973_v43  ;;  %977 = vst [vmem:[%s3448_s3 + $0x10] sm:$0x88] %v976_v9  ;;  %v2098_v44 = vpop.permute.xlu0 %2097  ;;  %v1277_v46 = vrot.slane %v1261_v34, 1  ;;  %v1747_v8 = vmul.f32 %v1739_v6, %v2760_v29  ;;  %v3512_v9 = vld [vmem:[#allocation8_spill] sm:$0xff] }
  0xee   :  { %v2100_v10 = vunpack.i.h.bf16 %v2098_v44  ;;  %v2099_v35 = vunpack.i.l.bf16 %v2098_v44  ;;  %v1324_v45 = vmax.f32 %v3510_v56, %v1316_v13  ;;  %v1743_v54 = vunpack.c.l.bf16 %v2158_v50 }
  0xef   :  { %v1224_v63 = vsel %vm2815_vm9, %v1923_v19, %v1223_v1  ;;  %v1205_v15 = vmax.f32 %v1173_v22, %v1197_v17  ;;  %v1511_v40 = vmax.f32 %v1503_v58, 0.0  ;;  %v1293_v60 = vmax.f32 %v1261_v34, %v1277_v46 }
  0xf0   :  { %1225 = vst [vmem:[%s3448_s3 + $0x8] sm:$0x11] %v1224_v63  ;;  %v1315_v4 = vsel %vm144_vm0, %v2100_v10, %v2104_v41  ;;  %v1198_v62 = vsel %vm144_vm0, %v2095_v36, %v2099_v35  ;;  %v2113_v21 = vpop.permute.xlu1 %2112  ;;  %v1507_v18 = vadd.f32 %v1499_v33, %v2765_v11  ;;  %v1755_v59 = vadd.f32 %v1747_v8, %v2765_v11 }
  0xf1   :  { %v1323_v51 = vmax.f32 %v1289_v37, %v1315_v4  ;;  %v1206_v0 = vmax.f32 %v3511_v2, %v1198_v62  ;;  %v2114_v47 = vunpack.i.l.bf16 %v2113_v21  ;;  %v1751_v24 = vmul.f32 %v1743_v54, %v2760_v29 }
  0xf2   :  { %v1527_v31 = vrot.slane %v1511_v40, 1  ;;  %v994_v34 = vmul.f32 %v986_v49, %v2760_v29  ;;  %v1515_v19 = vmax.f32 %v1507_v18, 0.0  ;;  %v1763_v13 = vmax.f32 %v1755_v59, 0.0  ;;  %v1860_v23 = vld [vmem:[%s3448_s3 + $0x18] sm:$0x44] }
  0xf3   :  { %v1925_v36 = vpack.c.bf16 %v1324_v45, %v1323_v51  ;;  %v1924_v38 = vpack.c.bf16 %v1206_v0, %v1205_v15  ;;  %v2108_v5 = vpop.permute.xlu0 %2107  ;;  %v1759_v44 = vadd.f32 %v1751_v24, %v2765_v11  ;;  %v2115_v63 = vunpack.i.h.bf16 %v2113_v21  ;;  %v3513_v15 = vld [vmem:[#allocation7_spill] sm:$0xff] }
  0xf4   :  { %v1103_v48 = vld [vmem:[%s3448_s3] sm:$0x88]  ;;  %v2110_v32 = vunpack.i.h.bf16 %v2108_v5  ;;  %v2109_v7 = vunpack.i.l.bf16 %v2108_v5  ;;  %v1543_v58 = vmax.f32 %v1511_v40, %v1527_v31  ;;  %v1002_v29 = vadd.f32 %v994_v34, %v2765_v11 }
  0xf5   :  { %v1104_v53 = vsel %vm1102_vm4, %v1091_v39, %v1103_v48  ;;  %v1342_v30 = vshll.u32 %v1925_v36, 16  ;;  %v1227_v12 = vsel %vm2815_vm9, %v1924_v38, %v1226_v42  ;;  %v1531_v45 = vrot.slane %v1515_v19, 1 }
  0xf6   :  { %1105 = vst [vmem:[%s3448_s3] sm:$0x88] %v1104_v53  ;;  %1228 = vst [vmem:[%s3448_s3 + $0x18] sm:$0x11] %v1227_v12  ;;  %v1318_v41 = vsel %vm144_vm0, %v2110_v32, %v2114_v47  ;;  %v1317_v1 = vsel %vm144_vm0, %v2109_v7, %v2110_v32  ;;  %v1779_v46 = vrot.slane %v1763_v13, 1  ;;  %v1767_v50 = vmax.f32 %v1759_v44, 0.0 }
  0xf7   :  { %v1353_v55 = vld [vmem:[%s3448_s3 + $0x8] sm:$0x11]  ;;  %v1893_v43 = vrot.slane %v1342_v30, 9  ;;  %v1326_v26 = vmax.f32 %v3512_v9, %v1318_v41  ;;  %v1325_v6 = vmax.f32 %v1293_v60, %v1317_v1  ;;  %v2123_v3 = vpop.permute.xlu1 %2122  ;;  %v1010_v49 = vmax.f32 %v1002_v29, 0.0  ;;  %v1607_v12 = vld [vmem:[%s3448_s3 + $0x8] sm:$0x22] }
  0xf8   :  { %v2125_v0 = vunpack.i.h.bf16 %v2123_v3  ;;  %v2124_v28 = vunpack.i.l.bf16 %v2123_v3  ;;  %v1783_v40 = vrot.slane %v1767_v50, 1  ;;  %v1547_v36 = vmax.f32 %v1515_v19, %v1531_v45 }
  0xf9   :  { %v1354_v22 = vsel %vm2872_vm1, %v1893_v43, %v1353_v55  ;;  %v1926_v37 = vpack.c.bf16 %v1326_v26, %v1325_v6  ;;  %v1795_v60 = vmax.f32 %v1763_v13, %v1779_v46  ;;  %v1026_v32 = vrot.slane %v1010_v49, 1 }
  0xfa   :  { %1355 = vst [vmem:[%s3448_s3 + $0x8] sm:$0x11] %v1354_v22  ;;  %v2118_v17 = vpop.permute.xlu0 %2117  ;;  %v1571_v18 = vsel %vm144_vm0, %v2124_v28, %v2125_v0  ;;  %v2054_v7 = vunpack.i.l.bf16 %v3091_v61  ;;  %v2050_v59 = vunpack.i.h.bf16 %v3102_v57  ;;  %v1799_v41 = vmax.f32 %v1767_v50, %v1783_v40  ;;  %v3514_v61 = vld [vmem:[#allocation9_spill] sm:$0xff] }
  0xfb   :  { %v1347_v10 = vshll.u32 %v1926_v37, 16  ;;  %v2120_v35 = vunpack.i.h.bf16 %v2118_v17  ;;  %v2119_v56 = vunpack.i.l.bf16 %v2118_v17  ;;  %v1579_v1 = vmax.f32 %v1547_v36, %v1571_v18 }
  0xfc   :  { %v1042_v6 = vmax.f32 %v1010_v49, %v1026_v32  ;;  %v1066_v3 = vsel %vm144_vm0, %v2050_v59, %v2054_v7 }
  0xfd   :  { %v1894_v33 = vrot.slane %v1347_v10, 9  ;;  %v1356_v39 = vld [vmem:[%s3448_s3 + $0x18] sm:$0x11]  ;;  %v1569_v4 = vsel %vm144_vm0, %v2115_v63, %v2119_v56  ;;  %v1570_v62 = vsel %vm144_vm0, %v2119_v56, %v2120_v35  ;;  %v2133_v8 = vpop.permute.xlu1 %2132 }
  0xfe   :  { %v1577_v54 = vmax.f32 %v1543_v58, %v1569_v4  ;;  %v1578_v11 = vmax.f32 %v3513_v15, %v1570_v62  ;;  %v2135_v21 = vunpack.i.h.bf16 %v2133_v8  ;;  %v2134_v51 = vunpack.i.l.bf16 %v2133_v8  ;;  %v1610_v4 = vld [vmem:[%s3448_s3 + $0x18] sm:$0x22]  ;;  %v1857_v62 = vld [vmem:[%s3448_s3 + $0x8] sm:$0x44] }
  0xff   :  { %v1357_v2 = vsel %vm2872_vm1, %v1894_v33, %v1356_v39  ;;  %v1074_v35 = vmax.f32 %v1042_v6, %v1066_v3  ;;  %v3515_v33 = vld [vmem:[#allocation3_spill] sm:$0xff] }
 0x100   :  { %1358 = vst [vmem:[%s3448_s3 + $0x18] sm:$0x11] %v1357_v2  ;;  %v1929_v42 = vpack.c.bf16 %v1578_v11, %v1577_v54  ;;  %v1822_v47 = vsel %vm144_vm0, %v2134_v51, %v2135_v21  ;;  %v1106_v21 = vld [vmem:[%s3448_s3 + $0x10] sm:$0x88] }
 0x101   :  { %v2128_v5 = vpop.permute.xlu0 %2127  ;;  %v1830_v30 = vmax.f32 %v2746_v14, %v1822_v47 }
 0x102   :  { %v1596_v38 = vshll.u32 %v1929_v42, 16  ;;  %v2130_v48 = vunpack.i.h.bf16 %v2128_v5  ;;  %v2129_v27 = vunpack.i.l.bf16 %v2128_v5 }
 0x104   :  { %v1901_v53 = vrot.slane %v1596_v38, 10  ;;  %v1821_v24 = vsel %vm144_vm0, %v2130_v48, %v2134_v51  ;;  %v1572_v55 = vsel %vm144_vm0, %v2125_v0, %v2129_v27  ;;  %v1820_v9 = vpop.permute.xlu1 %1819 }
 0x105   :  { %v1829_v34 = vmax.f32 %v1795_v60, %v1821_v24  ;;  %v1580_v43 = vmax.f32 %v3514_v61, %v1572_v55  ;;  %v2138_v57 = vpop.permute.xlu0 %2137 }
 0x106   :  { %v1608_v31 = vsel %vm2970_vm12, %v1901_v53, %v1607_v12  ;;  %v2140_v14 = vunpack.i.h.bf16 %v2138_v57  ;;  %v2139_v26 = vunpack.i.l.bf16 %v2138_v57 }
 0x107   :  { %1609 = vst [vmem:[%s3448_s3 + $0x8] sm:$0x22] %v1608_v31  ;;  %v1933_v19 = vpack.c.bf16 %v1830_v30, %v1829_v34  ;;  %v1930_v13 = vpack.c.bf16 %v1580_v43, %v1579_v1 }
 0x108   :  { %v1823_v22 = vsel %vm144_vm0, %v2139_v26, %v2140_v14  ;;  %v1824_v37 = vsel %vm144_vm0, %v2140_v14, %v1820_v9 }
 0x109   :  { %v1848_v44 = vshll.u32 %v1933_v19, 16  ;;  %v1601_v58 = vshll.u32 %v1930_v13, 16  ;;  %v1831_v17 = vmax.f32 %v1799_v41, %v1823_v22  ;;  %v1832_v29 = vmax.f32 %v2754_v25, %v1824_v37  ;;  %v1063_v63 = vpop.permute.xlu0 %1062 }
 0x10a   :  { %v1067_v10 = vsel %vm144_vm0, %v2054_v7, %v1063_v63 }
 0x10b   :  { %v1850_v56 = vrot.slane %v1848_v44, 7  ;;  %v1902_v45 = vrot.slane %v1601_v58, 10  ;;  %v1934_v46 = vpack.c.bf16 %v1832_v29, %v1831_v17  ;;  %v1075_v39 = vmax.f32 %v3515_v33, %v1067_v10 }
 0x10d   :  { %v1611_v25 = vsel %vm2970_vm12, %v1902_v45, %v1610_v4  ;;  %v1852_v8 = vshll.u32 %v1934_v46, 16  ;;  %v1858_v50 = vsel %vm3209_vm10, %v1850_v56, %v1857_v62  ;;  %v1922_v54 = vpack.c.bf16 %v1075_v39, %v1074_v35 }
 0x10e   :  { %1612 = vst [vmem:[%s3448_s3 + $0x18] sm:$0x22] %v1611_v25  ;;  %1859 = vst [vmem:[%s3448_s3 + $0x8] sm:$0x44] %v1858_v50 }
 0x10f   :  { %v1854_v15 = vrot.slane %v1852_v8, 7  ;;  %v1094_v11 = vshll.u32 %v1922_v54, 16 }
 0x111   :  { %v1861_v51 = vsel %vm3209_vm10, %v1854_v15, %v1860_v23  ;;  %v1107_v2 = vsel %vm1102_vm4, %v1094_v11, %v1106_v21 }
 0x112   :  { %1862 = vst [vmem:[%s3448_s3 + $0x18] sm:$0x44] %v1861_v51  ;;  %1108 = vst [vmem:[%s3448_s3 + $0x10] sm:$0x88] %v1107_v2 }

// kernel: cnn_forward.5
= control target key start
LH: loop header
LB: loop body
LE: loop exit
PB: predicated region body
PF: predicated region fallthrough
CT: control target
= control target key end

     0   :  { %v2661_v1 = vmov 0   ;;  %vm47_vm0 = vsmask.f32 7424  ;;  %vm103_vm1 = vcmask 261120   ;;  %vm383_vm2 = vcmask 1046528   ;;  %s3344_s1 = inlined_call_operand.vmem [shape: bf16[5,32,448], index: 1, kind: input, shape index: {}]   ;;  %s3345_s0 = inlined_call_operand.vmem [shape: bf16[2,32,32], index: 0, kind: input, shape index: {}]   ;;  %s3346_s2 = inlined_call_operand.vmem [shape: bf16[2,28,448], index: 2, kind: output, shape index: {0}]   ;;  %s3347_s3 = inlined_call_operand.vmem [shape: f32[1,8,448], index: 3, kind: output, shape index: {1}]   ;;  %s3348_s4 = inlined_call_operand.vmem [shape: f32[1,8,448], index: 4, kind: output, shape index: {2}]  }
   0x1   :  { %v2690_v0 = vld [vmem:[%s3344_s1 + $0x44] ss:$16 sps:$4 sm:$0xff]   ;;  %142 = vmatprep.mubr.bf16.mxu0 %v2661_v1  ;;  %195 = vmatprep.mubr.bf16.mxu1 %v2661_v1  ;;  %v2697_v2 = vld [vmem:[%s3344_s1 + $0x4c] ss:$16 sps:$4 sm:$0xff]   ;;  %v2703_v3 = vld [vmem:[%s3344_s1 + $0x40] ss:$16 sps:$4 sm:$0xff]  }
   0x2   :  { %110 = vmatprep.subr.bf16.mxu0 %v2690_v0  ;;  %v2708_v4 = vld [vmem:[%s3344_s1 + $0x48] ss:$16 sps:$4 sm:$0xff]   ;;  %163 = vmatprep.subr.bf16.mxu1 %v2697_v2  ;;  %v2714_v5 = vld [vmem:[%s3344_s1 + $0x64] ss:$16 sps:$4 sm:$0xff]   ;;  %v2721_v6 = vld [vmem:[%s3344_s1 + $0x6c] ss:$16 sps:$4 sm:$0xff]  }
   0x3   :  { %111 = vmatpush1.bf16.msra.mxu0 %v2703_v3  ;;  %164 = vmatpush1.bf16.msra.mxu1 %v2708_v4  ;;  %v2726_v7 = vld [vmem:[%s3344_s1 + $0x60] ss:$16 sps:$4 sm:$0xff]   ;;  %v2732_v8 = vld [vmem:[%s3344_s1 + $0x68] ss:$16 sps:$4 sm:$0xff]   ;;  %v2740_v10 = vld [vmem:[%s3345_s0 + $0x4] sm:$0xf] }
   0x4   :  { %112 = vmatprep.subr.bf16.mxu0 %v2714_v5  ;;  %v15_v9 = vld [vmem:[%s3345_s0] sm:$0xf]  ;;  %165 = vmatprep.subr.bf16.mxu1 %v2721_v6  ;;  %v2746_v11 = vld [vmem:[%s3345_s0 + $0x8] sm:$0xf]  ;;  %v27_v12 = vld [vmem:[%s3345_s0 + $0xc] sm:$0x7] }
   0x5   :  { %v2752_v13 = vcombine.low %v15_v9, %v2740_v10  ;;  %v2755_v14 = vcombine.low %v2746_v11, %v27_v12  ;;  %v2322_v15 = vld [vmem:[%s3345_s0 + $0x10] sm:$0xf]  ;;  %v2763_v16 = vld [vmem:[%s3345_s0 + $0x14] sm:$0xf]  ;;  %v2768_v17 = vld [vmem:[%s3345_s0 + $0x18] sm:$0xf] }
   0x6   :  { %v2326_v20 = vld [vmem:[%s3345_s0 + $0x1c] sm:$0x7]  ;;  %v2778_v21 = vcombine.low %v2322_v15, %v2763_v16  ;;  %v2787_v24 = vld [vmem:[%s3344_s1 + $0x4] ss:$16 sps:$4 sm:$0xff]   ;;  %v2801_v33 = vld [vmem:[%s3344_s1] ss:$16 sps:$4 sm:$0xff]  }
   0x7   :  { %113 = vmatpush1.bf16.msra.mxu0 %v2726_v7  ;;  %166 = vmatpush1.bf16.msra.mxu1 %v2732_v8  ;;  %v49_v18 = vshrl.u32 %v2752_v13, 16  ;;  %v51_v19 = vshll.u32 %v2752_v13, 16  ;;  %v56_v22 = vshll.u32 %v2755_v14, 16  ;;  %v2782_v23 = vcombine.low %v2768_v17, %v2326_v20  ;;  %v2796_v30 = vld [vmem:[%s3344_s1 + $0xc] ss:$16 sps:$4 sm:$0xff]  }
   0x8   :  { %v1146_v26 = vshrl.u32 %v2778_v21, 16  ;;  %v1148_v27 = vshll.u32 %v2778_v21, 16  ;;  %264 = vmatprep.subr.bf16.mxu0 %v2787_v24  ;;  %v2806_v34 = vld [vmem:[%s3344_s1 + $0x8] ss:$16 sps:$4 sm:$0xff]   ;;  %317 = vmatprep.subr.bf16.mxu1 %v2796_v30  ;;  %v2814_v36 = vld [vmem:[%s3344_s1 + $0x24] ss:$16 sps:$4 sm:$0xff]  }
   0x9   :  { %v53_v25 = vrot.slane %v51_v19, 1  ;;  %v58_v28 = vrot.slane %v56_v22, 1  ;;  %v1153_v29 = vshll.u32 %v2782_v23, 16  ;;  %v2820_v39 = vld [vmem:[%s3344_s1 + $0x2c] ss:$16 sps:$4 sm:$0xff]   ;;  %v60_v40 = vshrl.u32 %v2755_v14, 16 }
   0xa   :  { %v1150_v32 = vrot.slane %v1148_v27, 1  ;;  %v2828_v41 = vld [vmem:[%s3344_s1 + $0x20] ss:$16 sps:$4 sm:$0xff]   ;;  %v2839_v43 = vld [vmem:[%s3344_s1 + $0x28] ss:$16 sps:$4 sm:$0xff]   ;;  %vm767_vm3 = vcmask 1045504  }
   0xb   :  { %v54_v31 = vor.u32 %v53_v25, %v49_v18  ;;  %v2808_v35 = vrot.slane %v1153_v29, 1  ;;  %v2844_v44 = vld [vmem:[%s3344_s1 + $0x84] ss:$16 sps:$4 sm:$0xff]   ;;  %v2851_v45 = vld [vmem:[%s3344_s1 + $0x8c] ss:$16 sps:$4 sm:$0xff]   ;;  %v62_v46 = vor.u32 %v60_v40, %v58_v28  ;;  %v2904_v55 = vrot.slane %v2782_v23, 1 }
   0xc   :  { %v1151_v38 = vor.u32 %v1150_v32, %v1146_v26  ;;  %v2866_v47 = vld [vmem:[%s3344_s1 + $0x80] ss:$16 sps:$4 sm:$0xff]   ;;  %v2871_v48 = vld [vmem:[%s3344_s1 + $0x88] ss:$16 sps:$4 sm:$0xff]   ;;  %v18_v49 = vld [vmem:[%s3345_s0 + $0xc] sm:$0x3] }
   0xd   :  { %v59_v37 = vsel %vm47_vm0, %v54_v31, %v58_v28  ;;  %v2879_v50 = vld [vmem:[%s3344_s1 + $0xa0] ss:$16 sps:$4 sm:$0xff]   ;;  %v2884_v51 = vld [vmem:[%s3344_s1 + $0xa4] ss:$16 sps:$4 sm:$0xff]   ;;  %v2889_v52 = vld [vmem:[%s3344_s1 + $0xac] ss:$16 sps:$4 sm:$0xff]  }
   0xe   :  { %2234 = vmatmul.mubr.msk.bf16.vlgmr.msra.gmra.mrb[0].mxu0 %vm103_vm1, %v59_v37  ;;  %2236 = vmatmul.mubr.msk.bf16.vlgmr.msra.gmra.mrb[0].mxu1 %vm103_vm1, %v59_v37  ;;  %v2832_v42 = vsel %vm47_vm0, %v1151_v38, %v2808_v35  ;;  %v2898_v53 = vld [vmem:[%s3345_s0] sm:$0xc]  ;;  %v2362_v54 = vld [vmem:[%s3345_s0 + $0x10] sm:$0xe]  ;;  %v2911_v56 = vld [vmem:[%s3344_s1 + $0xa8] ss:$16 sps:$4 sm:$0xff]  }
   0xf   :  { %265 = vmatpush1.bf16.msra.mxu0 %v2801_v33  ;;  %318 = vmatpush1.bf16.msra.mxu1 %v2806_v34  ;;  %v2301_v57 = vcombine.low %v2898_v53, %v2740_v10  ;;  %v2371_v58 = vcombine.low %v2362_v54, %v2763_v16  ;;  %v2384_v59 = vld [vmem:[%s3345_s0 + $0x1c] sm:$0xf]  ;;  %v2406_v60 = vld [vmem:[%s3345_s0 + $0x10] sm:$0xc]  ;;  %v370_v61 = vld [vmem:[%s3345_s0] sm:$0xe] }
  0x10   :  { %152 = vmatprep.mubr.bf16.mxu0 %v2661_v1  ;;  %205 = vmatprep.mubr.bf16.mxu1 %v2661_v1  ;;  %v2930_v62 = vld [vmem:[%s3344_s1 + $0xc4] ss:$16 sps:$4 sm:$0xff]   ;;  %v2935_v63 = vld [vmem:[%s3344_s1 + $0xcc] ss:$16 sps:$4 sm:$0xff]   ;;  %v2393_v9 = vcombine.low %v2768_v17, %v2384_v59  ;;  %v2415_v12 = vcombine.low %v2406_v60, %v2763_v16  ;;  %v2259_v16 = vcombine.low %v370_v61, %v2740_v10  ;;  %v385_v54 = vrot.slane %v2755_v14, 1 }
  0x11   :  { %266 = vmatprep.subr.bf16.mxu0 %v2814_v36  ;;  %319 = vmatprep.subr.bf16.mxu1 %v2820_v39  ;;  %v1478_v15 = vrot.slane %v2371_v58, 1  ;;  %v1662_v18 = vshrl.u32 %v2371_v58, 16  ;;  %v1665_v19 = vshll.u32 %v2371_v58, 16  ;;  %vm568_vm4 = vsmask.f32 6400 }
  0x12   :  { %v1670_v20 = vshrl.u32 %v2393_v9, 16  ;;  %v1673_v22 = vshll.u32 %v2393_v9, 16  ;;  %v1858_v25 = vrot.slane %v2415_v12, 2  ;;  %v2942_v26 = vrot.slane %v2393_v9, 2  ;;  %v2976_v61 = vld [vmem:[%s3344_s1 + $0xc0] ss:$16 sps:$4 sm:$0xff]  }
  0x13   :  { %267 = vmatpush1.bf16.msra.mxu0 %v2828_v41  ;;  %320 = vmatpush1.bf16.msra.mxu1 %v2839_v43  ;;  %v2949_v27 = vsel %vm383_vm2, %v1478_v15, %v2904_v55  ;;  %v1664_v28 = vrot.slane %v1662_v18, 1  ;;  %v1667_v29 = vrot.slane %v1665_v19, 2  ;;  %v2981_v9 = vld [vmem:[%s3344_s1 + $0xc8] ss:$16 sps:$4 sm:$0xff]   ;;  %v2986_v14 = vld [vmem:[%s3344_s1 + $0xe4] ss:$16 sps:$4 sm:$0xff]  }
  0x14   :  { %433 = vmatprep.subr.bf16.mxu0 %v2844_v44  ;;  %486 = vmatprep.subr.bf16.mxu1 %v2851_v45  ;;  %v1672_v31 = vrot.slane %v1670_v20, 1  ;;  %v1675_v32 = vrot.slane %v1673_v22, 2  ;;  %v2955_v37 = vsel %vm767_vm3, %v1858_v25, %v2942_v26  ;;  %v3000_v15 = vld [vmem:[%s3344_s1 + $0xe0] ss:$16 sps:$4 sm:$0xff]   ;;  %v3005_v18 = vld [vmem:[%s3344_s1 + $0xe8] ss:$16 sps:$4 sm:$0xff]  }
  0x15   :  { %v1668_v38 = vor.u32 %v1667_v29, %v1664_v28  ;;  %v570_v19 = vshrl.u32 %v2259_v16, 16  ;;  %v573_v20 = vshll.u32 %v2259_v16, 16  ;;  %v3012_v22 = vld [vmem:[%s3344_s1 + $0x104] ss:$16 sps:$4 sm:$0xff]   ;;  %v3017_v25 = vld [vmem:[%s3344_s1 + $0x10c] ss:$16 sps:$4 sm:$0xff]  }
  0x16   :  { %2235 = vmatmul.mubr.msk.bf16.gmra.mrb[4].mxu0 %vm103_vm1, %v62_v46  ;;  %2237 = vmatmul.mubr.msk.bf16.gmra.mrb[4].mxu1 %vm103_vm1, %v62_v46  ;;  %v2959_v40 = vor.u32 %v1675_v32, %v1672_v31  ;;  %v555_v46 = vld [vmem:[%s3345_s0 + $0xc] sm:$0xf]  ;;  %vm988_vm5 = vcmask 1043456   ;;  %vm989_vm6 = vcmask 523268   ;;  %vm1031_vm8 = vcmask 523264  }
  0x17   :  { %296 = vmatprep.mubr.bf16.mxu0 %v2661_v1  ;;  %349 = vmatprep.mubr.bf16.mxu1 %v2661_v1  ;;  %v2280_v59 = vcombine.low %v2746_v11, %v555_v46  ;;  %v575_v28 = vrot.slane %v573_v20, 2  ;;  %v768_v20 = vrot.slane %v2301_v57, 2  ;;  %vm3187_vm7 = vmor %vm989_vm6, %vm988_vm5  ;;  %vm997_vm9 = vcmask 1041408  }
  0x18   :  { %v2969_v58 = vsel %vm568_vm4, %v1668_v38, %v2959_v40  ;;  %vm998_vm10 = vcmask 521220   ;;  %vm1037_vm12 = vcmask 519168  }
  0x19   :  { %v578_v12 = vshrl.u32 %v2280_v59, 16  ;;  %vm3231_vm11 = vmor %vm998_vm10, %vm997_vm9 }
  0x1b   :  { %v580_v29 = vrot.slane %v578_v12, 1  ;;  %v3048_v12 = vld [vmem:[%s3344_s1 + $0x12c] ss:$16 sps:$4 sm:$0xff]  }
  0x1e   :  { %2247 = vmatmul.mubr.msk.bf16.vlgmr.msra.gmra.mrb[0].mxu0 %vm103_vm1, %v2752_v13  ;;  %2249 = vmatmul.mubr.msk.bf16.vlgmr.msra.gmra.mrb[0].mxu1 %vm103_vm1, %v2752_v13  ;;  %v2238_v13 = vcombine.low %v2746_v11, %v18_v49  ;;  %v384_v49 = vrot.slane %v2259_v16, 1  ;;  %v2991_v11 = vld [vmem:[%s3344_s1 + $0xec] ss:$16 sps:$4 sm:$0xff]   ;;  %v572_v16 = vrot.slane %v570_v19, 1  ;;  %v3062_v19 = vld [vmem:[%s3344_s1 + $0x128] ss:$16 sps:$4 sm:$0xff]  }
  0x1f   :  { %434 = vmatpush1.bf16.msra.mxu0 %v2866_v47  ;;  %487 = vmatpush1.bf16.msra.mxu1 %v2871_v48 }
  0x20   :  { %306 = vmatprep.mubr.bf16.mxu0 %v2661_v1  ;;  %359 = vmatprep.mubr.bf16.mxu1 %v2661_v1  ;;  %v386_v60 = vsel %vm383_vm2, %v384_v49, %v385_v54  ;;  %v576_v32 = vor.u32 %v575_v28, %v572_v16  ;;  %v3033_v49 = vld [vmem:[%s3344_s1 + $0x100] ss:$16 sps:$4 sm:$0xff]   ;;  %v769_v16 = vrot.slane %v2280_v59, 2 }
  0x21   :  { %435 = vmatprep.subr.bf16.mxu0 %v2884_v51  ;;  %488 = vmatprep.subr.bf16.mxu1 %v2889_v52 }
  0x22   :  { %v770_v28 = vsel %vm767_vm3, %v768_v20, %v769_v16 }
  0x23   :  { %436 = vmatpush1.bf16.msra.mxu0 %v2879_v50  ;;  %489 = vmatpush1.bf16.msra.mxu1 %v2911_v56 }
  0x24   :  { %632 = vmatprep.subr.bf16.mxu0 %v2930_v62  ;;  %685 = vmatprep.subr.bf16.mxu1 %v2935_v63 }
  0x26   :  { %2248 = vmatmul.mubr.msk.bf16.gmra.mrb[4].mxu0 %vm103_vm1, %v2238_v13  ;;  %2250 = vmatmul.mubr.msk.bf16.gmra.mrb[4].mxu1 %vm103_vm1, %v2238_v13  ;;  %v581_v13 = vshll.u32 %v2280_v59, 16 }
  0x27   :  { %465 = vmatprep.mubr.bf16.mxu0 %v2661_v1  ;;  %518 = vmatprep.mubr.bf16.mxu1 %v2661_v1 }
  0x28   :  { %v583_v31 = vrot.slane %v581_v13, 2  ;;  %v3057_v13 = vld [vmem:[%s3344_s1 + $0x120] ss:$16 sps:$4 sm:$0xff]  }
  0x2a   :  { %v584_v38 = vor.u32 %v583_v31, %v580_v29 }
  0x2c   :  { %v585_v46 = vsel %vm568_vm4, %v576_v32, %v584_v38 }
  0x2e   :  { %2268 = vmatmul.mubr.msk.bf16.vlgmr.msra.gmra.mrb[0].mxu0 %vm103_vm1, %v386_v60  ;;  %2270 = vmatmul.mubr.msk.bf16.vlgmr.msra.gmra.mrb[0].mxu1 %vm103_vm1, %v386_v60  ;;  %v3038_v60 = vld [vmem:[%s3344_s1 + $0x108] ss:$16 sps:$4 sm:$0xff]  }
  0x2f   :  { %633 = vmatpush1.bf16.msra.mxu0 %v2976_v61  ;;  %686 = vmatpush1.bf16.msra.mxu1 %v2981_v9 }
  0x30   :  { %475 = vmatprep.mubr.bf16.mxu0 %v2661_v1  ;;  %528 = vmatprep.mubr.bf16.mxu1 %v2661_v1 }
  0x31   :  { %634 = vmatprep.subr.bf16.mxu0 %v2986_v14  ;;  %687 = vmatprep.subr.bf16.mxu1 %v2991_v11 }
  0x33   :  { %635 = vmatpush1.bf16.msra.mxu0 %v3000_v15  ;;  %688 = vmatpush1.bf16.msra.mxu1 %v3005_v18 }
  0x34   :  { %817 = vmatprep.subr.bf16.mxu0 %v3012_v22  ;;  %870 = vmatprep.subr.bf16.mxu1 %v3017_v25 }
  0x36   :  { %2269 = vmatmul.mubr.msk.bf16.gmra.mrb[4].mxu0 %vm103_vm1, %v385_v54  ;;  %2271 = vmatmul.mubr.msk.bf16.gmra.mrb[4].mxu1 %vm103_vm1, %v385_v54  ;;  %v3043_v54 = vld [vmem:[%s3344_s1 + $0x124] ss:$16 sps:$4 sm:$0xff]  }
  0x37   :  { %664 = vmatprep.mubr.bf16.mxu0 %v2661_v1  ;;  %717 = vmatprep.mubr.bf16.mxu1 %v2661_v1 }
  0x3e   :  { %2289 = vmatmul.mubr.msk.bf16.vlgmr.msra.gmra.mrb[0].mxu0 %vm103_vm1, %v585_v46  ;;  %2291 = vmatmul.mubr.msk.bf16.vlgmr.msra.gmra.mrb[0].mxu1 %vm103_vm1, %v585_v46 }
  0x3f   :  { %818 = vmatpush1.bf16.msra.mxu0 %v3033_v49  ;;  %871 = vmatpush1.bf16.msra.mxu1 %v3038_v60 }
  0x40   :  { %674 = vmatprep.mubr.bf16.mxu0 %v2661_v1  ;;  %727 = vmatprep.mubr.bf16.mxu1 %v2661_v1 }
  0x41   :  { %819 = vmatprep.subr.bf16.mxu0 %v3043_v54  ;;  %872 = vmatprep.subr.bf16.mxu1 %v3048_v12 }
  0x43   :  { %820 = vmatpush1.bf16.msra.mxu0 %v3057_v13  ;;  %873 = vmatpush1.bf16.msra.mxu1 %v3062_v19 }
  0x44   :  { %1206 = vmatprep.subr.bf16.mxu0 %v2690_v0  ;;  %1259 = vmatprep.subr.bf16.mxu1 %v2697_v2  ;;  %v1157_v0 = vshrl.u32 %v2782_v23, 16 }
  0x46   :  { %2290 = vmatmul.mubr.msk.bf16.gmra.mrb[4].mxu0 %vm103_vm1, %v584_v38  ;;  %2292 = vmatmul.mubr.msk.bf16.gmra.mrb[4].mxu1 %vm103_vm1, %v584_v38  ;;  %v1159_v2 = vor.u32 %v1157_v0, %v2808_v35 }
  0x47   :  { %849 = vmatprep.mubr.bf16.mxu0 %v2661_v1  ;;  %902 = vmatprep.mubr.bf16.mxu1 %v2661_v1 }
  0x4e   :  { %2310 = vmatmul.mubr.msk.bf16.vlgmr.msra.gmra.mrb[0].mxu0 %vm103_vm1, %v770_v28  ;;  %2312 = vmatmul.mubr.msk.bf16.vlgmr.msra.gmra.mrb[0].mxu1 %vm103_vm1, %v770_v28 }
  0x4f   :  { %1207 = vmatpush1.bf16.msra.mxu0 %v2703_v3  ;;  %1260 = vmatpush1.bf16.msra.mxu1 %v2708_v4  ;;  %v2325_v3 = vld [vmem:[%s3345_s0 + $0x1c] sm:$0x3] }
  0x50   :  { %859 = vmatprep.mubr.bf16.mxu0 %v2661_v1  ;;  %912 = vmatprep.mubr.bf16.mxu1 %v2661_v1  ;;  %v2349_v4 = vcombine.low %v2768_v17, %v2325_v3 }
  0x51   :  { %1208 = vmatprep.subr.bf16.mxu0 %v2714_v5  ;;  %1261 = vmatprep.subr.bf16.mxu1 %v2721_v6 }
  0x53   :  { %1209 = vmatpush1.bf16.msra.mxu0 %v2726_v7  ;;  %1262 = vmatpush1.bf16.msra.mxu1 %v2732_v8 }
  0x54   :  { %1360 = vmatprep.subr.bf16.mxu0 %v2787_v24  ;;  %1413 = vmatprep.subr.bf16.mxu1 %v2796_v30 }
  0x56   :  { %2311 = vmatmul.mubr.msk.bf16.gmra.mrb[4].mxu0 %vm103_vm1, %v769_v16  ;;  %2313 = vmatmul.mubr.msk.bf16.gmra.mrb[4].mxu1 %vm103_vm1, %v769_v16 }
  0x57   :  { %1238 = vmatprep.mubr.bf16.mxu0 %v2661_v1  ;;  %1291 = vmatprep.mubr.bf16.mxu1 %v2661_v1 }
  0x5e   :  { %2345 = vmatmul.mubr.msk.bf16.vlgmr.msra.gmra.mrb[8].mxu0 %vm103_vm1, %v2832_v42  ;;  %2347 = vmatmul.mubr.msk.bf16.vlgmr.msra.gmra.mrb[8].mxu1 %vm103_vm1, %v2832_v42 }
  0x5f   :  { %1361 = vmatpush1.bf16.msra.mxu0 %v2801_v33  ;;  %1414 = vmatpush1.bf16.msra.mxu1 %v2806_v34 }
  0x60   :  { %1248 = vmatprep.mubr.bf16.mxu0 %v2661_v1  ;;  %1301 = vmatprep.mubr.bf16.mxu1 %v2661_v1 }
  0x61   :  { %1362 = vmatprep.subr.bf16.mxu0 %v2814_v36  ;;  %1415 = vmatprep.subr.bf16.mxu1 %v2820_v39 }
  0x63   :  { %1363 = vmatpush1.bf16.msra.mxu0 %v2828_v41  ;;  %1416 = vmatpush1.bf16.msra.mxu1 %v2839_v43 }
  0x64   :  { %1527 = vmatprep.subr.bf16.mxu0 %v2844_v44  ;;  %1580 = vmatprep.subr.bf16.mxu1 %v2851_v45 }
  0x66   :  { %2346 = vmatmul.mubr.msk.bf16.gmra.mrb[12].mxu0 %vm103_vm1, %v1159_v2  ;;  %2348 = vmatmul.mubr.msk.bf16.gmra.mrb[12].mxu1 %vm103_vm1, %v1159_v2 }
  0x67   :  { %1392 = vmatprep.mubr.bf16.mxu0 %v2661_v1  ;;  %1445 = vmatprep.mubr.bf16.mxu1 %v2661_v1 }
  0x6e   :  { %2358 = vmatmul.mubr.msk.bf16.vlgmr.msra.gmra.mrb[8].mxu0 %vm103_vm1, %v2778_v21  ;;  %2360 = vmatmul.mubr.msk.bf16.vlgmr.msra.gmra.mrb[8].mxu1 %vm103_vm1, %v2778_v21 }
  0x6f   :  { %1528 = vmatpush1.bf16.msra.mxu0 %v2866_v47  ;;  %1581 = vmatpush1.bf16.msra.mxu1 %v2871_v48 }
  0x70   :  { %1402 = vmatprep.mubr.bf16.mxu0 %v2661_v1  ;;  %1455 = vmatprep.mubr.bf16.mxu1 %v2661_v1 }
  0x71   :  { %1529 = vmatprep.subr.bf16.mxu0 %v2884_v51  ;;  %1582 = vmatprep.subr.bf16.mxu1 %v2889_v52 }
  0x73   :  { %1530 = vmatpush1.bf16.msra.mxu0 %v2879_v50  ;;  %1583 = vmatpush1.bf16.msra.mxu1 %v2911_v56 }
  0x74   :  { %1724 = vmatprep.subr.bf16.mxu0 %v2930_v62  ;;  %1777 = vmatprep.subr.bf16.mxu1 %v2935_v63 }
  0x76   :  { %2359 = vmatmul.mubr.msk.bf16.gmra.mrb[12].mxu0 %vm103_vm1, %v2349_v4  ;;  %2361 = vmatmul.mubr.msk.bf16.gmra.mrb[12].mxu1 %vm103_vm1, %v2349_v4 }
  0x77   :  { %1559 = vmatprep.mubr.bf16.mxu0 %v2661_v1  ;;  %1612 = vmatprep.mubr.bf16.mxu1 %v2661_v1 }
  0x7e   :  { %2380 = vmatmul.mubr.msk.bf16.vlgmr.msra.gmra.mrb[8].mxu0 %vm103_vm1, %v2949_v27  ;;  %2382 = vmatmul.mubr.msk.bf16.vlgmr.msra.gmra.mrb[8].mxu1 %vm103_vm1, %v2949_v27 }
  0x7f   :  { %1725 = vmatpush1.bf16.msra.mxu0 %v2976_v61  ;;  %1778 = vmatpush1.bf16.msra.mxu1 %v2981_v9 }
  0x80   :  { %1569 = vmatprep.mubr.bf16.mxu0 %v2661_v1  ;;  %1622 = vmatprep.mubr.bf16.mxu1 %v2661_v1 }
  0x81   :  { %1726 = vmatprep.subr.bf16.mxu0 %v2986_v14  ;;  %1779 = vmatprep.subr.bf16.mxu1 %v2991_v11 }
  0x83   :  { %1727 = vmatpush1.bf16.msra.mxu0 %v3000_v15  ;;  %1780 = vmatpush1.bf16.msra.mxu1 %v3005_v18 }
  0x84   :  { %1907 = vmatprep.subr.bf16.mxu0 %v3012_v22  ;;  %1960 = vmatprep.subr.bf16.mxu1 %v3017_v25 }
  0x86   :  { %2381 = vmatmul.mubr.msk.bf16.gmra.mrb[12].mxu0 %vm103_vm1, %v2904_v55  ;;  %2383 = vmatmul.mubr.msk.bf16.gmra.mrb[12].mxu1 %vm103_vm1, %v2904_v55 }
  0x87   :  { %1756 = vmatprep.mubr.bf16.mxu0 %v2661_v1  ;;  %1809 = vmatprep.mubr.bf16.mxu1 %v2661_v1 }
  0x8e   :  { %2402 = vmatmul.mubr.msk.bf16.vlgmr.msra.gmra.mrb[8].mxu0 %vm103_vm1, %v2969_v58  ;;  %2404 = vmatmul.mubr.msk.bf16.vlgmr.msra.gmra.mrb[8].mxu1 %vm103_vm1, %v2969_v58 }
  0x8f   :  { %1908 = vmatpush1.bf16.msra.mxu0 %v3033_v49  ;;  %1961 = vmatpush1.bf16.msra.mxu1 %v3038_v60 }
  0x90   :  { %1766 = vmatprep.mubr.bf16.mxu0 %v2661_v1  ;;  %1819 = vmatprep.mubr.bf16.mxu1 %v2661_v1 }
  0x91   :  { %1909 = vmatprep.subr.bf16.mxu0 %v3043_v54  ;;  %1962 = vmatprep.subr.bf16.mxu1 %v3048_v12 }
  0x93   :  { %1910 = vmatpush1.bf16.msra.mxu0 %v3057_v13  ;;  %1963 = vmatpush1.bf16.msra.mxu1 %v3062_v19 }
  0x96   :  { %2403 = vmatmul.mubr.msk.bf16.gmra.mrb[12].mxu0 %vm103_vm1, %v2959_v40  ;;  %2405 = vmatmul.mubr.msk.bf16.gmra.mrb[12].mxu1 %vm103_vm1, %v2959_v40 }
  0x97   :  { %1939 = vmatprep.mubr.bf16.mxu0 %v2661_v1  ;;  %1992 = vmatprep.mubr.bf16.mxu1 %v2661_v1 }
  0x9e   :  { %2424 = vmatmul.mubr.msk.bf16.vlgmr.msra.gmra.mrb[8].mxu0 %vm103_vm1, %v2955_v37  ;;  %2426 = vmatmul.mubr.msk.bf16.vlgmr.msra.gmra.mrb[8].mxu1 %vm103_vm1, %v2955_v37 }
  0x9f   :  { %1949 = vmatprep.mubr.bf16.mxu0 %v2661_v1  ;;  %2002 = vmatprep.mubr.bf16.mxu1 %v2661_v1 }
  0xa6   :  { %2425 = vmatmul.mubr.msk.bf16.gmra.mrb[12].mxu0 %vm103_vm1, %v2942_v26  ;;  %2427 = vmatmul.mubr.msk.bf16.gmra.mrb[12].mxu1 %vm103_vm1, %v2942_v26 }
 0x121   :  { %v851_v5 = vpop.f32.mrb[0].mxu0  ;;  %v904_v6 = vpop.f32.mrb[0].mxu1 }
 0x122   :  { %v1050_v7 = vmul.f32 %v851_v5, %v851_v5  ;;  %v853_v8 = vpop.f32.mrb[1].mxu0  ;;  %v906_v10 = vpop.f32.mrb[1].mxu1  ;;  %v1052_v1 = vmul.f32 %v904_v6, %v904_v6 }
 0x123   :  { %v2444_v21 = vpack.c.bf16 %v853_v8, %v851_v5  ;;  %v1051_v23 = vmul.f32 %v853_v8, %v853_v8  ;;  %v2445_v24 = vpack.c.bf16 %v906_v10, %v904_v6  ;;  %v855_v30 = vpop.f32.mrb[2].mxu0  ;;  %v908_v33 = vpop.f32.mrb[2].mxu1  ;;  %v1053_v34 = vmul.f32 %v906_v10, %v906_v10 }
 0x124   :  { %v1001_v35 = vadd.f32 %v855_v30, %v851_v5  ;;  %v1054_v36 = vmul.f32 %v855_v30, %v855_v30  ;;  %v1021_v39 = vadd.f32 %v908_v33, %v904_v6  ;;  %v857_v41 = vpop.f32.mrb[3].mxu0  ;;  %v910_v42 = vpop.f32.mrb[3].mxu1  ;;  %v1056_v43 = vmul.f32 %v908_v33, %v908_v33 }
 0x125   :  { %987 = vst [vmem:[%s3346_s2] sm:$0xff] %v2444_v21  ;;  %991 = vst.msk [vmem:[%s3346_s2 + $0x8] sm:$0xff] %vm3187_vm7, %v2445_v24  ;;  %v2446_v44 = vpack.c.bf16 %v857_v41, %v855_v30  ;;  %v1011_v45 = vadd.f32 %v857_v41, %v853_v8  ;;  %v1055_v47 = vmul.f32 %v857_v41, %v857_v41  ;;  %v1032_v48 = vsel %vm1031_vm8, %v906_v10, 0.0 }
 0x126   :  { %v1066_v50 = vadd.f32 %v1054_v36, %v1050_v7  ;;  %v2447_v51 = vpack.c.bf16 %v910_v42, %v908_v33  ;;  %v1033_v52 = vsel %vm1031_vm8, %v910_v42, 0.0  ;;  %v1086_v53 = vadd.f32 %v1056_v43, %v1052_v1 }
 0x127   :  { %992 = vst [vmem:[%s3346_s2 + $0x10] sm:$0xff] %v2446_v44  ;;  %v1076_v55 = vadd.f32 %v1055_v47, %v1051_v23  ;;  %v1034_v56 = vadd.f32 %v1033_v52, %v1032_v48  ;;  %v1057_v57 = vmul.f32 %v910_v42, %v910_v42  ;;  %v1096_v62 = vsel %vm1031_vm8, %v1053_v34, 0.0 }
 0x128   :  { %993 = vst.msk [vmem:[%s3346_s2 + $0x18] sm:$0xff] %vm3187_vm7, %v2447_v51 }
 0x129   :  { %v1097_v63 = vsel %vm1031_vm8, %v1057_v57, 0.0  ;;  %v861_v26 = vpop.f32.mrb[4].mxu0  ;;  %v914_v27 = vpop.f32.mrb[4].mxu1 }
 0x12a   :  { %v1098_v37 = vadd.f32 %v1097_v63, %v1096_v62  ;;  %v1002_v40 = vadd.f32 %v1001_v35, %v861_v26  ;;  %v1058_v58 = vmul.f32 %v861_v26, %v861_v26  ;;  %v1022_v59 = vadd.f32 %v1021_v39, %v914_v27  ;;  %v863_v61 = vpop.f32.mrb[5].mxu0  ;;  %v916_v9 = vpop.f32.mrb[5].mxu1 }
 0x12b   :  { %v1060_v14 = vmul.f32 %v914_v27, %v914_v27  ;;  %v2448_v11 = vpack.c.bf16 %v863_v61, %v861_v26  ;;  %v1012_v15 = vadd.f32 %v1011_v45, %v863_v61  ;;  %v1059_v18 = vmul.f32 %v863_v61, %v863_v61  ;;  %v865_v22 = vpop.f32.mrb[6].mxu0  ;;  %v918_v25 = vpop.f32.mrb[6].mxu1 }
 0x12c   :  { %v1067_v29 = vadd.f32 %v1066_v50, %v1058_v58  ;;  %v2449_v31 = vpack.c.bf16 %v916_v9, %v914_v27  ;;  %v1035_v32 = vsel %vm1031_vm8, %v916_v9, 0.0  ;;  %v1061_v38 = vmul.f32 %v916_v9, %v916_v9  ;;  %v867_v46 = vpop.f32.mrb[7].mxu0  ;;  %v920_v49 = vpop.f32.mrb[7].mxu1 }
 0x12d   :  { %v1087_v60 = vadd.f32 %v1086_v53, %v1060_v14  ;;  %994 = vst [vmem:[%s3346_s2 + $0x20] sm:$0xff] %v2448_v11  ;;  %v1077_v54 = vadd.f32 %v1076_v55, %v1059_v18  ;;  %v1036_v12 = vadd.f32 %v1035_v32, %v1034_v56  ;;  %v1003_v13 = vsel %vm988_vm5, %v865_v22, 0.0 }
 0x12e   :  { %995 = vst.msk [vmem:[%s3346_s2 + $0x28] sm:$0xff] %vm3187_vm7, %v2449_v31  ;;  %v1099_v19 = vsel %vm1031_vm8, %v1061_v38, 0.0  ;;  %v1004_v20 = vadd.f32 %v1003_v13, %v1002_v40  ;;  %v1062_v16 = vmul.f32 %v865_v22, %v865_v22  ;;  %v1023_v28 = vsel %vm988_vm5, %v918_v25, 0.0 }
 0x12f   :  { %v1100_v0 = vadd.f32 %v1099_v19, %v1098_v37  ;;  %v1024_v2 = vadd.f32 %v1023_v28, %v1022_v59  ;;  %v1064_v3 = vmul.f32 %v918_v25, %v918_v25  ;;  %v2450_v4 = vpack.c.bf16 %v867_v46, %v865_v22 }
 0x130   :  { %v1068_v5 = vsel %vm988_vm5, %v1062_v16, 0.0  ;;  %v1013_v6 = vsel %vm988_vm5, %v867_v46, 0.0  ;;  %v1063_v7 = vmul.f32 %v867_v46, %v867_v46  ;;  %v2451_v30 = vpack.c.bf16 %v920_v49, %v918_v25 }
 0x131   :  { %v1069_v8 = vadd.f32 %v1068_v5, %v1067_v29  ;;  %v1088_v10 = vsel %vm988_vm5, %v1064_v3, 0.0  ;;  %996 = vst [vmem:[%s3346_s2 + $0x30] sm:$0x33] %v2450_v4  ;;  %v1014_v1 = vadd.f32 %v1013_v6, %v1012_v15  ;;  %v1038_v34 = vsel %vm1037_vm12, %v920_v49, 0.0 }
 0x132   :  { %v1089_v23 = vadd.f32 %v1088_v10, %v1087_v60  ;;  %v1078_v24 = vsel %vm988_vm5, %v1063_v7, 0.0  ;;  %1000 = vst.msk [vmem:[%s3346_s2 + $0x38] sm:$0x33] %vm3231_vm11, %v2451_v30  ;;  %v1065_v35 = vmul.f32 %v920_v49, %v920_v49  ;;  %v1039_v36 = vadd.f32 %v1038_v34, %v1036_v12 }
 0x133   :  { %v1079_v33 = vadd.f32 %v1078_v24, %v1077_v54  ;;  %v1005_v42 = vrot.slane %v1004_v20, 4  ;;  %v1025_v43 = vrot.slane %v1024_v2, 4  ;;  %v1070_v45 = vrot.slane %v1069_v8, 4 }
 0x134   :  { %v1101_v39 = vsel %vm1037_vm12, %v1065_v35, 0.0  ;;  %v1015_v48 = vrot.slane %v1014_v1, 4  ;;  %v1090_v50 = vrot.slane %v1089_v23, 4  ;;  %v1040_v58 = vrot.slane %v1039_v36, 4 }
 0x135   :  { %v1102_v41 = vadd.f32 %v1101_v39, %v1100_v0  ;;  %v1006_v44 = vadd.f32 %v1005_v42, %v1004_v20  ;;  %v1026_v47 = vadd.f32 %v1025_v43, %v1024_v2  ;;  %v1071_v52 = vadd.f32 %v1070_v45, %v1069_v8 }
 0x136   :  { %v1016_v55 = vadd.f32 %v1015_v48, %v1014_v1  ;;  %v1080_v56 = vrot.slane %v1079_v33, 4  ;;  %v1091_v57 = vadd.f32 %v1090_v50, %v1089_v23  ;;  %v1041_v22 = vadd.f32 %v1040_v58, %v1039_v36 }
 0x137   :  { %v1007_v51 = vrot.slane %v1006_v44, 2  ;;  %v1027_v53 = vrot.slane %v1026_v47, 2  ;;  %v1072_v63 = vrot.slane %v1071_v52, 2  ;;  %v1103_v59 = vrot.slane %v1102_v41, 4 }
 0x138   :  { %v1017_v27 = vrot.slane %v1016_v55, 2  ;;  %v1081_v37 = vadd.f32 %v1080_v56, %v1079_v33  ;;  %v1092_v40 = vrot.slane %v1091_v57, 2  ;;  %v1042_v12 = vrot.slane %v1041_v22, 2 }
 0x139   :  { %v1008_v62 = vadd.f32 %v1007_v51, %v1006_v44  ;;  %v1028_v26 = vadd.f32 %v1027_v53, %v1026_v47  ;;  %v1073_v9 = vadd.f32 %v1072_v63, %v1071_v52  ;;  %v1104_v25 = vadd.f32 %v1103_v59, %v1102_v41 }
 0x13a   :  { %v1018_v11 = vadd.f32 %v1017_v27, %v1016_v55  ;;  %v1082_v15 = vrot.slane %v1081_v37, 2  ;;  %v1093_v18 = vadd.f32 %v1092_v40, %v1091_v57  ;;  %v3274_v52 = vadd.f32 %v1042_v12, %v1041_v22 }
 0x13b   :  { %v1009_v61 = vrot.slane %v1008_v62, 1  ;;  %v1029_v14 = vrot.slane %v1028_v26, 1  ;;  %v1074_v31 = vrot.slane %v1073_v9, 1  ;;  %v1105_v13 = vrot.slane %v1104_v25, 2 }
 0x13c   :  { %v1019_v38 = vrot.slane %v1018_v11, 1  ;;  %v3247_v46 = vadd.f32 %v1082_v15, %v1081_v37  ;;  %v1094_v54 = vrot.slane %v1093_v18, 1 }
 0x13d   :  { %v3243_v29 = vadd.f32 %v1009_v61, %v1008_v62  ;;  %v3245_v32 = vadd.f32 %v1029_v14, %v1028_v26  ;;  %v3262_v47 = vadd.f32 %v1074_v31, %v1073_v9  ;;  %v3276_v53 = vadd.f32 %v1105_v13, %v1104_v25 }
 0x13e   :  { %v3264_v48 = vadd.f32 %v1094_v54, %v1093_v18  ;;  %v3266_v50 = vadd.f32 %v1019_v38, %v1018_v11  ;;  %v1084_v51 = vrot.slane %v3247_v46, 1 }
 0x171   :  { %v1941_v49 = vpop.f32.mrb[8].mxu0  ;;  %v1994_v60 = vpop.f32.mrb[8].mxu1 }
 0x172   :  { %v2133_v19 = vmul.f32 %v1941_v49, %v1941_v49  ;;  %v1943_v20 = vpop.f32.mrb[9].mxu0  ;;  %v1996_v16 = vpop.f32.mrb[9].mxu1  ;;  %v2135_v28 = vmul.f32 %v1994_v60, %v1994_v60 }
 0x173   :  { %v2452_v0 = vpack.c.bf16 %v1943_v20, %v1941_v49  ;;  %v2134_v2 = vmul.f32 %v1943_v20, %v1943_v20  ;;  %v2453_v3 = vpack.c.bf16 %v1996_v16, %v1994_v60  ;;  %v1945_v4 = vpop.f32.mrb[10].mxu0  ;;  %v1998_v5 = vpop.f32.mrb[10].mxu1  ;;  %v2136_v6 = vmul.f32 %v1996_v16, %v1996_v16 }
 0x174   :  { %v2086_v7 = vadd.f32 %v1945_v4, %v1941_v49  ;;  %v2137_v8 = vmul.f32 %v1945_v4, %v1945_v4  ;;  %v2106_v10 = vadd.f32 %v1998_v5, %v1994_v60  ;;  %v1947_v1 = vpop.f32.mrb[11].mxu0  ;;  %v2000_v23 = vpop.f32.mrb[11].mxu1  ;;  %v2139_v24 = vmul.f32 %v1998_v5, %v1998_v5 }
 0x175   :  { %2436 = vst [vmem:[%s3346_s2 + $0x40] sm:$0xff] %v2452_v0  ;;  %2437 = vst.msk [vmem:[%s3346_s2 + $0x48] sm:$0xff] %vm3187_vm7, %v2453_v3  ;;  %v2454_v30 = vpack.c.bf16 %v1947_v1, %v1945_v4  ;;  %v2096_v33 = vadd.f32 %v1947_v1, %v1943_v20  ;;  %v2138_v34 = vmul.f32 %v1947_v1, %v1947_v1  ;;  %v2116_v35 = vsel %vm1031_vm8, %v1996_v16, 0.0 }
 0x176   :  { %v2149_v36 = vadd.f32 %v2137_v8, %v2133_v19  ;;  %v2455_v39 = vpack.c.bf16 %v2000_v23, %v1998_v5  ;;  %v2117_v41 = vsel %vm1031_vm8, %v2000_v23, 0.0  ;;  %v2169_v42 = vadd.f32 %v2139_v24, %v2135_v28 }
 0x177   :  { %2438 = vst [vmem:[%s3346_s2 + $0x50] sm:$0xff] %v2454_v30  ;;  %v2159_v43 = vadd.f32 %v2138_v34, %v2134_v2  ;;  %v2118_v44 = vadd.f32 %v2117_v41, %v2116_v35  ;;  %v2140_v45 = vmul.f32 %v2000_v23, %v2000_v23  ;;  %v2179_v55 = vsel %vm1031_vm8, %v2136_v6, 0.0 }
 0x178   :  { %2439 = vst.msk [vmem:[%s3346_s2 + $0x58] sm:$0xff] %vm3187_vm7, %v2455_v39 }
 0x179   :  { %v2180_v56 = vsel %vm1031_vm8, %v2140_v45, 0.0  ;;  %v1951_v57 = vpop.f32.mrb[12].mxu0  ;;  %v2004_v62 = vpop.f32.mrb[12].mxu1 }
 0x17a   :  { %v2181_v63 = vadd.f32 %v2180_v56, %v2179_v55  ;;  %v2087_v26 = vadd.f32 %v2086_v7, %v1951_v57  ;;  %v2141_v27 = vmul.f32 %v1951_v57, %v1951_v57  ;;  %v2107_v37 = vadd.f32 %v2106_v10, %v2004_v62  ;;  %v1953_v40 = vpop.f32.mrb[13].mxu0  ;;  %v2006_v58 = vpop.f32.mrb[13].mxu1 }
 0x17b   :  { %v2143_v59 = vmul.f32 %v2004_v62, %v2004_v62  ;;  %v2456_v61 = vpack.c.bf16 %v1953_v40, %v1951_v57  ;;  %v2097_v9 = vadd.f32 %v2096_v33, %v1953_v40  ;;  %v2142_v14 = vmul.f32 %v1953_v40, %v1953_v40  ;;  %v1955_v11 = vpop.f32.mrb[14].mxu0  ;;  %v2008_v15 = vpop.f32.mrb[14].mxu1 }
 0x17c   :  { %v2150_v18 = vadd.f32 %v2149_v36, %v2141_v27  ;;  %v2457_v22 = vpack.c.bf16 %v2006_v58, %v2004_v62  ;;  %v2119_v25 = vsel %vm1031_vm8, %v2006_v58, 0.0  ;;  %v2144_v31 = vmul.f32 %v2006_v58, %v2006_v58  ;;  %v1957_v38 = vpop.f32.mrb[15].mxu0  ;;  %v2010_v49 = vpop.f32.mrb[15].mxu1 }
 0x17d   :  { %v2170_v60 = vadd.f32 %v2169_v42, %v2143_v59  ;;  %2440 = vst [vmem:[%s3346_s2 + $0x60] sm:$0xff] %v2456_v61  ;;  %v2160_v54 = vadd.f32 %v2159_v43, %v2142_v14  ;;  %v2120_v12 = vadd.f32 %v2119_v25, %v2118_v44  ;;  %v2088_v13 = vsel %vm988_vm5, %v1955_v11, 0.0 }
 0x17e   :  { %2441 = vst.msk [vmem:[%s3346_s2 + $0x68] sm:$0xff] %vm3187_vm7, %v2457_v22  ;;  %v2182_v19 = vsel %vm1031_vm8, %v2144_v31, 0.0  ;;  %v2089_v20 = vadd.f32 %v2088_v13, %v2087_v26  ;;  %v2145_v16 = vmul.f32 %v1955_v11, %v1955_v11  ;;  %v2108_v28 = vsel %vm988_vm5, %v2008_v15, 0.0 }
 0x17f   :  { %v2183_v0 = vadd.f32 %v2182_v19, %v2181_v63  ;;  %v2109_v2 = vadd.f32 %v2108_v28, %v2107_v37  ;;  %v2147_v3 = vmul.f32 %v2008_v15, %v2008_v15  ;;  %v2458_v4 = vpack.c.bf16 %v1957_v38, %v1955_v11 }
 0x180   :  { %v2090_v5 = vrot.slane %v2089_v20, 4  ;;  %v2151_v6 = vsel %vm988_vm5, %v2145_v16, 0.0  ;;  %v2098_v7 = vsel %vm988_vm5, %v1957_v38, 0.0  ;;  %v2146_v17 = vmul.f32 %v1957_v38, %v1957_v38 }
 0x181   :  { %v2152_v8 = vadd.f32 %v2151_v6, %v2150_v18  ;;  %v2110_v10 = vrot.slane %v2109_v2, 4  ;;  %v2171_v1 = vsel %vm988_vm5, %v2147_v3, 0.0  ;;  %2442 = vst [vmem:[%s3346_s2 + $0x70] sm:$0x33] %v2458_v4  ;;  %v2099_v23 = vadd.f32 %v2098_v7, %v2097_v9 }
 0x182   :  { %v2091_v24 = vadd.f32 %v2090_v5, %v2089_v20  ;;  %v2172_v30 = vadd.f32 %v2171_v1, %v2170_v60  ;;  %v2161_v33 = vsel %vm988_vm5, %v2146_v17, 0.0  ;;  %v2459_v34 = vpack.c.bf16 %v2010_v49, %v2008_v15 }
 0x183   :  { %v2153_v35 = vrot.slane %v2152_v8, 4  ;;  %v2111_v36 = vadd.f32 %v2110_v10, %v2109_v2  ;;  %v2100_v39 = vrot.slane %v2099_v23, 4  ;;  %v2162_v41 = vadd.f32 %v2161_v33, %v2160_v54 }
 0x184   :  { %v2092_v42 = vrot.slane %v2091_v24, 2  ;;  %v2173_v43 = vrot.slane %v2172_v30, 4  ;;  %2443 = vst.msk [vmem:[%s3346_s2 + $0x78] sm:$0x33] %vm3231_vm11, %v2459_v34  ;;  %v2121_v44 = vsel %vm1037_vm12, %v2010_v49, 0.0  ;;  %v2148_v45 = vmul.f32 %v2010_v49, %v2010_v49 }
 0x185   :  { %v2154_v55 = vadd.f32 %v2153_v35, %v2152_v8  ;;  %v2112_v56 = vrot.slane %v2111_v36, 2  ;;  %v2101_v57 = vadd.f32 %v2100_v39, %v2099_v23  ;;  %v2163_v62 = vrot.slane %v2162_v41, 4 }
 0x186   :  { %v2093_v63 = vadd.f32 %v2092_v42, %v2091_v24  ;;  %v2174_v26 = vadd.f32 %v2173_v43, %v2172_v30  ;;  %v2122_v27 = vadd.f32 %v2121_v44, %v2120_v12  ;;  %v2184_v37 = vsel %vm1037_vm12, %v2148_v45, 0.0 }
 0x187   :  { %v2155_v40 = vrot.slane %v2154_v55, 2  ;;  %v2113_v58 = vadd.f32 %v2112_v56, %v2111_v36  ;;  %v2102_v59 = vrot.slane %v2101_v57, 2  ;;  %v2164_v21 = vadd.f32 %v2163_v62, %v2162_v41 }
 0x188   :  { %v2094_v61 = vrot.slane %v2093_v63, 1  ;;  %v2175_v9 = vrot.slane %v2174_v26, 2  ;;  %v2123_v14 = vrot.slane %v2122_v27, 4  ;;  %v2185_v11 = vadd.f32 %v2184_v37, %v2183_v0 }
 0x189   :  { %v2156_v15 = vadd.f32 %v2155_v40, %v2154_v55  ;;  %v2114_v18 = vrot.slane %v2113_v58, 1  ;;  %v2103_v22 = vadd.f32 %v2102_v59, %v2101_v57  ;;  %v2165_v25 = vrot.slane %v2164_v21, 2 }
 0x18a   :  { %v2095_v31 = vadd.f32 %v2094_v61, %v2093_v63  ;;  %v2176_v38 = vadd.f32 %v2175_v9, %v2174_v26  ;;  %v2124_v49 = vadd.f32 %v2123_v14, %v2122_v27  ;;  %v2186_v60 = vrot.slane %v2185_v11, 4 }
 0x18b   :  { %v2157_v54 = vrot.slane %v2156_v15, 1  ;;  %v2115_v12 = vadd.f32 %v2114_v18, %v2113_v58  ;;  %v2104_v13 = vrot.slane %v2103_v22, 1  ;;  %v2166_v19 = vadd.f32 %v2165_v25, %v2164_v21 }
 0x18c   :  { %v2129_v20 = vadd.f32 %v2095_v31, %v3243_v29  ;;  %v2177_v16 = vrot.slane %v2176_v38, 1  ;;  %v2125_v28 = vrot.slane %v2124_v49, 2  ;;  %v2187_v2 = vadd.f32 %v2186_v60, %v2185_v11 }
 0x18d   :  { %v2158_v3 = vadd.f32 %v2157_v54, %v2156_v15  ;;  %v2131_v0 = vadd.f32 %v2115_v12, %v3245_v32  ;;  %v2105_v4 = vadd.f32 %v2104_v13, %v2103_v22  ;;  %v2167_v5 = vrot.slane %v2166_v19, 1 }
 0x18e   :  { %v1044_v6 = vrot.slane %v3274_v52, 1  ;;  %2196 = vst [vmem:[%s3347_s3] sm:$0xff] %v2129_v20  ;;  %v2178_v7 = vadd.f32 %v2177_v16, %v2176_v38  ;;  %v2126_v17 = vadd.f32 %v2125_v28, %v2124_v49  ;;  %v2188_v8 = vrot.slane %v2187_v2, 2 }
 0x18f   :  { %v1085_v29 = vadd.f32 %v1084_v51, %v3247_v46  ;;  %v2192_v10 = vadd.f32 %v2158_v3, %v3262_v47  ;;  %2198 = vst [vmem:[%s3347_s3 + $0x10] sm:$0xff] %v2131_v0  ;;  %v2130_v32 = vadd.f32 %v2105_v4, %v3266_v50  ;;  %v2168_v1 = vadd.f32 %v2167_v5, %v2166_v19 }
 0x190   :  { %v1107_v23 = vrot.slane %v3276_v53, 1  ;;  %v2194_v24 = vadd.f32 %v2178_v7, %v3264_v48  ;;  %v2127_v30 = vrot.slane %v2126_v17, 1  ;;  %v2189_v33 = vadd.f32 %v2188_v8, %v2187_v2 }
 0x191   :  { %2200 = vst [vmem:[%s3348_s4] sm:$0xff] %v2192_v10  ;;  %v2193_v46 = vadd.f32 %v2168_v1, %v1085_v29  ;;  %2197 = vst [vmem:[%s3347_s3 + $0x8] sm:$0xff] %v2130_v32  ;;  %v1045_v47 = vadd.f32 %v1044_v6, %v3274_v52 }
 0x192   :  { %2202 = vst [vmem:[%s3348_s4 + $0x10] sm:$0xff] %v2194_v24  ;;  %v2128_v50 = vadd.f32 %v2127_v30, %v2126_v17  ;;  %v2190_v51 = vrot.slane %v2189_v33, 1  ;;  %v1108_v48 = vadd.f32 %v1107_v23, %v3276_v53 }
 0x193   :  { %2201 = vst [vmem:[%s3348_s4 + $0x8] sm:$0xff] %v2193_v46 }
 0x194   :  { %v2132_v34 = vadd.f32 %v2128_v50, %v1045_v47  ;;  %v2191_v35 = vadd.f32 %v2190_v51, %v2189_v33 }
 0x196   :  { %v2195_v36 = vadd.f32 %v2191_v35, %v1108_v48  ;;  %2199 = vst.msk [vmem:[%s3347_s3 + $0x18] sm:$0xff] %vm1031_vm8, %v2132_v34 }
 0x198   :  { %2203 = vst.msk [vmem:[%s3348_s4 + $0x18] sm:$0xff] %vm1031_vm8, %v2195_v36 }

// kernel: cnn_forward.7
= control target key start
LH: loop header
LB: loop body
LE: loop exit
PB: predicated region body
PF: predicated region fallthrough
CT: control target
= control target key end

     0   :  { %vm562_vm0 = vcmask 261120   ;;  %vm2014_vm1 = vsmask.f32 6400  ;;  %vm2682_vm2 = vcmask 1045504   ;;  %vm3262_vm3 = vcmask 1043456   ;;  %s11988_s1 = inlined_call_operand.vmem [shape: bf16[5,288,448], index: 1, kind: input, shape index: {}]   ;;  %s11989_s0 = inlined_call_operand.vmem [shape: bf16[2,18,288], index: 0, kind: input, shape index: {}]   ;;  %s11990_s2 = inlined_call_operand.vmem [shape: bf16[2,14,448], index: 2, kind: output, shape index: {0}]   ;;  %s11991_s3 = inlined_call_operand.vmem [shape: f32[1,8,448], index: 3, kind: output, shape index: {1}]   ;;  %s11992_s4 = inlined_call_operand.vmem [shape: f32[1,8,448], index: 4, kind: output, shape index: {2}]  }
   0x1   :  { %v8236_v0 = vld [vmem:[%s11988_s1 + $0x244] ss:$16 sps:$4 sm:$0xff]   ;;  %v8238_v1 = vld [vmem:[%s11988_s1 + $0x24c] ss:$16 sps:$4 sm:$0xff]   ;;  %v8240_v2 = vld [vmem:[%s11988_s1 + $0x240] ss:$16 sps:$4 sm:$0xff]  }
   0x2   :  { %566 = vmatprep.subr.bf16.mxu0 %v8236_v0  ;;  %v8241_v3 = vld [vmem:[%s11988_s1 + $0x248] ss:$16 sps:$4 sm:$0xff]   ;;  %652 = vmatprep.subr.bf16.mxu1 %v8238_v1  ;;  %v8242_v4 = vld [vmem:[%s11988_s1 + $0x264] ss:$16 sps:$4 sm:$0xff]   ;;  %v8244_v5 = vld [vmem:[%s11988_s1 + $0x26c] ss:$16 sps:$4 sm:$0xff]  }
   0x3   :  { %567 = vmatpush1.bf16.msra.mxu0 %v8240_v2  ;;  %653 = vmatpush1.bf16.msra.mxu1 %v8241_v3  ;;  %v8246_v6 = vld [vmem:[%s11988_s1 + $0x260] ss:$16 sps:$4 sm:$0xff]   ;;  %v8247_v7 = vld [vmem:[%s11988_s1 + $0x268] ss:$16 sps:$4 sm:$0xff]   ;;  %v8248_v8 = vld [vmem:[%s11988_s1 + $0x284] ss:$16 sps:$4 sm:$0xff]  }
   0x4   :  { %568 = vmatprep.subr.bf16.mxu0 %v8242_v4  ;;  %654 = vmatprep.subr.bf16.mxu1 %v8244_v5  ;;  %v8250_v9 = vld [vmem:[%s11988_s1 + $0x28c] ss:$16 sps:$4 sm:$0xff]   ;;  %v8252_v10 = vld [vmem:[%s11988_s1 + $0x280] ss:$16 sps:$4 sm:$0xff]   ;;  %v8253_v11 = vld [vmem:[%s11988_s1 + $0x288] ss:$16 sps:$4 sm:$0xff]  }
   0x5   :  { %v8254_v12 = vld [vmem:[%s11988_s1 + $0x2a4] ss:$16 sps:$4 sm:$0xff]   ;;  %v8256_v13 = vld [vmem:[%s11988_s1 + $0x2ac] ss:$16 sps:$4 sm:$0xff]   ;;  %v8258_v14 = vld [vmem:[%s11988_s1 + $0x2a0] ss:$16 sps:$4 sm:$0xff]  }
   0x6   :  { %v8259_v15 = vld [vmem:[%s11988_s1 + $0x2a8] ss:$16 sps:$4 sm:$0xff]   ;;  %v8260_v16 = vld [vmem:[%s11988_s1 + $0x2c4] ss:$16 sps:$4 sm:$0xff]   ;;  %v8262_v17 = vld [vmem:[%s11988_s1 + $0x2cc] ss:$16 sps:$4 sm:$0xff]  }
   0x7   :  { %569 = vmatpush1.bf16.msra.mxu0 %v8246_v6  ;;  %655 = vmatpush1.bf16.msra.mxu1 %v8247_v7  ;;  %v8264_v18 = vld [vmem:[%s11988_s1 + $0x2c0] ss:$16 sps:$4 sm:$0xff]   ;;  %v8265_v19 = vld [vmem:[%s11988_s1 + $0x2c8] ss:$16 sps:$4 sm:$0xff]   ;;  %v8266_v20 = vld [vmem:[%s11988_s1 + $0x2e4] ss:$16 sps:$4 sm:$0xff]  }
   0x8   :  { %570 = vmatprep.subr.bf16.mxu0 %v8248_v8  ;;  %656 = vmatprep.subr.bf16.mxu1 %v8250_v9  ;;  %v8268_v21 = vld [vmem:[%s11988_s1 + $0x2ec] ss:$16 sps:$4 sm:$0xff]   ;;  %v8270_v22 = vld [vmem:[%s11988_s1 + $0x2e0] ss:$16 sps:$4 sm:$0xff]   ;;  %v8271_v23 = vld [vmem:[%s11988_s1 + $0x2e8] ss:$16 sps:$4 sm:$0xff]  }
   0x9   :  { %v8272_v24 = vld [vmem:[%s11988_s1 + $0x304] ss:$16 sps:$4 sm:$0xff]   ;;  %v8274_v25 = vld [vmem:[%s11988_s1 + $0x30c] ss:$16 sps:$4 sm:$0xff]   ;;  %v8276_v26 = vld [vmem:[%s11988_s1 + $0x300] ss:$16 sps:$4 sm:$0xff]  }
   0xa   :  { %v8277_v27 = vld [vmem:[%s11988_s1 + $0x308] ss:$16 sps:$4 sm:$0xff]   ;;  %v8278_v28 = vld [vmem:[%s11988_s1 + $0x324] ss:$16 sps:$4 sm:$0xff]   ;;  %v8280_v29 = vld [vmem:[%s11988_s1 + $0x32c] ss:$16 sps:$4 sm:$0xff]  }
   0xb   :  { %571 = vmatpush1.bf16.msra.mxu0 %v8252_v10  ;;  %657 = vmatpush1.bf16.msra.mxu1 %v8253_v11  ;;  %v8282_v30 = vld [vmem:[%s11988_s1 + $0x320] ss:$16 sps:$4 sm:$0xff]   ;;  %v8283_v31 = vld [vmem:[%s11988_s1 + $0x328] ss:$16 sps:$4 sm:$0xff]   ;;  %v8284_v32 = vld [vmem:[%s11988_s1 + $0x344] ss:$16 sps:$4 sm:$0xff]  }
   0xc   :  { %572 = vmatprep.subr.bf16.mxu0 %v8254_v12  ;;  %658 = vmatprep.subr.bf16.mxu1 %v8256_v13  ;;  %v8286_v33 = vld [vmem:[%s11988_s1 + $0x34c] ss:$16 sps:$4 sm:$0xff]   ;;  %v8288_v34 = vld [vmem:[%s11988_s1 + $0x340] ss:$16 sps:$4 sm:$0xff]   ;;  %v8289_v35 = vld [vmem:[%s11988_s1 + $0x348] ss:$16 sps:$4 sm:$0xff]  }
   0xd   :  { %v8290_v36 = vld [vmem:[%s11988_s1 + $0x364] ss:$16 sps:$4 sm:$0xff]   ;;  %v8292_v37 = vld [vmem:[%s11988_s1 + $0x36c] ss:$16 sps:$4 sm:$0xff]   ;;  %v8294_v38 = vld [vmem:[%s11988_s1 + $0x360] ss:$16 sps:$4 sm:$0xff]  }
   0xe   :  { %v8295_v39 = vld [vmem:[%s11988_s1 + $0x368] ss:$16 sps:$4 sm:$0xff]   ;;  %v8296_v40 = vld [vmem:[%s11988_s1 + $0x384] ss:$16 sps:$4 sm:$0xff]   ;;  %v8298_v41 = vld [vmem:[%s11988_s1 + $0x38c] ss:$16 sps:$4 sm:$0xff]  }
   0xf   :  { %573 = vmatpush1.bf16.msra.mxu0 %v8258_v14  ;;  %659 = vmatpush1.bf16.msra.mxu1 %v8259_v15  ;;  %v8300_v42 = vld [vmem:[%s11988_s1 + $0x380] ss:$16 sps:$4 sm:$0xff]   ;;  %v8301_v43 = vld [vmem:[%s11988_s1 + $0x388] ss:$16 sps:$4 sm:$0xff]   ;;  %v8302_v44 = vld [vmem:[%s11988_s1 + $0x3a4] ss:$16 sps:$4 sm:$0xff]  }
  0x10   :  { %574 = vmatprep.subr.bf16.mxu0 %v8260_v16  ;;  %660 = vmatprep.subr.bf16.mxu1 %v8262_v17  ;;  %v8304_v45 = vld [vmem:[%s11988_s1 + $0x3ac] ss:$16 sps:$4 sm:$0xff]   ;;  %v9519_v46 = vld [vmem:[%s11989_s0] sm:$0xff]  ;;  %v8307_v49 = vld [vmem:[%s11988_s1 + $0x3a8] ss:$16 sps:$4 sm:$0xff]   ;;  %vm3263_vm4 = vcmask 523268  }
  0x11   :  { %v9524_v47 = vld [vmem:[%s11989_s0 + $0xc] sm:$0xff]  ;;  %v8308_v51 = vld [vmem:[%s11988_s1 + $0x3c4] ss:$16 sps:$4 sm:$0xff]   ;;  %v8313_v56 = vld [vmem:[%s11988_s1 + $0x3c8] ss:$16 sps:$4 sm:$0xff]   ;;  %vm3296_vm5 = vcmask 523264  }
  0x12   :  { %v8306_v48 = vld [vmem:[%s11988_s1 + $0x3a0] ss:$16 sps:$4 sm:$0xff]   ;;  %v6776_v50 = vcombine.high %v9519_v46, %v9524_v47  ;;  %v8310_v52 = vld [vmem:[%s11988_s1 + $0x3cc] ss:$16 sps:$4 sm:$0xff]   ;;  %v8314_v58 = vld [vmem:[%s11988_s1 + $0x3e4] ss:$16 sps:$4 sm:$0xff]   ;;  %v6775_v62 = vcombine.low %v9519_v46, %v9524_v47 }
  0x13   :  { %575 = vmatpush1.bf16.msra.mxu0 %v8264_v18  ;;  %661 = vmatpush1.bf16.msra.mxu1 %v8265_v19  ;;  %v8312_v55 = vld [vmem:[%s11988_s1 + $0x3c0] ss:$16 sps:$4 sm:$0xff]   ;;  %v8316_v59 = vld [vmem:[%s11988_s1 + $0x3ec] ss:$16 sps:$4 sm:$0xff]   ;;  %v8319_v63 = vld [vmem:[%s11988_s1 + $0x3e8] ss:$16 sps:$4 sm:$0xff]  }
  0x14   :  { %576 = vmatprep.subr.bf16.mxu0 %v8266_v20  ;;  %662 = vmatprep.subr.bf16.mxu1 %v8268_v21  ;;  %v187_v53 = vshrl.u32 %v6776_v50, 16  ;;  %v189_v54 = vshll.u32 %v6776_v50, 16  ;;  %v8318_v61 = vld [vmem:[%s11988_s1 + $0x3e0] ss:$16 sps:$4 sm:$0xff]   ;;  %v8320_v0 = vld [vmem:[%s11988_s1 + $0x404] ss:$16 sps:$4 sm:$0xff]   ;;  %vm11319_vm6 = vmor %vm3263_vm4, %vm3262_vm3 }
  0x15   :  { %v8322_v1 = vld [vmem:[%s11988_s1 + $0x40c] ss:$16 sps:$4 sm:$0xff]   ;;  %v8324_v2 = vld [vmem:[%s11988_s1 + $0x400] ss:$16 sps:$4 sm:$0xff]   ;;  %v182_v3 = vshll.u32 %v6775_v62, 16  ;;  %v180_v9 = vshrl.u32 %v6775_v62, 16 }
  0x16   :  { %v191_v57 = vrot.slane %v189_v54, 1  ;;  %v8325_v4 = vld [vmem:[%s11988_s1 + $0x408] ss:$16 sps:$4 sm:$0xff]   ;;  %v8326_v5 = vld [vmem:[%s11988_s1 + $0x424] ss:$16 sps:$4 sm:$0xff]   ;;  %vm3267_vm7 = vcmask 1042432  }
  0x17   :  { %577 = vmatpush1.bf16.msra.mxu0 %v8270_v22  ;;  %663 = vmatpush1.bf16.msra.mxu1 %v8271_v23  ;;  %v8328_v6 = vld [vmem:[%s11988_s1 + $0x42c] ss:$16 sps:$4 sm:$0xff]   ;;  %v8330_v7 = vld [vmem:[%s11988_s1 + $0x420] ss:$16 sps:$4 sm:$0xff]   ;;  %v8331_v8 = vld [vmem:[%s11988_s1 + $0x428] ss:$16 sps:$4 sm:$0xff]  }
  0x18   :  { %578 = vmatprep.subr.bf16.mxu0 %v8272_v24  ;;  %664 = vmatprep.subr.bf16.mxu1 %v8274_v25  ;;  %v192_v60 = vor.u32 %v191_v57, %v187_v53  ;;  %v184_v10 = vrot.slane %v182_v3, 1  ;;  %v9587_v11 = vld [vmem:[%s11989_s0 + $0x8] sm:$0xf]  ;;  %v92_v12 = vld [vmem:[%s11989_s0 + $0x14] sm:$0xf]  ;;  %vm3268_vm8 = vcmask 522244  }
  0x19   :  { %v8336_v13 = vld [vmem:[%s11988_s1 + $0x444] ss:$16 sps:$4 sm:$0xff]   ;;  %v8339_v14 = vld [vmem:[%s11988_s1 + $0x44c] ss:$16 sps:$4 sm:$0xff]   ;;  %v8334_v16 = vld [vmem:[%s11988_s1 + $0x440] ss:$16 sps:$4 sm:$0xff]   ;;  %v6777_v17 = vcombine.low %v9587_v11, %v92_v12 }
  0x1a   :  { %598 = vmatprep.mubr.bf16.mxu0 %v192_v60  ;;  %684 = vmatprep.mubr.bf16.mxu1 %v192_v60  ;;  %v185_v15 = vor.u32 %v184_v10, %v180_v9  ;;  %v8337_v18 = vld [vmem:[%s11988_s1 + $0x448] ss:$16 sps:$4 sm:$0xff]   ;;  %v8342_v19 = vld [vmem:[%s11988_s1 + $0x464] ss:$16 sps:$4 sm:$0xff]   ;;  %v8345_v20 = vld [vmem:[%s11988_s1 + $0x46c] ss:$16 sps:$4 sm:$0xff]  }
  0x1b   :  { %579 = vmatpush1.bf16.msra.mxu0 %v8276_v26  ;;  %665 = vmatpush1.bf16.msra.mxu1 %v8277_v27  ;;  %v8340_v21 = vld [vmem:[%s11988_s1 + $0x460] ss:$16 sps:$4 sm:$0xff]   ;;  %v196_v22 = vshll.u32 %v6777_v17, 16  ;;  %v8343_v23 = vld [vmem:[%s11988_s1 + $0x468] ss:$16 sps:$4 sm:$0xff]   ;;  %v9352_v26 = vmov 0   ;;  %vm11366_vm9 = vmor %vm3268_vm8, %vm3267_vm7 }
  0x1c   :  { %580 = vmatprep.subr.bf16.mxu0 %v8278_v28  ;;  %666 = vmatprep.subr.bf16.mxu1 %v8280_v29  ;;  %v8348_v24 = vld [vmem:[%s11988_s1 + $0x4] ss:$16 sps:$4 sm:$0xff]   ;;  %v8351_v25 = vld [vmem:[%s11988_s1 + $0xc] ss:$16 sps:$4 sm:$0xff]   ;;  %v194_v27 = vshrl.u32 %v6777_v17, 16  ;;  %vm3298_vm10 = vcmask 521216  }
  0x1d   :  { %v198_v28 = vrot.slane %v196_v22, 1  ;;  %v8346_v29 = vld [vmem:[%s11988_s1] ss:$16 sps:$4 sm:$0xff]   ;;  %v8388_v57 = vld [vmem:[%s11988_s1 + $0xcc] ss:$16 sps:$4 sm:$0xff]  }
  0x1e   :  { %v9684_v50 = vld [vmem:[%s11989_s0 + $0xc] sm:$0x77]  ;;  %v8391_v60 = vld [vmem:[%s11988_s1 + $0xe4] ss:$16 sps:$4 sm:$0xff]   ;;  %v8398_v3 = vld [vmem:[%s11988_s1 + $0x108] ss:$16 sps:$4 sm:$0xff]  }
  0x1f   :  { %581 = vmatpush1.bf16.msra.mxu0 %v8282_v30  ;;  %667 = vmatpush1.bf16.msra.mxu1 %v8283_v31  ;;  %v199_v30 = vor.u32 %v198_v28, %v194_v27  ;;  %v8349_v31 = vld [vmem:[%s11988_s1 + $0x8] ss:$16 sps:$4 sm:$0xff]   ;;  %v6853_v53 = vcombine.high %v9519_v46, %v9684_v50  ;;  %v8377_v54 = vld [vmem:[%s11988_s1 + $0xa0] ss:$16 sps:$4 sm:$0xff]   ;;  %v8412_v9 = vld [vmem:[%s11988_s1 + $0x14c] ss:$16 sps:$4 sm:$0xff]  }
  0x20   :  { %582 = vmatprep.subr.bf16.mxu0 %v8284_v32  ;;  %668 = vmatprep.subr.bf16.mxu1 %v8286_v33  ;;  %v8355_v32 = vld [vmem:[%s11988_s1 + $0x24] ss:$16 sps:$4 sm:$0xff]   ;;  %v8358_v33 = vld [vmem:[%s11988_s1 + $0x2c] ss:$16 sps:$4 sm:$0xff]   ;;  %v8389_v62 = vld [vmem:[%s11988_s1 + $0xe0] ss:$16 sps:$4 sm:$0xff]  }
  0x21   :  { %v8407_v10 = vld [vmem:[%s11988_s1 + $0x140] ss:$16 sps:$4 sm:$0xff]   ;;  %v8410_v12 = vld [vmem:[%s11988_s1 + $0x148] ss:$16 sps:$4 sm:$0xff]   ;;  %v8421_v17 = vld [vmem:[%s11988_s1 + $0x184] ss:$16 sps:$4 sm:$0xff]  }
  0x22   :  { %v8430_v22 = vld [vmem:[%s11988_s1 + $0x1ac] ss:$16 sps:$4 sm:$0xff]   ;;  %v8431_v28 = vld [vmem:[%s11988_s1 + $0x1c0] ss:$16 sps:$4 sm:$0xff]  }
  0x23   :  { %583 = vmatpush1.bf16.msra.mxu0 %v8288_v34  ;;  %669 = vmatpush1.bf16.msra.mxu1 %v8289_v35  ;;  %v8353_v34 = vld [vmem:[%s11988_s1 + $0x20] ss:$16 sps:$4 sm:$0xff]   ;;  %v8356_v35 = vld [vmem:[%s11988_s1 + $0x28] ss:$16 sps:$4 sm:$0xff]   ;;  %v8436_v27 = vld [vmem:[%s11988_s1 + $0x1cc] ss:$16 sps:$4 sm:$0xff]  }
  0x24   :  { %584 = vmatprep.subr.bf16.mxu0 %v8290_v36  ;;  %670 = vmatprep.subr.bf16.mxu1 %v8292_v37  ;;  %v8361_v36 = vld [vmem:[%s11988_s1 + $0x44] ss:$16 sps:$4 sm:$0xff]   ;;  %v8364_v37 = vld [vmem:[%s11988_s1 + $0x4c] ss:$16 sps:$4 sm:$0xff]  }
  0x27   :  { %585 = vmatpush1.bf16.msra.mxu0 %v8294_v38  ;;  %671 = vmatpush1.bf16.msra.mxu1 %v8295_v39  ;;  %v8359_v38 = vld [vmem:[%s11988_s1 + $0x40] ss:$16 sps:$4 sm:$0xff]   ;;  %v8362_v39 = vld [vmem:[%s11988_s1 + $0x48] ss:$16 sps:$4 sm:$0xff]  }
  0x28   :  { %586 = vmatprep.subr.bf16.mxu0 %v8296_v40  ;;  %672 = vmatprep.subr.bf16.mxu1 %v8298_v41  ;;  %v8367_v40 = vld [vmem:[%s11988_s1 + $0x64] ss:$16 sps:$4 sm:$0xff]   ;;  %v8370_v41 = vld [vmem:[%s11988_s1 + $0x6c] ss:$16 sps:$4 sm:$0xff]  }
  0x2b   :  { %587 = vmatpush1.bf16.msra.mxu0 %v8300_v42  ;;  %673 = vmatpush1.bf16.msra.mxu1 %v8301_v43  ;;  %v8365_v42 = vld [vmem:[%s11988_s1 + $0x60] ss:$16 sps:$4 sm:$0xff]   ;;  %v8368_v43 = vld [vmem:[%s11988_s1 + $0x68] ss:$16 sps:$4 sm:$0xff]  }
  0x2c   :  { %588 = vmatprep.subr.bf16.mxu0 %v8302_v44  ;;  %674 = vmatprep.subr.bf16.mxu1 %v8304_v45  ;;  %v8373_v44 = vld [vmem:[%s11988_s1 + $0x84] ss:$16 sps:$4 sm:$0xff]   ;;  %v8376_v45 = vld [vmem:[%s11988_s1 + $0x8c] ss:$16 sps:$4 sm:$0xff]  }
  0x2f   :  { %589 = vmatpush1.bf16.msra.mxu0 %v8306_v48  ;;  %675 = vmatpush1.bf16.msra.mxu1 %v8307_v49  ;;  %v8371_v48 = vld [vmem:[%s11988_s1 + $0x80] ss:$16 sps:$4 sm:$0xff]   ;;  %v8374_v49 = vld [vmem:[%s11988_s1 + $0x88] ss:$16 sps:$4 sm:$0xff]  }
  0x30   :  { %590 = vmatprep.subr.bf16.mxu0 %v8308_v51  ;;  %676 = vmatprep.subr.bf16.mxu1 %v8310_v52  ;;  %v8379_v51 = vld [vmem:[%s11988_s1 + $0xa4] ss:$16 sps:$4 sm:$0xff]   ;;  %v8382_v52 = vld [vmem:[%s11988_s1 + $0xac] ss:$16 sps:$4 sm:$0xff]  }
  0x33   :  { %591 = vmatpush1.bf16.msra.mxu0 %v8312_v55  ;;  %677 = vmatpush1.bf16.msra.mxu1 %v8313_v56  ;;  %v8380_v55 = vld [vmem:[%s11988_s1 + $0xa8] ss:$16 sps:$4 sm:$0xff]   ;;  %v8385_v56 = vld [vmem:[%s11988_s1 + $0xc4] ss:$16 sps:$4 sm:$0xff]  }
  0x34   :  { %592 = vmatprep.subr.bf16.mxu0 %v8314_v58  ;;  %678 = vmatprep.subr.bf16.mxu1 %v8316_v59  ;;  %v8383_v58 = vld [vmem:[%s11988_s1 + $0xc0] ss:$16 sps:$4 sm:$0xff]   ;;  %v8386_v59 = vld [vmem:[%s11988_s1 + $0xc8] ss:$16 sps:$4 sm:$0xff]  }
  0x37   :  { %593 = vmatpush1.bf16.msra.mxu0 %v8318_v61  ;;  %679 = vmatpush1.bf16.msra.mxu1 %v8319_v63  ;;  %v8394_v61 = vld [vmem:[%s11988_s1 + $0xec] ss:$16 sps:$4 sm:$0xff]   ;;  %v8392_v63 = vld [vmem:[%s11988_s1 + $0xe8] ss:$16 sps:$4 sm:$0xff]  }
  0x38   :  { %594 = vmatprep.subr.bf16.mxu0 %v8320_v0  ;;  %680 = vmatprep.subr.bf16.mxu1 %v8322_v1  ;;  %v8397_v0 = vld [vmem:[%s11988_s1 + $0x104] ss:$16 sps:$4 sm:$0xff]   ;;  %v8400_v1 = vld [vmem:[%s11988_s1 + $0x10c] ss:$16 sps:$4 sm:$0xff]  }
  0x3b   :  { %595 = vmatpush1.bf16.msra.mxu0 %v8324_v2  ;;  %681 = vmatpush1.bf16.msra.mxu1 %v8325_v4  ;;  %v8395_v2 = vld [vmem:[%s11988_s1 + $0x100] ss:$16 sps:$4 sm:$0xff]   ;;  %v8403_v4 = vld [vmem:[%s11988_s1 + $0x124] ss:$16 sps:$4 sm:$0xff]  }
  0x3c   :  { %596 = vmatprep.subr.bf16.mxu0 %v8326_v5  ;;  %682 = vmatprep.subr.bf16.mxu1 %v8328_v6  ;;  %v8406_v5 = vld [vmem:[%s11988_s1 + $0x12c] ss:$16 sps:$4 sm:$0xff]   ;;  %v8401_v6 = vld [vmem:[%s11988_s1 + $0x120] ss:$16 sps:$4 sm:$0xff]  }
  0x3f   :  { %597 = vmatpush1.bf16.msra.mxu0 %v8330_v7  ;;  %683 = vmatpush1.bf16.msra.mxu1 %v8331_v8  ;;  %v8404_v7 = vld [vmem:[%s11988_s1 + $0x128] ss:$16 sps:$4 sm:$0xff]   ;;  %v8409_v8 = vld [vmem:[%s11988_s1 + $0x144] ss:$16 sps:$4 sm:$0xff]  }
  0x40   :  { %609 = vmatprep.subr.bf16.mxu0 %v8336_v13  ;;  %695 = vmatprep.subr.bf16.mxu1 %v8339_v14  ;;  %v8415_v13 = vld [vmem:[%s11988_s1 + $0x164] ss:$16 sps:$4 sm:$0xff]   ;;  %v8418_v14 = vld [vmem:[%s11988_s1 + $0x16c] ss:$16 sps:$4 sm:$0xff]  }
  0x42   :  { %599 = vmatmul.mubr.bf16.vlgmr.msra.gmra.mrb[0].mxu0 %v185_v15  ;;  %685 = vmatmul.mubr.bf16.vlgmr.msra.gmra.mrb[0].mxu1 %v185_v15  ;;  %v8413_v15 = vld [vmem:[%s11988_s1 + $0x160] ss:$16 sps:$4 sm:$0xff]  }
  0x43   :  { %610 = vmatpush1.bf16.msra.mxu0 %v8334_v16  ;;  %696 = vmatpush1.bf16.msra.mxu1 %v8337_v18  ;;  %v8416_v16 = vld [vmem:[%s11988_s1 + $0x168] ss:$16 sps:$4 sm:$0xff]   ;;  %v8424_v18 = vld [vmem:[%s11988_s1 + $0x18c] ss:$16 sps:$4 sm:$0xff]  }
  0x44   :  { %611 = vmatprep.subr.bf16.mxu0 %v8342_v19  ;;  %697 = vmatprep.subr.bf16.mxu1 %v8345_v20  ;;  %v8419_v19 = vld [vmem:[%s11988_s1 + $0x180] ss:$16 sps:$4 sm:$0xff]   ;;  %v8422_v20 = vld [vmem:[%s11988_s1 + $0x188] ss:$16 sps:$4 sm:$0xff]  }
  0x45   :  { %641 = vmatprep.mubr.bf16.mxu0 %v9352_v26  ;;  %727 = vmatprep.mubr.bf16.mxu1 %v9352_v26 }
  0x47   :  { %612 = vmatpush1.bf16.msra.mxu0 %v8340_v21  ;;  %698 = vmatpush1.bf16.msra.mxu1 %v8343_v23  ;;  %v8427_v21 = vld [vmem:[%s11988_s1 + $0x1a4] ss:$16 sps:$4 sm:$0xff]   ;;  %v8425_v23 = vld [vmem:[%s11988_s1 + $0x1a0] ss:$16 sps:$4 sm:$0xff]  }
  0x48   :  { %1111 = vmatprep.subr.bf16.mxu0 %v8348_v24  ;;  %1197 = vmatprep.subr.bf16.mxu1 %v8351_v25  ;;  %v8428_v24 = vld [vmem:[%s11988_s1 + $0x1a8] ss:$16 sps:$4 sm:$0xff]   ;;  %v8433_v25 = vld [vmem:[%s11988_s1 + $0x1c4] ss:$16 sps:$4 sm:$0xff]  }
  0x4e   :  { %6850 = vmatmul.mubr.msk.bf16.vlgmr.msra.gmra.mrb[0].mxu0 %vm562_vm0, %v199_v30  ;;  %6851 = vmatmul.mubr.msk.bf16.vlgmr.msra.gmra.mrb[0].mxu1 %vm562_vm0, %v199_v30  ;;  %v8439_v30 = vld [vmem:[%s11988_s1 + $0x1e4] ss:$16 sps:$4 sm:$0xff]  }
  0x4f   :  { %1112 = vmatpush1.bf16.msra.mxu0 %v8346_v29  ;;  %1198 = vmatpush1.bf16.msra.mxu1 %v8349_v31  ;;  %v8434_v29 = vld [vmem:[%s11988_s1 + $0x1c8] ss:$16 sps:$4 sm:$0xff]   ;;  %v8442_v31 = vld [vmem:[%s11988_s1 + $0x1ec] ss:$16 sps:$4 sm:$0xff]  }
  0x50   :  { %1113 = vmatprep.subr.bf16.mxu0 %v8355_v32  ;;  %1199 = vmatprep.subr.bf16.mxu1 %v8358_v33  ;;  %v8437_v32 = vld [vmem:[%s11988_s1 + $0x1e0] ss:$16 sps:$4 sm:$0xff]   ;;  %v8440_v33 = vld [vmem:[%s11988_s1 + $0x1e8] ss:$16 sps:$4 sm:$0xff]  }
  0x51   :  { %1143 = vmatprep.mubr.bf16.mxu0 %v6853_v53  ;;  %1229 = vmatprep.mubr.bf16.mxu1 %v6853_v53  ;;  %v8469_v53 = vld [vmem:[%s11988_s1 + $0x4ac] ss:$16 sps:$4 sm:$0xff]  }
  0x53   :  { %1114 = vmatpush1.bf16.msra.mxu0 %v8353_v34  ;;  %1200 = vmatpush1.bf16.msra.mxu1 %v8356_v35  ;;  %v8447_v34 = vld [vmem:[%s11988_s1 + $0x204] ss:$16 sps:$4 sm:$0xff]   ;;  %v8450_v35 = vld [vmem:[%s11988_s1 + $0x20c] ss:$16 sps:$4 sm:$0xff]  }
  0x54   :  { %1115 = vmatprep.subr.bf16.mxu0 %v8361_v36  ;;  %1201 = vmatprep.subr.bf16.mxu1 %v8364_v37  ;;  %v6852_v36 = vcombine.low %v9519_v46, %v9684_v50  ;;  %v8445_v37 = vld [vmem:[%s11988_s1 + $0x200] ss:$16 sps:$4 sm:$0xff]   ;;  %v8456_v46 = vld [vmem:[%s11988_s1 + $0x22c] ss:$16 sps:$4 sm:$0xff]  }
  0x57   :  { %1116 = vmatpush1.bf16.msra.mxu0 %v8359_v38  ;;  %1202 = vmatpush1.bf16.msra.mxu1 %v8362_v39  ;;  %v8448_v38 = vld [vmem:[%s11988_s1 + $0x208] ss:$16 sps:$4 sm:$0xff]   ;;  %v8453_v39 = vld [vmem:[%s11988_s1 + $0x224] ss:$16 sps:$4 sm:$0xff]  }
  0x58   :  { %1117 = vmatprep.subr.bf16.mxu0 %v8367_v40  ;;  %1203 = vmatprep.subr.bf16.mxu1 %v8370_v41  ;;  %v8451_v40 = vld [vmem:[%s11988_s1 + $0x220] ss:$16 sps:$4 sm:$0xff]   ;;  %v8454_v41 = vld [vmem:[%s11988_s1 + $0x228] ss:$16 sps:$4 sm:$0xff]  }
  0x5b   :  { %1118 = vmatpush1.bf16.msra.mxu0 %v8365_v42  ;;  %1204 = vmatpush1.bf16.msra.mxu1 %v8368_v43  ;;  %v8459_v42 = vld [vmem:[%s11988_s1 + $0x484] ss:$16 sps:$4 sm:$0xff]   ;;  %v8462_v43 = vld [vmem:[%s11988_s1 + $0x48c] ss:$16 sps:$4 sm:$0xff]  }
  0x5c   :  { %1119 = vmatprep.subr.bf16.mxu0 %v8373_v44  ;;  %1205 = vmatprep.subr.bf16.mxu1 %v8376_v45  ;;  %v9857_v44 = vld [vmem:[%s11989_s0] sm:$0xee]  ;;  %v18_v45 = vld [vmem:[%s11989_s0 + $0x14] sm:$0x7] }
  0x5d   :  { %v6854_v50 = vcombine.low %v9587_v11, %v18_v45  ;;  %v8467_v11 = vld [vmem:[%s11988_s1 + $0x4a8] ss:$16 sps:$4 sm:$0xff]   ;;  %v8550_v45 = vld [vmem:[%s11988_s1 + $0x664] ss:$16 sps:$4 sm:$0xff]  }
  0x5f   :  { %1120 = vmatpush1.bf16.msra.mxu0 %v8371_v48  ;;  %1206 = vmatpush1.bf16.msra.mxu1 %v8374_v49  ;;  %v7002_v48 = vcombine.high %v9857_v44, %v9524_v47  ;;  %v8457_v49 = vld [vmem:[%s11988_s1 + $0x480] ss:$16 sps:$4 sm:$0xff]  }
  0x60   :  { %1121 = vmatprep.subr.bf16.mxu0 %v8379_v51  ;;  %1207 = vmatprep.subr.bf16.mxu1 %v8382_v52  ;;  %v8460_v51 = vld [vmem:[%s11988_s1 + $0x488] ss:$16 sps:$4 sm:$0xff]   ;;  %v8466_v52 = vld [vmem:[%s11988_s1 + $0x4a4] ss:$16 sps:$4 sm:$0xff]   ;;  %v8464_v47 = vld [vmem:[%s11988_s1 + $0x4a0] ss:$16 sps:$4 sm:$0xff]  }
  0x63   :  { %1122 = vmatpush1.bf16.msra.mxu0 %v8377_v54  ;;  %1208 = vmatpush1.bf16.msra.mxu1 %v8380_v55  ;;  %v1367_v54 = vrot.slane %v7002_v48, 1  ;;  %v8472_v55 = vld [vmem:[%s11988_s1 + $0x4c4] ss:$16 sps:$4 sm:$0xff]   ;;  %v8553_v48 = vld [vmem:[%s11988_s1 + $0x66c] ss:$16 sps:$4 sm:$0xff]  }
  0x64   :  { %1123 = vmatprep.subr.bf16.mxu0 %v8385_v56  ;;  %1209 = vmatprep.subr.bf16.mxu1 %v8388_v57  ;;  %v8475_v56 = vld [vmem:[%s11988_s1 + $0x4cc] ss:$16 sps:$4 sm:$0xff]   ;;  %v8470_v57 = vld [vmem:[%s11988_s1 + $0x4c0] ss:$16 sps:$4 sm:$0xff]  }
  0x67   :  { %1124 = vmatpush1.bf16.msra.mxu0 %v8383_v58  ;;  %1210 = vmatpush1.bf16.msra.mxu1 %v8386_v59  ;;  %v8473_v58 = vld [vmem:[%s11988_s1 + $0x4c8] ss:$16 sps:$4 sm:$0xff]   ;;  %v8478_v59 = vld [vmem:[%s11988_s1 + $0x4e4] ss:$16 sps:$4 sm:$0xff]  }
  0x68   :  { %1125 = vmatprep.subr.bf16.mxu0 %v8391_v60  ;;  %1211 = vmatprep.subr.bf16.mxu1 %v8394_v61  ;;  %v8481_v60 = vld [vmem:[%s11988_s1 + $0x4ec] ss:$16 sps:$4 sm:$0xff]   ;;  %v8476_v61 = vld [vmem:[%s11988_s1 + $0x4e0] ss:$16 sps:$4 sm:$0xff]  }
  0x6b   :  { %1126 = vmatpush1.bf16.msra.mxu0 %v8389_v62  ;;  %1212 = vmatpush1.bf16.msra.mxu1 %v8392_v63  ;;  %v8479_v62 = vld [vmem:[%s11988_s1 + $0x4e8] ss:$16 sps:$4 sm:$0xff]   ;;  %v8484_v63 = vld [vmem:[%s11988_s1 + $0x504] ss:$16 sps:$4 sm:$0xff]  }
  0x6c   :  { %1127 = vmatprep.subr.bf16.mxu0 %v8397_v0  ;;  %1213 = vmatprep.subr.bf16.mxu1 %v8400_v1  ;;  %v8487_v0 = vld [vmem:[%s11988_s1 + $0x50c] ss:$16 sps:$4 sm:$0xff]   ;;  %v8482_v1 = vld [vmem:[%s11988_s1 + $0x500] ss:$16 sps:$4 sm:$0xff]  }
  0x6f   :  { %1128 = vmatpush1.bf16.msra.mxu0 %v8395_v2  ;;  %1214 = vmatpush1.bf16.msra.mxu1 %v8398_v3  ;;  %v8485_v2 = vld [vmem:[%s11988_s1 + $0x508] ss:$16 sps:$4 sm:$0xff]   ;;  %v8490_v3 = vld [vmem:[%s11988_s1 + $0x524] ss:$16 sps:$4 sm:$0xff]  }
  0x70   :  { %1129 = vmatprep.subr.bf16.mxu0 %v8403_v4  ;;  %1215 = vmatprep.subr.bf16.mxu1 %v8406_v5  ;;  %v8493_v4 = vld [vmem:[%s11988_s1 + $0x52c] ss:$16 sps:$4 sm:$0xff]   ;;  %v8488_v5 = vld [vmem:[%s11988_s1 + $0x520] ss:$16 sps:$4 sm:$0xff]  }
  0x73   :  { %1130 = vmatpush1.bf16.msra.mxu0 %v8401_v6  ;;  %1216 = vmatpush1.bf16.msra.mxu1 %v8404_v7  ;;  %v8491_v6 = vld [vmem:[%s11988_s1 + $0x528] ss:$16 sps:$4 sm:$0xff]   ;;  %v8496_v7 = vld [vmem:[%s11988_s1 + $0x544] ss:$16 sps:$4 sm:$0xff]  }
  0x74   :  { %1131 = vmatprep.subr.bf16.mxu0 %v8409_v8  ;;  %1217 = vmatprep.subr.bf16.mxu1 %v8412_v9  ;;  %v8499_v8 = vld [vmem:[%s11988_s1 + $0x54c] ss:$16 sps:$4 sm:$0xff]   ;;  %v8494_v9 = vld [vmem:[%s11988_s1 + $0x540] ss:$16 sps:$4 sm:$0xff]  }
  0x77   :  { %1132 = vmatpush1.bf16.msra.mxu0 %v8407_v10  ;;  %1218 = vmatpush1.bf16.msra.mxu1 %v8410_v12  ;;  %v8497_v10 = vld [vmem:[%s11988_s1 + $0x548] ss:$16 sps:$4 sm:$0xff]   ;;  %v8502_v12 = vld [vmem:[%s11988_s1 + $0x564] ss:$16 sps:$4 sm:$0xff]  }
  0x78   :  { %1133 = vmatprep.subr.bf16.mxu0 %v8415_v13  ;;  %1219 = vmatprep.subr.bf16.mxu1 %v8418_v14  ;;  %v8505_v13 = vld [vmem:[%s11988_s1 + $0x56c] ss:$16 sps:$4 sm:$0xff]   ;;  %v8500_v14 = vld [vmem:[%s11988_s1 + $0x560] ss:$16 sps:$4 sm:$0xff]  }
  0x7b   :  { %1134 = vmatpush1.bf16.msra.mxu0 %v8413_v15  ;;  %1220 = vmatpush1.bf16.msra.mxu1 %v8416_v16  ;;  %v8503_v15 = vld [vmem:[%s11988_s1 + $0x568] ss:$16 sps:$4 sm:$0xff]   ;;  %v8508_v16 = vld [vmem:[%s11988_s1 + $0x584] ss:$16 sps:$4 sm:$0xff]  }
  0x7c   :  { %1135 = vmatprep.subr.bf16.mxu0 %v8421_v17  ;;  %1221 = vmatprep.subr.bf16.mxu1 %v8424_v18  ;;  %v8511_v17 = vld [vmem:[%s11988_s1 + $0x58c] ss:$16 sps:$4 sm:$0xff]   ;;  %v8506_v18 = vld [vmem:[%s11988_s1 + $0x580] ss:$16 sps:$4 sm:$0xff]  }
  0x7f   :  { %1136 = vmatpush1.bf16.msra.mxu0 %v8419_v19  ;;  %1222 = vmatpush1.bf16.msra.mxu1 %v8422_v20  ;;  %v8509_v19 = vld [vmem:[%s11988_s1 + $0x588] ss:$16 sps:$4 sm:$0xff]   ;;  %v8514_v20 = vld [vmem:[%s11988_s1 + $0x5a4] ss:$16 sps:$4 sm:$0xff]  }
  0x80   :  { %1137 = vmatprep.subr.bf16.mxu0 %v8427_v21  ;;  %1223 = vmatprep.subr.bf16.mxu1 %v8430_v22  ;;  %v8517_v21 = vld [vmem:[%s11988_s1 + $0x5ac] ss:$16 sps:$4 sm:$0xff]   ;;  %v8512_v22 = vld [vmem:[%s11988_s1 + $0x5a0] ss:$16 sps:$4 sm:$0xff]  }
  0x83   :  { %1138 = vmatpush1.bf16.msra.mxu0 %v8425_v23  ;;  %1224 = vmatpush1.bf16.msra.mxu1 %v8428_v24  ;;  %v8515_v23 = vld [vmem:[%s11988_s1 + $0x5a8] ss:$16 sps:$4 sm:$0xff]   ;;  %v8520_v24 = vld [vmem:[%s11988_s1 + $0x5c4] ss:$16 sps:$4 sm:$0xff]  }
  0x84   :  { %1139 = vmatprep.subr.bf16.mxu0 %v8433_v25  ;;  %1225 = vmatprep.subr.bf16.mxu1 %v8436_v27  ;;  %v8523_v25 = vld [vmem:[%s11988_s1 + $0x5cc] ss:$16 sps:$4 sm:$0xff]   ;;  %v8518_v27 = vld [vmem:[%s11988_s1 + $0x5c0] ss:$16 sps:$4 sm:$0xff]  }
  0x87   :  { %1140 = vmatpush1.bf16.msra.mxu0 %v8431_v28  ;;  %1226 = vmatpush1.bf16.msra.mxu1 %v8434_v29  ;;  %v8521_v28 = vld [vmem:[%s11988_s1 + $0x5c8] ss:$16 sps:$4 sm:$0xff]   ;;  %v8526_v29 = vld [vmem:[%s11988_s1 + $0x5e4] ss:$16 sps:$4 sm:$0xff]  }
  0x88   :  { %1141 = vmatprep.subr.bf16.mxu0 %v8439_v30  ;;  %1227 = vmatprep.subr.bf16.mxu1 %v8442_v31  ;;  %v8529_v30 = vld [vmem:[%s11988_s1 + $0x5ec] ss:$16 sps:$4 sm:$0xff]   ;;  %v8524_v31 = vld [vmem:[%s11988_s1 + $0x5e0] ss:$16 sps:$4 sm:$0xff]  }
  0x8b   :  { %1142 = vmatpush1.bf16.msra.mxu0 %v8437_v32  ;;  %1228 = vmatpush1.bf16.msra.mxu1 %v8440_v33  ;;  %v8527_v32 = vld [vmem:[%s11988_s1 + $0x5e8] ss:$16 sps:$4 sm:$0xff]   ;;  %v8532_v33 = vld [vmem:[%s11988_s1 + $0x604] ss:$16 sps:$4 sm:$0xff]  }
  0x8c   :  { %1154 = vmatprep.subr.bf16.mxu0 %v8447_v34  ;;  %1240 = vmatprep.subr.bf16.mxu1 %v8450_v35  ;;  %v8535_v34 = vld [vmem:[%s11988_s1 + $0x60c] ss:$16 sps:$4 sm:$0xff]   ;;  %v8530_v35 = vld [vmem:[%s11988_s1 + $0x600] ss:$16 sps:$4 sm:$0xff]  }
  0x8e   :  { %1144 = vmatmul.mubr.bf16.vlgmr.msra.gmra.mrb[0].mxu0 %v6852_v36  ;;  %1230 = vmatmul.mubr.bf16.vlgmr.msra.gmra.mrb[0].mxu1 %v6852_v36  ;;  %v8533_v36 = vld [vmem:[%s11988_s1 + $0x608] ss:$16 sps:$4 sm:$0xff]  }
  0x8f   :  { %1155 = vmatpush1.bf16.msra.mxu0 %v8445_v37  ;;  %1241 = vmatpush1.bf16.msra.mxu1 %v8448_v38  ;;  %v8538_v37 = vld [vmem:[%s11988_s1 + $0x624] ss:$16 sps:$4 sm:$0xff]   ;;  %v8541_v38 = vld [vmem:[%s11988_s1 + $0x62c] ss:$16 sps:$4 sm:$0xff]  }
  0x90   :  { %1156 = vmatprep.subr.bf16.mxu0 %v8453_v39  ;;  %1242 = vmatprep.subr.bf16.mxu1 %v8456_v46  ;;  %v8536_v39 = vld [vmem:[%s11988_s1 + $0x620] ss:$16 sps:$4 sm:$0xff]   ;;  %v8539_v46 = vld [vmem:[%s11988_s1 + $0x628] ss:$16 sps:$4 sm:$0xff]  }
  0x91   :  { %1186 = vmatprep.mubr.bf16.mxu0 %v9352_v26  ;;  %1272 = vmatprep.mubr.bf16.mxu1 %v9352_v26 }
  0x93   :  { %1157 = vmatpush1.bf16.msra.mxu0 %v8451_v40  ;;  %1243 = vmatpush1.bf16.msra.mxu1 %v8454_v41  ;;  %v8544_v40 = vld [vmem:[%s11988_s1 + $0x644] ss:$16 sps:$4 sm:$0xff]   ;;  %v8547_v41 = vld [vmem:[%s11988_s1 + $0x64c] ss:$16 sps:$4 sm:$0xff]  }
  0x94   :  { %1734 = vmatprep.subr.bf16.mxu0 %v8459_v42  ;;  %1820 = vmatprep.subr.bf16.mxu1 %v8462_v43  ;;  %v8542_v42 = vld [vmem:[%s11988_s1 + $0x640] ss:$16 sps:$4 sm:$0xff]   ;;  %v8545_v43 = vld [vmem:[%s11988_s1 + $0x648] ss:$16 sps:$4 sm:$0xff]  }
  0x9a   :  { %6927 = vmatmul.mubr.msk.bf16.vlgmr.msra.gmra.mrb[0].mxu0 %vm562_vm0, %v6854_v50  ;;  %6928 = vmatmul.mubr.msk.bf16.vlgmr.msra.gmra.mrb[0].mxu1 %vm562_vm0, %v6854_v50  ;;  %v8551_v50 = vld [vmem:[%s11988_s1 + $0x668] ss:$16 sps:$4 sm:$0xff]  }
  0x9b   :  { %1735 = vmatpush1.bf16.msra.mxu0 %v8457_v49  ;;  %1821 = vmatpush1.bf16.msra.mxu1 %v8460_v51  ;;  %v8548_v49 = vld [vmem:[%s11988_s1 + $0x660] ss:$16 sps:$4 sm:$0xff]  }
  0x9c   :  { %1736 = vmatprep.subr.bf16.mxu0 %v8466_v52  ;;  %1822 = vmatprep.subr.bf16.mxu1 %v8469_v53  ;;  %v9349_v51 = vld [vmem:[%s11989_s0 + $0xc] sm:$0xff]  ;;  %v10060_v53 = vld [vmem:[%s11989_s0] sm:$0xee] }
  0x9d   :  { %1766 = vmatprep.mubr.bf16.mxu0 %v1367_v54  ;;  %1852 = vmatprep.mubr.bf16.mxu1 %v1367_v54  ;;  %v7001_v52 = vcombine.low %v9857_v44, %v9349_v51  ;;  %v10065_v54 = vld [vmem:[%s11989_s0 + $0xc] sm:$0xff] }
  0x9e   :  { %v8561_v44 = vld [vmem:[%s11988_s1 + $0x68c] ss:$16 sps:$4 sm:$0xff]  }
  0x9f   :  { %1737 = vmatpush1.bf16.msra.mxu0 %v8464_v47  ;;  %1823 = vmatpush1.bf16.msra.mxu1 %v8467_v11  ;;  %v8558_v47 = vld [vmem:[%s11988_s1 + $0x684] ss:$16 sps:$4 sm:$0xff]   ;;  %v1366_v11 = vrot.slane %v7001_v52, 1  ;;  %v8610_v51 = vld [vmem:[%s11988_s1 + $0x78c] ss:$16 sps:$4 sm:$0xff]  }
  0xa0   :  { %1738 = vmatprep.subr.bf16.mxu0 %v8472_v55  ;;  %1824 = vmatprep.subr.bf16.mxu1 %v8475_v56  ;;  %v8556_v55 = vld [vmem:[%s11988_s1 + $0x680] ss:$16 sps:$4 sm:$0xff]   ;;  %v7151_v56 = vcombine.high %v10060_v53, %v10065_v54 }
  0xa1   :  { %v10212_v52 = vld [vmem:[%s11989_s0 + $0x20] ss:$0 sps:$4 sm:$0x11]  }
  0xa3   :  { %1739 = vmatpush1.bf16.msra.mxu0 %v8470_v57  ;;  %1825 = vmatpush1.bf16.msra.mxu1 %v8473_v58  ;;  %v8559_v57 = vld [vmem:[%s11988_s1 + $0x688] ss:$16 sps:$4 sm:$0xff]  }
  0xa4   :  { %1740 = vmatprep.subr.bf16.mxu0 %v8478_v59  ;;  %1826 = vmatprep.subr.bf16.mxu1 %v8481_v60  ;;  %v10084_v58 = vld [vmem:[%s11989_s0 + $0x18] sm:$0x11]  ;;  %v8564_v59 = vld [vmem:[%s11988_s1 + $0x6a4] ss:$16 sps:$4 sm:$0xff]  }
  0xa5   :  { %v8567_v60 = vld [vmem:[%s11988_s1 + $0x6ac] ss:$16 sps:$4 sm:$0xff]  }
  0xa7   :  { %1741 = vmatpush1.bf16.msra.mxu0 %v8476_v61  ;;  %1827 = vmatpush1.bf16.msra.mxu1 %v8479_v62  ;;  %v8562_v61 = vld [vmem:[%s11988_s1 + $0x6a0] ss:$16 sps:$4 sm:$0xff]   ;;  %v10097_v62 = vcombine.high %v10084_v58, %v10084_v58 }
  0xa8   :  { %1742 = vmatprep.subr.bf16.mxu0 %v8484_v63  ;;  %1828 = vmatprep.subr.bf16.mxu1 %v8487_v0  ;;  %v2029_v63 = vshrl.u32 %v7151_v56, 16  ;;  %v2032_v0 = vshll.u32 %v7151_v56, 16  ;;  %v8613_v56 = vld [vmem:[%s11988_s1 + $0x7a4] ss:$16 sps:$4 sm:$0xff]  }
  0xab   :  { %1743 = vmatpush1.bf16.msra.mxu0 %v8482_v1  ;;  %1829 = vmatpush1.bf16.msra.mxu1 %v8485_v2  ;;  %v8565_v1 = vld [vmem:[%s11988_s1 + $0x6a8] ss:$16 sps:$4 sm:$0xff]  }
  0xac   :  { %1744 = vmatprep.subr.bf16.mxu0 %v8490_v3  ;;  %1830 = vmatprep.subr.bf16.mxu1 %v8493_v4  ;;  %v1284_v2 = vld [vmem:[%s11989_s0 + $0x8] sm:$0xe]  ;;  %v8570_v3 = vld [vmem:[%s11988_s1 + $0x6c4] ss:$16 sps:$4 sm:$0xff]   ;;  %v8573_v4 = vld [vmem:[%s11988_s1 + $0x6cc] ss:$16 sps:$4 sm:$0xff]  }
  0xaf   :  { %1745 = vmatpush1.bf16.msra.mxu0 %v8488_v5  ;;  %1831 = vmatpush1.bf16.msra.mxu1 %v8491_v6  ;;  %v9350_v5 = vld [vmem:[%s11989_s0 + $0x14] sm:$0xf] }
  0xb0   :  { %1746 = vmatprep.subr.bf16.mxu0 %v8496_v7  ;;  %1832 = vmatprep.subr.bf16.mxu1 %v8499_v8  ;;  %v7003_v6 = vcombine.low %v1284_v2, %v9350_v5  ;;  %v2031_v7 = vrot.slane %v2029_v63, 1  ;;  %v2034_v8 = vrot.slane %v2032_v0, 2  ;;  %v8614_v63 = vld [vmem:[%s11988_s1 + $0x7a8] ss:$16 sps:$4 sm:$0xff]   ;;  %v8619_v0 = vld [vmem:[%s11988_s1 + $0x7c4] ss:$16 sps:$4 sm:$0xff]  }
  0xb1   :  { %v8617_v2 = vld [vmem:[%s11988_s1 + $0x7c0] ss:$16 sps:$4 sm:$0xff]   ;;  %v8628_v5 = vld [vmem:[%s11988_s1 + $0x7ec] ss:$16 sps:$4 sm:$0xff]  }
  0xb3   :  { %1747 = vmatpush1.bf16.msra.mxu0 %v8494_v9  ;;  %1833 = vmatpush1.bf16.msra.mxu1 %v8497_v10  ;;  %v2037_v9 = vshll.u32 %v10097_v62, 16  ;;  %v8568_v10 = vld [vmem:[%s11988_s1 + $0x6c0] ss:$16 sps:$4 sm:$0xff]  }
  0xb4   :  { %1748 = vmatprep.subr.bf16.mxu0 %v8502_v12  ;;  %1834 = vmatprep.subr.bf16.mxu1 %v8505_v13  ;;  %v1368_v12 = vrot.slane %v7003_v6, 1  ;;  %v2035_v13 = vor.u32 %v2034_v8, %v2031_v7  ;;  %v8623_v6 = vld [vmem:[%s11988_s1 + $0x7e0] ss:$16 sps:$4 sm:$0xff]   ;;  %v8626_v7 = vld [vmem:[%s11988_s1 + $0x7e8] ss:$16 sps:$4 sm:$0xff]  }
  0xb5   :  { %v8631_v8 = vld [vmem:[%s11988_s1 + $0x804] ss:$16 sps:$4 sm:$0xff]  }
  0xb7   :  { %1749 = vmatpush1.bf16.msra.mxu0 %v8500_v14  ;;  %1835 = vmatpush1.bf16.msra.mxu1 %v8503_v15  ;;  %v2039_v14 = vrot.slane %v2037_v9, 2  ;;  %v8571_v15 = vld [vmem:[%s11988_s1 + $0x6c8] ss:$16 sps:$4 sm:$0xff]   ;;  %v8634_v9 = vld [vmem:[%s11988_s1 + $0x80c] ss:$16 sps:$4 sm:$0xff]  }
  0xb8   :  { %1750 = vmatprep.subr.bf16.mxu0 %v8508_v16  ;;  %1836 = vmatprep.subr.bf16.mxu1 %v8511_v17  ;;  %v8577_v16 = vld [vmem:[%s11988_s1 + $0x6e4] ss:$16 sps:$4 sm:$0xff]   ;;  %v8580_v17 = vld [vmem:[%s11988_s1 + $0x6ec] ss:$16 sps:$4 sm:$0xff]  }
  0xbb   :  { %1751 = vmatpush1.bf16.msra.mxu0 %v8506_v18  ;;  %1837 = vmatpush1.bf16.msra.mxu1 %v8509_v19  ;;  %v2040_v18 = vsel %vm2014_vm1, %v2035_v13, %v2039_v14  ;;  %v8575_v19 = vld [vmem:[%s11988_s1 + $0x6e0] ss:$16 sps:$4 sm:$0xff]   ;;  %v8637_v13 = vld [vmem:[%s11988_s1 + $0x824] ss:$16 sps:$4 sm:$0xff]   ;;  %v8640_v14 = vld [vmem:[%s11988_s1 + $0x82c] ss:$16 sps:$4 sm:$0xff]  }
  0xbc   :  { %1752 = vmatprep.subr.bf16.mxu0 %v8514_v20  ;;  %1838 = vmatprep.subr.bf16.mxu1 %v8517_v21  ;;  %v8578_v20 = vld [vmem:[%s11988_s1 + $0x6e8] ss:$16 sps:$4 sm:$0xff]   ;;  %v8583_v21 = vld [vmem:[%s11988_s1 + $0x704] ss:$16 sps:$4 sm:$0xff]  }
  0xbf   :  { %1753 = vmatpush1.bf16.msra.mxu0 %v8512_v22  ;;  %1839 = vmatpush1.bf16.msra.mxu1 %v8515_v23  ;;  %v8586_v22 = vld [vmem:[%s11988_s1 + $0x70c] ss:$16 sps:$4 sm:$0xff]   ;;  %v8581_v23 = vld [vmem:[%s11988_s1 + $0x700] ss:$16 sps:$4 sm:$0xff]  }
  0xc0   :  { %1754 = vmatprep.subr.bf16.mxu0 %v8520_v24  ;;  %1840 = vmatprep.subr.bf16.mxu1 %v8523_v25  ;;  %v8584_v24 = vld [vmem:[%s11988_s1 + $0x708] ss:$16 sps:$4 sm:$0xff]   ;;  %v8589_v25 = vld [vmem:[%s11988_s1 + $0x724] ss:$16 sps:$4 sm:$0xff]  }
  0xc3   :  { %1755 = vmatpush1.bf16.msra.mxu0 %v8518_v27  ;;  %1841 = vmatpush1.bf16.msra.mxu1 %v8521_v28  ;;  %v8592_v27 = vld [vmem:[%s11988_s1 + $0x72c] ss:$16 sps:$4 sm:$0xff]   ;;  %v8587_v28 = vld [vmem:[%s11988_s1 + $0x720] ss:$16 sps:$4 sm:$0xff]  }
  0xc4   :  { %1756 = vmatprep.subr.bf16.mxu0 %v8526_v29  ;;  %1842 = vmatprep.subr.bf16.mxu1 %v8529_v30  ;;  %v8590_v29 = vld [vmem:[%s11988_s1 + $0x728] ss:$16 sps:$4 sm:$0xff]   ;;  %v8595_v30 = vld [vmem:[%s11988_s1 + $0x744] ss:$16 sps:$4 sm:$0xff]  }
  0xc7   :  { %1757 = vmatpush1.bf16.msra.mxu0 %v8524_v31  ;;  %1843 = vmatpush1.bf16.msra.mxu1 %v8527_v32  ;;  %v8598_v31 = vld [vmem:[%s11988_s1 + $0x74c] ss:$16 sps:$4 sm:$0xff]   ;;  %v10170_v32 = vcombine.low %v10084_v58, %v10084_v58 }
  0xc8   :  { %1758 = vmatprep.subr.bf16.mxu0 %v8532_v33  ;;  %1844 = vmatprep.subr.bf16.mxu1 %v8535_v34  ;;  %v2599_v33 = vld [vmem:[%s11989_s0] sm:$0xcc] }
  0xc9   :  { %v8593_v34 = vld [vmem:[%s11988_s1 + $0x740] ss:$16 sps:$4 sm:$0xff]  }
  0xcb   :  { %1759 = vmatpush1.bf16.msra.mxu0 %v8530_v35  ;;  %1845 = vmatpush1.bf16.msra.mxu1 %v8533_v36  ;;  %v7303_v35 = vcombine.high %v2599_v33, %v10065_v54  ;;  %v2687_v36 = vrot.slane %v10097_v62, 2  ;;  %v8611_v62 = vld [vmem:[%s11988_s1 + $0x7a0] ss:$16 sps:$4 sm:$0xff]  }
  0xcc   :  { %1760 = vmatprep.subr.bf16.mxu0 %v8538_v37  ;;  %1846 = vmatprep.subr.bf16.mxu1 %v8541_v38  ;;  %v7302_v37 = vcombine.low %v2599_v33, %v10065_v54  ;;  %v2684_v38 = vrot.slane %v10170_v32, 2 }
  0xcf   :  { %1761 = vmatpush1.bf16.msra.mxu0 %v8536_v39  ;;  %1847 = vmatpush1.bf16.msra.mxu1 %v8539_v46  ;;  %v8596_v39 = vld [vmem:[%s11988_s1 + $0x748] ss:$16 sps:$4 sm:$0xff]   ;;  %v8601_v46 = vld [vmem:[%s11988_s1 + $0x764] ss:$16 sps:$4 sm:$0xff]  }
  0xd0   :  { %1762 = vmatprep.subr.bf16.mxu0 %v8544_v40  ;;  %1848 = vmatprep.subr.bf16.mxu1 %v8547_v41  ;;  %v8604_v40 = vld [vmem:[%s11988_s1 + $0x76c] ss:$16 sps:$4 sm:$0xff]   ;;  %v2686_v41 = vrot.slane %v7303_v35, 2  ;;  %v2024_v35 = vshll.u32 %v10170_v32, 16  ;;  %v8662_v32 = vld [vmem:[%s11988_s1 + $0x8a8] ss:$16 sps:$4 sm:$0xff]  }
  0xd3   :  { %1763 = vmatpush1.bf16.msra.mxu0 %v8542_v42  ;;  %1849 = vmatpush1.bf16.msra.mxu1 %v8545_v43  ;;  %v2683_v42 = vrot.slane %v7302_v37, 2  ;;  %v8599_v43 = vld [vmem:[%s11988_s1 + $0x760] ss:$16 sps:$4 sm:$0xff]   ;;  %v1915_v37 = vld [vmem:[%s11989_s0 + $0x8] sm:$0xe] }
  0xd4   :  { %1764 = vmatprep.subr.bf16.mxu0 %v8550_v45  ;;  %1850 = vmatprep.subr.bf16.mxu1 %v8553_v48  ;;  %v8602_v45 = vld [vmem:[%s11988_s1 + $0x768] ss:$16 sps:$4 sm:$0xff]   ;;  %v10198_v48 = vsel %vm2682_vm2, %v2686_v41, %v2687_v36  ;;  %v8664_v36 = vld [vmem:[%s11988_s1 + $0x8ac] ss:$16 sps:$4 sm:$0xff]   ;;  %v8671_v41 = vld [vmem:[%s11988_s1 + $0x8c4] ss:$16 sps:$4 sm:$0xff]  }
  0xd7   :  { %1765 = vmatpush1.bf16.msra.mxu0 %v8548_v49  ;;  %1851 = vmatpush1.bf16.msra.mxu1 %v8551_v50  ;;  %v10201_v49 = vsel %vm2682_vm2, %v2683_v42, %v2684_v38  ;;  %v8607_v50 = vld [vmem:[%s11988_s1 + $0x784] ss:$16 sps:$4 sm:$0xff]   ;;  %v8659_v38 = vld [vmem:[%s11988_s1 + $0x8a0] ss:$16 sps:$4 sm:$0xff]   ;;  %v8674_v42 = vld [vmem:[%s11988_s1 + $0x8cc] ss:$16 sps:$4 sm:$0xff]  }
  0xd8   :  { %1777 = vmatprep.subr.bf16.mxu0 %v8558_v47  ;;  %1863 = vmatprep.subr.bf16.mxu1 %v8561_v44  ;;  %v8605_v47 = vld [vmem:[%s11988_s1 + $0x780] ss:$16 sps:$4 sm:$0xff]   ;;  %v8608_v44 = vld [vmem:[%s11988_s1 + $0x788] ss:$16 sps:$4 sm:$0xff]  }
  0xda   :  { %1767 = vmatmul.mubr.bf16.vlgmr.msra.gmra.mrb[0].mxu0 %v1366_v11  ;;  %1853 = vmatmul.mubr.bf16.vlgmr.msra.gmra.mrb[0].mxu1 %v1366_v11  ;;  %v10223_v11 = vld [vmem:[%s11989_s0 + $0x14] sm:$0xf] }
  0xdb   :  { %1778 = vmatpush1.bf16.msra.mxu0 %v8556_v55  ;;  %1864 = vmatpush1.bf16.msra.mxu1 %v8559_v57  ;;  %v2600_v55 = vld [vmem:[%s11989_s0 + $0x8] sm:$0xc]  ;;  %v8616_v57 = vld [vmem:[%s11988_s1 + $0x7ac] ss:$16 sps:$4 sm:$0xff]  }
  0xdc   :  { %1779 = vmatprep.subr.bf16.mxu0 %v8564_v59  ;;  %1865 = vmatprep.subr.bf16.mxu1 %v8567_v60  ;;  %v7304_v58 = vcombine.low %v2600_v55, %v10223_v11  ;;  %v2690_v59 = vrot.slane %v10212_v52, 2  ;;  %v8675_v55 = vld [vmem:[%s11988_s1 + $0x8e0] ss:$16 sps:$4 sm:$0xff]  }
  0xdd   :  { %1809 = vmatprep.mubr.bf16.mxu0 %v9352_v26  ;;  %1895 = vmatprep.mubr.bf16.mxu1 %v9352_v26 }
  0xde   :  { %v2689_v60 = vrot.slane %v7304_v58, 2 }
  0xdf   :  { %1780 = vmatpush1.bf16.msra.mxu0 %v8562_v61  ;;  %1866 = vmatpush1.bf16.msra.mxu1 %v8565_v1  ;;  %v8622_v1 = vld [vmem:[%s11988_s1 + $0x7cc] ss:$16 sps:$4 sm:$0xff]  }
  0xe0   :  { %2419 = vmatprep.subr.bf16.mxu0 %v8570_v3  ;;  %2505 = vmatprep.subr.bf16.mxu1 %v8573_v4  ;;  %v10237_v61 = vsel %vm2682_vm2, %v2689_v60, %v2690_v59  ;;  %v8620_v3 = vld [vmem:[%s11988_s1 + $0x7c8] ss:$16 sps:$4 sm:$0xff]   ;;  %v8625_v4 = vld [vmem:[%s11988_s1 + $0x7e4] ss:$16 sps:$4 sm:$0xff]   ;;  %v2050_v59 = vshll.u32 %v10212_v52, 16 }
  0xe1   :  { %v8683_v60 = vld [vmem:[%s11988_s1 + $0x904] ss:$16 sps:$4 sm:$0xff]   ;;  %v8681_v52 = vld [vmem:[%s11988_s1 + $0x900] ss:$16 sps:$4 sm:$0xff]  }
  0xe6   :  { %7076 = vmatmul.mubr.msk.bf16.vlgmr.msra.gmra.mrb[0].mxu0 %vm562_vm0, %v1368_v12  ;;  %7077 = vmatmul.mubr.msk.bf16.vlgmr.msra.gmra.mrb[0].mxu1 %vm562_vm0, %v1368_v12  ;;  %v8632_v12 = vld [vmem:[%s11988_s1 + $0x808] ss:$16 sps:$4 sm:$0xff]  }
  0xe7   :  { %2420 = vmatpush1.bf16.msra.mxu0 %v8568_v10  ;;  %2506 = vmatpush1.bf16.msra.mxu1 %v8571_v15  ;;  %v8629_v10 = vld [vmem:[%s11988_s1 + $0x800] ss:$16 sps:$4 sm:$0xff]  }
  0xe8   :  { %2421 = vmatprep.subr.bf16.mxu0 %v8577_v16  ;;  %2507 = vmatprep.subr.bf16.mxu1 %v8580_v17  ;;  %v8635_v15 = vld [vmem:[%s11988_s1 + $0x820] ss:$16 sps:$4 sm:$0xff]   ;;  %v8638_v16 = vld [vmem:[%s11988_s1 + $0x828] ss:$16 sps:$4 sm:$0xff]   ;;  %v8643_v17 = vld [vmem:[%s11988_s1 + $0x844] ss:$16 sps:$4 sm:$0xff]  }
  0xe9   :  { %2451 = vmatprep.mubr.bf16.mxu0 %v2040_v18  ;;  %2537 = vmatprep.mubr.bf16.mxu1 %v2040_v18  ;;  %v8646_v18 = vld [vmem:[%s11988_s1 + $0x84c] ss:$16 sps:$4 sm:$0xff]  }
  0xeb   :  { %2422 = vmatpush1.bf16.msra.mxu0 %v8575_v19  ;;  %2508 = vmatpush1.bf16.msra.mxu1 %v8578_v20  ;;  %v8641_v19 = vld [vmem:[%s11988_s1 + $0x840] ss:$16 sps:$4 sm:$0xff]   ;;  %v8644_v20 = vld [vmem:[%s11988_s1 + $0x848] ss:$16 sps:$4 sm:$0xff]  }
  0xec   :  { %2423 = vmatprep.subr.bf16.mxu0 %v8583_v21  ;;  %2509 = vmatprep.subr.bf16.mxu1 %v8586_v22  ;;  %v7150_v21 = vcombine.low %v10060_v53, %v10065_v54  ;;  %v8649_v22 = vld [vmem:[%s11988_s1 + $0x864] ss:$16 sps:$4 sm:$0xff]   ;;  %v8650_v53 = vld [vmem:[%s11988_s1 + $0x868] ss:$16 sps:$4 sm:$0xff]  }
  0xee   :  { %v2016_v54 = vshrl.u32 %v7150_v21, 16 }
  0xef   :  { %2424 = vmatpush1.bf16.msra.mxu0 %v8581_v23  ;;  %2510 = vmatpush1.bf16.msra.mxu1 %v8584_v24  ;;  %v8652_v23 = vld [vmem:[%s11988_s1 + $0x86c] ss:$16 sps:$4 sm:$0xff]   ;;  %v8647_v24 = vld [vmem:[%s11988_s1 + $0x860] ss:$16 sps:$4 sm:$0xff]  }
  0xf0   :  { %2425 = vmatprep.subr.bf16.mxu0 %v8589_v25  ;;  %2511 = vmatprep.subr.bf16.mxu1 %v8592_v27  ;;  %v2019_v25 = vshll.u32 %v7150_v21, 16  ;;  %v8655_v27 = vld [vmem:[%s11988_s1 + $0x884] ss:$16 sps:$4 sm:$0xff]   ;;  %v2018_v33 = vrot.slane %v2016_v54, 1  ;;  %v8713_v21 = vld [vmem:[%s11988_s1 + $0x9a0] ss:$16 sps:$4 sm:$0xff]  }
  0xf1   :  { %v8722_v54 = vld [vmem:[%s11988_s1 + $0x9c8] ss:$16 sps:$4 sm:$0xff]  }
  0xf3   :  { %2426 = vmatpush1.bf16.msra.mxu0 %v8587_v28  ;;  %2512 = vmatpush1.bf16.msra.mxu1 %v8590_v29  ;;  %v8658_v28 = vld [vmem:[%s11988_s1 + $0x88c] ss:$16 sps:$4 sm:$0xff]   ;;  %v8653_v29 = vld [vmem:[%s11988_s1 + $0x880] ss:$16 sps:$4 sm:$0xff]  }
  0xf4   :  { %2427 = vmatprep.subr.bf16.mxu0 %v8595_v30  ;;  %2513 = vmatprep.subr.bf16.mxu1 %v8598_v31  ;;  %v8656_v30 = vld [vmem:[%s11988_s1 + $0x888] ss:$16 sps:$4 sm:$0xff]   ;;  %v8661_v31 = vld [vmem:[%s11988_s1 + $0x8a4] ss:$16 sps:$4 sm:$0xff]  }
  0xf7   :  { %2428 = vmatpush1.bf16.msra.mxu0 %v8593_v34  ;;  %2514 = vmatpush1.bf16.msra.mxu1 %v8596_v39  ;;  %v2021_v34 = vrot.slane %v2019_v25, 2  ;;  %v8727_v25 = vld [vmem:[%s11988_s1 + $0x9e4] ss:$16 sps:$4 sm:$0xff]  }
  0xf8   :  { %2429 = vmatprep.subr.bf16.mxu0 %v8601_v46  ;;  %2515 = vmatprep.subr.bf16.mxu1 %v8604_v40  ;;  %v2026_v46 = vrot.slane %v2024_v35, 2  ;;  %v7152_v40 = vcombine.low %v1915_v37, %v10223_v11  ;;  %v8680_v11 = vld [vmem:[%s11988_s1 + $0x8ec] ss:$16 sps:$4 sm:$0xff]   ;;  %v8739_v35 = vld [vmem:[%s11988_s1 + $0xa24] ss:$16 sps:$4 sm:$0xff]  }
  0xf9   :  { %v2022_v39 = vor.u32 %v2021_v34, %v2018_v33  ;;  %v8731_v33 = vld [vmem:[%s11988_s1 + $0xa00] ss:$16 sps:$4 sm:$0xff]   ;;  %v8734_v34 = vld [vmem:[%s11988_s1 + $0xa08] ss:$16 sps:$4 sm:$0xff]  }
  0xfa   :  { %v8737_v37 = vld [vmem:[%s11988_s1 + $0xa20] ss:$16 sps:$4 sm:$0xff]  }
  0xfb   :  { %2430 = vmatpush1.bf16.msra.mxu0 %v8599_v43  ;;  %2516 = vmatpush1.bf16.msra.mxu1 %v8602_v45  ;;  %v8669_v43 = vld [vmem:[%s11988_s1 + $0x8c0] ss:$16 sps:$4 sm:$0xff]   ;;  %v2027_v45 = vsel %vm2014_vm1, %v2022_v39, %v2026_v46  ;;  %v8748_v39 = vld [vmem:[%s11988_s1 + $0xa4c] ss:$16 sps:$4 sm:$0xff]  }
  0xfc   :  { %2431 = vmatprep.subr.bf16.mxu0 %v8607_v50  ;;  %2517 = vmatprep.subr.bf16.mxu1 %v8610_v51  ;;  %v8672_v50 = vld [vmem:[%s11988_s1 + $0x8c8] ss:$16 sps:$4 sm:$0xff]   ;;  %v2042_v51 = vshrl.u32 %v7152_v40, 16  ;;  %v8743_v46 = vld [vmem:[%s11988_s1 + $0xa40] ss:$16 sps:$4 sm:$0xff]  }
  0xff   :  { %2432 = vmatpush1.bf16.msra.mxu0 %v8605_v47  ;;  %2518 = vmatpush1.bf16.msra.mxu1 %v8608_v44  ;;  %v2045_v47 = vshll.u32 %v7152_v40, 16  ;;  %v8677_v44 = vld [vmem:[%s11988_s1 + $0x8e4] ss:$16 sps:$4 sm:$0xff]   ;;  %v8746_v40 = vld [vmem:[%s11988_s1 + $0xa48] ss:$16 sps:$4 sm:$0xff]  }
 0x100   :  { %2433 = vmatprep.subr.bf16.mxu0 %v8613_v56  ;;  %2519 = vmatprep.subr.bf16.mxu1 %v8616_v57  ;;  %v8678_v56 = vld [vmem:[%s11988_s1 + $0x8e8] ss:$16 sps:$4 sm:$0xff]   ;;  %v2044_v57 = vrot.slane %v2042_v51, 1  ;;  %v8760_v51 = vld [vmem:[%s11988_s1 + $0xa8c] ss:$16 sps:$4 sm:$0xff]  }
 0x101   :  { %v2047_v58 = vrot.slane %v2045_v47, 2  ;;  %v8755_v47 = vld [vmem:[%s11988_s1 + $0xa80] ss:$16 sps:$4 sm:$0xff]  }
 0x103   :  { %2434 = vmatpush1.bf16.msra.mxu0 %v8611_v62  ;;  %2520 = vmatpush1.bf16.msra.mxu1 %v8614_v63  ;;  %v8686_v62 = vld [vmem:[%s11988_s1 + $0x90c] ss:$16 sps:$4 sm:$0xff]   ;;  %v2048_v63 = vor.u32 %v2047_v58, %v2044_v57  ;;  %v8764_v57 = vld [vmem:[%s11988_s1 + $0xaa8] ss:$16 sps:$4 sm:$0xff]   ;;  %v8769_v58 = vld [vmem:[%s11988_s1 + $0xac4] ss:$16 sps:$4 sm:$0xff]  }
 0x104   :  { %2435 = vmatprep.subr.bf16.mxu0 %v8619_v0  ;;  %2521 = vmatprep.subr.bf16.mxu1 %v8622_v1  ;;  %v2052_v0 = vrot.slane %v2050_v59, 2  ;;  %v8684_v1 = vld [vmem:[%s11988_s1 + $0x908] ss:$16 sps:$4 sm:$0xff]   ;;  %v8772_v59 = vld [vmem:[%s11988_s1 + $0xacc] ss:$16 sps:$4 sm:$0xff]  }
 0x107   :  { %2436 = vmatpush1.bf16.msra.mxu0 %v8617_v2  ;;  %2522 = vmatpush1.bf16.msra.mxu1 %v8620_v3  ;;  %v2053_v2 = vsel %vm2014_vm1, %v2048_v63, %v2052_v0  ;;  %v8691_v3 = vld [vmem:[%s11988_s1 + $0x924] ss:$16 sps:$4 sm:$0xff]   ;;  %v8778_v0 = vld [vmem:[%s11988_s1 + $0xaec] ss:$16 sps:$4 sm:$0xff]  }
 0x108   :  { %2437 = vmatprep.subr.bf16.mxu0 %v8625_v4  ;;  %2523 = vmatprep.subr.bf16.mxu1 %v8628_v5  ;;  %v8694_v4 = vld [vmem:[%s11988_s1 + $0x92c] ss:$16 sps:$4 sm:$0xff]   ;;  %v8689_v5 = vld [vmem:[%s11988_s1 + $0x920] ss:$16 sps:$4 sm:$0xff]   ;;  %v8775_v63 = vld [vmem:[%s11988_s1 + $0xae4] ss:$16 sps:$4 sm:$0xff]  }
 0x10b   :  { %2438 = vmatpush1.bf16.msra.mxu0 %v8623_v6  ;;  %2524 = vmatpush1.bf16.msra.mxu1 %v8626_v7  ;;  %v8692_v6 = vld [vmem:[%s11988_s1 + $0x928] ss:$16 sps:$4 sm:$0xff]   ;;  %v8697_v7 = vld [vmem:[%s11988_s1 + $0x944] ss:$16 sps:$4 sm:$0xff]  }
 0x10c   :  { %2439 = vmatprep.subr.bf16.mxu0 %v8631_v8  ;;  %2525 = vmatprep.subr.bf16.mxu1 %v8634_v9  ;;  %v8700_v8 = vld [vmem:[%s11988_s1 + $0x94c] ss:$16 sps:$4 sm:$0xff]   ;;  %v8695_v9 = vld [vmem:[%s11988_s1 + $0x940] ss:$16 sps:$4 sm:$0xff]  }
 0x10f   :  { %2440 = vmatpush1.bf16.msra.mxu0 %v8629_v10  ;;  %2526 = vmatpush1.bf16.msra.mxu1 %v8632_v12  ;;  %v8698_v10 = vld [vmem:[%s11988_s1 + $0x948] ss:$16 sps:$4 sm:$0xff]   ;;  %v8703_v12 = vld [vmem:[%s11988_s1 + $0x964] ss:$16 sps:$4 sm:$0xff]  }
 0x110   :  { %2441 = vmatprep.subr.bf16.mxu0 %v8637_v13  ;;  %2527 = vmatprep.subr.bf16.mxu1 %v8640_v14  ;;  %v8701_v13 = vld [vmem:[%s11988_s1 + $0x960] ss:$16 sps:$4 sm:$0xff]   ;;  %v8704_v14 = vld [vmem:[%s11988_s1 + $0x968] ss:$16 sps:$4 sm:$0xff]  }
 0x113   :  { %2442 = vmatpush1.bf16.msra.mxu0 %v8635_v15  ;;  %2528 = vmatpush1.bf16.msra.mxu1 %v8638_v16  ;;  %v8709_v15 = vld [vmem:[%s11988_s1 + $0x984] ss:$16 sps:$4 sm:$0xff]   ;;  %v8712_v16 = vld [vmem:[%s11988_s1 + $0x98c] ss:$16 sps:$4 sm:$0xff]  }
 0x114   :  { %2443 = vmatprep.subr.bf16.mxu0 %v8643_v17  ;;  %2529 = vmatprep.subr.bf16.mxu1 %v8646_v18  ;;  %v8707_v17 = vld [vmem:[%s11988_s1 + $0x980] ss:$16 sps:$4 sm:$0xff]   ;;  %v8710_v18 = vld [vmem:[%s11988_s1 + $0x988] ss:$16 sps:$4 sm:$0xff]  }
 0x117   :  { %2444 = vmatpush1.bf16.msra.mxu0 %v8641_v19  ;;  %2530 = vmatpush1.bf16.msra.mxu1 %v8644_v20  ;;  %v8715_v19 = vld [vmem:[%s11988_s1 + $0x9a4] ss:$16 sps:$4 sm:$0xff]   ;;  %v8718_v20 = vld [vmem:[%s11988_s1 + $0x9ac] ss:$16 sps:$4 sm:$0xff]  }
 0x118   :  { %2445 = vmatprep.subr.bf16.mxu0 %v8649_v22  ;;  %2531 = vmatprep.subr.bf16.mxu1 %v8652_v23  ;;  %v8716_v22 = vld [vmem:[%s11988_s1 + $0x9a8] ss:$16 sps:$4 sm:$0xff]   ;;  %v8721_v23 = vld [vmem:[%s11988_s1 + $0x9c4] ss:$16 sps:$4 sm:$0xff]  }
 0x11b   :  { %2446 = vmatpush1.bf16.msra.mxu0 %v8647_v24  ;;  %2532 = vmatpush1.bf16.msra.mxu1 %v8650_v53  ;;  %v8724_v24 = vld [vmem:[%s11988_s1 + $0x9cc] ss:$16 sps:$4 sm:$0xff]   ;;  %v8719_v53 = vld [vmem:[%s11988_s1 + $0x9c0] ss:$16 sps:$4 sm:$0xff]  }
 0x11c   :  { %2447 = vmatprep.subr.bf16.mxu0 %v8655_v27  ;;  %2533 = vmatprep.subr.bf16.mxu1 %v8658_v28  ;;  %v8730_v27 = vld [vmem:[%s11988_s1 + $0x9ec] ss:$16 sps:$4 sm:$0xff]   ;;  %v8725_v28 = vld [vmem:[%s11988_s1 + $0x9e0] ss:$16 sps:$4 sm:$0xff]  }
 0x11f   :  { %2448 = vmatpush1.bf16.msra.mxu0 %v8653_v29  ;;  %2534 = vmatpush1.bf16.msra.mxu1 %v8656_v30  ;;  %v8728_v29 = vld [vmem:[%s11988_s1 + $0x9e8] ss:$16 sps:$4 sm:$0xff]   ;;  %v8733_v30 = vld [vmem:[%s11988_s1 + $0xa04] ss:$16 sps:$4 sm:$0xff]  }
 0x120   :  { %2449 = vmatprep.subr.bf16.mxu0 %v8661_v31  ;;  %2535 = vmatprep.subr.bf16.mxu1 %v8664_v36  ;;  %v8736_v31 = vld [vmem:[%s11988_s1 + $0xa0c] ss:$16 sps:$4 sm:$0xff]  }
 0x121   :  { %v8742_v36 = vld [vmem:[%s11988_s1 + $0xa2c] ss:$16 sps:$4 sm:$0xff]  }
 0x123   :  { %2450 = vmatpush1.bf16.msra.mxu0 %v8659_v38  ;;  %2536 = vmatpush1.bf16.msra.mxu1 %v8662_v32  ;;  %v8740_v38 = vld [vmem:[%s11988_s1 + $0xa28] ss:$16 sps:$4 sm:$0xff]   ;;  %v8745_v32 = vld [vmem:[%s11988_s1 + $0xa44] ss:$16 sps:$4 sm:$0xff]  }
 0x124   :  { %2462 = vmatprep.subr.bf16.mxu0 %v8671_v41  ;;  %2548 = vmatprep.subr.bf16.mxu1 %v8674_v42  ;;  %v8751_v41 = vld [vmem:[%s11988_s1 + $0xa64] ss:$16 sps:$4 sm:$0xff]   ;;  %v8754_v42 = vld [vmem:[%s11988_s1 + $0xa6c] ss:$16 sps:$4 sm:$0xff]  }
 0x126   :  { %2452 = vmatmul.mubr.bf16.vlgmr.msra.gmra.mrb[0].mxu0 %v2027_v45  ;;  %2538 = vmatmul.mubr.bf16.vlgmr.msra.gmra.mrb[0].mxu1 %v2027_v45  ;;  %v8752_v45 = vld [vmem:[%s11988_s1 + $0xa68] ss:$16 sps:$4 sm:$0xff]  }
 0x127   :  { %2463 = vmatpush1.bf16.msra.mxu0 %v8669_v43  ;;  %2549 = vmatpush1.bf16.msra.mxu1 %v8672_v50  ;;  %v8749_v43 = vld [vmem:[%s11988_s1 + $0xa60] ss:$16 sps:$4 sm:$0xff]   ;;  %v8757_v50 = vld [vmem:[%s11988_s1 + $0xa84] ss:$16 sps:$4 sm:$0xff]  }
 0x128   :  { %2464 = vmatprep.subr.bf16.mxu0 %v8677_v44  ;;  %2550 = vmatprep.subr.bf16.mxu1 %v8680_v11  ;;  %v8758_v44 = vld [vmem:[%s11988_s1 + $0xa88] ss:$16 sps:$4 sm:$0xff]   ;;  %v8763_v11 = vld [vmem:[%s11988_s1 + $0xaa4] ss:$16 sps:$4 sm:$0xff]  }
 0x129   :  { %2494 = vmatprep.mubr.bf16.mxu0 %v9352_v26  ;;  %2580 = vmatprep.mubr.bf16.mxu1 %v9352_v26 }
 0x12b   :  { %2465 = vmatpush1.bf16.msra.mxu0 %v8675_v55  ;;  %2551 = vmatpush1.bf16.msra.mxu1 %v8678_v56  ;;  %v8766_v55 = vld [vmem:[%s11988_s1 + $0xaac] ss:$16 sps:$4 sm:$0xff]   ;;  %v8761_v56 = vld [vmem:[%s11988_s1 + $0xaa0] ss:$16 sps:$4 sm:$0xff]  }
 0x12c   :  { %3057 = vmatprep.subr.bf16.mxu0 %v8683_v60  ;;  %3143 = vmatprep.subr.bf16.mxu1 %v8686_v62  ;;  %v8767_v60 = vld [vmem:[%s11988_s1 + $0xac0] ss:$16 sps:$4 sm:$0xff]   ;;  %v8770_v62 = vld [vmem:[%s11988_s1 + $0xac8] ss:$16 sps:$4 sm:$0xff]  }
 0x132   :  { %7228 = vmatmul.mubr.msk.bf16.vlgmr.msra.gmra.mrb[0].mxu0 %vm562_vm0, %v2053_v2  ;;  %7229 = vmatmul.mubr.msk.bf16.vlgmr.msra.gmra.mrb[0].mxu1 %vm562_vm0, %v2053_v2  ;;  %v8783_v2 = vld [vmem:[%s11988_s1 + $0xb04] ss:$16 sps:$4 sm:$0xff]  }
 0x133   :  { %3058 = vmatpush1.bf16.msra.mxu0 %v8681_v52  ;;  %3144 = vmatpush1.bf16.msra.mxu1 %v8684_v1  ;;  %v8773_v52 = vld [vmem:[%s11988_s1 + $0xae0] ss:$16 sps:$4 sm:$0xff]   ;;  %v8776_v1 = vld [vmem:[%s11988_s1 + $0xae8] ss:$16 sps:$4 sm:$0xff]  }
 0x134   :  { %3059 = vmatprep.subr.bf16.mxu0 %v8691_v3  ;;  %3145 = vmatprep.subr.bf16.mxu1 %v8694_v4  ;;  %v8786_v3 = vld [vmem:[%s11988_s1 + $0xb0c] ss:$16 sps:$4 sm:$0xff]   ;;  %v10582_v4 = vld [vmem:[%s11989_s0 + $0x24] sm:$0xff] }
 0x135   :  { %3089 = vmatprep.mubr.bf16.mxu0 %v10198_v48  ;;  %3175 = vmatprep.mubr.bf16.mxu1 %v10198_v48  ;;  %v8706_v48 = vld [vmem:[%s11988_s1 + $0x96c] ss:$16 sps:$4 sm:$0xff]  }
 0x137   :  { %3060 = vmatpush1.bf16.msra.mxu0 %v8689_v5  ;;  %3146 = vmatpush1.bf16.msra.mxu1 %v8692_v6  ;;  %v10587_v5 = vld [vmem:[%s11989_s0 + $0x30] sm:$0xff] }
 0x138   :  { %3061 = vmatprep.subr.bf16.mxu0 %v8697_v7  ;;  %3147 = vmatprep.subr.bf16.mxu1 %v8700_v8  ;;  %v8781_v6 = vld [vmem:[%s11988_s1 + $0xb00] ss:$16 sps:$4 sm:$0xff]   ;;  %v8784_v7 = vld [vmem:[%s11988_s1 + $0xb08] ss:$16 sps:$4 sm:$0xff]   ;;  %v8789_v8 = vld [vmem:[%s11988_s1 + $0xb24] ss:$16 sps:$4 sm:$0xff]  }
 0x13b   :  { %3062 = vmatpush1.bf16.msra.mxu0 %v8695_v9  ;;  %3148 = vmatpush1.bf16.msra.mxu1 %v8698_v10  ;;  %v8792_v9 = vld [vmem:[%s11988_s1 + $0xb2c] ss:$16 sps:$4 sm:$0xff]   ;;  %v7462_v10 = vcombine.high %v10582_v4, %v10587_v5 }
 0x13c   :  { %3063 = vmatprep.subr.bf16.mxu0 %v8703_v12  ;;  %3149 = vmatprep.subr.bf16.mxu1 %v8706_v48  ;;  %v8787_v12 = vld [vmem:[%s11988_s1 + $0xb20] ss:$16 sps:$4 sm:$0xff]   ;;  %v8790_v48 = vld [vmem:[%s11988_s1 + $0xb28] ss:$16 sps:$4 sm:$0xff]  }
 0x13f   :  { %3064 = vmatpush1.bf16.msra.mxu0 %v8701_v13  ;;  %3150 = vmatpush1.bf16.msra.mxu1 %v8704_v14  ;;  %v8795_v13 = vld [vmem:[%s11988_s1 + $0x244] ss:$16 sps:$4 sm:$0xff]   ;;  %v3530_v14 = vshll.u32 %v7462_v10, 16 }
 0x140   :  { %3065 = vmatprep.subr.bf16.mxu0 %v8709_v15  ;;  %3151 = vmatprep.subr.bf16.mxu1 %v8712_v16  ;;  %v3528_v15 = vshrl.u32 %v7462_v10, 16  ;;  %v7461_v10 = vcombine.low %v10582_v4, %v10587_v5 }
 0x141   :  { %v3532_v16 = vrot.slane %v3530_v14, 1 }
 0x142   :  { %v3523_v14 = vshll.u32 %v7461_v10, 16 }
 0x143   :  { %3066 = vmatpush1.bf16.msra.mxu0 %v8707_v17  ;;  %3152 = vmatpush1.bf16.msra.mxu1 %v8710_v18  ;;  %v8793_v17 = vld [vmem:[%s11988_s1 + $0x240] ss:$16 sps:$4 sm:$0xff]   ;;  %v8796_v18 = vld [vmem:[%s11988_s1 + $0x248] ss:$16 sps:$4 sm:$0xff]  }
 0x144   :  { %3067 = vmatprep.subr.bf16.mxu0 %v8715_v19  ;;  %3153 = vmatprep.subr.bf16.mxu1 %v8718_v20  ;;  %v8802_v19 = vld [vmem:[%s11988_s1 + $0x264] ss:$16 sps:$4 sm:$0xff]   ;;  %v8805_v20 = vld [vmem:[%s11988_s1 + $0x26c] ss:$16 sps:$4 sm:$0xff]  }
 0x147   :  { %3068 = vmatpush1.bf16.msra.mxu0 %v8713_v21  ;;  %3154 = vmatpush1.bf16.msra.mxu1 %v8716_v22  ;;  %v3533_v21 = vor.u32 %v3532_v16, %v3528_v15  ;;  %v8800_v22 = vld [vmem:[%s11988_s1 + $0x260] ss:$16 sps:$4 sm:$0xff]   ;;  %v8881_v16 = vld [vmem:[%s11988_s1 + $0x408] ss:$16 sps:$4 sm:$0xff]  }
 0x148   :  { %3069 = vmatprep.subr.bf16.mxu0 %v8721_v23  ;;  %3155 = vmatprep.subr.bf16.mxu1 %v8724_v24  ;;  %v8803_v23 = vld [vmem:[%s11988_s1 + $0x268] ss:$16 sps:$4 sm:$0xff]   ;;  %v8808_v24 = vld [vmem:[%s11988_s1 + $0x284] ss:$16 sps:$4 sm:$0xff]   ;;  %v8878_v15 = vld [vmem:[%s11988_s1 + $0x400] ss:$16 sps:$4 sm:$0xff]  }
 0x14b   :  { %3070 = vmatpush1.bf16.msra.mxu0 %v8719_v53  ;;  %3156 = vmatpush1.bf16.msra.mxu1 %v8722_v54  ;;  %v8806_v53 = vld [vmem:[%s11988_s1 + $0x280] ss:$16 sps:$4 sm:$0xff]   ;;  %v8809_v54 = vld [vmem:[%s11988_s1 + $0x288] ss:$16 sps:$4 sm:$0xff]  }
 0x14c   :  { %3071 = vmatprep.subr.bf16.mxu0 %v8727_v25  ;;  %3157 = vmatprep.subr.bf16.mxu1 %v8730_v27  ;;  %v8814_v25 = vld [vmem:[%s11988_s1 + $0x2a4] ss:$16 sps:$4 sm:$0xff]   ;;  %v8817_v27 = vld [vmem:[%s11988_s1 + $0x2ac] ss:$16 sps:$4 sm:$0xff]  }
 0x14f   :  { %3072 = vmatpush1.bf16.msra.mxu0 %v8725_v28  ;;  %3158 = vmatpush1.bf16.msra.mxu1 %v8728_v29  ;;  %v8812_v28 = vld [vmem:[%s11988_s1 + $0x2a0] ss:$16 sps:$4 sm:$0xff]   ;;  %v8815_v29 = vld [vmem:[%s11988_s1 + $0x2a8] ss:$16 sps:$4 sm:$0xff]  }
 0x150   :  { %3073 = vmatprep.subr.bf16.mxu0 %v8733_v30  ;;  %3159 = vmatprep.subr.bf16.mxu1 %v8736_v31  ;;  %v8820_v30 = vld [vmem:[%s11988_s1 + $0x2c4] ss:$16 sps:$4 sm:$0xff]   ;;  %v8823_v31 = vld [vmem:[%s11988_s1 + $0x2cc] ss:$16 sps:$4 sm:$0xff]  }
 0x153   :  { %3074 = vmatpush1.bf16.msra.mxu0 %v8731_v33  ;;  %3160 = vmatpush1.bf16.msra.mxu1 %v8734_v34  ;;  %v8818_v33 = vld [vmem:[%s11988_s1 + $0x2c0] ss:$16 sps:$4 sm:$0xff]   ;;  %v8821_v34 = vld [vmem:[%s11988_s1 + $0x2c8] ss:$16 sps:$4 sm:$0xff]  }
 0x154   :  { %3075 = vmatprep.subr.bf16.mxu0 %v8739_v35  ;;  %3161 = vmatprep.subr.bf16.mxu1 %v8742_v36  ;;  %v8826_v35 = vld [vmem:[%s11988_s1 + $0x2e4] ss:$16 sps:$4 sm:$0xff]   ;;  %v8829_v36 = vld [vmem:[%s11988_s1 + $0x2ec] ss:$16 sps:$4 sm:$0xff]  }
 0x157   :  { %3076 = vmatpush1.bf16.msra.mxu0 %v8737_v37  ;;  %3162 = vmatpush1.bf16.msra.mxu1 %v8740_v38  ;;  %v8824_v37 = vld [vmem:[%s11988_s1 + $0x2e0] ss:$16 sps:$4 sm:$0xff]   ;;  %v8827_v38 = vld [vmem:[%s11988_s1 + $0x2e8] ss:$16 sps:$4 sm:$0xff]  }
 0x158   :  { %3077 = vmatprep.subr.bf16.mxu0 %v8745_v32  ;;  %3163 = vmatprep.subr.bf16.mxu1 %v8748_v39  ;;  %v8832_v32 = vld [vmem:[%s11988_s1 + $0x304] ss:$16 sps:$4 sm:$0xff]   ;;  %v8835_v39 = vld [vmem:[%s11988_s1 + $0x30c] ss:$16 sps:$4 sm:$0xff]  }
 0x15b   :  { %3078 = vmatpush1.bf16.msra.mxu0 %v8743_v46  ;;  %3164 = vmatpush1.bf16.msra.mxu1 %v8746_v40  ;;  %v8830_v46 = vld [vmem:[%s11988_s1 + $0x300] ss:$16 sps:$4 sm:$0xff]   ;;  %v8833_v40 = vld [vmem:[%s11988_s1 + $0x308] ss:$16 sps:$4 sm:$0xff]  }
 0x15c   :  { %3079 = vmatprep.subr.bf16.mxu0 %v8751_v41  ;;  %3165 = vmatprep.subr.bf16.mxu1 %v8754_v42  ;;  %v8838_v41 = vld [vmem:[%s11988_s1 + $0x324] ss:$16 sps:$4 sm:$0xff]   ;;  %v8841_v42 = vld [vmem:[%s11988_s1 + $0x32c] ss:$16 sps:$4 sm:$0xff]  }
 0x15f   :  { %3080 = vmatpush1.bf16.msra.mxu0 %v8749_v43  ;;  %3166 = vmatpush1.bf16.msra.mxu1 %v8752_v45  ;;  %v8836_v43 = vld [vmem:[%s11988_s1 + $0x320] ss:$16 sps:$4 sm:$0xff]   ;;  %v8839_v45 = vld [vmem:[%s11988_s1 + $0x328] ss:$16 sps:$4 sm:$0xff]  }
 0x160   :  { %3081 = vmatprep.subr.bf16.mxu0 %v8757_v50  ;;  %3167 = vmatprep.subr.bf16.mxu1 %v8760_v51  ;;  %v8844_v50 = vld [vmem:[%s11988_s1 + $0x344] ss:$16 sps:$4 sm:$0xff]   ;;  %v8847_v51 = vld [vmem:[%s11988_s1 + $0x34c] ss:$16 sps:$4 sm:$0xff]  }
 0x163   :  { %3082 = vmatpush1.bf16.msra.mxu0 %v8755_v47  ;;  %3168 = vmatpush1.bf16.msra.mxu1 %v8758_v44  ;;  %v8842_v47 = vld [vmem:[%s11988_s1 + $0x340] ss:$16 sps:$4 sm:$0xff]   ;;  %v8845_v44 = vld [vmem:[%s11988_s1 + $0x348] ss:$16 sps:$4 sm:$0xff]  }
 0x164   :  { %3083 = vmatprep.subr.bf16.mxu0 %v8763_v11  ;;  %3169 = vmatprep.subr.bf16.mxu1 %v8766_v55  ;;  %v8850_v11 = vld [vmem:[%s11988_s1 + $0x364] ss:$16 sps:$4 sm:$0xff]   ;;  %v8853_v55 = vld [vmem:[%s11988_s1 + $0x36c] ss:$16 sps:$4 sm:$0xff]  }
 0x167   :  { %3084 = vmatpush1.bf16.msra.mxu0 %v8761_v56  ;;  %3170 = vmatpush1.bf16.msra.mxu1 %v8764_v57  ;;  %v8848_v56 = vld [vmem:[%s11988_s1 + $0x360] ss:$16 sps:$4 sm:$0xff]   ;;  %v8851_v57 = vld [vmem:[%s11988_s1 + $0x368] ss:$16 sps:$4 sm:$0xff]  }
 0x168   :  { %3085 = vmatprep.subr.bf16.mxu0 %v8769_v58  ;;  %3171 = vmatprep.subr.bf16.mxu1 %v8772_v59  ;;  %v8856_v58 = vld [vmem:[%s11988_s1 + $0x384] ss:$16 sps:$4 sm:$0xff]   ;;  %v8859_v59 = vld [vmem:[%s11988_s1 + $0x38c] ss:$16 sps:$4 sm:$0xff]  }
 0x16b   :  { %3086 = vmatpush1.bf16.msra.mxu0 %v8767_v60  ;;  %3172 = vmatpush1.bf16.msra.mxu1 %v8770_v62  ;;  %v8854_v60 = vld [vmem:[%s11988_s1 + $0x380] ss:$16 sps:$4 sm:$0xff]   ;;  %v8857_v62 = vld [vmem:[%s11988_s1 + $0x388] ss:$16 sps:$4 sm:$0xff]  }
 0x16c   :  { %3087 = vmatprep.subr.bf16.mxu0 %v8775_v63  ;;  %3173 = vmatprep.subr.bf16.mxu1 %v8778_v0  ;;  %v8862_v63 = vld [vmem:[%s11988_s1 + $0x3a4] ss:$16 sps:$4 sm:$0xff]   ;;  %v8865_v0 = vld [vmem:[%s11988_s1 + $0x3ac] ss:$16 sps:$4 sm:$0xff]  }
 0x16f   :  { %3088 = vmatpush1.bf16.msra.mxu0 %v8773_v52  ;;  %3174 = vmatpush1.bf16.msra.mxu1 %v8776_v1  ;;  %v8860_v52 = vld [vmem:[%s11988_s1 + $0x3a0] ss:$16 sps:$4 sm:$0xff]   ;;  %v8863_v1 = vld [vmem:[%s11988_s1 + $0x3a8] ss:$16 sps:$4 sm:$0xff]  }
 0x170   :  { %3100 = vmatprep.subr.bf16.mxu0 %v8783_v2  ;;  %3186 = vmatprep.subr.bf16.mxu1 %v8786_v3  ;;  %v8868_v2 = vld [vmem:[%s11988_s1 + $0x3c4] ss:$16 sps:$4 sm:$0xff]   ;;  %v8871_v3 = vld [vmem:[%s11988_s1 + $0x3cc] ss:$16 sps:$4 sm:$0xff]  }
 0x172   :  { %3090 = vmatmul.mubr.bf16.vlgmr.msra.gmra.mrb[0].mxu0 %v10201_v49  ;;  %3176 = vmatmul.mubr.bf16.vlgmr.msra.gmra.mrb[0].mxu1 %v10201_v49  ;;  %v8798_v49 = vld [vmem:[%s11988_s1 + $0x24c] ss:$16 sps:$4 sm:$0xff]  }
 0x173   :  { %3101 = vmatpush1.bf16.msra.mxu0 %v8781_v6  ;;  %3187 = vmatpush1.bf16.msra.mxu1 %v8784_v7  ;;  %v8866_v6 = vld [vmem:[%s11988_s1 + $0x3c0] ss:$16 sps:$4 sm:$0xff]   ;;  %v8869_v7 = vld [vmem:[%s11988_s1 + $0x3c8] ss:$16 sps:$4 sm:$0xff]  }
 0x174   :  { %3102 = vmatprep.subr.bf16.mxu0 %v8789_v8  ;;  %3188 = vmatprep.subr.bf16.mxu1 %v8792_v9  ;;  %v8874_v8 = vld [vmem:[%s11988_s1 + $0x3e4] ss:$16 sps:$4 sm:$0xff]   ;;  %v8877_v9 = vld [vmem:[%s11988_s1 + $0x3ec] ss:$16 sps:$4 sm:$0xff]  }
 0x175   :  { %3132 = vmatprep.mubr.bf16.mxu0 %v9352_v26  ;;  %3218 = vmatprep.mubr.bf16.mxu1 %v9352_v26 }
 0x177   :  { %3103 = vmatpush1.bf16.msra.mxu0 %v8787_v12  ;;  %3189 = vmatpush1.bf16.msra.mxu1 %v8790_v48  ;;  %v8872_v12 = vld [vmem:[%s11988_s1 + $0x3e0] ss:$16 sps:$4 sm:$0xff]   ;;  %v8875_v48 = vld [vmem:[%s11988_s1 + $0x3e8] ss:$16 sps:$4 sm:$0xff]  }
 0x178   :  { %3906 = vmatprep.subr.bf16.mxu0 %v8795_v13  ;;  %3992 = vmatprep.subr.bf16.mxu1 %v8798_v49  ;;  %v8880_v13 = vld [vmem:[%s11988_s1 + $0x404] ss:$16 sps:$4 sm:$0xff]   ;;  %v8883_v49 = vld [vmem:[%s11988_s1 + $0x40c] ss:$16 sps:$4 sm:$0xff]  }
 0x17e   :  { %7377 = vmatmul.mubr.msk.bf16.vlgmr.msra.gmra.mrb[0].mxu0 %vm562_vm0, %v10237_v61  ;;  %7378 = vmatmul.mubr.msk.bf16.vlgmr.msra.gmra.mrb[0].mxu1 %vm562_vm0, %v10237_v61  ;;  %v8811_v61 = vld [vmem:[%s11988_s1 + $0x28c] ss:$16 sps:$4 sm:$0xff]  }
 0x17f   :  { %3907 = vmatpush1.bf16.msra.mxu0 %v8793_v17  ;;  %3993 = vmatpush1.bf16.msra.mxu1 %v8796_v18  ;;  %v8886_v17 = vld [vmem:[%s11988_s1 + $0x424] ss:$16 sps:$4 sm:$0xff]   ;;  %v8889_v18 = vld [vmem:[%s11988_s1 + $0x42c] ss:$16 sps:$4 sm:$0xff]  }
 0x180   :  { %3908 = vmatprep.subr.bf16.mxu0 %v8802_v19  ;;  %3994 = vmatprep.subr.bf16.mxu1 %v8805_v20  ;;  %v8884_v19 = vld [vmem:[%s11988_s1 + $0x420] ss:$16 sps:$4 sm:$0xff]   ;;  %v3521_v20 = vshrl.u32 %v7461_v10, 16  ;;  %v8952_v10 = vld [vmem:[%s11988_s1 + $0xec] ss:$16 sps:$4 sm:$0xff]  }
 0x181   :  { %3938 = vmatprep.mubr.bf16.mxu0 %v3533_v21  ;;  %4024 = vmatprep.mubr.bf16.mxu1 %v3533_v21  ;;  %v3525_v21 = vrot.slane %v3523_v14, 1  ;;  %v8953_v14 = vld [vmem:[%s11988_s1 + $0x100] ss:$16 sps:$4 sm:$0xff]  }
 0x183   :  { %3909 = vmatpush1.bf16.msra.mxu0 %v8800_v22  ;;  %3995 = vmatpush1.bf16.msra.mxu1 %v8803_v23  ;;  %v8887_v22 = vld [vmem:[%s11988_s1 + $0x428] ss:$16 sps:$4 sm:$0xff]   ;;  %v10814_v23 = vld [vmem:[%s11989_s0 + $0x2c] sm:$0xf] }
 0x184   :  { %3910 = vmatprep.subr.bf16.mxu0 %v8808_v24  ;;  %3996 = vmatprep.subr.bf16.mxu1 %v8811_v61  ;;  %v10819_v24 = vld [vmem:[%s11989_s0 + $0x38] sm:$0xf]  ;;  %v8894_v61 = vld [vmem:[%s11988_s1 + $0x444] ss:$16 sps:$4 sm:$0xff]  }
 0x187   :  { %3911 = vmatpush1.bf16.msra.mxu0 %v8806_v53  ;;  %3997 = vmatpush1.bf16.msra.mxu1 %v8809_v54  ;;  %v8897_v53 = vld [vmem:[%s11988_s1 + $0x44c] ss:$16 sps:$4 sm:$0xff]   ;;  %v3526_v54 = vor.u32 %v3525_v21, %v3521_v20  ;;  %v8967_v20 = vld [vmem:[%s11988_s1 + $0x144] ss:$16 sps:$4 sm:$0xff]  }
 0x188   :  { %3912 = vmatprep.subr.bf16.mxu0 %v8814_v25  ;;  %3998 = vmatprep.subr.bf16.mxu1 %v8817_v27  ;;  %v7463_v25 = vcombine.low %v10814_v23, %v10819_v24  ;;  %v8892_v27 = vld [vmem:[%s11988_s1 + $0x440] ss:$16 sps:$4 sm:$0xff]   ;;  %v8970_v21 = vld [vmem:[%s11988_s1 + $0x14c] ss:$16 sps:$4 sm:$0xff]  }
 0x18b   :  { %3913 = vmatpush1.bf16.msra.mxu0 %v8812_v28  ;;  %3999 = vmatpush1.bf16.msra.mxu1 %v8815_v29  ;;  %v8895_v28 = vld [vmem:[%s11988_s1 + $0x448] ss:$16 sps:$4 sm:$0xff]   ;;  %v8900_v29 = vld [vmem:[%s11988_s1 + $0x464] ss:$16 sps:$4 sm:$0xff]  }
 0x18c   :  { %3914 = vmatprep.subr.bf16.mxu0 %v8820_v30  ;;  %4000 = vmatprep.subr.bf16.mxu1 %v8823_v31  ;;  %v8903_v30 = vld [vmem:[%s11988_s1 + $0x46c] ss:$16 sps:$4 sm:$0xff]   ;;  %v3537_v31 = vshll.u32 %v7463_v25, 16 }
 0x18f   :  { %3915 = vmatpush1.bf16.msra.mxu0 %v8818_v33  ;;  %4001 = vmatpush1.bf16.msra.mxu1 %v8821_v34  ;;  %v8898_v33 = vld [vmem:[%s11988_s1 + $0x460] ss:$16 sps:$4 sm:$0xff]   ;;  %v8901_v34 = vld [vmem:[%s11988_s1 + $0x468] ss:$16 sps:$4 sm:$0xff]  }
 0x190   :  { %3916 = vmatprep.subr.bf16.mxu0 %v8826_v35  ;;  %4002 = vmatprep.subr.bf16.mxu1 %v8829_v36  ;;  %v8906_v35 = vld [vmem:[%s11988_s1 + $0x4] ss:$16 sps:$4 sm:$0xff]   ;;  %v8909_v36 = vld [vmem:[%s11988_s1 + $0xc] ss:$16 sps:$4 sm:$0xff]  }
 0x193   :  { %3917 = vmatpush1.bf16.msra.mxu0 %v8824_v37  ;;  %4003 = vmatpush1.bf16.msra.mxu1 %v8827_v38  ;;  %v3535_v37 = vshrl.u32 %v7463_v25, 16  ;;  %v3539_v38 = vrot.slane %v3537_v31, 1  ;;  %v8971_v25 = vld [vmem:[%s11988_s1 + $0x160] ss:$16 sps:$4 sm:$0xff]   ;;  %v8980_v31 = vld [vmem:[%s11988_s1 + $0x188] ss:$16 sps:$4 sm:$0xff]  }
 0x194   :  { %3918 = vmatprep.subr.bf16.mxu0 %v8832_v32  ;;  %4004 = vmatprep.subr.bf16.mxu1 %v8835_v39  ;;  %v10858_v39 = vld [vmem:[%s11989_s0 + $0x30] sm:$0x77] }
 0x195   :  { %v3540_v32 = vor.u32 %v3539_v38, %v3535_v37  ;;  %v8991_v37 = vld [vmem:[%s11988_s1 + $0x1c4] ss:$16 sps:$4 sm:$0xff]   ;;  %v8994_v38 = vld [vmem:[%s11988_s1 + $0x1cc] ss:$16 sps:$4 sm:$0xff]  }
 0x197   :  { %3919 = vmatpush1.bf16.msra.mxu0 %v8830_v46  ;;  %4005 = vmatpush1.bf16.msra.mxu1 %v8833_v40  ;;  %v8904_v46 = vld [vmem:[%s11988_s1] ss:$16 sps:$4 sm:$0xff]   ;;  %v8907_v40 = vld [vmem:[%s11988_s1 + $0x8] ss:$16 sps:$4 sm:$0xff]  }
 0x198   :  { %3920 = vmatprep.subr.bf16.mxu0 %v8838_v41  ;;  %4006 = vmatprep.subr.bf16.mxu1 %v8841_v42  ;;  %v8913_v41 = vld [vmem:[%s11988_s1 + $0x24] ss:$16 sps:$4 sm:$0xff]   ;;  %v8916_v42 = vld [vmem:[%s11988_s1 + $0x2c] ss:$16 sps:$4 sm:$0xff]  }
 0x19b   :  { %3921 = vmatpush1.bf16.msra.mxu0 %v8836_v43  ;;  %4007 = vmatpush1.bf16.msra.mxu1 %v8839_v45  ;;  %v7539_v43 = vcombine.high %v10582_v4, %v10858_v39  ;;  %v8911_v45 = vld [vmem:[%s11988_s1 + $0x20] ss:$16 sps:$4 sm:$0xff]  }
 0x19c   :  { %3922 = vmatprep.subr.bf16.mxu0 %v8844_v50  ;;  %4008 = vmatprep.subr.bf16.mxu1 %v8847_v51  ;;  %v8914_v50 = vld [vmem:[%s11988_s1 + $0x28] ss:$16 sps:$4 sm:$0xff]   ;;  %v8919_v51 = vld [vmem:[%s11988_s1 + $0x44] ss:$16 sps:$4 sm:$0xff]  }
 0x19f   :  { %3923 = vmatpush1.bf16.msra.mxu0 %v8842_v47  ;;  %4009 = vmatpush1.bf16.msra.mxu1 %v8845_v44  ;;  %v8922_v47 = vld [vmem:[%s11988_s1 + $0x4c] ss:$16 sps:$4 sm:$0xff]   ;;  %v8917_v44 = vld [vmem:[%s11988_s1 + $0x40] ss:$16 sps:$4 sm:$0xff]  }
 0x1a0   :  { %3924 = vmatprep.subr.bf16.mxu0 %v8850_v11  ;;  %4010 = vmatprep.subr.bf16.mxu1 %v8853_v55  ;;  %v8920_v11 = vld [vmem:[%s11988_s1 + $0x48] ss:$16 sps:$4 sm:$0xff]   ;;  %v8925_v55 = vld [vmem:[%s11988_s1 + $0x64] ss:$16 sps:$4 sm:$0xff]  }
 0x1a3   :  { %3925 = vmatpush1.bf16.msra.mxu0 %v8848_v56  ;;  %4011 = vmatpush1.bf16.msra.mxu1 %v8851_v57  ;;  %v8928_v56 = vld [vmem:[%s11988_s1 + $0x6c] ss:$16 sps:$4 sm:$0xff]   ;;  %v8923_v57 = vld [vmem:[%s11988_s1 + $0x60] ss:$16 sps:$4 sm:$0xff]  }
 0x1a4   :  { %3926 = vmatprep.subr.bf16.mxu0 %v8856_v58  ;;  %4012 = vmatprep.subr.bf16.mxu1 %v8859_v59  ;;  %v8926_v58 = vld [vmem:[%s11988_s1 + $0x68] ss:$16 sps:$4 sm:$0xff]   ;;  %v8931_v59 = vld [vmem:[%s11988_s1 + $0x84] ss:$16 sps:$4 sm:$0xff]  }
 0x1a7   :  { %3927 = vmatpush1.bf16.msra.mxu0 %v8854_v60  ;;  %4013 = vmatpush1.bf16.msra.mxu1 %v8857_v62  ;;  %v8934_v60 = vld [vmem:[%s11988_s1 + $0x8c] ss:$16 sps:$4 sm:$0xff]   ;;  %v8929_v62 = vld [vmem:[%s11988_s1 + $0x80] ss:$16 sps:$4 sm:$0xff]  }
 0x1a8   :  { %3928 = vmatprep.subr.bf16.mxu0 %v8862_v63  ;;  %4014 = vmatprep.subr.bf16.mxu1 %v8865_v0  ;;  %v8932_v63 = vld [vmem:[%s11988_s1 + $0x88] ss:$16 sps:$4 sm:$0xff]   ;;  %v8937_v0 = vld [vmem:[%s11988_s1 + $0xa4] ss:$16 sps:$4 sm:$0xff]  }
 0x1ab   :  { %3929 = vmatpush1.bf16.msra.mxu0 %v8860_v52  ;;  %4015 = vmatpush1.bf16.msra.mxu1 %v8863_v1  ;;  %v8940_v52 = vld [vmem:[%s11988_s1 + $0xac] ss:$16 sps:$4 sm:$0xff]   ;;  %v8935_v1 = vld [vmem:[%s11988_s1 + $0xa0] ss:$16 sps:$4 sm:$0xff]  }
 0x1ac   :  { %3930 = vmatprep.subr.bf16.mxu0 %v8868_v2  ;;  %4016 = vmatprep.subr.bf16.mxu1 %v8871_v3  ;;  %v8938_v2 = vld [vmem:[%s11988_s1 + $0xa8] ss:$16 sps:$4 sm:$0xff]   ;;  %v8943_v3 = vld [vmem:[%s11988_s1 + $0xc4] ss:$16 sps:$4 sm:$0xff]  }
 0x1af   :  { %3931 = vmatpush1.bf16.msra.mxu0 %v8866_v6  ;;  %4017 = vmatpush1.bf16.msra.mxu1 %v8869_v7  ;;  %v8946_v6 = vld [vmem:[%s11988_s1 + $0xcc] ss:$16 sps:$4 sm:$0xff]   ;;  %v8941_v7 = vld [vmem:[%s11988_s1 + $0xc0] ss:$16 sps:$4 sm:$0xff]  }
 0x1b0   :  { %3932 = vmatprep.subr.bf16.mxu0 %v8874_v8  ;;  %4018 = vmatprep.subr.bf16.mxu1 %v8877_v9  ;;  %v8944_v8 = vld [vmem:[%s11988_s1 + $0xc8] ss:$16 sps:$4 sm:$0xff]   ;;  %v8949_v9 = vld [vmem:[%s11988_s1 + $0xe4] ss:$16 sps:$4 sm:$0xff]  }
 0x1b3   :  { %3933 = vmatpush1.bf16.msra.mxu0 %v8872_v12  ;;  %4019 = vmatpush1.bf16.msra.mxu1 %v8875_v48  ;;  %v8947_v12 = vld [vmem:[%s11988_s1 + $0xe0] ss:$16 sps:$4 sm:$0xff]   ;;  %v8950_v48 = vld [vmem:[%s11988_s1 + $0xe8] ss:$16 sps:$4 sm:$0xff]  }
 0x1b4   :  { %3934 = vmatprep.subr.bf16.mxu0 %v8880_v13  ;;  %4020 = vmatprep.subr.bf16.mxu1 %v8883_v49  ;;  %v8955_v13 = vld [vmem:[%s11988_s1 + $0x104] ss:$16 sps:$4 sm:$0xff]   ;;  %v8958_v49 = vld [vmem:[%s11988_s1 + $0x10c] ss:$16 sps:$4 sm:$0xff]  }
 0x1b7   :  { %3935 = vmatpush1.bf16.msra.mxu0 %v8878_v15  ;;  %4021 = vmatpush1.bf16.msra.mxu1 %v8881_v16  ;;  %v8956_v15 = vld [vmem:[%s11988_s1 + $0x108] ss:$16 sps:$4 sm:$0xff]   ;;  %v8961_v16 = vld [vmem:[%s11988_s1 + $0x124] ss:$16 sps:$4 sm:$0xff]  }
 0x1b8   :  { %3936 = vmatprep.subr.bf16.mxu0 %v8886_v17  ;;  %4022 = vmatprep.subr.bf16.mxu1 %v8889_v18  ;;  %v8964_v17 = vld [vmem:[%s11988_s1 + $0x12c] ss:$16 sps:$4 sm:$0xff]   ;;  %v8959_v18 = vld [vmem:[%s11988_s1 + $0x120] ss:$16 sps:$4 sm:$0xff]  }
 0x1bb   :  { %3937 = vmatpush1.bf16.msra.mxu0 %v8884_v19  ;;  %4023 = vmatpush1.bf16.msra.mxu1 %v8887_v22  ;;  %v8962_v19 = vld [vmem:[%s11988_s1 + $0x128] ss:$16 sps:$4 sm:$0xff]   ;;  %v8965_v22 = vld [vmem:[%s11988_s1 + $0x140] ss:$16 sps:$4 sm:$0xff]  }
 0x1bc   :  { %3949 = vmatprep.subr.bf16.mxu0 %v8894_v61  ;;  %4035 = vmatprep.subr.bf16.mxu1 %v8897_v53  ;;  %v8968_v61 = vld [vmem:[%s11988_s1 + $0x148] ss:$16 sps:$4 sm:$0xff]   ;;  %v8973_v53 = vld [vmem:[%s11988_s1 + $0x164] ss:$16 sps:$4 sm:$0xff]  }
 0x1be   :  { %3939 = vmatmul.mubr.bf16.vlgmr.msra.gmra.mrb[4].mxu0 %v3526_v54  ;;  %4025 = vmatmul.mubr.bf16.vlgmr.msra.gmra.mrb[4].mxu1 %v3526_v54  ;;  %v8976_v54 = vld [vmem:[%s11988_s1 + $0x16c] ss:$16 sps:$4 sm:$0xff]  }
 0x1bf   :  { %3950 = vmatpush1.bf16.msra.mxu0 %v8892_v27  ;;  %4036 = vmatpush1.bf16.msra.mxu1 %v8895_v28  ;;  %v8974_v27 = vld [vmem:[%s11988_s1 + $0x168] ss:$16 sps:$4 sm:$0xff]   ;;  %v8979_v28 = vld [vmem:[%s11988_s1 + $0x184] ss:$16 sps:$4 sm:$0xff]  }
 0x1c0   :  { %3951 = vmatprep.subr.bf16.mxu0 %v8900_v29  ;;  %4037 = vmatprep.subr.bf16.mxu1 %v8903_v30  ;;  %v8982_v29 = vld [vmem:[%s11988_s1 + $0x18c] ss:$16 sps:$4 sm:$0xff]   ;;  %v8977_v30 = vld [vmem:[%s11988_s1 + $0x180] ss:$16 sps:$4 sm:$0xff]  }
 0x1c1   :  { %3981 = vmatprep.mubr.bf16.mxu0 %v9352_v26  ;;  %4067 = vmatprep.mubr.bf16.mxu1 %v9352_v26 }
 0x1c3   :  { %3952 = vmatpush1.bf16.msra.mxu0 %v8898_v33  ;;  %4038 = vmatpush1.bf16.msra.mxu1 %v8901_v34  ;;  %v8985_v33 = vld [vmem:[%s11988_s1 + $0x1a4] ss:$16 sps:$4 sm:$0xff]   ;;  %v8988_v34 = vld [vmem:[%s11988_s1 + $0x1ac] ss:$16 sps:$4 sm:$0xff]  }
 0x1c4   :  { %4451 = vmatprep.subr.bf16.mxu0 %v8906_v35  ;;  %4537 = vmatprep.subr.bf16.mxu1 %v8909_v36  ;;  %v8983_v35 = vld [vmem:[%s11988_s1 + $0x1a0] ss:$16 sps:$4 sm:$0xff]   ;;  %v8986_v36 = vld [vmem:[%s11988_s1 + $0x1a8] ss:$16 sps:$4 sm:$0xff]  }
 0x1ca   :  { %7536 = vmatmul.mubr.msk.bf16.vlgmr.msra.gmra.mrb[4].mxu0 %vm562_vm0, %v3540_v32  ;;  %7537 = vmatmul.mubr.msk.bf16.vlgmr.msra.gmra.mrb[4].mxu1 %vm562_vm0, %v3540_v32  ;;  %v8989_v32 = vld [vmem:[%s11988_s1 + $0x1c0] ss:$16 sps:$4 sm:$0xff]  }
 0x1cb   :  { %4452 = vmatpush1.bf16.msra.mxu0 %v8904_v46  ;;  %4538 = vmatpush1.bf16.msra.mxu1 %v8907_v40  ;;  %v8992_v46 = vld [vmem:[%s11988_s1 + $0x1c8] ss:$16 sps:$4 sm:$0xff]   ;;  %v8997_v40 = vld [vmem:[%s11988_s1 + $0x1e4] ss:$16 sps:$4 sm:$0xff]  }
 0x1cc   :  { %4453 = vmatprep.subr.bf16.mxu0 %v8913_v41  ;;  %4539 = vmatprep.subr.bf16.mxu1 %v8916_v42  ;;  %v9000_v41 = vld [vmem:[%s11988_s1 + $0x1ec] ss:$16 sps:$4 sm:$0xff]   ;;  %v8995_v42 = vld [vmem:[%s11988_s1 + $0x1e0] ss:$16 sps:$4 sm:$0xff]  }
 0x1cd   :  { %4483 = vmatprep.mubr.bf16.mxu0 %v7539_v43  ;;  %4569 = vmatprep.mubr.bf16.mxu1 %v7539_v43  ;;  %v8998_v43 = vld [vmem:[%s11988_s1 + $0x1e8] ss:$16 sps:$4 sm:$0xff]  }
 0x1cf   :  { %4454 = vmatpush1.bf16.msra.mxu0 %v8911_v45  ;;  %4540 = vmatpush1.bf16.msra.mxu1 %v8914_v50  ;;  %v9005_v45 = vld [vmem:[%s11988_s1 + $0x204] ss:$16 sps:$4 sm:$0xff]   ;;  %v9008_v50 = vld [vmem:[%s11988_s1 + $0x20c] ss:$16 sps:$4 sm:$0xff]  }
 0x1d0   :  { %4455 = vmatprep.subr.bf16.mxu0 %v8919_v51  ;;  %4541 = vmatprep.subr.bf16.mxu1 %v8922_v47  ;;  %v7538_v51 = vcombine.low %v10582_v4, %v10858_v39  ;;  %v9003_v47 = vld [vmem:[%s11988_s1 + $0x200] ss:$16 sps:$4 sm:$0xff]   ;;  %v9014_v4 = vld [vmem:[%s11988_s1 + $0x22c] ss:$16 sps:$4 sm:$0xff]  }
 0x1d1   :  { %v9009_v39 = vld [vmem:[%s11988_s1 + $0x220] ss:$16 sps:$4 sm:$0xff]  }
 0x1d3   :  { %4456 = vmatpush1.bf16.msra.mxu0 %v8917_v44  ;;  %4542 = vmatpush1.bf16.msra.mxu1 %v8920_v11  ;;  %v9006_v44 = vld [vmem:[%s11988_s1 + $0x208] ss:$16 sps:$4 sm:$0xff]   ;;  %v9011_v11 = vld [vmem:[%s11988_s1 + $0x224] ss:$16 sps:$4 sm:$0xff]  }
 0x1d4   :  { %4457 = vmatprep.subr.bf16.mxu0 %v8925_v55  ;;  %4543 = vmatprep.subr.bf16.mxu1 %v8928_v56  ;;  %v9012_v55 = vld [vmem:[%s11988_s1 + $0x228] ss:$16 sps:$4 sm:$0xff]   ;;  %v9017_v56 = vld [vmem:[%s11988_s1 + $0x484] ss:$16 sps:$4 sm:$0xff]  }
 0x1d7   :  { %4458 = vmatpush1.bf16.msra.mxu0 %v8923_v57  ;;  %4544 = vmatpush1.bf16.msra.mxu1 %v8926_v58  ;;  %v9020_v57 = vld [vmem:[%s11988_s1 + $0x48c] ss:$16 sps:$4 sm:$0xff]   ;;  %v11087_v58 = vld [vmem:[%s11989_s0 + $0x24] sm:$0xee] }
 0x1d8   :  { %4459 = vmatprep.subr.bf16.mxu0 %v8931_v59  ;;  %4545 = vmatprep.subr.bf16.mxu1 %v8934_v60  ;;  %v7386_v59 = vld [vmem:[%s11989_s0 + $0x38] sm:$0x7]  ;;  %v7690_v60 = vcombine.high %v11087_v58, %v10587_v5  ;;  %v9022_v5 = vld [vmem:[%s11988_s1 + $0x4a0] ss:$16 sps:$4 sm:$0xff]  }
 0x1db   :  { %4460 = vmatpush1.bf16.msra.mxu0 %v8929_v62  ;;  %4546 = vmatpush1.bf16.msra.mxu1 %v8932_v63  ;;  %v7540_v62 = vcombine.low %v10814_v23, %v7386_v59  ;;  %v9015_v63 = vld [vmem:[%s11988_s1 + $0x480] ss:$16 sps:$4 sm:$0xff]   ;;  %v9025_v23 = vld [vmem:[%s11988_s1 + $0x4a8] ss:$16 sps:$4 sm:$0xff]  }
 0x1dc   :  { %4461 = vmatprep.subr.bf16.mxu0 %v8937_v0  ;;  %4547 = vmatprep.subr.bf16.mxu1 %v8940_v52  ;;  %v9018_v0 = vld [vmem:[%s11988_s1 + $0x488] ss:$16 sps:$4 sm:$0xff]   ;;  %v9024_v52 = vld [vmem:[%s11988_s1 + $0x4a4] ss:$16 sps:$4 sm:$0xff]  }
 0x1dd   :  { %v9103_v59 = vld [vmem:[%s11988_s1 + $0x648] ss:$16 sps:$4 sm:$0xff]  }
 0x1df   :  { %4462 = vmatpush1.bf16.msra.mxu0 %v8935_v1  ;;  %4548 = vmatpush1.bf16.msra.mxu1 %v8938_v2  ;;  %v9027_v1 = vld [vmem:[%s11988_s1 + $0x4ac] ss:$16 sps:$4 sm:$0xff]   ;;  %v4706_v2 = vrot.slane %v7690_v60, 1  ;;  %v9108_v60 = vld [vmem:[%s11988_s1 + $0x664] ss:$16 sps:$4 sm:$0xff]  }
 0x1e0   :  { %4463 = vmatprep.subr.bf16.mxu0 %v8943_v3  ;;  %4549 = vmatprep.subr.bf16.mxu1 %v8946_v6  ;;  %v9030_v3 = vld [vmem:[%s11988_s1 + $0x4c4] ss:$16 sps:$4 sm:$0xff]   ;;  %v9033_v6 = vld [vmem:[%s11988_s1 + $0x4cc] ss:$16 sps:$4 sm:$0xff]  }
 0x1e3   :  { %4464 = vmatpush1.bf16.msra.mxu0 %v8941_v7  ;;  %4550 = vmatpush1.bf16.msra.mxu1 %v8944_v8  ;;  %v9028_v7 = vld [vmem:[%s11988_s1 + $0x4c0] ss:$16 sps:$4 sm:$0xff]   ;;  %v9031_v8 = vld [vmem:[%s11988_s1 + $0x4c8] ss:$16 sps:$4 sm:$0xff]  }
 0x1e4   :  { %4465 = vmatprep.subr.bf16.mxu0 %v8949_v9  ;;  %4551 = vmatprep.subr.bf16.mxu1 %v8952_v10  ;;  %v9036_v9 = vld [vmem:[%s11988_s1 + $0x4e4] ss:$16 sps:$4 sm:$0xff]   ;;  %v9039_v10 = vld [vmem:[%s11988_s1 + $0x4ec] ss:$16 sps:$4 sm:$0xff]  }
 0x1e7   :  { %4466 = vmatpush1.bf16.msra.mxu0 %v8947_v12  ;;  %4552 = vmatpush1.bf16.msra.mxu1 %v8950_v48  ;;  %v9034_v12 = vld [vmem:[%s11988_s1 + $0x4e0] ss:$16 sps:$4 sm:$0xff]   ;;  %v9037_v48 = vld [vmem:[%s11988_s1 + $0x4e8] ss:$16 sps:$4 sm:$0xff]  }
 0x1e8   :  { %4467 = vmatprep.subr.bf16.mxu0 %v8955_v13  ;;  %4553 = vmatprep.subr.bf16.mxu1 %v8958_v49  ;;  %v9042_v13 = vld [vmem:[%s11988_s1 + $0x504] ss:$16 sps:$4 sm:$0xff]   ;;  %v9045_v49 = vld [vmem:[%s11988_s1 + $0x50c] ss:$16 sps:$4 sm:$0xff]  }
 0x1eb   :  { %4468 = vmatpush1.bf16.msra.mxu0 %v8953_v14  ;;  %4554 = vmatpush1.bf16.msra.mxu1 %v8956_v15  ;;  %v9040_v14 = vld [vmem:[%s11988_s1 + $0x500] ss:$16 sps:$4 sm:$0xff]   ;;  %v9043_v15 = vld [vmem:[%s11988_s1 + $0x508] ss:$16 sps:$4 sm:$0xff]  }
 0x1ec   :  { %4469 = vmatprep.subr.bf16.mxu0 %v8961_v16  ;;  %4555 = vmatprep.subr.bf16.mxu1 %v8964_v17  ;;  %v9048_v16 = vld [vmem:[%s11988_s1 + $0x524] ss:$16 sps:$4 sm:$0xff]   ;;  %v9051_v17 = vld [vmem:[%s11988_s1 + $0x52c] ss:$16 sps:$4 sm:$0xff]  }
 0x1ef   :  { %4470 = vmatpush1.bf16.msra.mxu0 %v8959_v18  ;;  %4556 = vmatpush1.bf16.msra.mxu1 %v8962_v19  ;;  %v9046_v18 = vld [vmem:[%s11988_s1 + $0x520] ss:$16 sps:$4 sm:$0xff]   ;;  %v9049_v19 = vld [vmem:[%s11988_s1 + $0x528] ss:$16 sps:$4 sm:$0xff]  }
 0x1f0   :  { %4471 = vmatprep.subr.bf16.mxu0 %v8967_v20  ;;  %4557 = vmatprep.subr.bf16.mxu1 %v8970_v21  ;;  %v9054_v20 = vld [vmem:[%s11988_s1 + $0x544] ss:$16 sps:$4 sm:$0xff]   ;;  %v9057_v21 = vld [vmem:[%s11988_s1 + $0x54c] ss:$16 sps:$4 sm:$0xff]  }
 0x1f3   :  { %4472 = vmatpush1.bf16.msra.mxu0 %v8965_v22  ;;  %4558 = vmatpush1.bf16.msra.mxu1 %v8968_v61  ;;  %v9052_v22 = vld [vmem:[%s11988_s1 + $0x540] ss:$16 sps:$4 sm:$0xff]   ;;  %v9055_v61 = vld [vmem:[%s11988_s1 + $0x548] ss:$16 sps:$4 sm:$0xff]  }
 0x1f4   :  { %4473 = vmatprep.subr.bf16.mxu0 %v8973_v53  ;;  %4559 = vmatprep.subr.bf16.mxu1 %v8976_v54  ;;  %v9060_v53 = vld [vmem:[%s11988_s1 + $0x564] ss:$16 sps:$4 sm:$0xff]   ;;  %v9063_v54 = vld [vmem:[%s11988_s1 + $0x56c] ss:$16 sps:$4 sm:$0xff]  }
 0x1f7   :  { %4474 = vmatpush1.bf16.msra.mxu0 %v8971_v25  ;;  %4560 = vmatpush1.bf16.msra.mxu1 %v8974_v27  ;;  %v9058_v25 = vld [vmem:[%s11988_s1 + $0x560] ss:$16 sps:$4 sm:$0xff]   ;;  %v9061_v27 = vld [vmem:[%s11988_s1 + $0x568] ss:$16 sps:$4 sm:$0xff]  }
 0x1f8   :  { %4475 = vmatprep.subr.bf16.mxu0 %v8979_v28  ;;  %4561 = vmatprep.subr.bf16.mxu1 %v8982_v29  ;;  %v9066_v28 = vld [vmem:[%s11988_s1 + $0x584] ss:$16 sps:$4 sm:$0xff]   ;;  %v9069_v29 = vld [vmem:[%s11988_s1 + $0x58c] ss:$16 sps:$4 sm:$0xff]  }
 0x1fb   :  { %4476 = vmatpush1.bf16.msra.mxu0 %v8977_v30  ;;  %4562 = vmatpush1.bf16.msra.mxu1 %v8980_v31  ;;  %v9064_v30 = vld [vmem:[%s11988_s1 + $0x580] ss:$16 sps:$4 sm:$0xff]   ;;  %v9067_v31 = vld [vmem:[%s11988_s1 + $0x588] ss:$16 sps:$4 sm:$0xff]  }
 0x1fc   :  { %4477 = vmatprep.subr.bf16.mxu0 %v8985_v33  ;;  %4563 = vmatprep.subr.bf16.mxu1 %v8988_v34  ;;  %v9072_v33 = vld [vmem:[%s11988_s1 + $0x5a4] ss:$16 sps:$4 sm:$0xff]   ;;  %v9075_v34 = vld [vmem:[%s11988_s1 + $0x5ac] ss:$16 sps:$4 sm:$0xff]  }
 0x1ff   :  { %4478 = vmatpush1.bf16.msra.mxu0 %v8983_v35  ;;  %4564 = vmatpush1.bf16.msra.mxu1 %v8986_v36  ;;  %v9070_v35 = vld [vmem:[%s11988_s1 + $0x5a0] ss:$16 sps:$4 sm:$0xff]   ;;  %v9073_v36 = vld [vmem:[%s11988_s1 + $0x5a8] ss:$16 sps:$4 sm:$0xff]  }
 0x200   :  { %4479 = vmatprep.subr.bf16.mxu0 %v8991_v37  ;;  %4565 = vmatprep.subr.bf16.mxu1 %v8994_v38  ;;  %v9078_v37 = vld [vmem:[%s11988_s1 + $0x5c4] ss:$16 sps:$4 sm:$0xff]   ;;  %v9081_v38 = vld [vmem:[%s11988_s1 + $0x5cc] ss:$16 sps:$4 sm:$0xff]  }
 0x203   :  { %4480 = vmatpush1.bf16.msra.mxu0 %v8989_v32  ;;  %4566 = vmatpush1.bf16.msra.mxu1 %v8992_v46  ;;  %v9076_v32 = vld [vmem:[%s11988_s1 + $0x5c0] ss:$16 sps:$4 sm:$0xff]   ;;  %v9079_v46 = vld [vmem:[%s11988_s1 + $0x5c8] ss:$16 sps:$4 sm:$0xff]  }
 0x204   :  { %4481 = vmatprep.subr.bf16.mxu0 %v8997_v40  ;;  %4567 = vmatprep.subr.bf16.mxu1 %v9000_v41  ;;  %v9084_v40 = vld [vmem:[%s11988_s1 + $0x5e4] ss:$16 sps:$4 sm:$0xff]   ;;  %v9087_v41 = vld [vmem:[%s11988_s1 + $0x5ec] ss:$16 sps:$4 sm:$0xff]  }
 0x207   :  { %4482 = vmatpush1.bf16.msra.mxu0 %v8995_v42  ;;  %4568 = vmatpush1.bf16.msra.mxu1 %v8998_v43  ;;  %v9082_v42 = vld [vmem:[%s11988_s1 + $0x5e0] ss:$16 sps:$4 sm:$0xff]   ;;  %v9085_v43 = vld [vmem:[%s11988_s1 + $0x5e8] ss:$16 sps:$4 sm:$0xff]  }
 0x208   :  { %4494 = vmatprep.subr.bf16.mxu0 %v9005_v45  ;;  %4580 = vmatprep.subr.bf16.mxu1 %v9008_v50  ;;  %v9090_v45 = vld [vmem:[%s11988_s1 + $0x604] ss:$16 sps:$4 sm:$0xff]   ;;  %v9093_v50 = vld [vmem:[%s11988_s1 + $0x60c] ss:$16 sps:$4 sm:$0xff]  }
 0x20a   :  { %4484 = vmatmul.mubr.bf16.vlgmr.msra.gmra.mrb[4].mxu0 %v7538_v51  ;;  %4570 = vmatmul.mubr.bf16.vlgmr.msra.gmra.mrb[4].mxu1 %v7538_v51  ;;  %v9088_v51 = vld [vmem:[%s11988_s1 + $0x600] ss:$16 sps:$4 sm:$0xff]  }
 0x20b   :  { %4495 = vmatpush1.bf16.msra.mxu0 %v9003_v47  ;;  %4581 = vmatpush1.bf16.msra.mxu1 %v9006_v44  ;;  %v9091_v47 = vld [vmem:[%s11988_s1 + $0x608] ss:$16 sps:$4 sm:$0xff]   ;;  %v9096_v44 = vld [vmem:[%s11988_s1 + $0x624] ss:$16 sps:$4 sm:$0xff]  }
 0x20c   :  { %4496 = vmatprep.subr.bf16.mxu0 %v9011_v11  ;;  %4582 = vmatprep.subr.bf16.mxu1 %v9014_v4  ;;  %v9099_v11 = vld [vmem:[%s11988_s1 + $0x62c] ss:$16 sps:$4 sm:$0xff]   ;;  %v9094_v4 = vld [vmem:[%s11988_s1 + $0x620] ss:$16 sps:$4 sm:$0xff]  }
 0x20d   :  { %4526 = vmatprep.mubr.bf16.mxu0 %v9352_v26  ;;  %4612 = vmatprep.mubr.bf16.mxu1 %v9352_v26 }
 0x20f   :  { %4497 = vmatpush1.bf16.msra.mxu0 %v9009_v39  ;;  %4583 = vmatpush1.bf16.msra.mxu1 %v9012_v55  ;;  %v9097_v39 = vld [vmem:[%s11988_s1 + $0x628] ss:$16 sps:$4 sm:$0xff]   ;;  %v9102_v55 = vld [vmem:[%s11988_s1 + $0x644] ss:$16 sps:$4 sm:$0xff]  }
 0x210   :  { %5073 = vmatprep.subr.bf16.mxu0 %v9017_v56  ;;  %5159 = vmatprep.subr.bf16.mxu1 %v9020_v57  ;;  %v9105_v56 = vld [vmem:[%s11988_s1 + $0x64c] ss:$16 sps:$4 sm:$0xff]   ;;  %v9100_v57 = vld [vmem:[%s11988_s1 + $0x640] ss:$16 sps:$4 sm:$0xff]  }
 0x216   :  { %7613 = vmatmul.mubr.msk.bf16.vlgmr.msra.gmra.mrb[4].mxu0 %vm562_vm0, %v7540_v62  ;;  %7614 = vmatmul.mubr.msk.bf16.vlgmr.msra.gmra.mrb[4].mxu1 %vm562_vm0, %v7540_v62  ;;  %v9111_v62 = vld [vmem:[%s11988_s1 + $0x66c] ss:$16 sps:$4 sm:$0xff]  }
 0x217   :  { %5074 = vmatpush1.bf16.msra.mxu0 %v9015_v63  ;;  %5160 = vmatpush1.bf16.msra.mxu1 %v9018_v0  ;;  %v11280_v63 = vld [vmem:[%s11989_s0 + $0x24] sm:$0xee]  ;;  %v11285_v0 = vld [vmem:[%s11989_s0 + $0x30] sm:$0xff] }
 0x218   :  { %5075 = vmatprep.subr.bf16.mxu0 %v9024_v52  ;;  %5161 = vmatprep.subr.bf16.mxu1 %v9027_v1  ;;  %v9351_v52 = vld [vmem:[%s11989_s0 + $0x30] sm:$0xff] }
 0x219   :  { %5105 = vmatprep.mubr.bf16.mxu0 %v4706_v2  ;;  %5191 = vmatprep.mubr.bf16.mxu1 %v4706_v2  ;;  %v7689_v1 = vcombine.low %v11087_v58, %v9351_v52  ;;  %v9106_v2 = vld [vmem:[%s11988_s1 + $0x660] ss:$16 sps:$4 sm:$0xff]   ;;  %v11304_v58 = vcombine.high %v11280_v63, %v11285_v0 }
 0x21b   :  { %5076 = vmatpush1.bf16.msra.mxu0 %v9022_v5  ;;  %5162 = vmatpush1.bf16.msra.mxu1 %v9025_v23  ;;  %v9109_v5 = vld [vmem:[%s11988_s1 + $0x668] ss:$16 sps:$4 sm:$0xff]   ;;  %v11300_v23 = vld [vmem:[%s11989_s0 + $0x3c] sm:$0x11] }
 0x21c   :  { %5077 = vmatprep.subr.bf16.mxu0 %v9030_v3  ;;  %5163 = vmatprep.subr.bf16.mxu1 %v9033_v6  ;;  %v9114_v3 = vld [vmem:[%s11988_s1 + $0x684] ss:$16 sps:$4 sm:$0xff]   ;;  %v9117_v6 = vld [vmem:[%s11988_s1 + $0x68c] ss:$16 sps:$4 sm:$0xff]  }
 0x21f   :  { %5078 = vmatpush1.bf16.msra.mxu0 %v9028_v7  ;;  %5164 = vmatpush1.bf16.msra.mxu1 %v9031_v8 }
 0x220   :  { %5079 = vmatprep.subr.bf16.mxu0 %v9036_v9  ;;  %5165 = vmatprep.subr.bf16.mxu1 %v9039_v10  ;;  %v4705_v9 = vrot.slane %v7689_v1, 1  ;;  %v9112_v10 = vld [vmem:[%s11988_s1 + $0x680] ss:$16 sps:$4 sm:$0xff]  }
 0x223   :  { %5080 = vmatpush1.bf16.msra.mxu0 %v9034_v12  ;;  %5166 = vmatpush1.bf16.msra.mxu1 %v9037_v48 }
 0x224   :  { %5081 = vmatprep.subr.bf16.mxu0 %v9042_v13  ;;  %5167 = vmatprep.subr.bf16.mxu1 %v9045_v49  ;;  %v9115_v49 = vld [vmem:[%s11988_s1 + $0x688] ss:$16 sps:$4 sm:$0xff]  }
 0x227   :  { %5082 = vmatpush1.bf16.msra.mxu0 %v9040_v14  ;;  %5168 = vmatpush1.bf16.msra.mxu1 %v9043_v15  ;;  %v11328_v14 = vcombine.high %v11300_v23, %v11300_v23 }
 0x228   :  { %5083 = vmatprep.subr.bf16.mxu0 %v9048_v16  ;;  %5169 = vmatprep.subr.bf16.mxu1 %v9051_v17 }
 0x22b   :  { %5084 = vmatpush1.bf16.msra.mxu0 %v9046_v18  ;;  %5170 = vmatpush1.bf16.msra.mxu1 %v9049_v19  ;;  %v9120_v19 = vld [vmem:[%s11988_s1 + $0x6a4] ss:$16 sps:$4 sm:$0xff]  }
 0x22c   :  { %5085 = vmatprep.subr.bf16.mxu0 %v9054_v20  ;;  %5171 = vmatprep.subr.bf16.mxu1 %v9057_v21  ;;  %v5366_v20 = vshrl.u32 %v11304_v58, 16  ;;  %v5369_v21 = vshll.u32 %v11304_v58, 16 }
 0x22f   :  { %5086 = vmatpush1.bf16.msra.mxu0 %v9052_v22  ;;  %5172 = vmatpush1.bf16.msra.mxu1 %v9055_v61 }
 0x230   :  { %5087 = vmatprep.subr.bf16.mxu0 %v9060_v53  ;;  %5173 = vmatprep.subr.bf16.mxu1 %v9063_v54 }
 0x233   :  { %5088 = vmatpush1.bf16.msra.mxu0 %v9058_v25  ;;  %5174 = vmatpush1.bf16.msra.mxu1 %v9061_v27 }
 0x234   :  { %5089 = vmatprep.subr.bf16.mxu0 %v9066_v28  ;;  %5175 = vmatprep.subr.bf16.mxu1 %v9069_v29  ;;  %v9123_v28 = vld [vmem:[%s11988_s1 + $0x6ac] ss:$16 sps:$4 sm:$0xff]  }
 0x237   :  { %5090 = vmatpush1.bf16.msra.mxu0 %v9064_v30  ;;  %5176 = vmatpush1.bf16.msra.mxu1 %v9067_v31 }
 0x238   :  { %5091 = vmatprep.subr.bf16.mxu0 %v9072_v33  ;;  %5177 = vmatprep.subr.bf16.mxu1 %v9075_v34 }
 0x23b   :  { %5092 = vmatpush1.bf16.msra.mxu0 %v9070_v35  ;;  %5178 = vmatpush1.bf16.msra.mxu1 %v9073_v36 }
 0x23c   :  { %5093 = vmatprep.subr.bf16.mxu0 %v9078_v37  ;;  %5179 = vmatprep.subr.bf16.mxu1 %v9081_v38  ;;  %v7616_v38 = vld [vmem:[%s11989_s0 + $0x2c] sm:$0xe] }
 0x23f   :  { %5094 = vmatpush1.bf16.msra.mxu0 %v9076_v32  ;;  %5180 = vmatpush1.bf16.msra.mxu1 %v9079_v46 }
 0x240   :  { %5095 = vmatprep.subr.bf16.mxu0 %v9084_v40  ;;  %5181 = vmatprep.subr.bf16.mxu1 %v9087_v41 }
 0x243   :  { %5096 = vmatpush1.bf16.msra.mxu0 %v9082_v42  ;;  %5182 = vmatpush1.bf16.msra.mxu1 %v9085_v43  ;;  %v9118_v42 = vld [vmem:[%s11988_s1 + $0x6a0] ss:$16 sps:$4 sm:$0xff]   ;;  %v9121_v43 = vld [vmem:[%s11988_s1 + $0x6a8] ss:$16 sps:$4 sm:$0xff]  }
 0x244   :  { %5097 = vmatprep.subr.bf16.mxu0 %v9090_v45  ;;  %5183 = vmatprep.subr.bf16.mxu1 %v9093_v50 }
 0x247   :  { %5098 = vmatpush1.bf16.msra.mxu0 %v9088_v51  ;;  %5184 = vmatpush1.bf16.msra.mxu1 %v9091_v47 }
 0x248   :  { %5099 = vmatprep.subr.bf16.mxu0 %v9096_v44  ;;  %5185 = vmatprep.subr.bf16.mxu1 %v9099_v11  ;;  %v9126_v44 = vld [vmem:[%s11988_s1 + $0x6c4] ss:$16 sps:$4 sm:$0xff]   ;;  %v9129_v11 = vld [vmem:[%s11988_s1 + $0x6cc] ss:$16 sps:$4 sm:$0xff]  }
 0x24b   :  { %5100 = vmatpush1.bf16.msra.mxu0 %v9094_v4  ;;  %5186 = vmatpush1.bf16.msra.mxu1 %v9097_v39 }
 0x24c   :  { %5101 = vmatprep.subr.bf16.mxu0 %v9102_v55  ;;  %5187 = vmatprep.subr.bf16.mxu1 %v9105_v56  ;;  %v7691_v55 = vcombine.low %v7616_v38, %v10819_v24  ;;  %v5368_v56 = vrot.slane %v5366_v20, 1  ;;  %v9147_v20 = vld [vmem:[%s11988_s1 + $0x72c] ss:$16 sps:$4 sm:$0xff]   ;;  %v9168_v38 = vld [vmem:[%s11988_s1 + $0x7a4] ss:$16 sps:$4 sm:$0xff]  }
 0x24e   :  { %v4707_v58 = vrot.slane %v7691_v55, 1  ;;  %v9178_v55 = vld [vmem:[%s11988_s1 + $0x7e0] ss:$16 sps:$4 sm:$0xff]  }
 0x24f   :  { %5102 = vmatpush1.bf16.msra.mxu0 %v9100_v57  ;;  %5188 = vmatpush1.bf16.msra.mxu1 %v9103_v59 }
 0x250   :  { %5103 = vmatprep.subr.bf16.mxu0 %v9108_v60  ;;  %5189 = vmatprep.subr.bf16.mxu1 %v9111_v62  ;;  %v5371_v60 = vrot.slane %v5369_v21, 2  ;;  %v5374_v62 = vshll.u32 %v11328_v14, 16  ;;  %v9142_v21 = vld [vmem:[%s11988_s1 + $0x720] ss:$16 sps:$4 sm:$0xff]  }
 0x251   :  { %v3134_v7 = vpop.f32.mrb[0].mxu0  ;;  %v3220_v8 = vpop.f32.mrb[0].mxu1 }
 0x252   :  { %v3136_v12 = vpop.f32.mrb[1].mxu0  ;;  %v11315_v48 = vpop.f32.mrb[1].mxu1  ;;  %v3311_v22 = vmul.f32 %v3134_v7, %v3134_v7  ;;  %v3313_v34 = vmul.f32 %v3220_v8, %v3220_v8 }
 0x253   :  { %5104 = vmatpush1.bf16.msra.mxu0 %v9106_v2  ;;  %5190 = vmatpush1.bf16.msra.mxu1 %v9109_v5  ;;  %v8083_v15 = vpack.c.bf16 %v3136_v12, %v3134_v7  ;;  %v8084_v16 = vpack.c.bf16 %v11315_v48, %v3220_v8  ;;  %v3138_v17 = vpop.f32.mrb[2].mxu0  ;;  %v3224_v18 = vpop.f32.mrb[2].mxu1  ;;  %v3312_v32 = vmul.f32 %v3136_v12, %v3136_v12  ;;  %v3297_v52 = vsel %vm3296_vm5, %v11315_v48, 0.0 }
 0x254   :  { %v3272_v61 = vsel %vm2682_vm2, %v3138_v17, 0.0  ;;  %v3315_v53 = vmul.f32 %v3138_v17, %v3138_v17  ;;  %v3288_v54 = vsel %vm2682_vm2, %v3224_v18, 0.0  ;;  %5116 = vmatprep.subr.bf16.mxu0 %v9114_v3  ;;  %5202 = vmatprep.subr.bf16.mxu1 %v9117_v6  ;;  %v3140_v25 = vpop.f32.mrb[3].mxu0  ;;  %v3226_v27 = vpop.f32.mrb[3].mxu1  ;;  %v3317_v31 = vmul.f32 %v3224_v18, %v3224_v18 }
 0x255   :  { %3261 = vst [vmem:[%s11990_s2] sm:$0xff] %v8083_v15  ;;  %3265 = vst.msk [vmem:[%s11990_s2 + $0x8] sm:$0xff] %vm11319_vm6, %v8084_v16  ;;  %v11349_v29 = vadd.f32 %v3272_v61, %v3134_v7  ;;  %v11351_v30 = vadd.f32 %v3288_v54, %v3220_v8  ;;  %v8085_v33 = vpack.c.bf16 %v3140_v25, %v3138_v17  ;;  %v3280_v36 = vsel %vm2682_vm2, %v3140_v25, 0.0  ;;  %v9124_v7 = vld [vmem:[%s11988_s1 + $0x6c0] ss:$16 sps:$4 sm:$0xff]   ;;  %v9127_v8 = vld [vmem:[%s11988_s1 + $0x6c8] ss:$16 sps:$4 sm:$0xff]  }
 0x256   :  { %v3319_v35 = vsel %vm2682_vm2, %v3315_v53, 0.0  ;;  %5106 = vmatmul.mubr.bf16.vlgmr.msra.gmra.mrb[4].mxu0 %v4705_v9  ;;  %5192 = vmatmul.mubr.bf16.vlgmr.msra.gmra.mrb[4].mxu1 %v4705_v9  ;;  %v3316_v37 = vmul.f32 %v3140_v25, %v3140_v25  ;;  %v3335_v40 = vsel %vm2682_vm2, %v3317_v31, 0.0  ;;  %v11378_v50 = vadd.f32 %v3280_v36, %v3136_v12  ;;  %v9132_v9 = vld [vmem:[%s11988_s1 + $0x6e4] ss:$16 sps:$4 sm:$0xff]   ;;  %v9141_v16 = vld [vmem:[%s11988_s1 + $0x70c] ss:$16 sps:$4 sm:$0xff]  }
 0x257   :  { %v11358_v46 = vadd.f32 %v3319_v35, %v3311_v22  ;;  %3266 = vst [vmem:[%s11990_s2 + $0x10] sm:$0x77] %v8085_v33  ;;  %5117 = vmatpush1.bf16.msra.mxu0 %v9112_v10  ;;  %5203 = vmatpush1.bf16.msra.mxu1 %v9115_v49  ;;  %v11376_v45 = vadd.f32 %v3335_v40, %v3313_v34  ;;  %v3299_v57 = vsel %vm3298_vm10, %v3226_v27, 0.0  ;;  %v5376_v6 = vrot.slane %v5374_v62, 2  ;;  %v9135_v10 = vld [vmem:[%s11988_s1 + $0x6ec] ss:$16 sps:$4 sm:$0xff]  }
 0x258   :  { %v3327_v51 = vsel %vm2682_vm2, %v3316_v37, 0.0  ;;  %v8086_v47 = vpack.c.bf16 %v3226_v27, %v3224_v18  ;;  %5118 = vmatprep.subr.bf16.mxu0 %v9120_v19  ;;  %5204 = vmatprep.subr.bf16.mxu1 %v9123_v28  ;;  %v3314_v4 = vmul.f32 %v11315_v48, %v11315_v48  ;;  %v3318_v59 = vmul.f32 %v3226_v27, %v3226_v27  ;;  %v9130_v48 = vld [vmem:[%s11988_s1 + $0x6e0] ss:$16 sps:$4 sm:$0xff]   ;;  %v9133_v49 = vld [vmem:[%s11988_s1 + $0x6e8] ss:$16 sps:$4 sm:$0xff]  }
 0x259   :  { %v11389_v39 = vadd.f32 %v3327_v51, %v3312_v32  ;;  %5148 = vmatprep.mubr.bf16.mxu0 %v9352_v26  ;;  %5234 = vmatprep.mubr.bf16.mxu1 %v9352_v26  ;;  %v11403_v1 = vadd.f32 %v3299_v57, %v3297_v52  ;;  %v5372_v3 = vor.u32 %v5371_v60, %v5368_v56  ;;  %v9138_v15 = vld [vmem:[%s11988_s1 + $0x704] ss:$16 sps:$4 sm:$0xff]   ;;  %v9136_v17 = vld [vmem:[%s11988_s1 + $0x700] ss:$16 sps:$4 sm:$0xff]   ;;  %v9139_v18 = vld [vmem:[%s11988_s1 + $0x708] ss:$16 sps:$4 sm:$0xff]  }
 0x25a   :  { %3270 = vst.msk [vmem:[%s11990_s2 + $0x18] sm:$0x77] %vm11366_vm9, %v8086_v47  ;;  %v3344_v24 = vsel %vm3298_vm10, %v3318_v59, 0.0  ;;  %v3343_v2 = vsel %vm3296_vm5, %v3314_v4, 0.0  ;;  %v9144_v19 = vld [vmem:[%s11988_s1 + $0x724] ss:$16 sps:$4 sm:$0xff]  }
 0x25b   :  { %5119 = vmatpush1.bf16.msra.mxu0 %v9118_v42  ;;  %5205 = vmatpush1.bf16.msra.mxu1 %v9121_v43  ;;  %v11407_v5 = vadd.f32 %v3344_v24, %v3343_v2  ;;  %v5377_v12 = vsel %vm2014_vm1, %v5372_v3, %v5376_v6  ;;  %v9145_v22 = vld [vmem:[%s11988_s1 + $0x728] ss:$16 sps:$4 sm:$0xff]   ;;  %v9150_v61 = vld [vmem:[%s11988_s1 + $0x744] ss:$16 sps:$4 sm:$0xff]   ;;  %v9153_v53 = vld [vmem:[%s11988_s1 + $0x74c] ss:$16 sps:$4 sm:$0xff]  }
 0x25c   :  { %5756 = vmatprep.subr.bf16.mxu0 %v9126_v44  ;;  %5842 = vmatprep.subr.bf16.mxu1 %v9129_v11  ;;  %v9148_v54 = vld [vmem:[%s11988_s1 + $0x740] ss:$16 sps:$4 sm:$0xff]   ;;  %v9151_v25 = vld [vmem:[%s11988_s1 + $0x748] ss:$16 sps:$4 sm:$0xff]   ;;  %v9156_v27 = vld [vmem:[%s11988_s1 + $0x764] ss:$16 sps:$4 sm:$0xff]  }
 0x25d   :  { %v9159_v28 = vld [vmem:[%s11988_s1 + $0x76c] ss:$16 sps:$4 sm:$0xff]   ;;  %v9154_v31 = vld [vmem:[%s11988_s1 + $0x760] ss:$16 sps:$4 sm:$0xff]   ;;  %v9157_v33 = vld [vmem:[%s11988_s1 + $0x768] ss:$16 sps:$4 sm:$0xff]  }
 0x25e   :  { %v9162_v34 = vld [vmem:[%s11988_s1 + $0x784] ss:$16 sps:$4 sm:$0xff]   ;;  %v9165_v35 = vld [vmem:[%s11988_s1 + $0x78c] ss:$16 sps:$4 sm:$0xff]   ;;  %v9160_v36 = vld [vmem:[%s11988_s1 + $0x780] ss:$16 sps:$4 sm:$0xff]  }
 0x25f   :  { %v9163_v37 = vld [vmem:[%s11988_s1 + $0x788] ss:$16 sps:$4 sm:$0xff]   ;;  %v9171_v32 = vld [vmem:[%s11988_s1 + $0x7ac] ss:$16 sps:$4 sm:$0xff]   ;;  %v9166_v40 = vld [vmem:[%s11988_s1 + $0x7a0] ss:$16 sps:$4 sm:$0xff]  }
 0x260   :  { %v9169_v42 = vld [vmem:[%s11988_s1 + $0x7a8] ss:$16 sps:$4 sm:$0xff]   ;;  %v9174_v43 = vld [vmem:[%s11988_s1 + $0x7c4] ss:$16 sps:$4 sm:$0xff]   ;;  %v9177_v51 = vld [vmem:[%s11988_s1 + $0x7cc] ss:$16 sps:$4 sm:$0xff]  }
 0x261   :  { %v9172_v47 = vld [vmem:[%s11988_s1 + $0x7c0] ss:$16 sps:$4 sm:$0xff]   ;;  %v9175_v44 = vld [vmem:[%s11988_s1 + $0x7c8] ss:$16 sps:$4 sm:$0xff]   ;;  %v9180_v11 = vld [vmem:[%s11988_s1 + $0x7e4] ss:$16 sps:$4 sm:$0xff]  }
 0x262   :  { %7764 = vmatmul.mubr.msk.bf16.vlgmr.msra.gmra.mrb[4].mxu0 %vm562_vm0, %v4707_v58  ;;  %7765 = vmatmul.mubr.msk.bf16.vlgmr.msra.gmra.mrb[4].mxu1 %vm562_vm0, %v4707_v58  ;;  %v9183_v4 = vld [vmem:[%s11988_s1 + $0x7ec] ss:$16 sps:$4 sm:$0xff]   ;;  %v9181_v56 = vld [vmem:[%s11988_s1 + $0x7e8] ss:$16 sps:$4 sm:$0xff]   ;;  %v9186_v57 = vld [vmem:[%s11988_s1 + $0x804] ss:$16 sps:$4 sm:$0xff]  }
 0x263   :  { %5757 = vmatpush1.bf16.msra.mxu0 %v9124_v7  ;;  %5843 = vmatpush1.bf16.msra.mxu1 %v9127_v8  ;;  %v9189_v59 = vld [vmem:[%s11988_s1 + $0x80c] ss:$16 sps:$4 sm:$0xff]   ;;  %v9184_v60 = vld [vmem:[%s11988_s1 + $0x800] ss:$16 sps:$4 sm:$0xff]   ;;  %v9187_v62 = vld [vmem:[%s11988_s1 + $0x808] ss:$16 sps:$4 sm:$0xff]  }
 0x264   :  { %5758 = vmatprep.subr.bf16.mxu0 %v9132_v9  ;;  %5844 = vmatprep.subr.bf16.mxu1 %v9135_v10  ;;  %v9192_v52 = vld [vmem:[%s11988_s1 + $0x824] ss:$16 sps:$4 sm:$0xff]   ;;  %v9195_v24 = vld [vmem:[%s11988_s1 + $0x82c] ss:$16 sps:$4 sm:$0xff]   ;;  %v9190_v2 = vld [vmem:[%s11988_s1 + $0x820] ss:$16 sps:$4 sm:$0xff]   ;;  %v7844_v9 = vcombine.low %v11280_v63, %v11285_v0 }
 0x265   :  { %5788 = vmatprep.mubr.bf16.mxu0 %v5377_v12  ;;  %5874 = vmatprep.mubr.bf16.mxu1 %v5377_v12  ;;  %v9193_v58 = vld [vmem:[%s11988_s1 + $0x828] ss:$16 sps:$4 sm:$0xff]   ;;  %v9198_v3 = vld [vmem:[%s11988_s1 + $0x844] ss:$16 sps:$4 sm:$0xff]   ;;  %v9201_v6 = vld [vmem:[%s11988_s1 + $0x84c] ss:$16 sps:$4 sm:$0xff]  }
 0x266   :  { %v9196_v7 = vld [vmem:[%s11988_s1 + $0x840] ss:$16 sps:$4 sm:$0xff]   ;;  %v9199_v8 = vld [vmem:[%s11988_s1 + $0x848] ss:$16 sps:$4 sm:$0xff]   ;;  %v9204_v10 = vld [vmem:[%s11988_s1 + $0x864] ss:$16 sps:$4 sm:$0xff]  }
 0x267   :  { %5759 = vmatpush1.bf16.msra.mxu0 %v9130_v48  ;;  %5845 = vmatpush1.bf16.msra.mxu1 %v9133_v49  ;;  %v9207_v12 = vld [vmem:[%s11988_s1 + $0x86c] ss:$16 sps:$4 sm:$0xff]   ;;  %v9202_v48 = vld [vmem:[%s11988_s1 + $0x860] ss:$16 sps:$4 sm:$0xff]   ;;  %v9205_v63 = vld [vmem:[%s11988_s1 + $0x868] ss:$16 sps:$4 sm:$0xff]   ;;  %v11578_v49 = vcombine.low %v11300_v23, %v11300_v23 }
 0x268   :  { %5760 = vmatprep.subr.bf16.mxu0 %v9138_v15  ;;  %5846 = vmatprep.subr.bf16.mxu1 %v9141_v16  ;;  %v5353_v15 = vshrl.u32 %v7844_v9, 16  ;;  %v5356_v16 = vshll.u32 %v7844_v9, 16  ;;  %v9211_v23 = vld [vmem:[%s11988_s1 + $0x888] ss:$16 sps:$4 sm:$0xff]   ;;  %v9249_v9 = vld [vmem:[%s11988_s1 + $0x92c] ss:$16 sps:$4 sm:$0xff]  }
 0x26b   :  { %5761 = vmatpush1.bf16.msra.mxu0 %v9136_v17  ;;  %5847 = vmatpush1.bf16.msra.mxu1 %v9139_v18  ;;  %v9210_v17 = vld [vmem:[%s11988_s1 + $0x884] ss:$16 sps:$4 sm:$0xff]   ;;  %v9213_v18 = vld [vmem:[%s11988_s1 + $0x88c] ss:$16 sps:$4 sm:$0xff]  }
 0x26c   :  { %5762 = vmatprep.subr.bf16.mxu0 %v9144_v19  ;;  %5848 = vmatprep.subr.bf16.mxu1 %v9147_v20  ;;  %v9208_v19 = vld [vmem:[%s11988_s1 + $0x880] ss:$16 sps:$4 sm:$0xff]   ;;  %v9216_v20 = vld [vmem:[%s11988_s1 + $0x8a4] ss:$16 sps:$4 sm:$0xff]  }
 0x26f   :  { %5763 = vmatpush1.bf16.msra.mxu0 %v9142_v21  ;;  %5849 = vmatpush1.bf16.msra.mxu1 %v9145_v22  ;;  %v5355_v21 = vrot.slane %v5353_v15, 1  ;;  %v5358_v22 = vrot.slane %v5356_v16, 2  ;;  %v9250_v15 = vld [vmem:[%s11988_s1 + $0x940] ss:$16 sps:$4 sm:$0xff]   ;;  %v9253_v16 = vld [vmem:[%s11988_s1 + $0x948] ss:$16 sps:$4 sm:$0xff]  }
 0x270   :  { %5764 = vmatprep.subr.bf16.mxu0 %v9150_v61  ;;  %5850 = vmatprep.subr.bf16.mxu1 %v9153_v53  ;;  %v5361_v61 = vshll.u32 %v11578_v49, 16  ;;  %v9219_v53 = vld [vmem:[%s11988_s1 + $0x8ac] ss:$16 sps:$4 sm:$0xff]  }
 0x273   :  { %5765 = vmatpush1.bf16.msra.mxu0 %v9148_v54  ;;  %5851 = vmatpush1.bf16.msra.mxu1 %v9151_v25  ;;  %v7767_v54 = vld [vmem:[%s11989_s0 + $0x2c] sm:$0xe]  ;;  %v11605_v25 = vld [vmem:[%s11989_s0 + $0x38] sm:$0xf] }
 0x274   :  { %5766 = vmatprep.subr.bf16.mxu0 %v9156_v27  ;;  %5852 = vmatprep.subr.bf16.mxu1 %v9159_v28  ;;  %v9214_v27 = vld [vmem:[%s11988_s1 + $0x8a0] ss:$16 sps:$4 sm:$0xff]   ;;  %v9217_v28 = vld [vmem:[%s11988_s1 + $0x8a8] ss:$16 sps:$4 sm:$0xff]  }
 0x277   :  { %5767 = vmatpush1.bf16.msra.mxu0 %v9154_v31  ;;  %5853 = vmatpush1.bf16.msra.mxu1 %v9157_v33  ;;  %v5359_v31 = vor.u32 %v5358_v22, %v5355_v21  ;;  %v5363_v33 = vrot.slane %v5361_v61, 2  ;;  %v9267_v21 = vld [vmem:[%s11988_s1 + $0x98c] ss:$16 sps:$4 sm:$0xff]   ;;  %v9262_v22 = vld [vmem:[%s11988_s1 + $0x980] ss:$16 sps:$4 sm:$0xff]  }
 0x278   :  { %5768 = vmatprep.subr.bf16.mxu0 %v9162_v34  ;;  %5854 = vmatprep.subr.bf16.mxu1 %v9165_v35  ;;  %v7846_v34 = vcombine.low %v7767_v54, %v11605_v25  ;;  %v9226_v35 = vld [vmem:[%s11988_s1 + $0x8c4] ss:$16 sps:$4 sm:$0xff]   ;;  %v9265_v61 = vld [vmem:[%s11988_s1 + $0x988] ss:$16 sps:$4 sm:$0xff]   ;;  %v9273_v54 = vld [vmem:[%s11988_s1 + $0x9ac] ss:$16 sps:$4 sm:$0xff]  }
 0x27b   :  { %5769 = vmatpush1.bf16.msra.mxu0 %v9160_v36  ;;  %5855 = vmatpush1.bf16.msra.mxu1 %v9163_v37  ;;  %v9229_v36 = vld [vmem:[%s11988_s1 + $0x8cc] ss:$16 sps:$4 sm:$0xff]   ;;  %v9224_v37 = vld [vmem:[%s11988_s1 + $0x8c0] ss:$16 sps:$4 sm:$0xff]  }
 0x27c   :  { %5770 = vmatprep.subr.bf16.mxu0 %v9168_v38  ;;  %5856 = vmatprep.subr.bf16.mxu1 %v9171_v32  ;;  %v9227_v38 = vld [vmem:[%s11988_s1 + $0x8c8] ss:$16 sps:$4 sm:$0xff]   ;;  %v5364_v32 = vsel %vm2014_vm1, %v5359_v31, %v5363_v33  ;;  %v9276_v31 = vld [vmem:[%s11988_s1 + $0x9c4] ss:$16 sps:$4 sm:$0xff]   ;;  %v9279_v33 = vld [vmem:[%s11988_s1 + $0x9cc] ss:$16 sps:$4 sm:$0xff]  }
 0x27f   :  { %5771 = vmatpush1.bf16.msra.mxu0 %v9166_v40  ;;  %5857 = vmatpush1.bf16.msra.mxu1 %v9169_v42  ;;  %v11630_v40 = vld [vmem:[%s11989_s0 + $0x44] ss:$0 sps:$4 sm:$0x11]   ;;  %v5379_v42 = vshrl.u32 %v7846_v34, 16 }
 0x280   :  { %5772 = vmatprep.subr.bf16.mxu0 %v9174_v43  ;;  %5858 = vmatprep.subr.bf16.mxu1 %v9177_v51  ;;  %v5382_v43 = vshll.u32 %v7846_v34, 16  ;;  %v9232_v51 = vld [vmem:[%s11988_s1 + $0x8e4] ss:$16 sps:$4 sm:$0xff]   ;;  %v9274_v34 = vld [vmem:[%s11988_s1 + $0x9c0] ss:$16 sps:$4 sm:$0xff]  }
 0x283   :  { %5773 = vmatpush1.bf16.msra.mxu0 %v9172_v47  ;;  %5859 = vmatpush1.bf16.msra.mxu1 %v9175_v44  ;;  %v9235_v47 = vld [vmem:[%s11988_s1 + $0x8ec] ss:$16 sps:$4 sm:$0xff]   ;;  %v9230_v44 = vld [vmem:[%s11988_s1 + $0x8e0] ss:$16 sps:$4 sm:$0xff]  }
 0x284   :  { %5774 = vmatprep.subr.bf16.mxu0 %v9180_v11  ;;  %5860 = vmatprep.subr.bf16.mxu1 %v9183_v4  ;;  %v9233_v11 = vld [vmem:[%s11988_s1 + $0x8e8] ss:$16 sps:$4 sm:$0xff]   ;;  %v5381_v4 = vrot.slane %v5379_v42, 1  ;;  %v9288_v42 = vld [vmem:[%s11988_s1 + $0xa04] ss:$16 sps:$4 sm:$0xff]  }
 0x287   :  { %5775 = vmatpush1.bf16.msra.mxu0 %v9178_v55  ;;  %5861 = vmatpush1.bf16.msra.mxu1 %v9181_v56  ;;  %v5384_v55 = vrot.slane %v5382_v43, 2  ;;  %v5387_v56 = vshll.u32 %v11630_v40, 16  ;;  %v9291_v43 = vld [vmem:[%s11988_s1 + $0xa0c] ss:$16 sps:$4 sm:$0xff]  }
 0x288   :  { %5776 = vmatprep.subr.bf16.mxu0 %v9186_v57  ;;  %5862 = vmatprep.subr.bf16.mxu1 %v9189_v59  ;;  %v11648_v57 = vld [vmem:[%s11989_s0 + $0x24] sm:$0xcc] }
 0x289   :  { %v9238_v59 = vld [vmem:[%s11988_s1 + $0x904] ss:$16 sps:$4 sm:$0xff]  }
 0x28b   :  { %5777 = vmatpush1.bf16.msra.mxu0 %v9184_v60  ;;  %5863 = vmatpush1.bf16.msra.mxu1 %v9187_v62  ;;  %v9241_v60 = vld [vmem:[%s11988_s1 + $0x90c] ss:$16 sps:$4 sm:$0xff]   ;;  %v7999_v62 = vcombine.high %v11648_v57, %v11285_v0 }
 0x28c   :  { %5778 = vmatprep.subr.bf16.mxu0 %v9192_v52  ;;  %5864 = vmatprep.subr.bf16.mxu1 %v9195_v24  ;;  %v5385_v52 = vor.u32 %v5384_v55, %v5381_v4  ;;  %v5389_v24 = vrot.slane %v5387_v56, 2  ;;  %v9292_v4 = vld [vmem:[%s11988_s1 + $0xa20] ss:$16 sps:$4 sm:$0xff]   ;;  %v9295_v55 = vld [vmem:[%s11988_s1 + $0xa28] ss:$16 sps:$4 sm:$0xff]  }
 0x28d   :  { %v9300_v56 = vld [vmem:[%s11988_s1 + $0xa44] ss:$16 sps:$4 sm:$0xff]  }
 0x28f   :  { %5779 = vmatpush1.bf16.msra.mxu0 %v9190_v2  ;;  %5865 = vmatpush1.bf16.msra.mxu1 %v9193_v58  ;;  %v6021_v2 = vrot.slane %v7999_v62, 2  ;;  %v6022_v58 = vrot.slane %v11328_v14, 2  ;;  %v9301_v62 = vld [vmem:[%s11988_s1 + $0xa48] ss:$16 sps:$4 sm:$0xff]  }
 0x290   :  { %5780 = vmatprep.subr.bf16.mxu0 %v9198_v3  ;;  %5866 = vmatprep.subr.bf16.mxu1 %v9201_v6  ;;  %v9236_v3 = vld [vmem:[%s11988_s1 + $0x900] ss:$16 sps:$4 sm:$0xff]   ;;  %v9239_v6 = vld [vmem:[%s11988_s1 + $0x908] ss:$16 sps:$4 sm:$0xff]  }
 0x291   :  { %v6023_v14 = vsel %vm2682_vm2, %v6021_v2, %v6022_v58  ;;  %v9304_v2 = vld [vmem:[%s11988_s1 + $0xa60] ss:$16 sps:$4 sm:$0xff]   ;;  %v9307_v58 = vld [vmem:[%s11988_s1 + $0xa68] ss:$16 sps:$4 sm:$0xff]  }
 0x293   :  { %5781 = vmatpush1.bf16.msra.mxu0 %v9196_v7  ;;  %5867 = vmatpush1.bf16.msra.mxu1 %v9199_v8  ;;  %v5390_v7 = vsel %vm2014_vm1, %v5385_v52, %v5389_v24  ;;  %v9246_v8 = vld [vmem:[%s11988_s1 + $0x924] ss:$16 sps:$4 sm:$0xff]   ;;  %v9309_v24 = vld [vmem:[%s11988_s1 + $0xa6c] ss:$16 sps:$4 sm:$0xff]  }
 0x294   :  { %5782 = vmatprep.subr.bf16.mxu0 %v9204_v10  ;;  %5868 = vmatprep.subr.bf16.mxu1 %v9207_v12  ;;  %v9244_v10 = vld [vmem:[%s11988_s1 + $0x920] ss:$16 sps:$4 sm:$0xff]   ;;  %v9247_v12 = vld [vmem:[%s11988_s1 + $0x928] ss:$16 sps:$4 sm:$0xff]   ;;  %v9306_v52 = vld [vmem:[%s11988_s1 + $0xa64] ss:$16 sps:$4 sm:$0xff]  }
 0x297   :  { %5783 = vmatpush1.bf16.msra.mxu0 %v9202_v48  ;;  %5869 = vmatpush1.bf16.msra.mxu1 %v9205_v63  ;;  %v9252_v48 = vld [vmem:[%s11988_s1 + $0x944] ss:$16 sps:$4 sm:$0xff]   ;;  %v9255_v63 = vld [vmem:[%s11988_s1 + $0x94c] ss:$16 sps:$4 sm:$0xff]  }
 0x298   :  { %5784 = vmatprep.subr.bf16.mxu0 %v9210_v17  ;;  %5870 = vmatprep.subr.bf16.mxu1 %v9213_v18  ;;  %v9258_v17 = vld [vmem:[%s11988_s1 + $0x964] ss:$16 sps:$4 sm:$0xff]   ;;  %v9261_v18 = vld [vmem:[%s11988_s1 + $0x96c] ss:$16 sps:$4 sm:$0xff]  }
 0x29b   :  { %5785 = vmatpush1.bf16.msra.mxu0 %v9208_v19  ;;  %5871 = vmatpush1.bf16.msra.mxu1 %v9211_v23  ;;  %v9256_v19 = vld [vmem:[%s11988_s1 + $0x960] ss:$16 sps:$4 sm:$0xff]   ;;  %v9259_v23 = vld [vmem:[%s11988_s1 + $0x968] ss:$16 sps:$4 sm:$0xff]  }
 0x29c   :  { %5786 = vmatprep.subr.bf16.mxu0 %v9216_v20  ;;  %5872 = vmatprep.subr.bf16.mxu1 %v9219_v53  ;;  %v9264_v20 = vld [vmem:[%s11988_s1 + $0x984] ss:$16 sps:$4 sm:$0xff]  }
 0x29d   :  { %v9270_v53 = vld [vmem:[%s11988_s1 + $0x9a4] ss:$16 sps:$4 sm:$0xff]  }
 0x29f   :  { %5787 = vmatpush1.bf16.msra.mxu0 %v9214_v27  ;;  %5873 = vmatpush1.bf16.msra.mxu1 %v9217_v28  ;;  %v9268_v27 = vld [vmem:[%s11988_s1 + $0x9a0] ss:$16 sps:$4 sm:$0xff]   ;;  %v9271_v28 = vld [vmem:[%s11988_s1 + $0x9a8] ss:$16 sps:$4 sm:$0xff]  }
 0x2a0   :  { %5799 = vmatprep.subr.bf16.mxu0 %v9226_v35  ;;  %5885 = vmatprep.subr.bf16.mxu1 %v9229_v36  ;;  %v9277_v35 = vld [vmem:[%s11988_s1 + $0x9c8] ss:$16 sps:$4 sm:$0xff]   ;;  %v9282_v36 = vld [vmem:[%s11988_s1 + $0x9e4] ss:$16 sps:$4 sm:$0xff]  }
 0x2a2   :  { %5789 = vmatmul.mubr.bf16.vlgmr.msra.gmra.mrb[4].mxu0 %v5364_v32  ;;  %5875 = vmatmul.mubr.bf16.vlgmr.msra.gmra.mrb[4].mxu1 %v5364_v32  ;;  %v9283_v32 = vld [vmem:[%s11988_s1 + $0x9e8] ss:$16 sps:$4 sm:$0xff]  }
 0x2a3   :  { %5800 = vmatpush1.bf16.msra.mxu0 %v9224_v37  ;;  %5886 = vmatpush1.bf16.msra.mxu1 %v9227_v38  ;;  %v9285_v37 = vld [vmem:[%s11988_s1 + $0x9ec] ss:$16 sps:$4 sm:$0xff]   ;;  %v9280_v38 = vld [vmem:[%s11988_s1 + $0x9e0] ss:$16 sps:$4 sm:$0xff]  }
 0x2a4   :  { %5801 = vmatprep.subr.bf16.mxu0 %v9232_v51  ;;  %5887 = vmatprep.subr.bf16.mxu1 %v9235_v47  ;;  %v9286_v51 = vld [vmem:[%s11988_s1 + $0xa00] ss:$16 sps:$4 sm:$0xff]   ;;  %v9289_v47 = vld [vmem:[%s11988_s1 + $0xa08] ss:$16 sps:$4 sm:$0xff]  }
 0x2a5   :  { %5831 = vmatprep.mubr.bf16.mxu0 %v9352_v26  ;;  %5917 = vmatprep.mubr.bf16.mxu1 %v9352_v26 }
 0x2a7   :  { %5802 = vmatpush1.bf16.msra.mxu0 %v9230_v44  ;;  %5888 = vmatpush1.bf16.msra.mxu1 %v9233_v11  ;;  %v9294_v44 = vld [vmem:[%s11988_s1 + $0xa24] ss:$16 sps:$4 sm:$0xff]   ;;  %v9297_v11 = vld [vmem:[%s11988_s1 + $0xa2c] ss:$16 sps:$4 sm:$0xff]  }
 0x2a8   :  { %6392 = vmatprep.subr.bf16.mxu0 %v9238_v59  ;;  %6478 = vmatprep.subr.bf16.mxu1 %v9241_v60  ;;  %v9303_v59 = vld [vmem:[%s11988_s1 + $0xa4c] ss:$16 sps:$4 sm:$0xff]   ;;  %v9298_v60 = vld [vmem:[%s11988_s1 + $0xa40] ss:$16 sps:$4 sm:$0xff]  }
 0x2ae   :  { %7922 = vmatmul.mubr.msk.bf16.vlgmr.msra.gmra.mrb[4].mxu0 %vm562_vm0, %v5390_v7  ;;  %7923 = vmatmul.mubr.msk.bf16.vlgmr.msra.gmra.mrb[4].mxu1 %vm562_vm0, %v5390_v7  ;;  %v9310_v7 = vld [vmem:[%s11988_s1 + $0xa80] ss:$16 sps:$4 sm:$0xff]  }
 0x2af   :  { %6393 = vmatpush1.bf16.msra.mxu0 %v9236_v3  ;;  %6479 = vmatpush1.bf16.msra.mxu1 %v9239_v6  ;;  %v9312_v3 = vld [vmem:[%s11988_s1 + $0xa84] ss:$16 sps:$4 sm:$0xff]   ;;  %v9315_v6 = vld [vmem:[%s11988_s1 + $0xa8c] ss:$16 sps:$4 sm:$0xff]  }
 0x2b0   :  { %6394 = vmatprep.subr.bf16.mxu0 %v9246_v8  ;;  %6480 = vmatprep.subr.bf16.mxu1 %v9249_v9  ;;  %v9313_v8 = vld [vmem:[%s11988_s1 + $0xa88] ss:$16 sps:$4 sm:$0xff]   ;;  %v9318_v9 = vld [vmem:[%s11988_s1 + $0xaa4] ss:$16 sps:$4 sm:$0xff]  }
 0x2b1   :  { %6424 = vmatprep.mubr.bf16.mxu0 %v6023_v14  ;;  %6510 = vmatprep.mubr.bf16.mxu1 %v6023_v14  ;;  %v9321_v14 = vld [vmem:[%s11988_s1 + $0xaac] ss:$16 sps:$4 sm:$0xff]  }
 0x2b3   :  { %6395 = vmatpush1.bf16.msra.mxu0 %v9244_v10  ;;  %6481 = vmatpush1.bf16.msra.mxu1 %v9247_v12  ;;  %v9316_v10 = vld [vmem:[%s11988_s1 + $0xaa0] ss:$16 sps:$4 sm:$0xff]   ;;  %v9319_v12 = vld [vmem:[%s11988_s1 + $0xaa8] ss:$16 sps:$4 sm:$0xff]  }
 0x2b4   :  { %6396 = vmatprep.subr.bf16.mxu0 %v9252_v48  ;;  %6482 = vmatprep.subr.bf16.mxu1 %v9255_v63  ;;  %v9324_v48 = vld [vmem:[%s11988_s1 + $0xac4] ss:$16 sps:$4 sm:$0xff]   ;;  %v9327_v63 = vld [vmem:[%s11988_s1 + $0xacc] ss:$16 sps:$4 sm:$0xff]  }
 0x2b7   :  { %6397 = vmatpush1.bf16.msra.mxu0 %v9250_v15  ;;  %6483 = vmatpush1.bf16.msra.mxu1 %v9253_v16  ;;  %v9322_v15 = vld [vmem:[%s11988_s1 + $0xac0] ss:$16 sps:$4 sm:$0xff]   ;;  %v9325_v16 = vld [vmem:[%s11988_s1 + $0xac8] ss:$16 sps:$4 sm:$0xff]  }
 0x2b8   :  { %6398 = vmatprep.subr.bf16.mxu0 %v9258_v17  ;;  %6484 = vmatprep.subr.bf16.mxu1 %v9261_v18  ;;  %v7998_v17 = vcombine.low %v11648_v57, %v11285_v0  ;;  %v9330_v18 = vld [vmem:[%s11988_s1 + $0xae4] ss:$16 sps:$4 sm:$0xff]   ;;  %v9331_v0 = vld [vmem:[%s11988_s1 + $0xae8] ss:$16 sps:$4 sm:$0xff]  }
 0x2ba   :  { %v6018_v57 = vrot.slane %v7998_v17, 2 }
 0x2bb   :  { %6399 = vmatpush1.bf16.msra.mxu0 %v9256_v19  ;;  %6485 = vmatpush1.bf16.msra.mxu1 %v9259_v23  ;;  %v9333_v19 = vld [vmem:[%s11988_s1 + $0xaec] ss:$16 sps:$4 sm:$0xff]   ;;  %v9328_v23 = vld [vmem:[%s11988_s1 + $0xae0] ss:$16 sps:$4 sm:$0xff]  }
 0x2bc   :  { %6400 = vmatprep.subr.bf16.mxu0 %v9264_v20  ;;  %6486 = vmatprep.subr.bf16.mxu1 %v9267_v21  ;;  %v6019_v20 = vrot.slane %v11578_v49, 2  ;;  %v9338_v21 = vld [vmem:[%s11988_s1 + $0xb04] ss:$16 sps:$4 sm:$0xff]   ;;  %v9339_v49 = vld [vmem:[%s11988_s1 + $0xb08] ss:$16 sps:$4 sm:$0xff]  }
 0x2bf   :  { %6401 = vmatpush1.bf16.msra.mxu0 %v9262_v22  ;;  %6487 = vmatpush1.bf16.msra.mxu1 %v9265_v61  ;;  %v9341_v22 = vld [vmem:[%s11988_s1 + $0xb0c] ss:$16 sps:$4 sm:$0xff]   ;;  %v6020_v61 = vsel %vm2682_vm2, %v6018_v57, %v6019_v20 }
 0x2c0   :  { %6402 = vmatprep.subr.bf16.mxu0 %v9270_v53  ;;  %6488 = vmatprep.subr.bf16.mxu1 %v9273_v54  ;;  %v9336_v53 = vld [vmem:[%s11988_s1 + $0xb00] ss:$16 sps:$4 sm:$0xff]   ;;  %v9344_v54 = vld [vmem:[%s11988_s1 + $0xb24] ss:$16 sps:$4 sm:$0xff]  }
 0x2c3   :  { %6403 = vmatpush1.bf16.msra.mxu0 %v9268_v27  ;;  %6489 = vmatpush1.bf16.msra.mxu1 %v9271_v28  ;;  %v9347_v27 = vld [vmem:[%s11988_s1 + $0xb2c] ss:$16 sps:$4 sm:$0xff]  }
 0x2c4   :  { %6404 = vmatprep.subr.bf16.mxu0 %v9276_v31  ;;  %6490 = vmatprep.subr.bf16.mxu1 %v9279_v33  ;;  %v7925_v28 = vld [vmem:[%s11989_s0 + $0x2c] sm:$0xc]  ;;  %v9342_v31 = vld [vmem:[%s11988_s1 + $0xb20] ss:$16 sps:$4 sm:$0xff]   ;;  %v9345_v33 = vld [vmem:[%s11988_s1 + $0xb28] ss:$16 sps:$4 sm:$0xff]  }
 0x2c7   :  { %6405 = vmatpush1.bf16.msra.mxu0 %v9274_v34  ;;  %6491 = vmatpush1.bf16.msra.mxu1 %v9277_v35  ;;  %v8000_v34 = vcombine.low %v7925_v28, %v11605_v25  ;;  %v3290_v25 = vrot.slane %v11351_v30, 4 }
 0x2c8   :  { %6406 = vmatprep.subr.bf16.mxu0 %v9282_v36  ;;  %6492 = vmatprep.subr.bf16.mxu1 %v9285_v37  ;;  %v6025_v36 = vrot.slane %v11630_v40, 2 }
 0x2c9   :  { %v6024_v35 = vrot.slane %v8000_v34, 2  ;;  %v3291_v40 = vadd.f32 %v3290_v25, %v11351_v30  ;;  %v3346_v30 = vrot.slane %v11407_v5, 4 }
 0x2cb   :  { %6407 = vmatpush1.bf16.msra.mxu0 %v9280_v38  ;;  %6493 = vmatpush1.bf16.msra.mxu1 %v9283_v32  ;;  %v6026_v37 = vsel %vm2682_vm2, %v6024_v35, %v6025_v36  ;;  %v3274_v38 = vrot.slane %v11349_v29, 4  ;;  %v3321_v32 = vrot.slane %v11358_v46, 4 }
 0x2cc   :  { %6408 = vmatprep.subr.bf16.mxu0 %v9288_v42  ;;  %6494 = vmatprep.subr.bf16.mxu1 %v9291_v43  ;;  %v3337_v42 = vrot.slane %v11376_v45, 4 }
 0x2cd   :  { %v3275_v43 = vadd.f32 %v3274_v38, %v11349_v29 }
 0x2cf   :  { %6409 = vmatpush1.bf16.msra.mxu0 %v9286_v51  ;;  %6495 = vmatpush1.bf16.msra.mxu1 %v9289_v47  ;;  %v3322_v51 = vadd.f32 %v3321_v32, %v11358_v46  ;;  %v3338_v47 = vadd.f32 %v3337_v42, %v11376_v45 }
 0x2d0   :  { %6410 = vmatprep.subr.bf16.mxu0 %v9294_v44  ;;  %6496 = vmatprep.subr.bf16.mxu1 %v9297_v11  ;;  %v3329_v11 = vrot.slane %v11389_v39, 4 }
 0x2d3   :  { %6411 = vmatpush1.bf16.msra.mxu0 %v9292_v4  ;;  %6497 = vmatpush1.bf16.msra.mxu1 %v9295_v55  ;;  %v3301_v4 = vrot.slane %v11403_v1, 4  ;;  %v3276_v55 = vrot.slane %v3275_v43, 2 }
 0x2d4   :  { %6412 = vmatprep.subr.bf16.mxu0 %v9300_v56  ;;  %6498 = vmatprep.subr.bf16.mxu1 %v9303_v59  ;;  %v3292_v56 = vrot.slane %v3291_v40, 2  ;;  %v3323_v59 = vrot.slane %v3322_v51, 2 }
 0x2d5   :  { %v3302_v29 = vadd.f32 %v3301_v4, %v11403_v1  ;;  %v3277_v46 = vadd.f32 %v3276_v55, %v3275_v43 }
 0x2d6   :  { %v3324_v45 = vadd.f32 %v3323_v59, %v3322_v51 }
 0x2d7   :  { %6413 = vmatpush1.bf16.msra.mxu0 %v9298_v60  ;;  %6499 = vmatpush1.bf16.msra.mxu1 %v9301_v62  ;;  %v3339_v60 = vrot.slane %v3338_v47, 2 }
 0x2d8   :  { %6414 = vmatprep.subr.bf16.mxu0 %v9306_v52  ;;  %6500 = vmatprep.subr.bf16.mxu1 %v9309_v24  ;;  %v3330_v52 = vadd.f32 %v3329_v11, %v11389_v39  ;;  %v3293_v24 = vadd.f32 %v3292_v56, %v3291_v40 }
 0x2db   :  { %6415 = vmatpush1.bf16.msra.mxu0 %v9304_v2  ;;  %6501 = vmatpush1.bf16.msra.mxu1 %v9307_v58  ;;  %v3340_v2 = vadd.f32 %v3339_v60, %v3338_v47  ;;  %v3331_v58 = vrot.slane %v3330_v52, 2 }
 0x2dc   :  { %6416 = vmatprep.subr.bf16.mxu0 %v9312_v3  ;;  %6502 = vmatprep.subr.bf16.mxu1 %v9315_v6  ;;  %v3303_v3 = vrot.slane %v3302_v29, 2  ;;  %v3347_v6 = vadd.f32 %v3346_v30, %v11407_v5 }
 0x2de   :  { %v11907_v39 = vadd.f32 %v3303_v3, %v3302_v29  ;;  %v3348_v1 = vrot.slane %v3347_v6, 2 }
 0x2df   :  { %6417 = vmatpush1.bf16.msra.mxu0 %v9310_v7  ;;  %6503 = vmatpush1.bf16.msra.mxu1 %v9313_v8  ;;  %v3278_v7 = vrot.slane %v3277_v46, 1  ;;  %v3294_v8 = vrot.slane %v3293_v24, 1 }
 0x2e0   :  { %6418 = vmatprep.subr.bf16.mxu0 %v9318_v9  ;;  %6504 = vmatprep.subr.bf16.mxu1 %v9321_v14  ;;  %v3325_v9 = vrot.slane %v3324_v45, 1  ;;  %v3341_v14 = vrot.slane %v3340_v2, 1 }
 0x2e3   :  { %6419 = vmatpush1.bf16.msra.mxu0 %v9316_v10  ;;  %6505 = vmatpush1.bf16.msra.mxu1 %v9319_v12  ;;  %v11905_v12 = vadd.f32 %v3331_v58, %v3330_v52 }
 0x2e4   :  { %6420 = vmatprep.subr.bf16.mxu0 %v9324_v48  ;;  %6506 = vmatprep.subr.bf16.mxu1 %v9327_v63  ;;  %v11909_v48 = vadd.f32 %v3278_v7, %v3277_v46  ;;  %v11911_v63 = vadd.f32 %v3294_v8, %v3293_v24 }
 0x2e5   :  { %v3333_v5 = vrot.slane %v11905_v12, 1 }
 0x2e7   :  { %6421 = vmatpush1.bf16.msra.mxu0 %v9322_v15  ;;  %6507 = vmatpush1.bf16.msra.mxu1 %v9325_v16  ;;  %v11913_v15 = vadd.f32 %v3325_v9, %v3324_v45  ;;  %v11915_v16 = vadd.f32 %v3341_v14, %v3340_v2 }
 0x2e8   :  { %6422 = vmatprep.subr.bf16.mxu0 %v9330_v18  ;;  %6508 = vmatprep.subr.bf16.mxu1 %v9333_v19 }
 0x2eb   :  { %6423 = vmatpush1.bf16.msra.mxu0 %v9328_v23  ;;  %6509 = vmatpush1.bf16.msra.mxu1 %v9331_v0  ;;  %v3305_v23 = vrot.slane %v11907_v39, 1  ;;  %v11921_v0 = vadd.f32 %v3348_v1, %v3347_v6 }
 0x2ec   :  { %6435 = vmatprep.subr.bf16.mxu0 %v9338_v21  ;;  %6521 = vmatprep.subr.bf16.mxu1 %v9341_v22 }
 0x2ee   :  { %6425 = vmatmul.mubr.bf16.vlgmr.msra.gmra.mrb[4].mxu0 %v6020_v61  ;;  %6511 = vmatmul.mubr.bf16.vlgmr.msra.gmra.mrb[4].mxu1 %v6020_v61 }
 0x2ef   :  { %6436 = vmatpush1.bf16.msra.mxu0 %v9336_v53  ;;  %6522 = vmatpush1.bf16.msra.mxu1 %v9339_v49 }
 0x2f0   :  { %6437 = vmatprep.subr.bf16.mxu0 %v9344_v54  ;;  %6523 = vmatprep.subr.bf16.mxu1 %v9347_v27 }
 0x2f1   :  { %6467 = vmatprep.mubr.bf16.mxu0 %v9352_v26  ;;  %6553 = vmatprep.mubr.bf16.mxu1 %v9352_v26  ;;  %v3282_v26 = vrot.slane %v11378_v50, 4 }
 0x2f3   :  { %6438 = vmatpush1.bf16.msra.mxu0 %v9342_v31  ;;  %6524 = vmatpush1.bf16.msra.mxu1 %v9345_v33  ;;  %v3283_v44 = vadd.f32 %v3282_v26, %v11378_v50 }
 0x2f5   :  { %v3284_v62 = vrot.slane %v3283_v44, 2 }
 0x2f7   :  { %v3285_v50 = vadd.f32 %v3284_v62, %v3283_v44 }
 0x2f9   :  { %v3286_v10 = vrot.slane %v3285_v50, 1 }
 0x2fa   :  { %8073 = vmatmul.mubr.msk.bf16.vlgmr.msra.gmra.mrb[4].mxu0 %vm562_vm0, %v6026_v37  ;;  %8074 = vmatmul.mubr.msk.bf16.vlgmr.msra.gmra.mrb[4].mxu1 %vm562_vm0, %v6026_v37 }
 0x2fb   :  { %v11917_v17 = vadd.f32 %v3286_v10, %v3285_v50 }
 0x3cd   :  { %v6469_v18 = vpop.f32.mrb[4].mxu0  ;;  %v6555_v19 = vpop.f32.mrb[4].mxu1 }
 0x3ce   :  { %v6638_v57 = vmul.f32 %v6469_v18, %v6469_v18  ;;  %v6640_v20 = vmul.f32 %v6555_v19, %v6555_v19  ;;  %v6471_v21 = vpop.f32.mrb[5].mxu0  ;;  %v6557_v22 = vpop.f32.mrb[5].mxu1 }
 0x3cf   :  { %v8087_v61 = vpack.c.bf16 %v6471_v21, %v6469_v18  ;;  %v6639_v53 = vmul.f32 %v6471_v21, %v6471_v21  ;;  %v8088_v49 = vpack.c.bf16 %v6557_v22, %v6555_v19  ;;  %v6625_v54 = vsel %vm3296_vm5, %v6557_v22, 0.0  ;;  %v6473_v27 = vpop.f32.mrb[6].mxu0  ;;  %v6559_v28 = vpop.f32.mrb[6].mxu1 }
 0x3d0   :  { %v6641_v31 = vmul.f32 %v6557_v22, %v6557_v22  ;;  %v6601_v33 = vsel %vm2682_vm2, %v6473_v27, 0.0  ;;  %v6642_v34 = vmul.f32 %v6473_v27, %v6473_v27  ;;  %v6617_v35 = vsel %vm2682_vm2, %v6559_v28, 0.0  ;;  %v6475_v36 = vpop.f32.mrb[7].mxu0  ;;  %v6561_v37 = vpop.f32.mrb[7].mxu1 }
 0x3d1   :  { %8079 = vst [vmem:[%s11990_s2 + $0x20] sm:$0xff] %v8087_v61  ;;  %8080 = vst.msk [vmem:[%s11990_s2 + $0x28] sm:$0xff] %vm11319_vm6, %v8088_v49  ;;  %v6602_v38 = vadd.f32 %v6601_v33, %v6469_v18  ;;  %v6618_v25 = vadd.f32 %v6617_v35, %v6555_v19  ;;  %v6644_v32 = vmul.f32 %v6559_v28, %v6559_v28  ;;  %v6609_v40 = vsel %vm2682_vm2, %v6475_v36, 0.0 }
 0x3d2   :  { %v8089_v42 = vpack.c.bf16 %v6475_v36, %v6473_v27  ;;  %v6670_v26 = vsel %vm3296_vm5, %v6641_v31, 0.0  ;;  %v6646_v43 = vsel %vm2682_vm2, %v6642_v34, 0.0  ;;  %v6643_v51 = vmul.f32 %v6475_v36, %v6475_v36 }
 0x3d3   :  { %v6603_v47 = vrot.slane %v6602_v38, 4  ;;  %v6647_v44 = vadd.f32 %v6646_v43, %v6638_v57  ;;  %v6619_v11 = vrot.slane %v6618_v25, 4  ;;  %v6662_v13 = vsel %vm2682_vm2, %v6644_v32, 0.0 }
 0x3d4   :  { %8081 = vst [vmem:[%s11990_s2 + $0x30] sm:$0x77] %v8089_v42  ;;  %v6663_v4 = vadd.f32 %v6662_v13, %v6640_v20  ;;  %v6610_v55 = vadd.f32 %v6609_v40, %v6471_v21  ;;  %v6654_v56 = vsel %vm2682_vm2, %v6643_v51, 0.0  ;;  %v8090_v59 = vpack.c.bf16 %v6561_v37, %v6559_v28 }
 0x3d5   :  { %v6604_v60 = vadd.f32 %v6603_v47, %v6602_v38  ;;  %v6648_v62 = vrot.slane %v6647_v44, 4  ;;  %v6620_v52 = vadd.f32 %v6619_v11, %v6618_v25  ;;  %v6655_v29 = vadd.f32 %v6654_v56, %v6639_v53 }
 0x3d6   :  { %v6664_v30 = vrot.slane %v6663_v4, 4  ;;  %v6611_v46 = vrot.slane %v6610_v55, 4  ;;  %8082 = vst.msk [vmem:[%s11990_s2 + $0x38] sm:$0x77] %vm11366_vm9, %v8090_v59  ;;  %v6626_v24 = vsel %vm3298_vm10, %v6561_v37, 0.0  ;;  %v6645_v45 = vmul.f32 %v6561_v37, %v6561_v37 }
 0x3d7   :  { %v6605_v2 = vrot.slane %v6604_v60, 2  ;;  %v6649_v50 = vadd.f32 %v6648_v62, %v6647_v44  ;;  %v6621_v58 = vrot.slane %v6620_v52, 2  ;;  %v6656_v3 = vrot.slane %v6655_v29, 4 }
 0x3d8   :  { %v6665_v6 = vadd.f32 %v6664_v30, %v6663_v4  ;;  %v6612_v7 = vadd.f32 %v6611_v46, %v6610_v55  ;;  %v6627_v8 = vadd.f32 %v6626_v24, %v6625_v54  ;;  %v6671_v9 = vsel %vm3298_vm10, %v6645_v45, 0.0 }
 0x3d9   :  { %v6606_v14 = vadd.f32 %v6605_v2, %v6604_v60  ;;  %v6650_v10 = vrot.slane %v6649_v50, 2  ;;  %v6622_v1 = vadd.f32 %v6621_v58, %v6620_v52  ;;  %v6657_v41 = vadd.f32 %v6656_v3, %v6655_v29 }
 0x3da   :  { %v6666_v18 = vrot.slane %v6665_v6, 2  ;;  %v6613_v19 = vrot.slane %v6612_v7, 2  ;;  %v6628_v57 = vrot.slane %v6627_v8, 4  ;;  %v6672_v20 = vadd.f32 %v6671_v9, %v6670_v26 }
 0x3db   :  { %v6607_v21 = vrot.slane %v6606_v14, 1  ;;  %v6651_v22 = vadd.f32 %v6650_v10, %v6649_v50  ;;  %v6623_v61 = vrot.slane %v6622_v1, 1  ;;  %v6658_v53 = vrot.slane %v6657_v41, 2 }
 0x3dc   :  { %v6667_v49 = vadd.f32 %v6666_v18, %v6665_v6  ;;  %v6614_v27 = vadd.f32 %v6613_v19, %v6612_v7  ;;  %v6629_v28 = vadd.f32 %v6628_v57, %v6627_v8  ;;  %v6673_v31 = vrot.slane %v6672_v20, 4 }
 0x3dd   :  { %v6608_v33 = vadd.f32 %v6607_v21, %v6606_v14  ;;  %v6652_v54 = vrot.slane %v6651_v22, 1  ;;  %v6624_v34 = vadd.f32 %v6623_v61, %v6622_v1  ;;  %v6659_v35 = vadd.f32 %v6658_v53, %v6657_v41 }
 0x3de   :  { %v6668_v36 = vrot.slane %v6667_v49, 1  ;;  %v6615_v37 = vrot.slane %v6614_v27, 1  ;;  %v6630_v38 = vrot.slane %v6629_v28, 2  ;;  %v6674_v25 = vadd.f32 %v6673_v31, %v6672_v20 }
 0x3df   :  { %v6634_v32 = vadd.f32 %v6608_v33, %v11909_v48  ;;  %v6653_v42 = vadd.f32 %v6652_v54, %v6651_v22  ;;  %v6636_v26 = vadd.f32 %v6624_v34, %v11911_v63  ;;  %v6660_v43 = vrot.slane %v6659_v35, 1 }
 0x3e0   :  { %v6669_v40 = vadd.f32 %v6668_v36, %v6667_v49  ;;  %v6616_v51 = vadd.f32 %v6615_v37, %v6614_v27  ;;  %v6631_v47 = vadd.f32 %v6630_v38, %v6629_v28  ;;  %v6675_v44 = vrot.slane %v6674_v25, 2 }
 0x3e1   :  { %v3334_v11 = vadd.f32 %v3333_v5, %v11905_v12  ;;  %v3350_v13 = vrot.slane %v11921_v0, 1  ;;  %v6679_v4 = vadd.f32 %v6653_v42, %v11913_v15  ;;  %6683 = vst [vmem:[%s11991_s3] sm:$0xff] %v6634_v32  ;;  %6685 = vst [vmem:[%s11991_s3 + $0x10] sm:$0xff] %v6636_v26  ;;  %v6661_v48 = vadd.f32 %v6660_v43, %v6659_v35 }
 0x3e2   :  { %v6681_v63 = vadd.f32 %v6669_v40, %v11915_v16  ;;  %v6635_v55 = vadd.f32 %v6616_v51, %v11917_v17  ;;  %v6632_v56 = vrot.slane %v6631_v47, 1  ;;  %v6676_v59 = vadd.f32 %v6675_v44, %v6674_v25 }
 0x3e3   :  { %6687 = vst [vmem:[%s11992_s4] sm:$0xff] %v6679_v4  ;;  %v6680_v12 = vadd.f32 %v6661_v48, %v3334_v11  ;;  %v3306_v15 = vadd.f32 %v3305_v23, %v11907_v39  ;;  %v3351_v5 = vadd.f32 %v3350_v13, %v11921_v0 }
 0x3e4   :  { %6689 = vst [vmem:[%s11992_s4 + $0x10] sm:$0xff] %v6681_v63  ;;  %6684 = vst [vmem:[%s11991_s3 + $0x8] sm:$0xff] %v6635_v55  ;;  %v6633_v16 = vadd.f32 %v6632_v56, %v6631_v47  ;;  %v6677_v17 = vrot.slane %v6676_v59, 1 }
 0x3e5   :  { %6688 = vst [vmem:[%s11992_s4 + $0x8] sm:$0xff] %v6680_v12 }
 0x3e6   :  { %v6637_v60 = vadd.f32 %v6633_v16, %v3306_v15  ;;  %v6678_v62 = vadd.f32 %v6677_v17, %v6676_v59 }
 0x3e8   :  { %v6682_v52 = vadd.f32 %v6678_v62, %v3351_v5  ;;  %6686 = vst.msk [vmem:[%s11991_s3 + $0x18] sm:$0xff] %vm3296_vm5, %v6637_v60 }
 0x3ea   :  { %6690 = vst.msk [vmem:[%s11992_s4 + $0x18] sm:$0xff] %vm3296_vm5, %v6682_v52 }

// kernel: tile.33
= control target key start
LH: loop header
LB: loop body
LE: loop exit
PB: predicated region body
PF: predicated region fallthrough
CT: control target
= control target key end

     0   :  { %s28_s0 = inlined_call_operand.vmem [shape: f32[32], index: 0, kind: input, shape index: {}]   ;;  %s29_s1 = inlined_call_operand.vmem [shape: f32[14,32], index: 1, kind: output, shape index: {}]  }
   0x1   :  { %v4_v0 = vld [vmem:[%s28_s0] ss:$0 sm:$0xff] }
   0x2   :  { %5 = vst [vmem:[%s29_s1] sm:$0xff] %v4_v0  ;;  %8 = vst [vmem:[%s29_s1 + $0x8] sm:$0xff] %v4_v0 }

// kernel: tile.34
= control target key start
LH: loop header
LB: loop body
LE: loop exit
PB: predicated region body
PF: predicated region fallthrough
CT: control target
= control target key end

     0   :  { %s57_s8 = smov 96   ;;  %vm3_vm0 = vcmask 261120   ;;  %s59_s15 = smov 64   ;;  %vm9_vm1 = vcmask 1048320   ;;  %vm15_vm2 = vcmask 785920   ;;  %vm21_vm3 = vcmask 523520   ;;  %s94_s0 = inlined_call_operand.vmem [shape: f32[14,32], index: 0, kind: input, shape index: {}]   ;;  %s95_s1 = inlined_call_operand.vmem [shape: f32[1,448], index: 1, kind: output, shape index: {}]  }
   0x1   :  { %v48_v0 = vld [vmem:[%s94_s0 + $0x3] ss:$4 sm:$0x7]   ;;  %v49_v1 = vld [vmem:[%s94_s0 + $0x2] ss:$4 sm:$0x7]  }
   0x2   :  { %7 = vrot.lane.b32.xlu0 %v48_v0, %s57_s8  ;;  %v50_v2 = vld [vmem:[%s94_s0 + $0x1] ss:$4 sm:$0xf]   ;;  %v2_v3 = vld [vmem:[%s94_s0] ss:$4 sm:$0xf]  }
   0x3   :  { %s58_s0 = smov 32   ;;  %4 = vst.msk [vmem:[#allocation0] ss:$8 sm:$0xf] %vm3_vm0, %v2_v3  }
   0x4   :  { %19 = vrot.lane.b32.xlu1 %v50_v2, %s58_s0 }
   0x6   :  { %13 = vrot.lane.b32.xlu0 %v49_v1, %s59_s15 }
  0x74   :  { %v8_v4 = vpop.permute.xlu0 %7  }
  0x75   :  { %10 = vst.msk [vmem:[#allocation0] ss:$8 sm:$0x7] %vm9_vm1, %v8_v4  }
  0x76   :  { %v20_v5 = vpop.permute.xlu1 %19  }
  0x78   :  { %v14_v6 = vpop.permute.xlu0 %13  }
  0x79   :  { %16 = vst.msk [vmem:[#allocation0] ss:$8 sm:$0x7] %vm15_vm2, %v14_v6  }
  0x7a   :  { %22 = vst.msk [vmem:[#allocation0] ss:$8 sm:$0xf] %vm21_vm3, %v20_v5  }
  0x81   :  { %v26_v7 = vld [vmem:[#allocation0] sm:$0x1]  ;;  %v30_v8 = vld [vmem:[#allocation0 + $0x8] sm:$0x1]  ;;  %v35_v9 = vld [vmem:[#allocation0 + $0x10] sm:$0x1] }
  0x82   :  { %28 = vst [vmem:[%s95_s1] sm:$0x1] %v26_v7  ;;  %51 = vst [vmem:[%s95_s1 + $0x1] sm:$0x1] %v30_v8  ;;  %v41_v10 = vld [vmem:[#allocation0 + $0x18] sm:$0x1] }
  0x83   :  { %52 = vst [vmem:[%s95_s1 + $0x2] sm:$0x1] %v35_v9  ;;  %53 = vst [vmem:[%s95_s1 + $0x3] sm:$0x1] %v41_v10 }

// kernel: cnn_forward.8
= control target key start
LH: loop header
LB: loop body
LE: loop exit
PB: predicated region body
PF: predicated region fallthrough
CT: control target
= control target key end

     0   :  { %v29_v0 = vlaneseq  ;;  %s1122_s11 = smov 32   ;;  %vm144_vm0 = vcmask 261120   ;;  %vm439_vm1 = vcmask 1041409   ;;  %vm173_vm2 = vcmask 1040384   ;;  %s1819_s0 = inlined_call_operand.vmem [shape: bf16[2,14,448], index: 0, kind: input, shape index: {}]   ;;  %s1820_s1 = inlined_call_operand.vmem [shape: f32[1,448], index: 1, kind: input, shape index: {}]   ;;  %s1821_s2 = inlined_call_operand.vmem [shape: f32[1,448], index: 2, kind: input, shape index: {}]   ;;  %s1822_s3 = inlined_call_operand.vmem [shape: bf16[2,7,224], index: 3, kind: output, shape index: {}]  }
   0x1   :  { %v1146_v1 = vld [vmem:[%s1820_s1] sm:$0xf]  ;;  %v1151_v2 = vld [vmem:[%s1819_s0 + $0x28] sm:$0x11]  ;;  %v322_v10 = vld [vmem:[%s1819_s0 + $0x8] sm:$0x44] }
   0x2   :  { %v1153_v3 = vshrl.u32 %v29_v0, 7  ;;  %v1158_v4 = vld [vmem:[%s1819_s0] sm:$0x44]  ;;  %v1163_v5 = vld [vmem:[%s1819_s0] sm:$0x11]  ;;  %v26_v7 = vunpack.c.l.bf16 %v1151_v2  ;;  %v327_v19 = vunpack.c.l.bf16 %v322_v10  ;;  %v328_v20 = vunpack.c.h.bf16 %v322_v10 }
   0x3   :  { %v1168_v6 = vld [vmem:[%s1821_s2] sm:$0xf]  ;;  %v326_v8 = vunpack.c.h.bf16 %v1158_v4  ;;  %v17_v9 = vld [vmem:[%s1819_s0 + $0x8] sm:$0x11]  ;;  %v21_v13 = vunpack.c.h.bf16 %v1163_v5  ;;  %v1189_v16 = vld [vmem:[%s1819_s0 + $0x28] sm:$0x44] }
   0x4   :  { %v35_v11 = vsub.s32 1, %v1153_v3  ;;  %v39_v12 = vsub.s32 2, %v1153_v3  ;;  %v22_v14 = vunpack.c.l.bf16 %v17_v9  ;;  %v1184_v15 = vld [vmem:[%s1819_s0 + $0x20] sm:$0x11]  ;;  %v23_v17 = vunpack.c.h.bf16 %v17_v9 }
   0x5   :  { %v43_v18 = vsub.s32 3, %v1153_v3  ;;  %v25_v27 = vunpack.c.h.bf16 %v1184_v15  ;;  %v332_v28 = vunpack.c.h.bf16 %v1189_v16  ;;  %vm174_vm3 = vsmask.f32 256 }
   0x6   :  { %v1193_v21 = vrot.slane %v1146_v1, %v35_v11  ;;  %v1196_v22 = vrot.slane %v1146_v1, %v39_v12  ;;  %v1199_v23 = vrot.slane %v1168_v6, %v35_v11  ;;  %v1202_v24 = vrot.slane %v1168_v6, %v39_v12  ;;  %vm1493_vm9 = vmand %vm173_vm2, %vm174_vm3 }
   0x7   :  { %v1205_v25 = vrot.slane %v1146_v1, %v43_v18  ;;  %v1208_v26 = vrot.slane %v1168_v6, %v43_v18  ;;  %vm440_vm4 = vsmask.f32 1280  ;;  %vm176_vm5 = vcmask 782340  }
   0x8   :  { %v55_v29 = vmul.f32 %v1196_v22, %v26_v7  ;;  %v334_v30 = vmul.f32 %v326_v8, %v1193_v21  ;;  %v50_v31 = vmul.f32 %v1193_v21, %v21_v13  ;;  %v51_v32 = vmul.f32 %v1196_v22, %v22_v14  ;;  %v1235_v7 = vld [vmem:[%s1819_s0 + $0x10] sm:$0x11]  ;;  %v1240_v8 = vld [vmem:[%s1819_s0 + $0x20] sm:$0x44]  ;;  %vm1506_vm11 = vmand %vm439_vm1, %vm440_vm4 }
   0x9   :  { %v335_v33 = vmul.f32 %v327_v19, %v1196_v22  ;;  %v336_v34 = vmul.f32 %v328_v20, %v1205_v25  ;;  %v52_v35 = vmul.f32 %v1205_v25, %v23_v17  ;;  %v54_v36 = vmul.f32 %v1193_v21, %v25_v27  ;;  %v1247_v13 = vld [vmem:[%s1819_s0 + $0x30] sm:$0x11]  ;;  %v1255_v19 = vld [vmem:[%s1819_s0 + $0x38] sm:$0x11] }
   0xa   :  { %v84_v37 = vadd.f32 %v1202_v24, %v55_v29  ;;  %v342_v38 = vadd.f32 %v334_v30, %v1199_v23  ;;  %v79_v39 = vadd.f32 %v1199_v23, %v50_v31  ;;  %v80_v40 = vadd.f32 %v1202_v24, %v51_v32  ;;  %v588_v30 = vld [vmem:[%s1819_s0 + $0x18] sm:$0x11] }
   0xb   :  { %v343_v41 = vadd.f32 %v335_v33, %v1202_v24  ;;  %v344_v42 = vadd.f32 %v336_v34, %v1208_v26  ;;  %v81_v43 = vadd.f32 %v1208_v26, %v52_v35  ;;  %v83_v44 = vadd.f32 %v1199_v23, %v54_v36 }
   0xc   :  { %v92_v45 = vmax.f32 %v84_v37, 0.0  ;;  %v350_v46 = vmax.f32 %v342_v38, 0.0  ;;  %v87_v47 = vmax.f32 %v79_v39, 0.0  ;;  %v88_v48 = vmax.f32 %v80_v40, 0.0 }
   0xd   :  { %v351_v49 = vmax.f32 %v343_v41, 0.0  ;;  %v352_v50 = vmax.f32 %v344_v42, 0.0  ;;  %v89_v51 = vmax.f32 %v81_v43, 0.0  ;;  %v91_v52 = vmax.f32 %v83_v44, 0.0 }
   0xe   :  { %v108_v53 = vrot.slane %v92_v45, 1  ;;  %v366_v54 = vrot.slane %v350_v46, 1  ;;  %v103_v55 = vrot.slane %v87_v47, 1  ;;  %v104_v56 = vrot.slane %v88_v48, 1 }
   0xf   :  { %v367_v57 = vrot.slane %v351_v49, 1  ;;  %v368_v58 = vrot.slane %v352_v50, 1  ;;  %v105_v59 = vrot.slane %v89_v51, 1  ;;  %v107_v60 = vrot.slane %v91_v52, 1 }
  0x10   :  { %v124_v61 = vmax.f32 %v92_v45, %v108_v53  ;;  %v1228_v62 = vmax.f32 %v350_v46, %v366_v54  ;;  %v1230_v63 = vmax.f32 %v87_v47, %v103_v55  ;;  %v120_v0 = vmax.f32 %v88_v48, %v104_v56 }
  0x11   :  { %v383_v9 = vmax.f32 %v351_v49, %v367_v57  ;;  %v384_v10 = vmax.f32 %v352_v50, %v368_v58  ;;  %v121_v11 = vmax.f32 %v89_v51, %v105_v59  ;;  %v1242_v12 = vmax.f32 %v91_v52, %v107_v60  ;;  %v1287_v52 = vld [vmem:[%s1819_s0] sm:$0x22] }
  0x12   :  { %v1027_v14 = vpack.i.bf16 %v1228_v62, %v124_v61  ;;  %v1017_v17 = vpack.i.bf16 %v120_v0, %v1230_v63  ;;  %v340_v18 = vmul.f32 %v332_v28, %v1205_v25  ;;  %v592_v27 = vunpack.c.h.bf16 %v1235_v7  ;;  %v187_v61 = vld [vmem:[%s1819_s0 + $0x8] sm:$0x22] }
  0x13   :  { %v1032_v20 = vpack.i.bf16 %v384_v10, %v383_v9  ;;  %v330_v29 = vunpack.c.h.bf16 %v1240_v8  ;;  %v1022_v28 = vpack.i.bf16 %v1242_v12, %v121_v11  ;;  %v331_v32 = vunpack.c.l.bf16 %v1189_v16 }
  0x14   :  { %1028 = vrot.lane.b32.xlu1 %v1027_v14, %s1122_s11  ;;  %1018 = vrot.lane.b32.xlu0 %v1017_v17, %s1122_s11  ;;  %v348_v31 = vadd.f32 %v340_v18, %v1208_v26  ;;  %v596_v33 = vunpack.c.h.bf16 %v1247_v13  ;;  %v27_v34 = vunpack.c.h.bf16 %v1151_v2  ;;  %v600_v35 = vmul.f32 %v592_v27, %v1193_v21 }
  0x15   :  { %v338_v36 = vmul.f32 %v330_v29, %v1193_v21  ;;  %v597_v37 = vunpack.c.l.bf16 %v1255_v19  ;;  %v339_v39 = vmul.f32 %v331_v32, %v1196_v22  ;;  %v593_v41 = vunpack.c.l.bf16 %v588_v30 }
  0x16   :  { %v356_v38 = vmax.f32 %v348_v31, 0.0  ;;  %v604_v40 = vmul.f32 %v596_v33, %v1193_v21  ;;  %v608_v42 = vadd.f32 %v600_v35, %v1199_v23  ;;  %v594_v44 = vunpack.c.h.bf16 %v588_v30 }
  0x17   :  { %v346_v16 = vadd.f32 %v338_v36, %v1199_v23  ;;  %v605_v43 = vmul.f32 %v597_v37, %v1196_v22  ;;  %v347_v45 = vadd.f32 %v339_v39, %v1202_v24  ;;  %v601_v47 = vmul.f32 %v593_v41, %v1196_v22  ;;  %v189_v36 = vld [vmem:[%s1819_s0 + $0x28] sm:$0x22] }
  0x18   :  { %1033 = vrot.lane.b32.xlu1 %v1032_v20, %s1122_s11  ;;  %1023 = vrot.lane.b32.xlu0 %v1022_v28, %s1122_s11  ;;  %v372_v2 = vrot.slane %v356_v38, 1  ;;  %v612_v46 = vadd.f32 %v604_v40, %v1199_v23  ;;  %v616_v48 = vmax.f32 %v608_v42, 0.0  ;;  %v602_v51 = vmul.f32 %v594_v44, %v1205_v25 }
  0x19   :  { %v354_v49 = vmax.f32 %v346_v16, 0.0  ;;  %v613_v50 = vadd.f32 %v605_v43, %v1202_v24  ;;  %v355_v54 = vmax.f32 %v347_v45, 0.0  ;;  %v609_v56 = vadd.f32 %v601_v47, %v1202_v24 }
  0x1a   :  { %v388_v53 = vmax.f32 %v356_v38, %v372_v2  ;;  %v620_v55 = vmax.f32 %v612_v46, 0.0  ;;  %v632_v57 = vrot.slane %v616_v48, 1  ;;  %v610_v60 = vadd.f32 %v602_v51, %v1208_v26  ;;  %v1318_v46 = vld [vmem:[%s1819_s0 + $0x20] sm:$0x22] }
  0x1b   :  { %v370_v58 = vrot.slane %v354_v49, 1  ;;  %v621_v59 = vmax.f32 %v613_v50, 0.0  ;;  %v371_v0 = vrot.slane %v355_v54, 1  ;;  %v617_v10 = vmax.f32 %v609_v56, 0.0 }
  0x1c   :  { %v636_v9 = vrot.slane %v620_v55, 1  ;;  %v191_v11 = vunpack.c.h.bf16 %v1287_v52  ;;  %v1295_v14 = vmax.f32 %v616_v48, %v632_v57  ;;  %v618_v20 = vmax.f32 %v610_v60, 0.0 }
  0x1d   :  { %v1297_v17 = vmax.f32 %v354_v49, %v370_v58  ;;  %v637_v18 = vrot.slane %v621_v59, 1  ;;  %v387_v27 = vmax.f32 %v355_v54, %v371_v0  ;;  %v633_v30 = vrot.slane %v617_v10, 1 }
  0x1e   :  { %v1299_v29 = vmax.f32 %v620_v55, %v636_v9  ;;  %v192_v28 = vunpack.c.l.bf16 %v187_v61  ;;  %v1042_v31 = vpack.i.bf16 %v1295_v14, %v388_v53  ;;  %v634_v33 = vrot.slane %v618_v20, 1 }
  0x1f   :  { %v653_v32 = vmax.f32 %v621_v59, %v637_v18  ;;  %v199_v35 = vmul.f32 %v191_v11, %v1193_v21  ;;  %v1037_v37 = vpack.i.bf16 %v387_v27, %v1297_v17  ;;  %v649_v38 = vmax.f32 %v617_v10, %v633_v30 }
  0x20   :  { %v200_v39 = vmul.f32 %v192_v28, %v1196_v22  ;;  %1043 = vrot.lane.b32.xlu1 %v1042_v31, %s1122_s11  ;;  %v650_v41 = vmax.f32 %v618_v20, %v634_v33  ;;  %v56_v16 = vmul.f32 %v1205_v25, %v27_v34  ;;  %v598_v44 = vunpack.c.h.bf16 %v1255_v19  ;;  %v1340_v28 = vld [vmem:[%s1819_s0 + $0x20] sm:$0x88] }
  0x21   :  { %v1052_v40 = vpack.i.bf16 %v653_v32, %v1299_v29  ;;  %v207_v42 = vadd.f32 %v199_v35, %v1199_v23  ;;  %1038 = vrot.lane.b32.xlu0 %v1037_v37, %s1122_s11  ;;  %v196_v2 = vunpack.c.l.bf16 %v189_v36  ;;  %v197_v45 = vunpack.c.h.bf16 %v189_v36 }
  0x22   :  { %v208_v43 = vadd.f32 %v200_v39, %v1202_v24  ;;  %v1047_v47 = vpack.i.bf16 %v650_v41, %v649_v38  ;;  %v85_v49 = vadd.f32 %v1208_v26, %v56_v16  ;;  %v193_v50 = vunpack.c.h.bf16 %v187_v61  ;;  %v453_v61 = vld [vmem:[%s1819_s0 + $0x8] sm:$0x88] }
  0x23   :  { %v215_v48 = vmax.f32 %v207_v42, 0.0  ;;  %v606_v34 = vmul.f32 %v598_v44, %v1205_v25  ;;  %v204_v53 = vmul.f32 %v196_v2, %v1196_v22  ;;  %v205_v54 = vmul.f32 %v197_v45, %v1205_v25 }
  0x24   :  { %v216_v51 = vmax.f32 %v208_v43, 0.0  ;;  %1053 = vrot.lane.b32.xlu1 %v1052_v40, %s1122_s11  ;;  %v93_v55 = vmax.f32 %v85_v49, 0.0  ;;  %v195_v56 = vunpack.c.h.bf16 %v1318_v46  ;;  %v201_v10 = vmul.f32 %v193_v50, %v1205_v25  ;;  %v1348_v40 = vld [vmem:[%s1819_s0] sm:$0x88] }
  0x25   :  { %v231_v19 = vrot.slane %v215_v48, 1  ;;  %1048 = vrot.lane.b32.xlu0 %v1047_v47, %s1122_s11  ;;  %v614_v58 = vadd.f32 %v606_v34, %v1208_v26  ;;  %v212_v59 = vadd.f32 %v204_v53, %v1202_v24  ;;  %v213_v60 = vadd.f32 %v205_v54, %v1208_v26 }
  0x26   :  { %v232_v57 = vrot.slane %v216_v51, 1  ;;  %v109_v9 = vrot.slane %v93_v55, 1  ;;  %v203_v11 = vmul.f32 %v195_v56, %v1193_v21  ;;  %v209_v32 = vadd.f32 %v201_v10, %v1208_v26  ;;  %v455_v10 = vld [vmem:[%s1819_s0 + $0x28] sm:$0x88] }
  0x27   :  { %v1333_v0 = vmax.f32 %v215_v48, %v231_v19  ;;  %v622_v20 = vmax.f32 %v614_v58, 0.0  ;;  %v220_v27 = vmax.f32 %v212_v59, 0.0  ;;  %v221_v30 = vmax.f32 %v213_v60, 0.0 }
  0x28   :  { %v248_v18 = vmax.f32 %v216_v51, %v232_v57  ;;  %v125_v31 = vmax.f32 %v93_v55, %v109_v9  ;;  %v211_v33 = vadd.f32 %v203_v11, %v1199_v23  ;;  %v459_v35 = vunpack.c.h.bf16 %v453_v61  ;;  %v1358_v51 = vld [vmem:[%s1819_s0 + $0x10] sm:$0x22]  ;;  %v1364_v55 = vld [vmem:[%s1819_s0 + $0x18] sm:$0x22] }
  0x29   :  { %v638_v37 = vrot.slane %v622_v20, 1  ;;  %v236_v38 = vrot.slane %v220_v27, 1  ;;  %v237_v39 = vrot.slane %v221_v30, 1  ;;  %v217_v41 = vmax.f32 %v209_v32, 0.0 }
  0x2a   :  { %v1062_v36 = vpack.i.bf16 %v248_v18, %v1333_v0  ;;  %v219_v42 = vmax.f32 %v211_v33, 0.0  ;;  %v461_v16 = vunpack.c.h.bf16 %v1340_v28  ;;  %v467_v45 = vmul.f32 %v459_v35, %v1205_v25 }
  0x2b   :  { %v654_v43 = vmax.f32 %v622_v20, %v638_v37  ;;  %v252_v44 = vmax.f32 %v220_v27, %v236_v38  ;;  %v253_v2 = vmax.f32 %v221_v30, %v237_v39  ;;  %v233_v47 = vrot.slane %v217_v41, 1  ;;  %v719_v38 = vld [vmem:[%s1819_s0 + $0x38] sm:$0x22] }
  0x2c   :  { %1063 = vrot.lane.b32.xlu1 %v1062_v36, %s1122_s11  ;;  %v235_v48 = vrot.slane %v219_v42, 1  ;;  %v469_v49 = vmul.f32 %v461_v16, %v1193_v21  ;;  %v457_v50 = vunpack.c.h.bf16 %v1348_v40  ;;  %v475_v54 = vadd.f32 %v467_v45, %v1208_v26 }
  0x2d   :  { %v1057_v34 = vpack.i.bf16 %v125_v31, %v654_v43  ;;  %v1072_v53 = vpack.i.bf16 %v253_v2, %v252_v44  ;;  %v458_v19 = vunpack.c.l.bf16 %v453_v61  ;;  %v249_v56 = vmax.f32 %v217_v41, %v233_v47 }
  0x2e   :  { %v1366_v57 = vmax.f32 %v219_v42, %v235_v48  ;;  %v477_v58 = vadd.f32 %v469_v49, %v1199_v23  ;;  %v465_v59 = vmul.f32 %v457_v50, %v1193_v21  ;;  %v483_v60 = vmax.f32 %v475_v54, 0.0 }
  0x2f   :  { %1058 = vrot.lane.b32.xlu0 %v1057_v34, %s1122_s11  ;;  %v466_v9 = vmul.f32 %v458_v19, %v1196_v22  ;;  %v721_v61 = vunpack.c.h.bf16 %v1358_v51  ;;  %v722_v27 = vunpack.c.l.bf16 %v1364_v55  ;;  %v462_v37 = vunpack.c.l.bf16 %v455_v10 }
  0x30   :  { %1073 = vrot.lane.b32.xlu1 %v1072_v53, %s1122_s11  ;;  %v1067_v11 = vpack.i.bf16 %v1366_v57, %v249_v56  ;;  %v485_v18 = vmax.f32 %v477_v58, 0.0  ;;  %v473_v20 = vadd.f32 %v465_v59, %v1199_v23  ;;  %v499_v30 = vrot.slane %v483_v60, 1 }
  0x31   :  { %v474_v31 = vadd.f32 %v466_v9, %v1202_v24  ;;  %v729_v32 = vmul.f32 %v721_v61, %v1193_v21  ;;  %v730_v36 = vmul.f32 %v722_v27, %v1196_v22  ;;  %v463_v16 = vunpack.c.h.bf16 %v455_v10 }
  0x32   :  { %v501_v33 = vrot.slane %v485_v18, 1  ;;  %v481_v35 = vmax.f32 %v473_v20, 0.0  ;;  %v515_v39 = vmax.f32 %v483_v60, %v499_v30  ;;  %v470_v45 = vmul.f32 %v462_v37, %v1196_v22 }
  0x33   :  { %1068 = vrot.lane.b32.xlu0 %v1067_v11, %s1122_s11  ;;  %v482_v41 = vmax.f32 %v474_v31, 0.0  ;;  %v737_v42 = vadd.f32 %v729_v32, %v1199_v23  ;;  %v738_v2 = vadd.f32 %v730_v36, %v1202_v24  ;;  %v471_v49 = vmul.f32 %v463_v16, %v1205_v25  ;;  %v1403_v11 = vld [vmem:[%s1819_s0 + $0x30] sm:$0x22]  ;;  %v850_v32 = vld [vmem:[%s1819_s0 + $0x18] sm:$0x44] }
  0x34   :  { %v1388_v43 = vmax.f32 %v485_v18, %v501_v33  ;;  %v497_v44 = vrot.slane %v481_v35, 1  ;;  %v726_v50 = vunpack.c.l.bf16 %v719_v38  ;;  %v478_v19 = vadd.f32 %v470_v45, %v1202_v24 }
  0x35   :  { %v498_v47 = vrot.slane %v482_v41, 1  ;;  %v745_v48 = vmax.f32 %v737_v42, 0.0  ;;  %v746_v54 = vmax.f32 %v738_v2, 0.0  ;;  %v479_v59 = vadd.f32 %v471_v49, %v1208_v26  ;;  %v1426_v42 = vld [vmem:[%s1819_s0 + $0x10] sm:$0x44] }
  0x36   :  { %v1082_v34 = vpack.i.bf16 %v1388_v43, %v515_v39  ;;  %v1394_v53 = vmax.f32 %v481_v35, %v497_v44  ;;  %v727_v60 = vunpack.c.h.bf16 %v719_v38  ;;  %v486_v61 = vmax.f32 %v478_v19, 0.0 }
  0x37   :  { %v514_v56 = vmax.f32 %v482_v41, %v498_v47  ;;  %v761_v58 = vrot.slane %v745_v48, 1  ;;  %v762_v9 = vrot.slane %v746_v54, 1  ;;  %v734_v10 = vmul.f32 %v726_v50, %v1196_v22  ;;  %v1421_v41 = vld [vmem:[%s1819_s0 + $0x30] sm:$0x44] }
  0x38   :  { %1083 = vrot.lane.b32.xlu1 %v1082_v34, %s1122_s11  ;;  %v723_v18 = vunpack.c.h.bf16 %v1364_v55  ;;  %v487_v30 = vmax.f32 %v479_v59, 0.0  ;;  %v735_v31 = vmul.f32 %v727_v60, %v1205_v25  ;;  %v502_v35 = vrot.slane %v486_v61, 1 }
  0x39   :  { %v1077_v20 = vpack.i.bf16 %v514_v56, %v1394_v53  ;;  %v1407_v27 = vmax.f32 %v745_v48, %v761_v58  ;;  %v778_v33 = vmax.f32 %v746_v54, %v762_v9  ;;  %v742_v36 = vadd.f32 %v734_v10, %v1202_v24 }
  0x3a   :  { %v503_v37 = vrot.slane %v487_v30, 1  ;;  %v743_v55 = vadd.f32 %v735_v31, %v1208_v26  ;;  %v725_v38 = vunpack.c.h.bf16 %v1403_v11  ;;  %v731_v39 = vmul.f32 %v723_v18, %v1205_v25 }
  0x3b   :  { %1078 = vrot.lane.b32.xlu0 %v1077_v20, %s1122_s11  ;;  %v1092_v16 = vpack.i.bf16 %v778_v33, %v1407_v27  ;;  %v518_v44 = vmax.f32 %v486_v61, %v502_v35  ;;  %v750_v2 = vmax.f32 %v742_v36, 0.0  ;;  %v856_v45 = vunpack.c.h.bf16 %v850_v32  ;;  %v852_v36 = vld [vmem:[%s1819_s0 + $0x38] sm:$0x44] }
  0x3c   :  { %v519_v47 = vmax.f32 %v487_v30, %v503_v37  ;;  %v751_v48 = vmax.f32 %v743_v55, 0.0  ;;  %v733_v49 = vmul.f32 %v725_v38, %v1193_v21  ;;  %v739_v50 = vadd.f32 %v731_v39, %v1208_v26 }
  0x3d   :  { %1093 = vrot.lane.b32.xlu1 %v1092_v16, %s1122_s11  ;;  %v766_v34 = vrot.slane %v750_v2, 1  ;;  %v858_v54 = vunpack.c.h.bf16 %v1421_v41  ;;  %v864_v19 = vmul.f32 %v856_v45, %v1205_v25  ;;  %v854_v56 = vunpack.c.h.bf16 %v1426_v42 }
  0x3e   :  { %v1087_v58 = vpack.i.bf16 %v519_v47, %v518_v44  ;;  %v767_v59 = vrot.slane %v751_v48, 1  ;;  %v741_v60 = vadd.f32 %v733_v49, %v1199_v23  ;;  %v747_v9 = vmax.f32 %v739_v50, 0.0 }
  0x3f   :  { %v782_v61 = vmax.f32 %v750_v2, %v766_v34  ;;  %v866_v10 = vmul.f32 %v858_v54, %v1193_v21  ;;  %v872_v18 = vadd.f32 %v864_v19, %v1208_v26  ;;  %v855_v20 = vunpack.c.l.bf16 %v850_v32 }
  0x40   :  { %1088 = vrot.lane.b32.xlu0 %v1087_v58, %s1122_s11  ;;  %v783_v30 = vmax.f32 %v751_v48, %v767_v59  ;;  %v749_v31 = vmax.f32 %v741_v60, 0.0  ;;  %v763_v33 = vrot.slane %v747_v9, 1  ;;  %v862_v35 = vmul.f32 %v854_v56, %v1193_v21 }
  0x41   :  { %v874_v37 = vadd.f32 %v866_v10, %v1199_v23  ;;  %v880_v55 = vmax.f32 %v872_v18, 0.0  ;;  %v863_v38 = vmul.f32 %v855_v20, %v1196_v22  ;;  %v859_v48 = vunpack.c.l.bf16 %v852_v36 }
  0x42   :  { %v1102_v39 = vpack.i.bf16 %v783_v30, %v782_v61  ;;  %v765_v16 = vrot.slane %v749_v31, 1  ;;  %v779_v44 = vmax.f32 %v747_v9, %v763_v33  ;;  %v870_v32 = vadd.f32 %v862_v35, %v1199_v23 }
  0x43   :  { %v882_v2 = vmax.f32 %v874_v37, 0.0  ;;  %v896_v45 = vrot.slane %v880_v55, 1  ;;  %v871_v47 = vadd.f32 %v863_v38, %v1202_v24  ;;  %v860_v50 = vunpack.c.h.bf16 %v852_v36 }
  0x44   :  { %1103 = vrot.lane.b32.xlu1 %v1102_v39, %s1122_s11  ;;  %v1448_v21 = vmax.f32 %v749_v31, %v765_v16  ;;  %v878_v49 = vmax.f32 %v870_v32, 0.0  ;;  %v867_v56 = vmul.f32 %v859_v48, %v1196_v22  ;;  %v20_v38 = vunpack.c.l.bf16 %v1163_v5 }
  0x45   :  { %v898_v34 = vrot.slane %v882_v2, 1  ;;  %v912_v54 = vmax.f32 %v880_v55, %v896_v45  ;;  %v879_v19 = vmax.f32 %v871_v47, 0.0  ;;  %v868_v23 = vmul.f32 %v860_v50, %v1205_v25 }
  0x46   :  { %v1097_v58 = vpack.i.bf16 %v1448_v21, %v779_v44  ;;  %v894_v59 = vrot.slane %v878_v49, 1  ;;  %v875_v61 = vadd.f32 %v867_v56, %v1202_v24  ;;  %v325_v55 = vunpack.c.l.bf16 %v1158_v4 }
  0x47   :  { %v1453_v60 = vmax.f32 %v882_v2, %v898_v34  ;;  %v895_v9 = vrot.slane %v879_v19, 1  ;;  %v876_v18 = vadd.f32 %v868_v23, %v1208_v26  ;;  %v31_v26 = vsub.s32 0, %v1153_v3 }
  0x48   :  { %1098 = vrot.lane.b32.xlu0 %v1097_v58, %s1122_s11  ;;  %v1457_v10 = vmax.f32 %v878_v49, %v894_v59  ;;  %v883_v22 = vmax.f32 %v875_v61, 0.0  ;;  %v329_v3 = vunpack.c.l.bf16 %v1240_v8  ;;  %v591_v5 = vunpack.c.l.bf16 %v1235_v7 }
  0x49   :  { %v1112_v20 = vpack.i.bf16 %v1453_v60, %v912_v54  ;;  %v911_v30 = vmax.f32 %v879_v19, %v895_v9  ;;  %v884_v31 = vmax.f32 %v876_v18, 0.0  ;;  %v1469_v39 = vrot.slane %v1146_v1, %v31_v26 }
  0x4a   :  { %v899_v33 = vrot.slane %v883_v22, 1  ;;  %v1472_v16 = vrot.slane %v1168_v6, %v31_v26  ;;  %v24_v48 = vunpack.c.l.bf16 %v1184_v15  ;;  %v595_v6 = vunpack.c.l.bf16 %v1247_v13 }
  0x4b   :  { %1113 = vrot.lane.b32.xlu1 %v1112_v20, %s1122_s11  ;;  %v1107_v25 = vpack.i.bf16 %v911_v30, %v1457_v10  ;;  %v900_v35 = vrot.slane %v884_v31, 1  ;;  %v49_v44 = vmul.f32 %v1469_v39, %v20_v38  ;;  %v333_v32 = vmul.f32 %v325_v55, %v1469_v39 }
  0x4c   :  { %v915_v24 = vmax.f32 %v883_v22, %v899_v33  ;;  %v337_v1 = vmul.f32 %v329_v3, %v1469_v39  ;;  %v599_v7 = vmul.f32 %v591_v5, %v1469_v39  ;;  %vm177_vm6 = vsmask.f32 4352 }
  0x4d   :  { %1108 = vrot.lane.b32.xlu0 %v1107_v25, %s1122_s11  ;;  %v916_v36 = vmax.f32 %v884_v31, %v900_v35  ;;  %v78_v2 = vadd.f32 %v1472_v16, %v49_v44  ;;  %v341_v45 = vadd.f32 %v333_v32, %v1472_v16  ;;  %vm1823_vm7 = vcmask 783365   ;;  %vm1499_vm10 = vmand %vm176_vm5, %vm177_vm6 }
  0x4e   :  { %v345_v8 = vadd.f32 %v337_v1, %v1472_v16  ;;  %vm443_vm8 = vsmask.f32 5376  ;;  %v607_v25 = vadd.f32 %v599_v7, %v1472_v16  ;;  %vm179_vm13 = vmor %vm1499_vm10, %vm1493_vm9  ;;  %v603_v3 = vmul.f32 %v595_v6, %v1469_v39 }
  0x4f   :  { %v1117_v37 = vpack.i.bf16 %v916_v36, %v915_v24  ;;  %v86_v47 = vmax.f32 %v78_v2, 0.0  ;;  %v349_v4 = vmax.f32 %v341_v45, 0.0  ;;  %v53_v36 = vmul.f32 %v1469_v39, %v24_v48  ;;  %vm1516_vm12 = vmand %vm1823_vm7, %vm443_vm8  ;;  %v180_v45 = vld [vmem:[%s1822_s3] sm:$0x11] }
  0x50   :  { %v353_v31 = vmax.f32 %v345_v8, 0.0  ;;  %v190_v2 = vunpack.c.l.bf16 %v1287_v52  ;;  %v615_v1 = vmax.f32 %v607_v25, 0.0  ;;  %vm445_vm14 = vmor %vm1516_vm12, %vm1506_vm11  ;;  %vm703_vm15 = vcmask 1042434  }
  0x51   :  { %1118 = vrot.lane.b32.xlu0 %v1117_v37, %s1122_s11  ;;  %v102_v34 = vrot.slane %v86_v47, 1  ;;  %v365_v54 = vrot.slane %v349_v4, 1  ;;  %v1540_v48 = vadd.f32 %v1472_v16, %v53_v36  ;;  %vm704_vm3 = vsmask.f32 2304 }
  0x52   :  { %v369_v5 = vrot.slane %v353_v31, 1  ;;  %v631_v7 = vrot.slane %v615_v1, 1  ;;  %vm706_vm4 = vcmask 784390   ;;  %vm707_vm6 = vsmask.f32 6400  ;;  %vm1574_vm8 = vmand %vm703_vm15, %vm704_vm3 }
  0x53   :  { %v118_v15 = vmax.f32 %v86_v47, %v102_v34  ;;  %v381_v13 = vmax.f32 %v349_v4, %v365_v54  ;;  %v198_v34 = vmul.f32 %v190_v2, %v1469_v39  ;;  %vm1582_vm7 = vmand %vm706_vm4, %vm707_vm6  ;;  %vm310_vm11 = vsmask.f32 7938 }
  0x54   :  { %vm709_vm3 = vmor %vm1582_vm7, %vm1574_vm8  ;;  %vm312_vm12 = vsmask.f32 7954  ;;  %vm578_vm7 = vsmask.f32 7958  ;;  %vm838_vm8 = vsmask.f32 7946 }
  0x55   :  { %vm1658_vm9 = vmand %vm176_vm5, %vm312_vm12  ;;  %vm576_vm5 = vsmask.f32 7942  ;;  %vm965_vm12 = vcmask 1043459  }
  0x56   :  { %vm1698_vm10 = vmand %vm439_vm1, %vm576_vm5 }
  0x86   :  { %v1483_v49 = vpop.permute.xlu1 %1028  ;;  %v1019_v50 = vpop.permute.xlu0 %1018 }
  0x87   :  { %v1021_v19 = vunpack.i.h.bf16 %v1019_v50  ;;  %v1020_v56 = vunpack.i.l.bf16 %v1019_v50  ;;  %v1031_v58 = vunpack.i.h.bf16 %v1483_v49  ;;  %v611_v50 = vadd.f32 %v603_v3, %v1472_v16 }
  0x89   :  { %v145_v9 = vsel %vm144_vm0, %v1020_v56, %v1021_v19  ;;  %v385_v56 = vmax.f32 %v353_v31, %v369_v5  ;;  %v619_v31 = vmax.f32 %v611_v50, 0.0 }
  0x8a   :  { %v1034_v59 = vpop.permute.xlu1 %1033  ;;  %v1488_v23 = vpop.permute.xlu0 %1023  ;;  %v153_v26 = vmax.f32 %v118_v15, %v145_v9  ;;  %v90_v9 = vmax.f32 %v1540_v48, 0.0 }
  0x8b   :  { %v1036_v61 = vunpack.i.h.bf16 %v1034_v59  ;;  %v1035_v18 = vunpack.i.l.bf16 %v1034_v59  ;;  %v1025_v30 = vunpack.i.l.bf16 %v1488_v23  ;;  %v635_v3 = vrot.slane %v619_v31, 1 }
  0x8c   :  { %v106_v48 = vrot.slane %v90_v9, 1 }
  0x8d   :  { %v407_v35 = vsel %vm144_vm0, %v1031_v58, %v1035_v18  ;;  %v408_v24 = vsel %vm144_vm0, %v1035_v18, %v1036_v61  ;;  %v146_v37 = vsel %vm144_vm0, %v1021_v19, %v1025_v30  ;;  %v456_v58 = vunpack.c.l.bf16 %v1348_v40 }
  0x8e   :  { %v415_v38 = vmax.f32 %v381_v13, %v407_v35  ;;  %v416_v44 = vmax.f32 %v1228_v62, %v408_v24  ;;  %v154_v32 = vmax.f32 %v1230_v63, %v146_v37  ;;  %v194_v62 = vunpack.c.l.bf16 %v1318_v46  ;;  %v446_v63 = vld [vmem:[%s1822_s3] sm:$0x22] }
  0x8f   :  { %v647_v24 = vmax.f32 %v615_v1, %v631_v7  ;;  %v206_v37 = vadd.f32 %v198_v34, %v1472_v16  ;;  %v464_v5 = vmul.f32 %v456_v58, %v1469_v39  ;;  %v1030_v34 = vunpack.i.l.bf16 %v1483_v49  ;;  %v710_v49 = vld [vmem:[%s1822_s3] sm:$0x44] }
  0x90   :  { %v1006_v47 = vpack.c.bf16 %v416_v44, %v415_v38  ;;  %v1002_v4 = vpack.c.bf16 %v154_v32, %v153_v26  ;;  %v202_v59 = vmul.f32 %v194_v62, %v1469_v39  ;;  %v460_v32 = vunpack.c.l.bf16 %v1340_v28 }
  0x91   :  { %v720_v7 = vunpack.c.l.bf16 %v1358_v51  ;;  %v472_v51 = vadd.f32 %v464_v5, %v1472_v16  ;;  %v122_v58 = vmax.f32 %v90_v9, %v106_v48 }
  0x92   :  { %v990_v52 = vrot.slane %v1006_v47, 9  ;;  %v181_v6 = vsel %vm179_vm13, %v1002_v4, %v180_v45  ;;  %v1044_v46 = vpop.permute.xlu1 %1043  ;;  %v210_v44 = vadd.f32 %v202_v59, %v1472_v16  ;;  %v449_v45 = vld [vmem:[%s1822_s3 + $0x8] sm:$0x22] }
  0x93   :  { %182 = vst [vmem:[%s1822_s3] sm:$0x11] %v181_v6  ;;  %v1045_v19 = vunpack.i.l.bf16 %v1044_v46  ;;  %v1039_v8 = vpop.permute.xlu0 %1038  ;;  %v1046_v61 = vunpack.i.h.bf16 %v1044_v46 }
  0x94   :  { %v447_v54 = vsel %vm445_vm14, %v990_v52, %v446_v63  ;;  %v1041_v15 = vunpack.i.h.bf16 %v1039_v8  ;;  %v1040_v13 = vunpack.i.l.bf16 %v1039_v8  ;;  %v214_v52 = vmax.f32 %v206_v37, 0.0 }
  0x95   :  { %448 = vst [vmem:[%s1822_s3] sm:$0x22] %v447_v54  ;;  %v218_v50 = vmax.f32 %v210_v44, 0.0  ;;  %v1026_v54 = vunpack.i.h.bf16 %v1488_v23  ;;  %v651_v23 = vmax.f32 %v619_v31, %v635_v3 }
  0x96   :  { %v410_v18 = vsel %vm144_vm0, %v1041_v15, %v1045_v19  ;;  %v409_v30 = vsel %vm144_vm0, %v1040_v13, %v1041_v15  ;;  %v1054_v35 = vpop.permute.xlu1 %1053  ;;  %v230_v55 = vrot.slane %v214_v52, 1 }
  0x97   :  { %v418_v40 = vmax.f32 %v1297_v17, %v410_v18  ;;  %v417_v25 = vmax.f32 %v385_v56, %v409_v30  ;;  %v1049_v36 = vpop.permute.xlu0 %1048  ;;  %v1056_v6 = vunpack.i.h.bf16 %v1054_v35  ;;  %v1055_v46 = vunpack.i.l.bf16 %v1054_v35 }
  0x98   :  { %v1051_v26 = vunpack.i.h.bf16 %v1049_v36  ;;  %v1050_v38 = vunpack.i.l.bf16 %v1049_v36  ;;  %v147_v59 = vsel %vm144_vm0, %v1026_v54, %v1030_v34  ;;  %v234_v31 = vrot.slane %v218_v50, 1 }
  0x99   :  { %v1007_v2 = vpack.c.bf16 %v418_v40, %v417_v25  ;;  %v468_v40 = vmul.f32 %v460_v32, %v1469_v39  ;;  %v246_v37 = vmax.f32 %v214_v52, %v230_v55 }
  0x9a   :  { %v673_v47 = vsel %vm144_vm0, %v1046_v61, %v1050_v38  ;;  %v674_v4 = vsel %vm144_vm0, %v1050_v38, %v1051_v26  ;;  %v480_v26 = vmax.f32 %v472_v51, 0.0 }
  0x9b   :  { %v991_v1 = vrot.slane %v1007_v2, 9  ;;  %v681_v62 = vmax.f32 %v647_v24, %v673_v47  ;;  %v682_v63 = vmax.f32 %v1295_v14, %v674_v4  ;;  %v724_v14 = vunpack.c.l.bf16 %v1403_v11 }
  0x9c   :  { %v675_v11 = vsel %vm144_vm0, %v1055_v46, %v1056_v6  ;;  %v250_v4 = vmax.f32 %v218_v50, %v234_v31  ;;  %v476_v52 = vadd.f32 %v468_v40, %v1472_v16  ;;  %v496_v54 = vrot.slane %v480_v26, 1  ;;  %v315_v40 = vld [vmem:[%s1822_s3] sm:$0x11] }
  0x9d   :  { %v450_v19 = vsel %vm445_vm14, %v991_v1, %v449_v45  ;;  %v1010_v56 = vpack.c.bf16 %v682_v63, %v681_v62  ;;  %v683_v36 = vmax.f32 %v651_v23, %v675_v11  ;;  %v155_v45 = vmax.f32 %v122_v58, %v147_v59  ;;  %v183_v1 = vld [vmem:[%s1822_s3 + $0x8] sm:$0x11]  ;;  %vm1646_vm14 = vmand %vm173_vm2, %vm310_vm11 }
  0x9e   :  { %v1064_v8 = vpop.permute.xlu1 %1063  ;;  %451 = vst [vmem:[%s1822_s3 + $0x8] sm:$0x22] %v450_v19  ;;  %v728_v19 = vmul.f32 %v720_v7, %v1469_v39  ;;  %v732_v22 = vmul.f32 %v724_v14, %v1469_v39  ;;  %v484_v51 = vmax.f32 %v476_v52, 0.0  ;;  %v853_v58 = vunpack.c.l.bf16 %v1426_v42  ;;  %vm314_vm2 = vmor %vm1658_vm9, %vm1646_vm14 }
  0x9f   :  { %v699_v33 = vrot.slane %v1010_v56, 6  ;;  %v1066_v15 = vunpack.i.h.bf16 %v1064_v8  ;;  %v1065_v13 = vunpack.i.l.bf16 %v1064_v8  ;;  %v512_v11 = vmax.f32 %v480_v26, %v496_v54  ;;  %vm1739_vm11 = vmand %vm703_vm15, %vm838_vm8 }
  0xa0   :  { %v740_v31 = vadd.f32 %v732_v22, %v1472_v16  ;;  %vm966_vm14 = vsmask.f32 3328  ;;  %vm968_vm15 = vcmask 785415  }
  0xa1   :  { %v711_v61 = vsel %vm709_vm3, %v699_v33, %v710_v49  ;;  %v1059_v18 = vpop.permute.xlu0 %1058  ;;  %v272_v38 = vsel %vm144_vm0, %v1065_v13, %v1066_v15  ;;  %v736_v13 = vadd.f32 %v728_v19, %v1472_v16  ;;  %vm1766_vm5 = vmand %vm965_vm12, %vm966_vm14 }
  0xa2   :  { %v1074_v30 = vpop.permute.xlu1 %1073  ;;  %712 = vst [vmem:[%s1822_s3] sm:$0x44] %v711_v61  ;;  %v1061_v9 = vunpack.i.h.bf16 %v1059_v18  ;;  %v1060_v25 = vunpack.i.l.bf16 %v1059_v18  ;;  %v280_v48 = vmax.f32 %v246_v37, %v272_v38 }
  0xa3   :  { %v1076_v35 = vunpack.i.h.bf16 %v1074_v30  ;;  %v1075_v24 = vunpack.i.l.bf16 %v1074_v30  ;;  %v500_v30 = vrot.slane %v484_v51, 1 }
  0xa4   :  { %v148_v44 = vsel %vm144_vm0, %v1030_v34, %v1061_v9  ;;  %v676_v2 = vsel %vm144_vm0, %v1056_v6, %v1060_v25 }
  0xa5   :  { %v275_v32 = vsel %vm144_vm0, %v1075_v24, %v1076_v35  ;;  %v156_v3 = vmax.f32 %v1242_v12, %v148_v44  ;;  %v684_v47 = vmax.f32 %v1299_v29, %v676_v2  ;;  %v1069_v5 = vpop.permute.xlu0 %1068  ;;  %v713_v12 = vld [vmem:[%s1822_s3 + $0x8] sm:$0x44]  ;;  %v861_v35 = vmul.f32 %v853_v58, %v1469_v39 }
  0xa6   :  { %v1071_v62 = vunpack.i.h.bf16 %v1069_v5  ;;  %v1070_v63 = vunpack.i.l.bf16 %v1069_v5  ;;  %v283_v34 = vmax.f32 %v1366_v57, %v275_v32  ;;  %v744_v44 = vmax.f32 %v736_v13, 0.0 }
  0xa7   :  { %v1003_v6 = vpack.c.bf16 %v156_v3, %v155_v45  ;;  %v1011_v46 = vpack.c.bf16 %v684_v47, %v683_v36  ;;  %v516_v47 = vmax.f32 %v484_v51, %v500_v30  ;;  %v748_v5 = vmax.f32 %v740_v31, 0.0 }
  0xa8   :  { %v274_v29 = vsel %vm144_vm0, %v1071_v62, %v1075_v24  ;;  %v273_v50 = vsel %vm144_vm0, %v1066_v15, %v1070_v63  ;;  %v857_v24 = vunpack.c.l.bf16 %v1421_v41  ;;  %v869_v63 = vadd.f32 %v861_v35, %v1472_v16 }
  0xa9   :  { %v184_v56 = vsel %vm179_vm13, %v1003_v6, %v183_v1  ;;  %v700_v8 = vrot.slane %v1011_v46, 6  ;;  %v282_v49 = vmax.f32 %v250_v4, %v274_v29  ;;  %v281_v57 = vmax.f32 %v1333_v0, %v273_v50 }
  0xaa   :  { %185 = vst [vmem:[%s1822_s3 + $0x8] sm:$0x11] %v184_v56  ;;  %v1084_v7 = vpop.permute.xlu1 %1083  ;;  %vm1842_vm13 = vcmask 783365   ;;  %v865_v52 = vmul.f32 %v857_v24, %v1469_v39  ;;  %v760_v6 = vrot.slane %v744_v44, 1  ;;  %v581_v39 = vld [vmem:[%s1822_s3] sm:$0x22] }
  0xab   :  { %v714_v20 = vsel %vm709_vm3, %v700_v8, %v713_v12  ;;  %v1005_v33 = vpack.c.bf16 %v283_v34, %v282_v49  ;;  %v1004_v55 = vpack.c.bf16 %v281_v57, %v280_v48  ;;  %v1085_v28 = vunpack.i.l.bf16 %v1084_v7  ;;  %vm1707_vm6 = vmand %vm1842_vm13, %vm578_vm7 }
  0xac   :  { %715 = vst [vmem:[%s1822_s3 + $0x8] sm:$0x44] %v714_v20  ;;  %v1086_v32 = vunpack.i.h.bf16 %v1084_v7  ;;  %vm580_vm1 = vmor %vm1707_vm6, %vm1698_vm10  ;;  %v764_v8 = vrot.slane %v748_v5, 1  ;;  %v877_v23 = vmax.f32 %v869_v63, 0.0  ;;  %v873_v7 = vadd.f32 %v865_v52, %v1472_v16  ;;  %v843_v52 = vld [vmem:[%s1822_s3] sm:$0x44] }
  0xad   :  { %v304_v14 = vshll.u32 %v1005_v33, 16  ;;  %v299_v17 = vshll.u32 %v1004_v55, 16  ;;  %v1079_v15 = vpop.permute.xlu0 %1078  ;;  %v776_v20 = vmax.f32 %v744_v44, %v760_v6  ;;  %vm840_vm3 = vsmask.f32 7962 }
  0xae   :  { %v1081_v59 = vunpack.i.h.bf16 %v1079_v15  ;;  %v1080_v42 = vunpack.i.l.bf16 %v1079_v15  ;;  %v780_v51 = vmax.f32 %v748_v5, %v764_v8  ;;  %vm1752_vm9 = vmand %vm706_vm4, %vm840_vm3 }
  0xaf   :  { %v987_v61 = vrot.slane %v304_v14, 9  ;;  %v986_v18 = vrot.slane %v299_v17, 9  ;;  %v1094_v2 = vpop.permute.xlu1 %1093  ;;  %v893_v14 = vrot.slane %v877_v23, 1  ;;  %v881_v17 = vmax.f32 %v873_v7, 0.0  ;;  %vm842_vm4 = vmor %vm1752_vm9, %vm1739_vm11 }
  0xb0   :  { %v539_v9 = vsel %vm144_vm0, %v1081_v59, %v1085_v28  ;;  %v538_v25 = vsel %vm144_vm0, %v1080_v42, %v1081_v59  ;;  %v1096_v46 = vunpack.i.h.bf16 %v1094_v2  ;;  %v1095_v34 = vunpack.i.l.bf16 %v1094_v2  ;;  %v584_v59 = vld [vmem:[%s1822_s3 + $0x8] sm:$0x22] }
  0xb1   :  { %v316_v36 = vsel %vm314_vm2, %v986_v18, %v315_v40  ;;  %v318_v37 = vld [vmem:[%s1822_s3 + $0x8] sm:$0x11]  ;;  %v547_v26 = vmax.f32 %v1394_v53, %v539_v9  ;;  %v546_v38 = vmax.f32 %v512_v11, %v538_v25  ;;  %v909_v35 = vmax.f32 %v877_v23, %v893_v14 }
  0xb2   :  { %317 = vst [vmem:[%s1822_s3] sm:$0x11] %v316_v36  ;;  %v319_v41 = vsel %vm314_vm2, %v987_v61, %v318_v37  ;;  %v1089_v4 = vpop.permute.xlu0 %1088  ;;  %vm969_vm2 = vsmask.f32 7424  ;;  %v897_v36 = vrot.slane %v881_v17, 1 }
  0xb3   :  { %320 = vst [vmem:[%s1822_s3 + $0x8] sm:$0x11] %v319_v41  ;;  %v1008_v3 = vpack.c.bf16 %v547_v26, %v546_v38  ;;  %v1091_v1 = vunpack.i.h.bf16 %v1089_v4  ;;  %v1090_v62 = vunpack.i.l.bf16 %v1089_v4  ;;  %vm1773_vm7 = vmand %vm968_vm15, %vm969_vm2 }
  0xb4   :  { %vm971_vm10 = vmor %vm1773_vm7, %vm1766_vm5 }
  0xb5   :  { %v565_v48 = vshll.u32 %v1008_v3, 16  ;;  %v540_v12 = vsel %vm144_vm0, %v1086_v32, %v1090_v62  ;;  %v541_v29 = vsel %vm144_vm0, %v1090_v62, %v1091_v1  ;;  %v913_v62 = vmax.f32 %v881_v17, %v897_v36 }
  0xb6   :  { %v548_v54 = vmax.f32 %v516_v47, %v540_v12  ;;  %v549_v19 = vmax.f32 %v1388_v43, %v541_v29  ;;  %v1104_v56 = vpop.permute.xlu1 %1103  ;;  %v802_v43 = vsel %vm144_vm0, %v1095_v34, %v1096_v46  ;;  %v972_v29 = vld [vmem:[%s1822_s3] sm:$0x88] }
  0xb7   :  { %v994_v50 = vrot.slane %v565_v48, 10  ;;  %v1106_v49 = vunpack.i.h.bf16 %v1104_v56  ;;  %v1105_v57 = vunpack.i.l.bf16 %v1104_v56  ;;  %v810_v11 = vmax.f32 %v776_v20, %v802_v43  ;;  %v846_v48 = vld [vmem:[%s1822_s3 + $0x8] sm:$0x44] }
  0xb8   :  { %v1009_v0 = vpack.c.bf16 %v549_v19, %v548_v54 }
  0xb9   :  { %v582_v22 = vsel %vm580_vm1, %v994_v50, %v581_v39  ;;  %v805_v33 = vsel %vm144_vm0, %v1105_v57, %v1106_v49 }
  0xba   :  { %583 = vst [vmem:[%s1822_s3] sm:$0x22] %v582_v22  ;;  %v570_v55 = vshll.u32 %v1009_v0, 16  ;;  %v1099_v16 = vpop.permute.xlu0 %1098  ;;  %v813_v13 = vmax.f32 %v1448_v21, %v805_v33 }
  0xbb   :  { %v1101_v58 = vunpack.i.h.bf16 %v1099_v16  ;;  %v1100_v28 = vunpack.i.l.bf16 %v1099_v16 }
  0xbc   :  { %v995_v15 = vrot.slane %v570_v55, 10 }
  0xbd   :  { %v804_v61 = vsel %vm144_vm0, %v1101_v58, %v1105_v57  ;;  %v803_v18 = vsel %vm144_vm0, %v1096_v46, %v1100_v28  ;;  %v1114_v30 = vpop.permute.xlu1 %1113  ;;  %v975_v57 = vld [vmem:[%s1822_s3 + $0x8] sm:$0x88] }
  0xbe   :  { %v585_v21 = vsel %vm580_vm1, %v995_v15, %v584_v59  ;;  %v812_v40 = vmax.f32 %v780_v51, %v804_v61  ;;  %v811_v9 = vmax.f32 %v1407_v27, %v803_v18  ;;  %v1115_v25 = vunpack.i.l.bf16 %v1114_v30 }
  0xbf   :  { %586 = vst [vmem:[%s1822_s3 + $0x8] sm:$0x22] %v585_v21  ;;  %v1109_v24 = vpop.permute.xlu0 %1108  ;;  %v1116_v53 = vunpack.i.h.bf16 %v1114_v30 }
  0xc0   :  { %v1013_v37 = vpack.c.bf16 %v813_v13, %v812_v40  ;;  %v1012_v26 = vpack.c.bf16 %v811_v9, %v810_v11  ;;  %v1111_v38 = vunpack.i.h.bf16 %v1109_v24  ;;  %v1110_v44 = vunpack.i.l.bf16 %v1109_v24 }
  0xc2   :  { %v833_v27 = vshll.u32 %v1013_v37, 16  ;;  %v829_v2 = vshll.u32 %v1012_v26, 16  ;;  %v936_v32 = vsel %vm144_vm0, %v1111_v38, %v1115_v25  ;;  %v935_v45 = vsel %vm144_vm0, %v1110_v44, %v1111_v38 }
  0xc3   :  { %v944_v47 = vmax.f32 %v1457_v10, %v936_v32  ;;  %v943_v4 = vmax.f32 %v909_v35, %v935_v45  ;;  %v1119_v63 = vpop.permute.xlu0 %1118 }
  0xc4   :  { %v835_v5 = vrot.slane %v833_v27, 7  ;;  %v831_v1 = vrot.slane %v829_v2, 7  ;;  %v1121_v46 = vunpack.i.h.bf16 %v1119_v63  ;;  %v1120_v34 = vunpack.i.l.bf16 %v1119_v63 }
  0xc5   :  { %v1014_v6 = vpack.c.bf16 %v944_v47, %v943_v4 }
  0xc6   :  { %v844_v10 = vsel %vm842_vm4, %v831_v1, %v843_v52  ;;  %v847_v12 = vsel %vm842_vm4, %v835_v5, %v846_v48  ;;  %v937_v54 = vsel %vm144_vm0, %v1116_v53, %v1120_v34  ;;  %v938_v19 = vsel %vm144_vm0, %v1120_v34, %v1121_v46 }
  0xc7   :  { %845 = vst [vmem:[%s1822_s3] sm:$0x44] %v844_v10  ;;  %848 = vst [vmem:[%s1822_s3 + $0x8] sm:$0x44] %v847_v12  ;;  %v961_v50 = vrot.slane %v1014_v6, 7  ;;  %v945_v56 = vmax.f32 %v913_v62, %v937_v54  ;;  %v946_v8 = vmax.f32 %v1453_v60, %v938_v19 }
  0xc9   :  { %v973_v39 = vsel %vm971_vm10, %v961_v50, %v972_v29  ;;  %v1015_v49 = vpack.c.bf16 %v946_v8, %v945_v56 }
  0xca   :  { %974 = vst [vmem:[%s1822_s3] sm:$0x88] %v973_v39 }
  0xcb   :  { %v962_v23 = vrot.slane %v1015_v49, 7 }
  0xcd   :  { %v976_v7 = vsel %vm971_vm10, %v962_v23, %v975_v57 }
  0xce   :  { %977 = vst [vmem:[%s1822_s3 + $0x8] sm:$0x88] %v976_v7 }

// kernel: cnn_forward.9
= control target key start
LH: loop header
LB: loop body
LE: loop exit
PB: predicated region body
PF: predicated region fallthrough
CT: control target
= control target key end

     0   :  { %v227_v29 = vlaneseq  ;;  %v1582_v35 = vmov 1966171168   ;;  %s1939_s0 = inlined_call_operand.vmem [shape: bf16[2,1568], index: 0, kind: input, shape index: {}]   ;;  %s1940_s1 = inlined_call_operand.vmem [shape: bf16[1568,10], index: 1, kind: input, shape index: {}]   ;;  %s1941_s2 = inlined_call_operand.vmem [shape: f32[1,10], index: 2, kind: input, shape index: {}]   ;;  %s1942_s3 = inlined_call_operand.hbm [shape: f32[2,10], index: 3, kind: output, shape index: {}]  }
   0x1   :  { %v1458_v0 = vld [vmem:[%s1940_s1 + $0x40] sm:$0xff]   ;;  %v1462_v4 = vld [vmem:[%s1940_s1 + $0x48] sm:$0xff]   ;;  %v1466_v8 = vld [vmem:[%s1940_s1 + $0x50] sm:$0xff]   ;;  %v225_v36 = vunpack.c.l.s4 %v1582_v35 }
   0x2   :  { %v1459_v1 = vld [vmem:[%s1940_s1] sm:$0xff]   ;;  %1311 = vmatprep.subr.bf16.mxu0 %v1458_v0  ;;  %v1463_v5 = vld [vmem:[%s1940_s1 + $0x8] sm:$0xff]   ;;  %v1467_v9 = vld [vmem:[%s1940_s1 + $0x10] sm:$0xff]   ;;  %v228_v33 = vshrl.u32 %v227_v29, 7 }
   0x3   :  { %v1460_v2 = vld [vmem:[%s1940_s1 + $0xc0] sm:$0xff]   ;;  %1312 = vmatpush3.bf16.msra.mxu0 %v1459_v1  ;;  %v1464_v6 = vld [vmem:[%s1940_s1 + $0xc8] sm:$0xff]   ;;  %v1468_v10 = vld [vmem:[%s1940_s1 + $0xd0] sm:$0xff]   ;;  %v226_v39 = vunpack.c.0.s8 %v225_v36 }
   0x4   :  { %v1461_v3 = vld [vmem:[%s1940_s1 + $0x80] sm:$0xff]   ;;  %1333 = vmatprep.subr.bf16.mxu1 %v1460_v2  ;;  %1313 = vmatprep.subr.bf16.mxu0 %v1462_v4  ;;  %v1465_v7 = vld [vmem:[%s1940_s1 + $0x88] sm:$0xff]   ;;  %v1469_v11 = vld [vmem:[%s1940_s1 + $0x90] sm:$0xff]  }
   0x5   :  { %1334 = vmatpush3.bf16.msra.mxu1 %v1461_v3  ;;  %v1470_v12 = vld [vmem:[%s1940_s1 + $0x58] sm:$0xff]   ;;  %v1474_v16 = vld [vmem:[%s1940_s1 + $0x60] sm:$0xff]   ;;  %v1478_v20 = vld [vmem:[%s1940_s1 + $0x68] sm:$0xff]   ;;  %v1711_v41 = vsub.s32 %v226_v39, %v228_v33 }
   0x6   :  { %1335 = vmatprep.subr.bf16.mxu1 %v1464_v6  ;;  %v1471_v13 = vld [vmem:[%s1940_s1 + $0x18] sm:$0xff]   ;;  %v1475_v17 = vld [vmem:[%s1940_s1 + $0x20] sm:$0xff]   ;;  %v1479_v21 = vld [vmem:[%s1940_s1 + $0x28] sm:$0xff]  }
   0x7   :  { %1314 = vmatpush3.bf16.msra.mxu0 %v1463_v5  ;;  %v1472_v14 = vld [vmem:[%s1940_s1 + $0xd8] sm:$0xff]   ;;  %v1476_v18 = vld [vmem:[%s1940_s1 + $0xe0] sm:$0xff]   ;;  %v1480_v22 = vld [vmem:[%s1940_s1 + $0xe8] sm:$0xff]  }
   0x8   :  { %1315 = vmatprep.subr.bf16.mxu0 %v1466_v8  ;;  %v1473_v15 = vld [vmem:[%s1940_s1 + $0x98] sm:$0xff]   ;;  %v1477_v19 = vld [vmem:[%s1940_s1 + $0xa0] sm:$0xff]   ;;  %v1481_v23 = vld [vmem:[%s1940_s1 + $0xa8] sm:$0xff]  }
   0x9   :  { %1336 = vmatpush3.bf16.msra.mxu1 %v1465_v7  ;;  %v1482_v24 = vld [vmem:[%s1940_s1 + $0x70] sm:$0xff]   ;;  %v1486_v28 = vld [vmem:[%s1940_s1 + $0x78] sm:$0xff]   ;;  %v1491_v34 = vld [vmem:[%s1940_s1 + $0x140] sm:$0xff]  }
   0xa   :  { %1337 = vmatprep.subr.bf16.mxu1 %v1468_v10  ;;  %v1483_v25 = vld [vmem:[%s1940_s1 + $0x30] sm:$0xff]   ;;  %v1487_v30 = vld [vmem:[%s1940_s1 + $0x38] sm:$0xff]   ;;  %v16_v37 = vld [vmem:[%s1939_s0] sm:$0xff] }
   0xb   :  { %1316 = vmatpush3.bf16.msra.mxu0 %v1467_v9  ;;  %v1484_v26 = vld [vmem:[%s1940_s1 + $0xf0] sm:$0xff]   ;;  %v1488_v31 = vld [vmem:[%s1940_s1 + $0xf8] sm:$0xff]   ;;  %v223_v38 = vcombine.high %v16_v37, %v16_v37  ;;  %v1493_v40 = vld [vmem:[%s1940_s1 + $0x1c0] sm:$0xff]   ;;  %v230_v42 = vrot.slane %v16_v37, %v1711_v41 }
   0xc   :  { %1317 = vmatprep.subr.bf16.mxu0 %v1470_v12  ;;  %v1485_v27 = vld [vmem:[%s1940_s1 + $0xb0] sm:$0xff]   ;;  %v1489_v32 = vld [vmem:[%s1940_s1 + $0xb8] sm:$0xff]   ;;  %v1492_v48 = vld [vmem:[%s1940_s1 + $0x100] sm:$0xff]  }
   0xd   :  { %1338 = vmatpush3.bf16.msra.mxu1 %v1469_v11  ;;  %v1715_v43 = vrot.slane %v223_v38, %v1711_v41  ;;  %v238_v44 = vcombine.high %v230_v42, %v230_v42  ;;  %v246_v45 = vrot.slane %v230_v42, %v1711_v41  ;;  %v1495_v51 = vld [vmem:[%s1940_s1 + $0x148] sm:$0xff]   ;;  %v1494_v53 = vld [vmem:[%s1940_s1 + $0x180] sm:$0xff]   ;;  %v1499_v57 = vld [vmem:[%s1940_s1 + $0x150] sm:$0xff]  }
   0xe   :  { %1339 = vmatprep.subr.bf16.mxu1 %v1472_v14  ;;  %v1497_v54 = vld [vmem:[%s1940_s1 + $0x1c8] sm:$0xff]   ;;  %v1501_v59 = vld [vmem:[%s1940_s1 + $0x1d0] sm:$0xff]   ;;  %v1503_v61 = vld [vmem:[%s1940_s1 + $0x158] sm:$0xff]  }
   0xf   :  { %1318 = vmatpush3.bf16.msra.mxu0 %v1471_v13  ;;  %v239_v46 = vcombine.high %v1715_v43, %v1715_v43  ;;  %v260_v47 = vrot.slane %v238_v44, %v1711_v41  ;;  %v268_v50 = vcombine.high %v246_v45, %v246_v45  ;;  %v1496_v56 = vld [vmem:[%s1940_s1 + $0x108] sm:$0xff]   ;;  %v1500_v60 = vld [vmem:[%s1940_s1 + $0x110] sm:$0xff]   ;;  %v1505_v63 = vld [vmem:[%s1940_s1 + $0x1d8] sm:$0xff]  }
  0x10   :  { %1319 = vmatprep.subr.bf16.mxu0 %v1474_v16  ;;  %v1498_v58 = vld [vmem:[%s1940_s1 + $0x188] sm:$0xff]   ;;  %v1502_v62 = vld [vmem:[%s1940_s1 + $0x190] sm:$0xff]   ;;  %v1504_v0 = vld [vmem:[%s1940_s1 + $0x118] sm:$0xff]  }
  0x11   :  { %1340 = vmatpush3.bf16.msra.mxu1 %v1473_v15  ;;  %v267_v49 = vrot.slane %v239_v46, %v1711_v41  ;;  %947 = vmatprep.mubr.bf16.mxu0 %v260_v47  ;;  %v270_v52 = vcombine.high %v260_v47, %v260_v47  ;;  %v1507_v1 = vld [vmem:[%s1940_s1 + $0x160] sm:$0xff]   ;;  %v1506_v2 = vld [vmem:[%s1940_s1 + $0x198] sm:$0xff]   ;;  %v1511_v5 = vld [vmem:[%s1940_s1 + $0x168] sm:$0xff]  }
  0x12   :  { %1341 = vmatprep.subr.bf16.mxu1 %v1476_v18  ;;  %v1509_v3 = vld [vmem:[%s1940_s1 + $0x1e0] sm:$0xff]   ;;  %v1513_v7 = vld [vmem:[%s1940_s1 + $0x1e8] sm:$0xff]   ;;  %v1515_v9 = vld [vmem:[%s1940_s1 + $0x170] sm:$0xff]  }
  0x13   :  { %1320 = vmatpush3.bf16.msra.mxu0 %v1475_v17  ;;  %v271_v55 = vcombine.high %v267_v49, %v267_v49  ;;  %987 = vmatprep.mubr.bf16.mxu1 %v270_v52  ;;  %v1508_v4 = vld [vmem:[%s1940_s1 + $0x120] sm:$0xff]   ;;  %v1512_v8 = vld [vmem:[%s1940_s1 + $0x128] sm:$0xff]   ;;  %v1517_v11 = vld [vmem:[%s1940_s1 + $0x1f0] sm:$0xff]   ;;  %v253_v17 = vrot.slane %v1715_v43, %v1711_v41 }
  0x14   :  { %1321 = vmatprep.subr.bf16.mxu0 %v1478_v20  ;;  %v1510_v6 = vld [vmem:[%s1940_s1 + $0x1a0] sm:$0xff]   ;;  %v1514_v10 = vld [vmem:[%s1940_s1 + $0x1a8] sm:$0xff]   ;;  %v1516_v12 = vld [vmem:[%s1940_s1 + $0x130] sm:$0xff]  }
  0x15   :  { %1342 = vmatpush3.bf16.msra.mxu1 %v1477_v19  ;;  %v1519_v13 = vld [vmem:[%s1940_s1 + $0x178] sm:$0xff]   ;;  %v1518_v14 = vld [vmem:[%s1940_s1 + $0x1b0] sm:$0xff]   ;;  %v1523_v18 = vld [vmem:[%s1940_s1 + $0x240] sm:$0xff]  }
  0x16   :  { %1343 = vmatprep.subr.bf16.mxu1 %v1480_v22  ;;  %v1521_v15 = vld [vmem:[%s1940_s1 + $0x1f8] sm:$0xff]   ;;  %v1525_v20 = vld [vmem:[%s1940_s1 + $0x2c0] sm:$0xff]   ;;  %v269_v22 = vcombine.high %v253_v17, %v253_v17  ;;  %v1533_v29 = vld [vmem:[%s1940_s1 + $0x2d0] sm:$0xff]  }
  0x17   :  { %1322 = vmatpush3.bf16.msra.mxu0 %v1479_v21  ;;  %v1520_v16 = vld [vmem:[%s1940_s1 + $0x138] sm:$0xff]   ;;  %v1524_v21 = vld [vmem:[%s1940_s1 + $0x200] sm:$0xff]   ;;  %v1543_v39 = vld [vmem:[%s1940_s1 + $0x268] sm:$0xff]  }
  0x18   :  { %1323 = vmatprep.subr.bf16.mxu0 %v1482_v24  ;;  %v1522_v19 = vld [vmem:[%s1940_s1 + $0x1b8] sm:$0xff]   ;;  %v1526_v24 = vld [vmem:[%s1940_s1 + $0x280] sm:$0xff]   ;;  %v1545_v42 = vld [vmem:[%s1940_s1 + $0x2e8] sm:$0xff]  }
  0x19   :  { %1344 = vmatpush3.bf16.msra.mxu1 %v1481_v23  ;;  %v1527_v23 = vld [vmem:[%s1940_s1 + $0x248] sm:$0xff]   ;;  %v1537_v33 = vld [vmem:[%s1940_s1 + $0x2d8] sm:$0xff]   ;;  %v1539_v35 = vld [vmem:[%s1940_s1 + $0x260] sm:$0xff]  }
  0x1a   :  { %1345 = vmatprep.subr.bf16.mxu1 %v1484_v26  ;;  %v1528_v26 = vld [vmem:[%s1940_s1 + $0x208] sm:$0xff]   ;;  %v1538_v36 = vld [vmem:[%s1940_s1 + $0x298] sm:$0xff]   ;;  %v1541_v37 = vld [vmem:[%s1940_s1 + $0x2e0] sm:$0xff]  }
  0x1b   :  { %1324 = vmatpush3.bf16.msra.mxu0 %v1483_v25  ;;  %v1529_v25 = vld [vmem:[%s1940_s1 + $0x2c8] sm:$0xff]   ;;  %v1540_v38 = vld [vmem:[%s1940_s1 + $0x220] sm:$0xff]   ;;  %v1547_v44 = vld [vmem:[%s1940_s1 + $0x270] sm:$0xff]  }
  0x1c   :  { %1325 = vmatprep.subr.bf16.mxu0 %v1486_v28  ;;  %v1530_v28 = vld [vmem:[%s1940_s1 + $0x288] sm:$0xff]  }
  0x1d   :  { %1346 = vmatpush3.bf16.msra.mxu1 %v1485_v27  ;;  %v1531_v27 = vld [vmem:[%s1940_s1 + $0x250] sm:$0xff]   ;;  %v1544_v43 = vld [vmem:[%s1940_s1 + $0x228] sm:$0xff]  }
  0x1e   :  { %1347 = vmatprep.subr.bf16.mxu1 %v1488_v31  ;;  %v1535_v31 = vld [vmem:[%s1940_s1 + $0x258] sm:$0xff]   ;;  %v1546_v46 = vld [vmem:[%s1940_s1 + $0x2a8] sm:$0xff]  }
  0x1f   :  { %1326 = vmatpush3.bf16.msra.mxu0 %v1487_v30  ;;  %v1532_v30 = vld [vmem:[%s1940_s1 + $0x210] sm:$0xff]  }
  0x20   :  { %1355 = vmatprep.subr.bf16.mxu0 %v1491_v34  ;;  %v1536_v34 = vld [vmem:[%s1940_s1 + $0x218] sm:$0xff]  }
  0x21   :  { %1348 = vmatpush3.bf16.msra.mxu1 %v1489_v32  ;;  %v1534_v32 = vld [vmem:[%s1940_s1 + $0x290] sm:$0xff]  }
  0x22   :  { %1377 = vmatprep.subr.bf16.mxu1 %v1493_v40  ;;  %948 = vmatmul.mubr.bf16.vlgmr.msra.gmra.mrb[0].mxu0 %v246_v45  ;;  %v1542_v40 = vld [vmem:[%s1940_s1 + $0x2a0] sm:$0xff]   ;;  %v17_v45 = vld [vmem:[%s1939_s0 + $0x8] sm:$0x1f] }
  0x23   :  { %1356 = vmatpush3.bf16.msra.mxu0 %v1492_v48  ;;  %1027 = vmatprep.mubr.bf16.mxu0 %v267_v49  ;;  %v279_v47 = vrot.slane %v17_v45, %v1711_v41  ;;  %v1549_v48 = vld [vmem:[%s1940_s1 + $0x2f0] sm:$0xff]  }
  0x24   :  { %988 = vmatmul.mubr.bf16.vlgmr.msra.gmra.mrb[0].mxu1 %v268_v50  ;;  %1357 = vmatprep.subr.bf16.mxu0 %v1495_v51 }
  0x25   :  { %1378 = vmatpush3.bf16.msra.mxu1 %v1494_v53  ;;  %1067 = vmatprep.mubr.bf16.mxu1 %v271_v55 }
  0x26   :  { %1379 = vmatprep.subr.bf16.mxu1 %v1497_v54 }
  0x27   :  { %1358 = vmatpush3.bf16.msra.mxu0 %v1496_v56 }
  0x28   :  { %1359 = vmatprep.subr.bf16.mxu0 %v1499_v57 }
  0x29   :  { %1380 = vmatpush3.bf16.msra.mxu1 %v1498_v58 }
  0x2a   :  { %1381 = vmatprep.subr.bf16.mxu1 %v1501_v59 }
  0x2b   :  { %1360 = vmatpush3.bf16.msra.mxu0 %v1500_v60 }
  0x2c   :  { %1361 = vmatprep.subr.bf16.mxu0 %v1503_v61 }
  0x2d   :  { %1382 = vmatpush3.bf16.msra.mxu1 %v1502_v62 }
  0x2e   :  { %1383 = vmatprep.subr.bf16.mxu1 %v1505_v63 }
  0x2f   :  { %1362 = vmatpush3.bf16.msra.mxu0 %v1504_v0 }
  0x30   :  { %1363 = vmatprep.subr.bf16.mxu0 %v1507_v1 }
  0x31   :  { %1384 = vmatpush3.bf16.msra.mxu1 %v1506_v2 }
  0x32   :  { %1385 = vmatprep.subr.bf16.mxu1 %v1509_v3 }
  0x33   :  { %1364 = vmatpush3.bf16.msra.mxu0 %v1508_v4 }
  0x34   :  { %1365 = vmatprep.subr.bf16.mxu0 %v1511_v5 }
  0x35   :  { %1386 = vmatpush3.bf16.msra.mxu1 %v1510_v6 }
  0x36   :  { %1387 = vmatprep.subr.bf16.mxu1 %v1513_v7 }
  0x37   :  { %1366 = vmatpush3.bf16.msra.mxu0 %v1512_v8 }
  0x38   :  { %1367 = vmatprep.subr.bf16.mxu0 %v1515_v9 }
  0x39   :  { %1388 = vmatpush3.bf16.msra.mxu1 %v1514_v10 }
  0x3a   :  { %1389 = vmatprep.subr.bf16.mxu1 %v1517_v11 }
  0x3b   :  { %1368 = vmatpush3.bf16.msra.mxu0 %v1516_v12 }
  0x3c   :  { %1369 = vmatprep.subr.bf16.mxu0 %v1519_v13 }
  0x3d   :  { %1390 = vmatpush3.bf16.msra.mxu1 %v1518_v14 }
  0x3e   :  { %1391 = vmatprep.subr.bf16.mxu1 %v1521_v15 }
  0x3f   :  { %1370 = vmatpush3.bf16.msra.mxu0 %v1520_v16 }
  0x40   :  { %1399 = vmatprep.subr.bf16.mxu0 %v1523_v18 }
  0x41   :  { %1392 = vmatpush3.bf16.msra.mxu1 %v1522_v19 }
  0x42   :  { %1028 = vmatmul.mubr.bf16.vlgmr.msra.gmra.mrb[4].mxu0 %v253_v17  ;;  %1421 = vmatprep.subr.bf16.mxu1 %v1525_v20 }
  0x43   :  { %1400 = vmatpush3.bf16.msra.mxu0 %v1524_v21 }
  0x44   :  { %1068 = vmatmul.mubr.bf16.vlgmr.msra.gmra.mrb[4].mxu1 %v269_v22  ;;  %1401 = vmatprep.subr.bf16.mxu0 %v1527_v23 }
  0x45   :  { %1422 = vmatpush3.bf16.msra.mxu1 %v1526_v24 }
  0x46   :  { %1423 = vmatprep.subr.bf16.mxu1 %v1529_v25 }
  0x47   :  { %1402 = vmatpush3.bf16.msra.mxu0 %v1528_v26 }
  0x48   :  { %1403 = vmatprep.subr.bf16.mxu0 %v1531_v27 }
  0x49   :  { %1424 = vmatpush3.bf16.msra.mxu1 %v1530_v28 }
  0x4a   :  { %1425 = vmatprep.subr.bf16.mxu1 %v1533_v29 }
  0x4b   :  { %1404 = vmatpush3.bf16.msra.mxu0 %v1532_v30 }
  0x4c   :  { %1405 = vmatprep.subr.bf16.mxu0 %v1535_v31 }
  0x4d   :  { %1426 = vmatpush3.bf16.msra.mxu1 %v1534_v32 }
  0x4e   :  { %1427 = vmatprep.subr.bf16.mxu1 %v1537_v33 }
  0x4f   :  { %1406 = vmatpush3.bf16.msra.mxu0 %v1536_v34 }
  0x50   :  { %1407 = vmatprep.subr.bf16.mxu0 %v1539_v35 }
  0x51   :  { %1428 = vmatpush3.bf16.msra.mxu1 %v1538_v36 }
  0x52   :  { %1429 = vmatprep.subr.bf16.mxu1 %v1541_v37 }
  0x53   :  { %1408 = vmatpush3.bf16.msra.mxu0 %v1540_v38 }
  0x54   :  { %1409 = vmatprep.subr.bf16.mxu0 %v1543_v39 }
  0x55   :  { %1430 = vmatpush3.bf16.msra.mxu1 %v1542_v40 }
  0x56   :  { %1431 = vmatprep.subr.bf16.mxu1 %v1545_v42 }
  0x57   :  { %8 = vsyncpa [#allocation3], 0  ;;  %1410 = vmatpush3.bf16.msra.mxu0 %v1544_v43  ;;  %v1548_v49 = vld [vmem:[%s1940_s1 + $0x230] sm:$0xff]   ;;  %v287_v50 = vcombine.high %v279_v47, %v279_v47  ;;  %v1551_v51 = vld [vmem:[%s1940_s1 + $0x278] sm:$0xff]   ;;  %v294_v57 = vrot.slane %v279_v47, %v1711_v41  ;;  %v272_v59 = vcombine.high %v17_v45, %v17_v45  ;;  %v1583_v61 = vmov 0.0  }
  0x58   :  { %1411 = vmatprep.subr.bf16.mxu0 %v1547_v44  ;;  %v1550_v52 = vld [vmem:[%s1940_s1 + $0x2b0] sm:$0xff]   ;;  %v1553_v54 = vld [vmem:[%s1940_s1 + $0x2f8] sm:$0xff]   ;;  %v1556_v60 = vld [vmem:[%s1940_s1 + $0x300] sm:$0xff]   ;;  %vm1584_vm0 = vmmov 0   ;;  %vm911_vm1 = vcmask 261120   ;;  %vm1195_vm2 = vcmask 74752  }
  0x59   :  { %1432 = vmatpush3.bf16.msra.mxu1 %v1546_v46  ;;  %v308_v53 = vrot.slane %v287_v50, %v1711_v41  ;;  %v1552_v55 = vld [vmem:[%s1940_s1 + $0x238] sm:$0xff]   ;;  %v309_v62 = vcombine.high %v294_v57, %v294_v57  ;;  %v286_v63 = vrot.slane %v272_v59, %v1711_v41  ;;  %v1557_v0 = vld [vmem:[%s1940_s1 + $0x308] sm:$0xff]   ;;  %v1211_v3 = vld [vmem:[%s1941_s2] ss:$0 sm:$0xff] }
  0x5a   :  { %1433 = vmatprep.subr.bf16.mxu1 %v1549_v48  ;;  %v1554_v58 = vld [vmem:[%s1940_s1 + $0x2b8] sm:$0xff]   ;;  %s1585_s1 = smov [#allocation2]  }
  0x5b   :  { %1412 = vmatpush3.bf16.msra.mxu0 %v1548_v49  ;;  %1107 = vmatprep.mubr.bf16.mxu0 %v308_v53  ;;  %v310_v56 = vcombine.high %v308_v53, %v308_v53  ;;  %v301_v1 = vrot.slane %v286_v63, %v1711_v41  ;;  %s1203_s2 = sshll.u32 %s1585_s1, 4  ;;  %s1204_s2 = int_to_ptr.vmem [resolvable:$true] %s1203_s2 }
  0x5c   :  { %1413 = vmatprep.subr.bf16.mxu0 %v1551_v51  ;;  %s1558_s24 = scalar_lea.vmem %s1204_s2, 32  ;;  %p1563_p1 = scmp.lt.s32.totalorder %s1204_s2, %s1204_s2 }
  0x5d   :  { %1434 = vmatpush3.bf16.msra.mxu1 %v1550_v52  ;;  %1147 = vmatprep.mubr.bf16.mxu1 %v310_v56  ;;  %p1559_p0 = scmp.ne.s32.totalorder %s1204_s2, %s1558_s24  ;;  %p1564_p2 = scmp.lt.s32.totalorder %s1558_s24, %s1558_s24 }
  0x5e   :  { %1435 = vmatprep.subr.bf16.mxu1 %v1553_v54 }
  0x5f   :  { %1414 = vmatpush3.bf16.msra.mxu0 %v1552_v55  ;;  %p1565_p3 = por %p1564_p2, %p1563_p1 }
  0x60   :  { %1446 = vmatprep.subr.bf16.mxu0 %v1583_v61 }
  0x61   :  { %1436 = vmatpush3.bf16.msra.mxu1 %v1554_v58  ;;  %p1566_p4 = pnand %p1565_p3, %p1559_p0 }
  0x62   :  { %1108 = vmatmul.mubr.bf16.vlgmr.msra.gmra.mrb[8].mxu0 %v294_v57 }
  0x63   :  { %1447 = vmatpush3.bf16.msra.mxu0 %v1556_v60  ;;  %1450 = vmatprep.mubr.msk.bf16.mxu0 %vm1584_vm0, %v1583_v61 }
  0x64   :  { %1148 = vmatmul.mubr.bf16.vlgmr.msra.gmra.mrb[8].mxu1 %v309_v62  ;;  %1448 = vmatprep.subr.bf16.mxu0 %v1583_v61 }
  0x67   :  { %1449 = vmatpush3.bf16.msra.mxu0 %v1557_v0 }
  0x6a   :  { %1451 = vmatmul.mubr.msk.bf16.vlgmr.msra.gmra.mrb[12].mxu0 %vm911_vm1, %v301_v1 }
  0xf5   :  { %v1327_v2 = vpop.f32.mrb[0].mxu0 }
  0xf6   :  { %v1328_v4 = vpop.f32.mrb[1].mxu0 }
  0xf7   :  { %v1329_v5 = vadd.f32 %v1328_v4, %v1327_v2  ;;  %v1330_v6 = vpop.f32.mrb[2].mxu0  ;;  %v1349_v7 = vpop.f32.mrb[0].mxu1 }
  0xf8   :  { %v1331_v8 = vpop.f32.mrb[3].mxu0  ;;  %v1350_v9 = vpop.f32.mrb[1].mxu1 }
  0xf9   :  { %v950_v10 = vadd.f32 %v1329_v5, %v1211_v3  ;;  %v1351_v11 = vadd.f32 %v1350_v9, %v1349_v7  ;;  %v1352_v12 = vpop.f32.mrb[2].mxu1 }
  0xfa   :  { %v1353_v13 = vpop.f32.mrb[3].mxu1 }
  0xfb   :  { %v990_v14 = vadd.f32 %v1351_v11, %v950_v10 }
 0x115   :  { %v1371_v41 = vpop.f32.mrb[4].mxu0 }
 0x116   :  { %v1372_v15 = vpop.f32.mrb[5].mxu0 }
 0x117   :  { %v1373_v16 = vadd.f32 %v1372_v15, %v1371_v41  ;;  %v1374_v17 = vpop.f32.mrb[6].mxu0  ;;  %v1393_v18 = vpop.f32.mrb[4].mxu1 }
 0x118   :  { %v1375_v19 = vpop.f32.mrb[7].mxu0  ;;  %v1394_v20 = vpop.f32.mrb[5].mxu1 }
 0x119   :  { %v1030_v21 = vadd.f32 %v1373_v16, %v990_v14  ;;  %v1395_v22 = vadd.f32 %v1394_v20, %v1393_v18  ;;  %v1396_v23 = vpop.f32.mrb[6].mxu1 }
 0x11a   :  { %v1397_v24 = vpop.f32.mrb[7].mxu1 }
 0x11b   :  { %v1070_v25 = vadd.f32 %v1395_v22, %v1030_v21 }
 0x135   :  { %v1415_v26 = vpop.f32.mrb[8].mxu0 }
 0x136   :  { %v1416_v27 = vpop.f32.mrb[9].mxu0 }
 0x137   :  { %v1417_v28 = vadd.f32 %v1416_v27, %v1415_v26  ;;  %v1437_v29 = vpop.f32.mrb[8].mxu1  ;;  %v1418_v30 = vpop.f32.mrb[10].mxu0 }
 0x138   :  { %v1438_v31 = vpop.f32.mrb[9].mxu1  ;;  %v1419_v32 = vpop.f32.mrb[11].mxu0 }
 0x139   :  { %v1110_v33 = vadd.f32 %v1417_v28, %v1070_v25  ;;  %v1439_v34 = vadd.f32 %v1438_v31, %v1437_v29  ;;  %v1440_v35 = vpop.f32.mrb[10].mxu1 }
 0x13a   :  { %v1441_v36 = vpop.f32.mrb[11].mxu1 }
 0x13b   :  { %v1150_v37 = vadd.f32 %v1439_v34, %v1110_v33 }
 0x13d   :  { %v1189_v38 = vpop.f32.mrb[12].mxu0 }
 0x13e   :  { %v1190_v39 = vadd.f32 %v1189_v38, %v1150_v37  ;;  %v1452_v40 = vpop.f32.mrb[13].mxu0 }
 0x13f   :  { %v1192_v42 = vpop.f32.mrb[14].mxu0 }
 0x140   :  { %v1453_v43 = vpop.f32.mrb[15].mxu0  ;;  %1196 = vst.msk [vmem:[#allocation2] sm:$0x3] %vm1195_vm2, %v1190_v39 }
 0x141   :  { %1569 = shalt.err (!%p1566_p4)
}
 0x142   :  { %s1570_s27 = scalar_lea.hbm %s1942_s3, 32 }
 0x143   :  { %p1571_p5 = scmp.ne.s32.totalorder %s1942_s3, %s1570_s27  ;;  %p1574_p6 = scmp.lt.u32.totalorder %s1570_s27, %s1942_s3 }
 0x145   :  { %p1576_p7 = pnand %p1574_p6, %p1571_p5 }
 0x147   :  { %1579 = shalt.err (!%p1576_p7)
}
 0x148   :  { %1206 = dma.vmem_to_hbm [thread:$0]  %s1204_s2, 32, %s1942_s3, [#allocation3]  }
 0x149   :  { %1580 = dma.done.wait [#allocation3], 32  }
 0x14a   :  { %1581 = vsyncadd [#allocation3], 4294967264 }
 0x14b   :  { %1210 = vsyncpa [#allocation3], 1 }

</bundles_post_ra>
